<compile_context>
chip_gen: v7x
topology: tpu7x:2x2x1
jax: 0.10.0
libtpu: 0.0.40
codegen_flags: <defaults>
</compile_context>

<pallas_src>
import functools

import jax
import jax.numpy as jnp
from jax.experimental import pallas as pl
from jax.experimental.pallas import tpu as pltpu

LEAKY_SLOPE = 0.2
BN_EPS = 1e-5
LANE = 128
M_CAP = 256    # max rows per tile (keeps nm>=2 for layer 1 -> v7x megacore)
K_CAP = 2048   # max reduction tile (fewer, larger grid steps; VMEM-bounded)


# ------------------------------ tiling helpers ------------------------------ #

def _round_up(x, m):
    return ((x + m - 1) // m) * m


def _tile(dim, cap, quantum):
    """Return (padded_dim, tile) with tile | padded_dim, tile <= max(cap, dim
    if dim<=cap), tile a multiple of `quantum` (or the full dim)."""
    if dim <= cap:
        return dim, dim
    t = (cap // quantum) * quantum
    tt = t
    while tt >= quantum:
        if dim % tt == 0:
            return dim, tt
        tt -= quantum
    # no divisor <= cap: pad up so the tile cap is actually enforced
    return _round_up(dim, t), t


# ----------------------------- Pallas kernels ------------------------------ #

def _conv_bias_act_kernel(a_ref, b_ref, bias_ref, o_ref, acc_ref, *, activation):
    """Tiled (tm,tk)@(tk,Cp) MXU matmul, epilogue = bias + activation."""
    k = pl.program_id(1)

    @pl.when(k == 0)
    def _():
        acc_ref[...] = jnp.zeros_like(acc_ref)

    acc_ref[...] += jnp.dot(a_ref[...], b_ref[...],
                            preferred_element_type=jnp.float32)

    @pl.when(k == pl.num_programs(1) - 1)
    def _():
        y = acc_ref[...] + bias_ref[...]
        if activation == "leaky":
            y = jnp.where(y > 0, y, LEAKY_SLOPE * y)
        elif activation == "sigmoid":
            y = 1.0 / (1.0 + jnp.exp(-y))
        o_ref[...] = y.astype(o_ref.dtype)


def _conv_bn_leaky_kernel(a_ref, b_ref, g_ref, be_ref, o_ref, acc_ref):
    """Conv matmul with the full BatchNorm + LeakyReLU fused into the epilogue.

    Requires the whole M dimension in a single tile (nm == 1), so the f32
    accumulator holds every output row when the last reduction step finishes:
    batch statistics are computed two-pass (numerically robust), biased
    variance, eps = 1e-5 -- matching PyTorch training-mode BatchNorm2d.
    Padded-lane invariant: gamma/beta are zero on lanes >= Co, hence the
    per-channel scale and shift are exactly zero there and padded output
    lanes stay zero for downstream layers.
    """
    k = pl.program_id(0)

    @pl.when(k == 0)
    def _():
        acc_ref[...] = jnp.zeros_like(acc_ref)

    acc_ref[...] += jnp.dot(a_ref[...], b_ref[...],
                            preferred_element_type=jnp.float32)

    @pl.when(k == pl.num_programs(0) - 1)
    def _():
        acc = acc_ref[...]
        mean = jnp.mean(acc, axis=0, keepdims=True)
        c = acc - mean
        var = jnp.mean(c * c, axis=0, keepdims=True)
        s = g_ref[...] * jax.lax.rsqrt(var + BN_EPS)
        y = c * s + be_ref[...]
        o_ref[...] = jnp.where(y > 0, y, LEAKY_SLOPE * y).astype(o_ref.dtype)


def _conv_stats_kernel(a_ref, b_ref, o_ref, stats_ref, acc_ref):
    """Fallback (nm > 1): raw conv output + per-M-tile BN partial sums."""
    k = pl.program_id(1)

    @pl.when(k == 0)
    def _():
        acc_ref[...] = jnp.zeros_like(acc_ref)

    acc_ref[...] += jnp.dot(a_ref[...], b_ref[...],
                            preferred_element_type=jnp.float32)

    @pl.when(k == pl.num_programs(1) - 1)
    def _():
        acc = acc_ref[...]
        o_ref[...] = acc.astype(o_ref.dtype)
        # write the two stat rows directly (rows 2..7 are never read)
        stats_ref[0:1, :] = jnp.sum(acc, axis=0, keepdims=True)
        stats_ref[1:2, :] = jnp.sum(acc * acc, axis=0, keepdims=True)


def _affine_leaky_kernel(x_ref, s_ref, t_ref, o_ref):
    y = x_ref[...] * s_ref[...] + t_ref[...]
    o_ref[...] = jnp.where(y > 0, y, LEAKY_SLOPE * y)


# ------------------------------ Pallas wrappers ----------------------------- #

def _prep(A, B):
    """Pick tiles, zero-pad A/B so tiles divide the (padded) dims exactly."""
    M, K = A.shape
    Cp = B.shape[1]
    Mp, tm = _tile(M, M_CAP, 8)
    Kp, tk = _tile(K, K_CAP, LANE)
    if Mp != M or Kp != K:
        A = jnp.pad(A, ((0, Mp - M), (0, Kp - K)))
    if Kp != K:
        B = jnp.pad(B, ((0, Kp - K), (0, 0)))
    return A, B, M, Mp, tm, Kp, tk, Cp


def conv_bias_act(A, B, bias_pad, activation):
    A, B, M, Mp, tm, Kp, tk, Cp = _prep(A, B)
    nm, nk = Mp // tm, Kp // tk
    y = pl.pallas_call(
        functools.partial(_conv_bias_act_kernel, activation=activation),
        out_shape=jax.ShapeDtypeStruct((Mp, Cp), jnp.float32),
        grid=(nm, nk),
        in_specs=[
            pl.BlockSpec((tm, tk), lambda m, k: (m, k)),
            pl.BlockSpec((tk, Cp), lambda m, k: (k, 0)),
            pl.BlockSpec((1, Cp), lambda m, k: (0, 0)),
        ],
        out_specs=pl.BlockSpec((tm, Cp), lambda m, k: (m, 0)),
        scratch_shapes=[pltpu.VMEM((tm, Cp), jnp.float32)],
        compiler_params=pltpu.CompilerParams(
            dimension_semantics=("parallel", "arbitrary")),
    )(A, B, bias_pad.reshape(1, Cp))
    return y[:M] if Mp != M else y


def conv_bn_leaky(A, B, gamma_pad, beta_pad):
    A, B, M, Mp, tm, Kp, tk, Cp = _prep(A, B)
    nm, nk = Mp // tm, Kp // tk

    if nm == 1:
        # Fully fused path: whole M (== Mp, unpadded) lives in one tile.
        return pl.pallas_call(
            _conv_bn_leaky_kernel,
            out_shape=jax.ShapeDtypeStruct((M, Cp), jnp.float32),
            grid=(nk,),
            in_specs=[
                pl.BlockSpec((M, tk), lambda k: (0, k)),
                pl.BlockSpec((tk, Cp), lambda k: (k, 0)),
                pl.BlockSpec((1, Cp), lambda k: (0, 0)),
                pl.BlockSpec((1, Cp), lambda k: (0, 0)),
            ],
            out_specs=pl.BlockSpec((M, Cp), lambda k: (0, 0)),
            scratch_shapes=[pltpu.VMEM((M, Cp), jnp.float32)],
            compiler_params=pltpu.CompilerParams(
                dimension_semantics=("arbitrary",)),
        )(A, B, gamma_pad.reshape(1, Cp), beta_pad.reshape(1, Cp))

    # Fallback (only triggers if the problem scales past M_CAP): conv + stats,
    # tiny per-channel scalar math in JAX, then one affine+leaky kernel.
    y_raw, stats = pl.pallas_call(
        _conv_stats_kernel,
        out_shape=(jax.ShapeDtypeStruct((Mp, Cp), jnp.float32),
                   jax.ShapeDtypeStruct((nm * 8, Cp), jnp.float32)),
        grid=(nm, nk),
        in_specs=[
            pl.BlockSpec((tm, tk), lambda m, k: (m, k)),
            pl.BlockSpec((tk, Cp), lambda m, k: (k, 0)),
        ],
        out_specs=(
            pl.BlockSpec((tm, Cp), lambda m, k: (m, 0)),
            pl.BlockSpec((8, Cp), lambda m, k: (m, 0)),
        ),
        scratch_shapes=[pltpu.VMEM((tm, Cp), jnp.float32)],
        compiler_params=pltpu.CompilerParams(
            dimension_semantics=("parallel", "arbitrary")),
    )(A, B)
    st = stats.reshape(nm, 8, Cp)
    ssum = jnp.sum(st[:, 0, :], axis=0)
    ssq = jnp.sum(st[:, 1, :], axis=0)
    mean = ssum / M                                  # padded rows contribute 0
    var = jnp.maximum(ssq / M - mean * mean, 0.0)    # biased variance
    s = gamma_pad * jax.lax.rsqrt(var + BN_EPS)
    t = beta_pad - mean * s
    y = pl.pallas_call(
        _affine_leaky_kernel,
        out_shape=jax.ShapeDtypeStruct((Mp, Cp), jnp.float32),
        grid=(nm,),
        in_specs=[
            pl.BlockSpec((tm, Cp), lambda m: (m, 0)),
            pl.BlockSpec((1, Cp), lambda m: (0, 0)),
            pl.BlockSpec((1, Cp), lambda m: (0, 0)),
        ],
        out_specs=pl.BlockSpec((tm, Cp), lambda m: (m, 0)),
        compiler_params=pltpu.CompilerParams(
            dimension_semantics=("parallel",)),
    )(y_raw, s.reshape(1, Cp), t.reshape(1, Cp))
    return y[:M] if Mp != M else y


# ------------------------------- JAX glue ---------------------------------- #

def im2col_nhwc(x, k=4, s=2, p=1):
    """x: (N, H, W, C) -> A: (N*Ho*Wo, k*k*C), feature order (kh, kw, cin)."""
    N, H, W, C = x.shape
    Ho = (H + 2 * p - k) // s + 1
    Wo = (W + 2 * p - k) // s + 1
    xp = jnp.pad(x, ((0, 0), (p, p), (p, p), (0, 0)))
    cols = []
    for i in range(k):
        for j in range(k):
            cols.append(xp[:, i:i + s * Ho:s, j:j + s * Wo:s, :])  # (N,Ho,Wo,C)
    patches = jnp.stack(cols, axis=3)                 # (N, Ho, Wo, k*k, C)
    A = patches.reshape(N * Ho * Wo, k * k * C)
    return A, Ho, Wo


def conv_layer_im2col(x_nhwc, W):
    """Build A (over the lane-padded channel dim) and lane-dense weight B."""
    N, _, _, Ci_pad = x_nhwc.shape
    Co, Ci, kh, kw = W.shape
    Cp = _round_up(Co, LANE)
    A, Ho, Wo = im2col_nhwc(x_nhwc)
    Wt = jnp.transpose(W, (2, 3, 1, 0)).astype(jnp.float32)   # (kh, kw, Ci, Co)
    Wt = jnp.pad(Wt, ((0, 0), (0, 0), (0, Ci_pad - Ci), (0, Cp - Co)))
    B = Wt.reshape(kh * kw * Ci_pad, Cp)
    return A, B, (N, Ho, Wo, Co, Cp)


def _pad_vec(v, Cp):
    return jnp.pad(v.astype(jnp.float32), (0, Cp - v.shape[0]))


def discriminator_forward(x_nchw, params):
    x = jnp.transpose(x_nchw, (0, 2, 3, 1)).astype(jnp.float32)  # NCHW -> NHWC
    ci = x.shape[-1]
    ci_pad = _round_up(ci, 8)            # K = 16*ci_pad becomes lane-dense (128)
    if ci_pad != ci:
        x = jnp.pad(x, ((0, 0), (0, 0), (0, 0), (0, ci_pad - ci)))

    # layer 1: Conv(bias) -> LeakyReLU(0.2)
    A, B, (N, Ho, Wo, Co, Cp) = conv_layer_im2col(x, params["w1"])
    h = conv_bias_act(A, B, _pad_vec(params["b1"], Cp), "leaky")
    h = h.reshape(N, Ho, Wo, Cp)          # stays lane-padded between layers

    # three Conv(bias=False) -> BatchNorm -> LeakyReLU blocks (fully fused)
    for wk, gk, bk in (("w2", "g2", "be2"), ("w3", "g3", "be3"),
                       ("w4", "g4", "be4")):
        A, B, (N, Ho, Wo, Co, Cp) = conv_layer_im2col(h, params[wk])
        h = conv_bn_leaky(A, B, _pad_vec(params[gk], Cp), _pad_vec(params[bk], Cp))
        h = h.reshape(N, Ho, Wo, Cp)

    # final Conv(bias) -> Sigmoid
    A, B, (N, Ho, Wo, Co, Cp) = conv_layer_im2col(h, params["w5"])
    y = conv_bias_act(A, B, _pad_vec(params["b5"], Cp), "sigmoid")
    y = y[:, :Co].reshape(N, Ho, Wo, Co)
    return jnp.transpose(y, (0, 3, 1, 2))  # (N, 1, 1, 1)


# ----------------------- pure-JAX reference (check) ------------------------ #

def reference_forward(x, params):
    def conv(x, W, b=None):
        y = jax.lax.conv_general_dilated(
            x, W, (2, 2), ((1, 1), (1, 1)),
            dimension_numbers=("NCHW", "OIHW", "NCHW"))
        if b is not None:
            y = y + b[None, :, None, None]
        return y

    def leaky(x):
        return jnp.where(x > 0, x, LEAKY_SLOPE * x)

    def bn(x, g, b):
        mean = jnp.mean(x, axis=(0, 2, 3), keepdims=True)
        var = jnp.mean(jnp.square(x - mean), axis=(0, 2, 3), keepdims=True)
        return (x - mean) / jnp.sqrt(var + BN_EPS) * g[None, :, None, None] \
            + b[None, :, None, None]

    h = leaky(conv(x, params["w1"], params["b1"]))
    h = leaky(bn(conv(h, params["w2"]), params["g2"], params["be2"]))
    h = leaky(bn(conv(h, params["w3"]), params["g3"], params["be3"]))
    h = leaky(bn(conv(h, params["w4"]), params["g4"], params["be4"]))
    return jax.nn.sigmoid(conv(h, params["w5"], params["b5"]))


# ---------------------------------- main ----------------------------------- #

if __name__ == "__main__":
    key = jax.random.PRNGKey(0)
    channels_img, features_d = 3, 8
    N, H = 2, 32  # 32 -> 16 -> 8 -> 4 -> 2 -> 1 through the five stride-2 convs
    ks = jax.random.split(key, 16)

    def w(k, co, ci):
        return (0.02 * jax.random.normal(k, (co, ci, 4, 4))).astype(jnp.float32)

    params = {
        "w1": w(ks[0], features_d, channels_img),
        "b1": (0.1 * jax.random.normal(ks[1], (features_d,))).astype(jnp.float32),
        "w2": w(ks[2], features_d * 2, features_d),
        "g2": (1.0 + 0.1 * jax.random.normal(ks[3], (features_d * 2,))).astype(jnp.float32),
        "be2": (0.1 * jax.random.normal(ks[4], (features_d * 2,))).astype(jnp.float32),
        "w3": w(ks[5], features_d * 4, features_d * 2),
        "g3": (1.0 + 0.1 * jax.random.normal(ks[6], (features_d * 4,))).astype(jnp.float32),
        "be3": (0.1 * jax.random.normal(ks[7], (features_d * 4,))).astype(jnp.float32),
        "w4": w(ks[8], features_d * 8, features_d * 4),
        "g4": (1.0 + 0.1 * jax.random.normal(ks[9], (features_d * 8,))).astype(jnp.float32),
        "be4": (0.1 * jax.random.normal(ks[10], (features_d * 8,))).astype(jnp.float32),
        "w5": w(ks[11], 1, features_d * 8),
        "b5": (0.1 * jax.random.normal(ks[12], (1,))).astype(jnp.float32),
    }
    x = jax.random.normal(ks[13], (N, channels_img, H, H), dtype=jnp.float32)

    fwd = jax.jit(discriminator_forward)
    out = jax.block_until_ready(fwd(x, params))

    assert out.shape == (N, 1, 1, 1), out.shape
    ref = reference_forward(x, params)
    assert jnp.allclose(out, ref, rtol=1e-4, atol=5e-5), (out, ref)

    print("KERNEL_OK")
</pallas_src>

<mosaic_0001>
module attributes {stable_mosaic.version = 11 : i64} {
  func.func @_conv_bias_act_kernel(%arg0: i32, %arg1: i32, %arg2: memref<256x128xf32, #tpu.memory_space<vmem>>, %arg3: memref<128x128xf32, #tpu.memory_space<vmem>>, %arg4: memref<1x128xf32, #tpu.memory_space<vmem>>, %arg5: memref<256x128xf32, #tpu.memory_space<vmem>>, %arg6: memref<256x128xf32, #tpu.memory_space<vmem>>) attributes {dimension_semantics = [#tpu.dimension_semantics<parallel>, #tpu.dimension_semantics<arbitrary>], iteration_bounds = array<i64: 2, 1>, scalar_prefetch = 0 : i64, scratch_operands = 1 : i64, tpu.core_type = #tpu.core_type<tc>, window_params = [{transform_indices = @transform_0, window_bounds = array<i64: 256, 128>}, {transform_indices = @transform_1, window_bounds = array<i64: 128, 128>}, {pipeline_mode = #tpu.pipeline_mode<synchronous>, transform_indices = @transform_2, window_bounds = array<i64: 1, 128>}, {transform_indices = @transform_3, window_bounds = array<i64: 256, 128>}]} {
    %c0_i32 = arith.constant 0 : i32
    %0 = arith.cmpi eq, %arg1, %c0_i32 : i32
    %1 = arith.extui %0 : i1 to i32
    %c0_i32_0 = arith.constant 0 : i32
    %2 = arith.cmpi ne, %1, %c0_i32_0 : i32
    scf.if %2 {
      %cst_10 = arith.constant 0.000000e+00 : f32
      %12 = vector.broadcast %cst_10 : f32 to vector<256x128xf32>
      %c0_11 = arith.constant 0 : index
      %c0_12 = arith.constant 0 : index
      %13 = vector.load %arg6[%c0_11, %c0_12] : memref<256x128xf32, #tpu.memory_space<vmem>>, vector<256x128xf32>
      tpu.vector_store %arg6[%c0_11, %c0_12], %12 {strides = array<i32>} : memref<256x128xf32, #tpu.memory_space<vmem>>, vector<256x128xf32>,
    } else {
    }
    %c0 = arith.constant 0 : index
    %c0_1 = arith.constant 0 : index
    %3 = vector.load %arg6[%c0, %c0_1] : memref<256x128xf32, #tpu.memory_space<vmem>>, vector<256x128xf32>
    %c0_2 = arith.constant 0 : index
    %c0_3 = arith.constant 0 : index
    %4 = vector.load %arg2[%c0_2, %c0_3] : memref<256x128xf32, #tpu.memory_space<vmem>>, vector<256x128xf32>
    %c0_4 = arith.constant 0 : index
    %c0_5 = arith.constant 0 : index
    %5 = vector.load %arg3[%c0_4, %c0_5] : memref<128x128xf32, #tpu.memory_space<vmem>>, vector<128x128xf32>
    %cst = arith.constant dense<0.000000e+00> : vector<256x128xf32>
    %6 = tpu.matmul %4, %5, %cst {dimension_numbers = #tpu.dot_dimension_numbers<[1], [0], [0], [1], [0, 0, 1, 1], [], []>} : vector<256x128xf32>, vector<128x128xf32>, vector<256x128xf32> -> vector<256x128xf32>
    %7 = arith.addf %3, %6 : vector<256x128xf32>
    %c0_6 = arith.constant 0 : index
    %c0_7 = arith.constant 0 : index
    %8 = vector.load %arg6[%c0_6, %c0_7] : memref<256x128xf32, #tpu.memory_space<vmem>>, vector<256x128xf32>
    tpu.vector_store %arg6[%c0_6, %c0_7], %7 {strides = array<i32>} : memref<256x128xf32, #tpu.memory_space<vmem>>, vector<256x128xf32>,
    %c0_i32_8 = arith.constant 0 : i32
    %9 = arith.cmpi eq, %arg1, %c0_i32_8 : i32
    %10 = arith.extui %9 : i1 to i32
    %c0_i32_9 = arith.constant 0 : i32
    %11 = arith.cmpi ne, %10, %c0_i32_9 : i32
    scf.if %11 {
      %c0_10 = arith.constant 0 : index
      %c0_11 = arith.constant 0 : index
      %12 = vector.load %arg6[%c0_10, %c0_11] : memref<256x128xf32, #tpu.memory_space<vmem>>, vector<256x128xf32>
      %c0_12 = arith.constant 0 : index
      %c0_13 = arith.constant 0 : index
      %13 = vector.load %arg4[%c0_12, %c0_13] : memref<1x128xf32, #tpu.memory_space<vmem>>, vector<1x128xf32>
      %14 = vector.broadcast %13 : vector<1x128xf32> to vector<256x128xf32>
      %15 = arith.addf %12, %14 : vector<256x128xf32>
      %cst_14 = arith.constant 0.000000e+00 : f32
      %16 = vector.broadcast %cst_14 : f32 to vector<256x128xf32>
      %17 = arith.cmpf ogt, %15, %16 : vector<256x128xf32>
      %cst_15 = arith.constant 2.000000e-01 : f32
      %18 = vector.broadcast %cst_15 : f32 to vector<256x128xf32>
      %19 = arith.mulf %18, %15 : vector<256x128xf32>
      %20 = arith.select %17, %15, %19 : vector<256x128xi1>, vector<256x128xf32>
      %c0_16 = arith.constant 0 : index
      %c0_17 = arith.constant 0 : index
      %21 = vector.load %arg5[%c0_16, %c0_17] : memref<256x128xf32, #tpu.memory_space<vmem>>, vector<256x128xf32>
      tpu.vector_store %arg5[%c0_16, %c0_17], %20 {strides = array<i32>} : memref<256x128xf32, #tpu.memory_space<vmem>>, vector<256x128xf32>,
    } else {
    }
    return
  }
  func.func @transform_0(%arg0: i32, %arg1: i32) -> (i32, i32) {
    %c0_i32 = arith.constant 0 : i32
    return %arg0, %arg1 : i32, i32
  }
  func.func @transform_1(%arg0: i32, %arg1: i32) -> (i32, i32) {
    %c0_i32 = arith.constant 0 : i32
    %c0_i32_0 = arith.constant 0 : i32
    return %arg1, %c0_i32 : i32, i32
  }
  func.func @transform_2(%arg0: i32, %arg1: i32) -> (i32, i32) {
    %c0_i32 = arith.constant 0 : i32
    %c0_i32_0 = arith.constant 0 : i32
    %c0_i32_1 = arith.constant 0 : i32
    return %c0_i32, %c0_i32_0 : i32, i32
  }
  func.func @transform_3(%arg0: i32, %arg1: i32) -> (i32, i32) {
    %c0_i32 = arith.constant 0 : i32
    %c0_i32_0 = arith.constant 0 : i32
    return %arg0, %c0_i32 : i32, i32
  }
}

module attributes {stable_mosaic.version = 11 : i64} {
  func.func @_conv_bn_leaky_kernel(%arg0: i32, %arg1: memref<128x2048xf32, #tpu.memory_space<vmem>>, %arg2: memref<2048x128xf32, #tpu.memory_space<vmem>>, %arg3: memref<1x128xf32, #tpu.memory_space<vmem>>, %arg4: memref<1x128xf32, #tpu.memory_space<vmem>>, %arg5: memref<128x128xf32, #tpu.memory_space<vmem>>, %arg6: memref<128x128xf32, #tpu.memory_space<vmem>>) attributes {dimension_semantics = [#tpu.dimension_semantics<arbitrary>], iteration_bounds = array<i64: 1>, scalar_prefetch = 0 : i64, scratch_operands = 1 : i64, tpu.core_type = #tpu.core_type<tc>, window_params = [{transform_indices = @transform_0, window_bounds = array<i64: 128, 2048>}, {transform_indices = @transform_1, window_bounds = array<i64: 2048, 128>}, {pipeline_mode = #tpu.pipeline_mode<synchronous>, transform_indices = @transform_2, window_bounds = array<i64: 1, 128>}, {pipeline_mode = #tpu.pipeline_mode<synchronous>, transform_indices = @transform_3, window_bounds = array<i64: 1, 128>}, {pipeline_mode = #tpu.pipeline_mode<synchronous>, transform_indices = @transform_4, window_bounds = array<i64: 128, 128>}]} {
    %c0_i32 = arith.constant 0 : i32
    %0 = arith.cmpi eq, %arg0, %c0_i32 : i32
    %1 = arith.extui %0 : i1 to i32
    %c0_i32_0 = arith.constant 0 : i32
    %2 = arith.cmpi ne, %1, %c0_i32_0 : i32
    scf.if %2 {
      %cst_10 = arith.constant 0.000000e+00 : f32
      %12 = vector.broadcast %cst_10 : f32 to vector<128x128xf32>
      %c0_11 = arith.constant 0 : index
      %c0_12 = arith.constant 0 : index
      %13 = vector.load %arg6[%c0_11, %c0_12] : memref<128x128xf32, #tpu.memory_space<vmem>>, vector<128x128xf32>
      tpu.vector_store %arg6[%c0_11, %c0_12], %12 {strides = array<i32>} : memref<128x128xf32, #tpu.memory_space<vmem>>, vector<128x128xf32>,
    } else {
    }
    %c0 = arith.constant 0 : index
    %c0_1 = arith.constant 0 : index
    %3 = vector.load %arg6[%c0, %c0_1] : memref<128x128xf32, #tpu.memory_space<vmem>>, vector<128x128xf32>
    %c0_2 = arith.constant 0 : index
    %c0_3 = arith.constant 0 : index
    %4 = vector.load %arg1[%c0_2, %c0_3] : memref<128x2048xf32, #tpu.memory_space<vmem>>, vector<128x2048xf32>
    %c0_4 = arith.constant 0 : index
    %c0_5 = arith.constant 0 : index
    %5 = vector.load %arg2[%c0_4, %c0_5] : memref<2048x128xf32, #tpu.memory_space<vmem>>, vector<2048x128xf32>
    %cst = arith.constant dense<0.000000e+00> : vector<128x128xf32>
    %6 = tpu.matmul %4, %5, %cst {dimension_numbers = #tpu.dot_dimension_numbers<[1], [0], [0], [1], [0, 0, 1, 1], [], []>} : vector<128x2048xf32>, vector<2048x128xf32>, vector<128x128xf32> -> vector<128x128xf32>
    %7 = arith.addf %3, %6 : vector<128x128xf32>
    %c0_6 = arith.constant 0 : index
    %c0_7 = arith.constant 0 : index
    %8 = vector.load %arg6[%c0_6, %c0_7] : memref<128x128xf32, #tpu.memory_space<vmem>>, vector<128x128xf32>
    tpu.vector_store %arg6[%c0_6, %c0_7], %7 {strides = array<i32>} : memref<128x128xf32, #tpu.memory_space<vmem>>, vector<128x128xf32>,
    %c0_i32_8 = arith.constant 0 : i32
    %9 = arith.cmpi eq, %arg0, %c0_i32_8 : i32
    %10 = arith.extui %9 : i1 to i32
    %c0_i32_9 = arith.constant 0 : i32
    %11 = arith.cmpi ne, %10, %c0_i32_9 : i32
    scf.if %11 {
      %c0_10 = arith.constant 0 : index
      %c0_11 = arith.constant 0 : index
      %12 = vector.load %arg6[%c0_10, %c0_11] : memref<128x128xf32, #tpu.memory_space<vmem>>, vector<128x128xf32>
      %cst_12 = arith.constant dense<0.000000e+00> : vector<128xf32>
      %13 = vector.multi_reduction <add>, %12, %cst_12 [0] : vector<128x128xf32> to vector<128xf32>
      %14 = vector.shape_cast %13 : vector<128xf32> to vector<1x128xf32>
      %cst_13 = arith.constant 1.280000e+02 : f32
      %15 = vector.broadcast %cst_13 : f32 to vector<1x128xf32>
      %16 = arith.divf %14, %15 : vector<1x128xf32>
      %17 = vector.broadcast %16 : vector<1x128xf32> to vector<128x128xf32>
      %18 = arith.subf %12, %17 : vector<128x128xf32>
      %19 = arith.mulf %18, %18 : vector<128x128xf32>
      %cst_14 = arith.constant dense<0.000000e+00> : vector<128xf32>
      %20 = vector.multi_reduction <add>, %19, %cst_14 [0] : vector<128x128xf32> to vector<128xf32>
      %21 = vector.shape_cast %20 : vector<128xf32> to vector<1x128xf32>
      %cst_15 = arith.constant 1.280000e+02 : f32
      %22 = vector.broadcast %cst_15 : f32 to vector<1x128xf32>
      %23 = arith.divf %21, %22 : vector<1x128xf32>
      %c0_16 = arith.constant 0 : index
      %c0_17 = arith.constant 0 : index
      %24 = vector.load %arg3[%c0_16, %c0_17] : memref<1x128xf32, #tpu.memory_space<vmem>>, vector<1x128xf32>
      %cst_18 = arith.constant 9.99999974E-6 : f32
      %25 = vector.broadcast %cst_18 : f32 to vector<1x128xf32>
      %26 = arith.addf %23, %25 : vector<1x128xf32>
      %27 = math.rsqrt %26 : vector<1x128xf32>
      %28 = arith.mulf %24, %27 : vector<1x128xf32>
      %29 = vector.broadcast %28 : vector<1x128xf32> to vector<128x128xf32>
      %30 = arith.mulf %18, %29 : vector<128x128xf32>
      %c0_19 = arith.constant 0 : index
      %c0_20 = arith.constant 0 : index
      %31 = vector.load %arg4[%c0_19, %c0_20] : memref<1x128xf32, #tpu.memory_space<vmem>>, vector<1x128xf32>
      %32 = vector.broadcast %31 : vector<1x128xf32> to vector<128x128xf32>
      %33 = arith.addf %30, %32 : vector<128x128xf32>
      %cst_21 = arith.constant 0.000000e+00 : f32
      %34 = vector.broadcast %cst_21 : f32 to vector<128x128xf32>
      %35 = arith.cmpf ogt, %33, %34 : vector<128x128xf32>
      %cst_22 = arith.constant 2.000000e-01 : f32
      %36 = vector.broadcast %cst_22 : f32 to vector<128x128xf32>
      %37 = arith.mulf %36, %33 : vector<128x128xf32>
      %38 = arith.select %35, %33, %37 : vector<128x128xi1>, vector<128x128xf32>
      %c0_23 = arith.constant 0 : index
      %c0_24 = arith.constant 0 : index
      %39 = vector.load %arg5[%c0_23, %c0_24] : memref<128x128xf32, #tpu.memory_space<vmem>>, vector<128x128xf32>
      tpu.vector_store %arg5[%c0_23, %c0_24], %38 {strides = array<i32>} : memref<128x128xf32, #tpu.memory_space<vmem>>, vector<128x128xf32>,
    } else {
    }
    return
  }
  func.func @transform_0(%arg0: i32) -> (i32, i32) {
    %c0_i32 = arith.constant 0 : i32
    %c0_i32_0 = arith.constant 0 : i32
    return %c0_i32, %arg0 : i32, i32
  }
  func.func @transform_1(%arg0: i32) -> (i32, i32) {
    %c0_i32 = arith.constant 0 : i32
    %c0_i32_0 = arith.constant 0 : i32
    return %arg0, %c0_i32 : i32, i32
  }
  func.func @transform_2(%arg0: i32) -> (i32, i32) {
    %c0_i32 = arith.constant 0 : i32
    %c0_i32_0 = arith.constant 0 : i32
    %c0_i32_1 = arith.constant 0 : i32
    return %c0_i32, %c0_i32_0 : i32, i32
  }
  func.func @transform_3(%arg0: i32) -> (i32, i32) {
    %c0_i32 = arith.constant 0 : i32
    %c0_i32_0 = arith.constant 0 : i32
    %c0_i32_1 = arith.constant 0 : i32
    return %c0_i32, %c0_i32_0 : i32, i32
  }
  func.func @transform_4(%arg0: i32) -> (i32, i32) {
    %c0_i32 = arith.constant 0 : i32
    %c0_i32_0 = arith.constant 0 : i32
    %c0_i32_1 = arith.constant 0 : i32
    return %c0_i32, %c0_i32_0 : i32, i32
  }
}

module attributes {stable_mosaic.version = 11 : i64} {
  func.func @_conv_bn_leaky_kernel(%arg0: i32, %arg1: memref<32x2048xf32, #tpu.memory_space<vmem>>, %arg2: memref<2048x128xf32, #tpu.memory_space<vmem>>, %arg3: memref<1x128xf32, #tpu.memory_space<vmem>>, %arg4: memref<1x128xf32, #tpu.memory_space<vmem>>, %arg5: memref<32x128xf32, #tpu.memory_space<vmem>>, %arg6: memref<32x128xf32, #tpu.memory_space<vmem>>) attributes {dimension_semantics = [#tpu.dimension_semantics<arbitrary>], iteration_bounds = array<i64: 1>, scalar_prefetch = 0 : i64, scratch_operands = 1 : i64, tpu.core_type = #tpu.core_type<tc>, window_params = [{transform_indices = @transform_0, window_bounds = array<i64: 32, 2048>}, {transform_indices = @transform_1, window_bounds = array<i64: 2048, 128>}, {pipeline_mode = #tpu.pipeline_mode<synchronous>, transform_indices = @transform_2, window_bounds = array<i64: 1, 128>}, {pipeline_mode = #tpu.pipeline_mode<synchronous>, transform_indices = @transform_3, window_bounds = array<i64: 1, 128>}, {pipeline_mode = #tpu.pipeline_mode<synchronous>, transform_indices = @transform_4, window_bounds = array<i64: 32, 128>}]} {
    %c0_i32 = arith.constant 0 : i32
    %0 = arith.cmpi eq, %arg0, %c0_i32 : i32
    %1 = arith.extui %0 : i1 to i32
    %c0_i32_0 = arith.constant 0 : i32
    %2 = arith.cmpi ne, %1, %c0_i32_0 : i32
    scf.if %2 {
      %cst_10 = arith.constant 0.000000e+00 : f32
      %12 = vector.broadcast %cst_10 : f32 to vector<32x128xf32>
      %c0_11 = arith.constant 0 : index
      %c0_12 = arith.constant 0 : index
      %13 = vector.load %arg6[%c0_11, %c0_12] : memref<32x128xf32, #tpu.memory_space<vmem>>, vector<32x128xf32>
      tpu.vector_store %arg6[%c0_11, %c0_12], %12 {strides = array<i32>} : memref<32x128xf32, #tpu.memory_space<vmem>>, vector<32x128xf32>,
    } else {
    }
    %c0 = arith.constant 0 : index
    %c0_1 = arith.constant 0 : index
    %3 = vector.load %arg6[%c0, %c0_1] : memref<32x128xf32, #tpu.memory_space<vmem>>, vector<32x128xf32>
    %c0_2 = arith.constant 0 : index
    %c0_3 = arith.constant 0 : index
    %4 = vector.load %arg1[%c0_2, %c0_3] : memref<32x2048xf32, #tpu.memory_space<vmem>>, vector<32x2048xf32>
    %c0_4 = arith.constant 0 : index
    %c0_5 = arith.constant 0 : index
    %5 = vector.load %arg2[%c0_4, %c0_5] : memref<2048x128xf32, #tpu.memory_space<vmem>>, vector<2048x128xf32>
    %cst = arith.constant dense<0.000000e+00> : vector<32x128xf32>
    %6 = tpu.matmul %4, %5, %cst {dimension_numbers = #tpu.dot_dimension_numbers<[1], [0], [0], [1], [0, 0, 1, 1], [], []>} : vector<32x2048xf32>, vector<2048x128xf32>, vector<32x128xf32> -> vector<32x128xf32>
    %7 = arith.addf %3, %6 : vector<32x128xf32>
    %c0_6 = arith.constant 0 : index
    %c0_7 = arith.constant 0 : index
    %8 = vector.load %arg6[%c0_6, %c0_7] : memref<32x128xf32, #tpu.memory_space<vmem>>, vector<32x128xf32>
    tpu.vector_store %arg6[%c0_6, %c0_7], %7 {strides = array<i32>} : memref<32x128xf32, #tpu.memory_space<vmem>>, vector<32x128xf32>,
    %c0_i32_8 = arith.constant 0 : i32
    %9 = arith.cmpi eq, %arg0, %c0_i32_8 : i32
    %10 = arith.extui %9 : i1 to i32
    %c0_i32_9 = arith.constant 0 : i32
    %11 = arith.cmpi ne, %10, %c0_i32_9 : i32
    scf.if %11 {
      %c0_10 = arith.constant 0 : index
      %c0_11 = arith.constant 0 : index
      %12 = vector.load %arg6[%c0_10, %c0_11] : memref<32x128xf32, #tpu.memory_space<vmem>>, vector<32x128xf32>
      %cst_12 = arith.constant dense<0.000000e+00> : vector<128xf32>
      %13 = vector.multi_reduction <add>, %12, %cst_12 [0] : vector<32x128xf32> to vector<128xf32>
      %14 = vector.shape_cast %13 : vector<128xf32> to vector<1x128xf32>
      %cst_13 = arith.constant 3.200000e+01 : f32
      %15 = vector.broadcast %cst_13 : f32 to vector<1x128xf32>
      %16 = arith.divf %14, %15 : vector<1x128xf32>
      %17 = vector.broadcast %16 : vector<1x128xf32> to vector<32x128xf32>
      %18 = arith.subf %12, %17 : vector<32x128xf32>
      %19 = arith.mulf %18, %18 : vector<32x128xf32>
      %cst_14 = arith.constant dense<0.000000e+00> : vector<128xf32>
      %20 = vector.multi_reduction <add>, %19, %cst_14 [0] : vector<32x128xf32> to vector<128xf32>
      %21 = vector.shape_cast %20 : vector<128xf32> to vector<1x128xf32>
      %cst_15 = arith.constant 3.200000e+01 : f32
      %22 = vector.broadcast %cst_15 : f32 to vector<1x128xf32>
      %23 = arith.divf %21, %22 : vector<1x128xf32>
      %c0_16 = arith.constant 0 : index
      %c0_17 = arith.constant 0 : index
      %24 = vector.load %arg3[%c0_16, %c0_17] : memref<1x128xf32, #tpu.memory_space<vmem>>, vector<1x128xf32>
      %cst_18 = arith.constant 9.99999974E-6 : f32
      %25 = vector.broadcast %cst_18 : f32 to vector<1x128xf32>
      %26 = arith.addf %23, %25 : vector<1x128xf32>
      %27 = math.rsqrt %26 : vector<1x128xf32>
      %28 = arith.mulf %24, %27 : vector<1x128xf32>
      %29 = vector.broadcast %28 : vector<1x128xf32> to vector<32x128xf32>
      %30 = arith.mulf %18, %29 : vector<32x128xf32>
      %c0_19 = arith.constant 0 : index
      %c0_20 = arith.constant 0 : index
      %31 = vector.load %arg4[%c0_19, %c0_20] : memref<1x128xf32, #tpu.memory_space<vmem>>, vector<1x128xf32>
      %32 = vector.broadcast %31 : vector<1x128xf32> to vector<32x128xf32>
      %33 = arith.addf %30, %32 : vector<32x128xf32>
      %cst_21 = arith.constant 0.000000e+00 : f32
      %34 = vector.broadcast %cst_21 : f32 to vector<32x128xf32>
      %35 = arith.cmpf ogt, %33, %34 : vector<32x128xf32>
      %cst_22 = arith.constant 2.000000e-01 : f32
      %36 = vector.broadcast %cst_22 : f32 to vector<32x128xf32>
      %37 = arith.mulf %36, %33 : vector<32x128xf32>
      %38 = arith.select %35, %33, %37 : vector<32x128xi1>, vector<32x128xf32>
      %c0_23 = arith.constant 0 : index
      %c0_24 = arith.constant 0 : index
      %39 = vector.load %arg5[%c0_23, %c0_24] : memref<32x128xf32, #tpu.memory_space<vmem>>, vector<32x128xf32>
      tpu.vector_store %arg5[%c0_23, %c0_24], %38 {strides = array<i32>} : memref<32x128xf32, #tpu.memory_space<vmem>>, vector<32x128xf32>,
    } else {
    }
    return
  }
  func.func @transform_0(%arg0: i32) -> (i32, i32) {
    %c0_i32 = arith.constant 0 : i32
    %c0_i32_0 = arith.constant 0 : i32
    return %c0_i32, %arg0 : i32, i32
  }
  func.func @transform_1(%arg0: i32) -> (i32, i32) {
    %c0_i32 = arith.constant 0 : i32
    %c0_i32_0 = arith.constant 0 : i32
    return %arg0, %c0_i32 : i32, i32
  }
  func.func @transform_2(%arg0: i32) -> (i32, i32) {
    %c0_i32 = arith.constant 0 : i32
    %c0_i32_0 = arith.constant 0 : i32
    %c0_i32_1 = arith.constant 0 : i32
    return %c0_i32, %c0_i32_0 : i32, i32
  }
  func.func @transform_3(%arg0: i32) -> (i32, i32) {
    %c0_i32 = arith.constant 0 : i32
    %c0_i32_0 = arith.constant 0 : i32
    %c0_i32_1 = arith.constant 0 : i32
    return %c0_i32, %c0_i32_0 : i32, i32
  }
  func.func @transform_4(%arg0: i32) -> (i32, i32) {
    %c0_i32 = arith.constant 0 : i32
    %c0_i32_0 = arith.constant 0 : i32
    %c0_i32_1 = arith.constant 0 : i32
    return %c0_i32, %c0_i32_0 : i32, i32
  }
}

module attributes {stable_mosaic.version = 11 : i64} {
  func.func @_conv_bn_leaky_kernel(%arg0: i32, %arg1: memref<8x2048xf32, #tpu.memory_space<vmem>>, %arg2: memref<2048x128xf32, #tpu.memory_space<vmem>>, %arg3: memref<1x128xf32, #tpu.memory_space<vmem>>, %arg4: memref<1x128xf32, #tpu.memory_space<vmem>>, %arg5: memref<8x128xf32, #tpu.memory_space<vmem>>, %arg6: memref<8x128xf32, #tpu.memory_space<vmem>>) attributes {dimension_semantics = [#tpu.dimension_semantics<arbitrary>], iteration_bounds = array<i64: 1>, scalar_prefetch = 0 : i64, scratch_operands = 1 : i64, tpu.core_type = #tpu.core_type<tc>, window_params = [{transform_indices = @transform_0, window_bounds = array<i64: 8, 2048>}, {transform_indices = @transform_1, window_bounds = array<i64: 2048, 128>}, {pipeline_mode = #tpu.pipeline_mode<synchronous>, transform_indices = @transform_2, window_bounds = array<i64: 1, 128>}, {pipeline_mode = #tpu.pipeline_mode<synchronous>, transform_indices = @transform_3, window_bounds = array<i64: 1, 128>}, {pipeline_mode = #tpu.pipeline_mode<synchronous>, transform_indices = @transform_4, window_bounds = array<i64: 8, 128>}]} {
    %c0_i32 = arith.constant 0 : i32
    %0 = arith.cmpi eq, %arg0, %c0_i32 : i32
    %1 = arith.extui %0 : i1 to i32
    %c0_i32_0 = arith.constant 0 : i32
    %2 = arith.cmpi ne, %1, %c0_i32_0 : i32
    scf.if %2 {
      %cst_10 = arith.constant 0.000000e+00 : f32
      %12 = vector.broadcast %cst_10 : f32 to vector<8x128xf32>
      %c0_11 = arith.constant 0 : index
      %c0_12 = arith.constant 0 : index
      %13 = vector.load %arg6[%c0_11, %c0_12] : memref<8x128xf32, #tpu.memory_space<vmem>>, vector<8x128xf32>
      tpu.vector_store %arg6[%c0_11, %c0_12], %12 {strides = array<i32>} : memref<8x128xf32, #tpu.memory_space<vmem>>, vector<8x128xf32>,
    } else {
    }
    %c0 = arith.constant 0 : index
    %c0_1 = arith.constant 0 : index
    %3 = vector.load %arg6[%c0, %c0_1] : memref<8x128xf32, #tpu.memory_space<vmem>>, vector<8x128xf32>
    %c0_2 = arith.constant 0 : index
    %c0_3 = arith.constant 0 : index
    %4 = vector.load %arg1[%c0_2, %c0_3] : memref<8x2048xf32, #tpu.memory_space<vmem>>, vector<8x2048xf32>
    %c0_4 = arith.constant 0 : index
    %c0_5 = arith.constant 0 : index
    %5 = vector.load %arg2[%c0_4, %c0_5] : memref<2048x128xf32, #tpu.memory_space<vmem>>, vector<2048x128xf32>
    %cst = arith.constant dense<0.000000e+00> : vector<8x128xf32>
    %6 = tpu.matmul %4, %5, %cst {dimension_numbers = #tpu.dot_dimension_numbers<[1], [0], [0], [1], [0, 0, 1, 1], [], []>} : vector<8x2048xf32>, vector<2048x128xf32>, vector<8x128xf32> -> vector<8x128xf32>
    %7 = arith.addf %3, %6 : vector<8x128xf32>
    %c0_6 = arith.constant 0 : index
    %c0_7 = arith.constant 0 : index
    %8 = vector.load %arg6[%c0_6, %c0_7] : memref<8x128xf32, #tpu.memory_space<vmem>>, vector<8x128xf32>
    tpu.vector_store %arg6[%c0_6, %c0_7], %7 {strides = array<i32>} : memref<8x128xf32, #tpu.memory_space<vmem>>, vector<8x128xf32>,
    %c0_i32_8 = arith.constant 0 : i32
    %9 = arith.cmpi eq, %arg0, %c0_i32_8 : i32
    %10 = arith.extui %9 : i1 to i32
    %c0_i32_9 = arith.constant 0 : i32
    %11 = arith.cmpi ne, %10, %c0_i32_9 : i32
    scf.if %11 {
      %c0_10 = arith.constant 0 : index
      %c0_11 = arith.constant 0 : index
      %12 = vector.load %arg6[%c0_10, %c0_11] : memref<8x128xf32, #tpu.memory_space<vmem>>, vector<8x128xf32>
      %cst_12 = arith.constant dense<0.000000e+00> : vector<128xf32>
      %13 = vector.multi_reduction <add>, %12, %cst_12 [0] : vector<8x128xf32> to vector<128xf32>
      %14 = vector.shape_cast %13 : vector<128xf32> to vector<1x128xf32>
      %cst_13 = arith.constant 8.000000e+00 : f32
      %15 = vector.broadcast %cst_13 : f32 to vector<1x128xf32>
      %16 = arith.divf %14, %15 : vector<1x128xf32>
      %17 = vector.broadcast %16 : vector<1x128xf32> to vector<8x128xf32>
      %18 = arith.subf %12, %17 : vector<8x128xf32>
      %19 = arith.mulf %18, %18 : vector<8x128xf32>
      %cst_14 = arith.constant dense<0.000000e+00> : vector<128xf32>
      %20 = vector.multi_reduction <add>, %19, %cst_14 [0] : vector<8x128xf32> to vector<128xf32>
      %21 = vector.shape_cast %20 : vector<128xf32> to vector<1x128xf32>
      %cst_15 = arith.constant 8.000000e+00 : f32
      %22 = vector.broadcast %cst_15 : f32 to vector<1x128xf32>
      %23 = arith.divf %21, %22 : vector<1x128xf32>
      %c0_16 = arith.constant 0 : index
      %c0_17 = arith.constant 0 : index
      %24 = vector.load %arg3[%c0_16, %c0_17] : memref<1x128xf32, #tpu.memory_space<vmem>>, vector<1x128xf32>
      %cst_18 = arith.constant 9.99999974E-6 : f32
      %25 = vector.broadcast %cst_18 : f32 to vector<1x128xf32>
      %26 = arith.addf %23, %25 : vector<1x128xf32>
      %27 = math.rsqrt %26 : vector<1x128xf32>
      %28 = arith.mulf %24, %27 : vector<1x128xf32>
      %29 = vector.broadcast %28 : vector<1x128xf32> to vector<8x128xf32>
      %30 = arith.mulf %18, %29 : vector<8x128xf32>
      %c0_19 = arith.constant 0 : index
      %c0_20 = arith.constant 0 : index
      %31 = vector.load %arg4[%c0_19, %c0_20] : memref<1x128xf32, #tpu.memory_space<vmem>>, vector<1x128xf32>
      %32 = vector.broadcast %31 : vector<1x128xf32> to vector<8x128xf32>
      %33 = arith.addf %30, %32 : vector<8x128xf32>
      %cst_21 = arith.constant 0.000000e+00 : f32
      %34 = vector.broadcast %cst_21 : f32 to vector<8x128xf32>
      %35 = arith.cmpf ogt, %33, %34 : vector<8x128xf32>
      %cst_22 = arith.constant 2.000000e-01 : f32
      %36 = vector.broadcast %cst_22 : f32 to vector<8x128xf32>
      %37 = arith.mulf %36, %33 : vector<8x128xf32>
      %38 = arith.select %35, %33, %37 : vector<8x128xi1>, vector<8x128xf32>
      %c0_23 = arith.constant 0 : index
      %c0_24 = arith.constant 0 : index
      %39 = vector.load %arg5[%c0_23, %c0_24] : memref<8x128xf32, #tpu.memory_space<vmem>>, vector<8x128xf32>
      tpu.vector_store %arg5[%c0_23, %c0_24], %38 {strides = array<i32>} : memref<8x128xf32, #tpu.memory_space<vmem>>, vector<8x128xf32>,
    } else {
    }
    return
  }
  func.func @transform_0(%arg0: i32) -> (i32, i32) {
    %c0_i32 = arith.constant 0 : i32
    %c0_i32_0 = arith.constant 0 : i32
    return %c0_i32, %arg0 : i32, i32
  }
  func.func @transform_1(%arg0: i32) -> (i32, i32) {
    %c0_i32 = arith.constant 0 : i32
    %c0_i32_0 = arith.constant 0 : i32
    return %arg0, %c0_i32 : i32, i32
  }
  func.func @transform_2(%arg0: i32) -> (i32, i32) {
    %c0_i32 = arith.constant 0 : i32
    %c0_i32_0 = arith.constant 0 : i32
    %c0_i32_1 = arith.constant 0 : i32
    return %c0_i32, %c0_i32_0 : i32, i32
  }
  func.func @transform_3(%arg0: i32) -> (i32, i32) {
    %c0_i32 = arith.constant 0 : i32
    %c0_i32_0 = arith.constant 0 : i32
    %c0_i32_1 = arith.constant 0 : i32
    return %c0_i32, %c0_i32_0 : i32, i32
  }
  func.func @transform_4(%arg0: i32) -> (i32, i32) {
    %c0_i32 = arith.constant 0 : i32
    %c0_i32_0 = arith.constant 0 : i32
    %c0_i32_1 = arith.constant 0 : i32
    return %c0_i32, %c0_i32_0 : i32, i32
  }
}

module attributes {stable_mosaic.version = 11 : i64} {
  func.func @_conv_bias_act_kernel(%arg0: i32, %arg1: i32, %arg2: memref<2x2048xf32, #tpu.memory_space<vmem>>, %arg3: memref<2048x128xf32, #tpu.memory_space<vmem>>, %arg4: memref<1x128xf32, #tpu.memory_space<vmem>>, %arg5: memref<2x128xf32, #tpu.memory_space<vmem>>, %arg6: memref<2x128xf32, #tpu.memory_space<vmem>>) attributes {dimension_semantics = [#tpu.dimension_semantics<parallel>, #tpu.dimension_semantics<arbitrary>], iteration_bounds = array<i64: 1, 1>, scalar_prefetch = 0 : i64, scratch_operands = 1 : i64, tpu.core_type = #tpu.core_type<tc>, window_params = [{transform_indices = @transform_0, window_bounds = array<i64: 2, 2048>}, {transform_indices = @transform_1, window_bounds = array<i64: 2048, 128>}, {pipeline_mode = #tpu.pipeline_mode<synchronous>, transform_indices = @transform_2, window_bounds = array<i64: 1, 128>}, {transform_indices = @transform_3, window_bounds = array<i64: 2, 128>}]} {
    %c0_i32 = arith.constant 0 : i32
    %0 = arith.cmpi eq, %arg1, %c0_i32 : i32
    %1 = arith.extui %0 : i1 to i32
    %c0_i32_0 = arith.constant 0 : i32
    %2 = arith.cmpi ne, %1, %c0_i32_0 : i32
    scf.if %2 {
      %cst_10 = arith.constant 0.000000e+00 : f32
      %12 = vector.broadcast %cst_10 : f32 to vector<2x128xf32>
      %c0_11 = arith.constant 0 : index
      %c0_12 = arith.constant 0 : index
      %13 = vector.load %arg6[%c0_11, %c0_12] : memref<2x128xf32, #tpu.memory_space<vmem>>, vector<2x128xf32>
      tpu.vector_store %arg6[%c0_11, %c0_12], %12 {strides = array<i32>} : memref<2x128xf32, #tpu.memory_space<vmem>>, vector<2x128xf32>,
    } else {
    }
    %c0 = arith.constant 0 : index
    %c0_1 = arith.constant 0 : index
    %3 = vector.load %arg6[%c0, %c0_1] : memref<2x128xf32, #tpu.memory_space<vmem>>, vector<2x128xf32>
    %c0_2 = arith.constant 0 : index
    %c0_3 = arith.constant 0 : index
    %4 = vector.load %arg2[%c0_2, %c0_3] : memref<2x2048xf32, #tpu.memory_space<vmem>>, vector<2x2048xf32>
    %c0_4 = arith.constant 0 : index
    %c0_5 = arith.constant 0 : index
    %5 = vector.load %arg3[%c0_4, %c0_5] : memref<2048x128xf32, #tpu.memory_space<vmem>>, vector<2048x128xf32>
    %cst = arith.constant dense<0.000000e+00> : vector<2x128xf32>
    %6 = tpu.matmul %4, %5, %cst {dimension_numbers = #tpu.dot_dimension_numbers<[1], [0], [0], [1], [0, 0, 1, 1], [], []>} : vector<2x2048xf32>, vector<2048x128xf32>, vector<2x128xf32> -> vector<2x128xf32>
    %7 = arith.addf %3, %6 : vector<2x128xf32>
    %c0_6 = arith.constant 0 : index
    %c0_7 = arith.constant 0 : index
    %8 = vector.load %arg6[%c0_6, %c0_7] : memref<2x128xf32, #tpu.memory_space<vmem>>, vector<2x128xf32>
    tpu.vector_store %arg6[%c0_6, %c0_7], %7 {strides = array<i32>} : memref<2x128xf32, #tpu.memory_space<vmem>>, vector<2x128xf32>,
    %c0_i32_8 = arith.constant 0 : i32
    %9 = arith.cmpi eq, %arg1, %c0_i32_8 : i32
    %10 = arith.extui %9 : i1 to i32
    %c0_i32_9 = arith.constant 0 : i32
    %11 = arith.cmpi ne, %10, %c0_i32_9 : i32
    scf.if %11 {
      %c0_10 = arith.constant 0 : index
      %c0_11 = arith.constant 0 : index
      %12 = vector.load %arg6[%c0_10, %c0_11] : memref<2x128xf32, #tpu.memory_space<vmem>>, vector<2x128xf32>
      %c0_12 = arith.constant 0 : index
      %c0_13 = arith.constant 0 : index
      %13 = vector.load %arg4[%c0_12, %c0_13] : memref<1x128xf32, #tpu.memory_space<vmem>>, vector<1x128xf32>
      %14 = vector.broadcast %13 : vector<1x128xf32> to vector<2x128xf32>
      %15 = arith.addf %12, %14 : vector<2x128xf32>
      %cst_14 = arith.constant 0.000000e+00 : f32
      %16 = vector.broadcast %cst_14 : f32 to vector<2x128xf32>
      %17 = arith.subf %16, %15 : vector<2x128xf32>
      %18 = math.exp %17 : vector<2x128xf32>
      %cst_15 = arith.constant 1.000000e+00 : f32
      %19 = vector.broadcast %cst_15 : f32 to vector<2x128xf32>
      %20 = arith.addf %19, %18 : vector<2x128xf32>
      %cst_16 = arith.constant 1.000000e+00 : f32
      %21 = vector.broadcast %cst_16 : f32 to vector<2x128xf32>
      %22 = arith.divf %21, %20 : vector<2x128xf32>
      %c0_17 = arith.constant 0 : index
      %c0_18 = arith.constant 0 : index
      %23 = vector.load %arg5[%c0_17, %c0_18] : memref<2x128xf32, #tpu.memory_space<vmem>>, vector<2x128xf32>
      tpu.vector_store %arg5[%c0_17, %c0_18], %22 {strides = array<i32>} : memref<2x128xf32, #tpu.memory_space<vmem>>, vector<2x128xf32>,
    } else {
    }
    return
  }
  func.func @transform_0(%arg0: i32, %arg1: i32) -> (i32, i32) {
    %c0_i32 = arith.constant 0 : i32
    return %arg0, %arg1 : i32, i32
  }
  func.func @transform_1(%arg0: i32, %arg1: i32) -> (i32, i32) {
    %c0_i32 = arith.constant 0 : i32
    %c0_i32_0 = arith.constant 0 : i32
    return %arg1, %c0_i32 : i32, i32
  }
  func.func @transform_2(%arg0: i32, %arg1: i32) -> (i32, i32) {
    %c0_i32 = arith.constant 0 : i32
    %c0_i32_0 = arith.constant 0 : i32
    %c0_i32_1 = arith.constant 0 : i32
    return %c0_i32, %c0_i32_0 : i32, i32
  }
  func.func @transform_3(%arg0: i32, %arg1: i32) -> (i32, i32) {
    %c0_i32 = arith.constant 0 : i32
    %c0_i32_0 = arith.constant 0 : i32
    return %arg0, %c0_i32 : i32, i32
  }
}

</mosaic_0001>

<bundles_post_ra>
// kernel: discriminator_forward.5
= control target key start
LH: loop header
LB: loop body
LE: loop exit
PB: predicated region body
PF: predicated region fallthrough
CT: control target
= control target key end

     0   :  { %s1166_s12 = smov 0   ;;  %s1168_s13 = smov 0   ;;  %s1359_s0 = inlined_call_operand.vmem [shape: f32[512,128], index: 0, kind: input, shape index: {}]   ;;  %s1360_s1 = inlined_call_operand.vmem [shape: f32[128,128], index: 1, kind: input, shape index: {}]   ;;  %s1361_s2 = inlined_call_operand.vmem [shape: f32[1,128], index: 2, kind: input, shape index: {}]   ;;  %s1362_s3 = inlined_call_operand.vmem [shape: f32[512,128], index: 3, kind: output, shape index: {}]  }
   0x1   :  { %s1170_s14 = smov 0  }
   0x2 LB: > { %s25_s15 = sadd.s32 1, %s1140_s13  ;;  %p914_p0 = scmp.ge.s32.totalorder %s1144_s14, 1  ;;  %s1144_s14 = sphi %s1170_s14, %s13_s14   ;;  %s1140_s13 = sphi %s1168_s13, %s1364_s13   ;;  %s1136_s12 = sphi %s1166_s12, %s1363_s12  }
   0x3   : > { %p27_p1 = scmp.ge.s32.totalorder %s25_s15, 2  ;;  %p166_p2 = scmp.lt.s32.totalorder %s1144_s14, 3 }
   0x5   : > { %s1366_s15 = smov (%p27_p1, %s25_s15), 0  ;;  %p167_p3 = pnand %p914_p0, %p166_p2 }
   0x6   : > { %v319_v0 = vld [vmem:[%s1360_s1] sm:$0xff] (!%p167_p3)  ;;  %v320_v1 = vld [vmem:[%s1360_s1 + $0x8] sm:$0xff] (!%p167_p3)  ;;  %v321_v2 = vld [vmem:[%s1360_s1 + $0x10] sm:$0xff] (!%p167_p3)  ;;  %s915_s22 = sshll.u32 (!%p167_p3), %s1136_s12, 5 }
   0x7   : > { %170 = sbr.rel (%p167_p3) target bundleno = 291 (0x123), region = 32  ;;  %v1050_v3 = vpack.c.bf16 (!%p167_p3), %v320_v1, %v319_v0  ;;  %v322_v4 = vld [vmem:[%s1360_s1 + $0x18] sm:$0xff] (!%p167_p3)  ;;  %p199_p4 = scmp.lt.s32.totalorder (!%p167_p3), %s915_s22, 63  ;;  %v323_v6 = vld [vmem:[%s1360_s1 + $0x20] sm:$0xff] (!%p167_p3)  ;;  %v324_v7 = vld [vmem:[%s1360_s1 + $0x28] sm:$0xff] (!%p167_p3) }
   0x8   : > { %v1054_v5 = vpack.c.bf16 (!%p167_p3), %v322_v4, %v321_v2  ;;  %v1058_v8 = vpack.c.bf16 (!%p167_p3), %v324_v7, %v323_v6  ;;  %v325_v9 = vld [vmem:[%s1360_s1 + $0x30] sm:$0xff] (!%p167_p3)  ;;  %v326_v10 = vld [vmem:[%s1360_s1 + $0x38] sm:$0xff] (!%p167_p3)  ;;  %v327_v14 = vld [vmem:[%s1360_s1 + $0x40] sm:$0xff] (!%p167_p3) }
   0x9   : > { %1051 = vmatprep.subr.bf16.mxu0 (!%p167_p3), %v1050_v3  ;;  %1082 = vmatprep.subr.bf16.mxu1 (!%p167_p3), %v1050_v3  ;;  %v1062_v13 = vpack.c.bf16 (!%p167_p3), %v326_v10, %v325_v9  ;;  %v328_v15 = vld [vmem:[%s1360_s1 + $0x48] sm:$0xff] (!%p167_p3)  ;;  %v329_v17 = vld [vmem:[%s1360_s1 + $0x50] sm:$0xff] (!%p167_p3)  ;;  %v330_v18 = vld [vmem:[%s1360_s1 + $0x58] sm:$0xff] (!%p167_p3) }
   0xa   : > { %1053 = vmatpush3.bf16.msra.mxu0 (!%p167_p3), %v1050_v3  ;;  %1090 = vmatpush3.bf16.msra.mxu1 (!%p167_p3), %v1050_v3  ;;  %v1066_v16 = vpack.c.bf16 (!%p167_p3), %v328_v15, %v327_v14  ;;  %v1070_v19 = vpack.c.bf16 (!%p167_p3), %v330_v18, %v329_v17  ;;  %v331_v20 = vld [vmem:[%s1360_s1 + $0x60] sm:$0xff] (!%p167_p3)  ;;  %v332_v21 = vld [vmem:[%s1360_s1 + $0x68] sm:$0xff] (!%p167_p3)  ;;  %v333_v23 = vld [vmem:[%s1360_s1 + $0x70] sm:$0xff] (!%p167_p3) }
   0xb   : > { %1055 = vmatprep.subr.bf16.mxu0 (!%p167_p3), %v1054_v5  ;;  %1083 = vmatprep.subr.bf16.mxu1 (!%p167_p3), %v1054_v5  ;;  %v1074_v22 = vpack.c.bf16 (!%p167_p3), %v332_v21, %v331_v20  ;;  %v334_v24 = vld [vmem:[%s1360_s1 + $0x78] sm:$0xff] (!%p167_p3)  ;;  %v1277_v56 = vld [vmem:[%s1361_s2] ss:$0 sm:$0xff] (!%p167_p3) }
   0xc   : > { %v1078_v25 = vpack.c.bf16 (!%p167_p3), %v334_v24, %v333_v23 }
   0xe   : > { %s1368_s22 = smov (!%p199_p4, %s915_s22), 63  ;;  %1057 = vmatpush3.bf16.msra.mxu0 %v1054_v5  ;;  %1091 = vmatpush3.bf16.msra.mxu1 %v1054_v5 }
   0xf   : > { %s916_s29 = sshll.u32 %s1368_s22, 3  ;;  %1059 = vmatprep.subr.bf16.mxu0 %v1058_v8  ;;  %1084 = vmatprep.subr.bf16.mxu1 %v1058_v8 }
  0x10   : > { %s1216_s9 = scalar_lea.vmem %s1359_s0, %s916_s29  ;;  %s1288_s8 = scalar_lea.vmem %s1362_s3, %s916_s29 }
  0x11   : > { %v287_v11 = vld [vmem:[%s1216_s9] sm:$0xff]  ;;  %v288_v26 = vld [vmem:[%s1216_s9 + $0x8] sm:$0xff]  ;;  %v289_v28 = vld [vmem:[%s1216_s9 + $0x10] sm:$0xff] }
  0x12   : > { %v303_v12 = vld [vmem:[%s1216_s9 + $0x80] sm:$0xff]  ;;  %1002 = vmatprep.mubr.f32.mxu0 %v287_v11  ;;  %1061 = vmatpush3.bf16.msra.mxu0 %v1058_v8  ;;  %v304_v27 = vld [vmem:[%s1216_s9 + $0x88] sm:$0xff]  ;;  %v305_v29 = vld [vmem:[%s1216_s9 + $0x90] sm:$0xff] }
  0x13   : > { %1026 = vmatprep.mubr.f32.mxu1 %v303_v12  ;;  %1092 = vmatpush3.bf16.msra.mxu1 %v1058_v8  ;;  %v290_v30 = vld [vmem:[%s1216_s9 + $0x18] sm:$0xff]  ;;  %v291_v32 = vld [vmem:[%s1216_s9 + $0x20] sm:$0xff]  ;;  %v292_v34 = vld [vmem:[%s1216_s9 + $0x28] sm:$0xff] }
  0x14   : > { %1063 = vmatprep.subr.bf16.mxu0 %v1062_v13  ;;  %1085 = vmatprep.subr.bf16.mxu1 %v1062_v13  ;;  %v306_v31 = vld [vmem:[%s1216_s9 + $0x98] sm:$0xff]  ;;  %v307_v33 = vld [vmem:[%s1216_s9 + $0xa0] sm:$0xff]  ;;  %v308_v35 = vld [vmem:[%s1216_s9 + $0xa8] sm:$0xff] }
  0x15   : > { %v293_v36 = vld [vmem:[%s1216_s9 + $0x30] sm:$0xff]  ;;  %v294_v38 = vld [vmem:[%s1216_s9 + $0x38] sm:$0xff]  ;;  %v295_v40 = vld [vmem:[%s1216_s9 + $0x40] sm:$0xff] }
  0x16   : > { %1065 = vmatpush3.bf16.msra.mxu0 %v1062_v13  ;;  %v309_v37 = vld [vmem:[%s1216_s9 + $0xb0] sm:$0xff]  ;;  %v310_v39 = vld [vmem:[%s1216_s9 + $0xb8] sm:$0xff]  ;;  %v311_v41 = vld [vmem:[%s1216_s9 + $0xc0] sm:$0xff] }
  0x17   : > { %1093 = vmatpush3.bf16.msra.mxu1 %v1062_v13  ;;  %1067 = vmatprep.subr.bf16.mxu0 %v1066_v16  ;;  %v296_v42 = vld [vmem:[%s1216_s9 + $0x48] sm:$0xff]  ;;  %v297_v44 = vld [vmem:[%s1216_s9 + $0x50] sm:$0xff]  ;;  %v298_v46 = vld [vmem:[%s1216_s9 + $0x58] sm:$0xff] }
  0x18   : > { %1086 = vmatprep.subr.bf16.mxu1 %v1066_v16  ;;  %v312_v43 = vld [vmem:[%s1216_s9 + $0xc8] sm:$0xff]  ;;  %v313_v45 = vld [vmem:[%s1216_s9 + $0xd0] sm:$0xff]  ;;  %v314_v47 = vld [vmem:[%s1216_s9 + $0xd8] sm:$0xff] }
  0x19   : > { %v299_v48 = vld [vmem:[%s1216_s9 + $0x60] sm:$0xff]  ;;  %v300_v50 = vld [vmem:[%s1216_s9 + $0x68] sm:$0xff]  ;;  %v301_v52 = vld [vmem:[%s1216_s9 + $0x70] sm:$0xff] }
  0x1a   : > { %1069 = vmatpush3.bf16.msra.mxu0 %v1066_v16  ;;  %v315_v49 = vld [vmem:[%s1216_s9 + $0xe0] sm:$0xff]  ;;  %v316_v51 = vld [vmem:[%s1216_s9 + $0xe8] sm:$0xff]  ;;  %v317_v53 = vld [vmem:[%s1216_s9 + $0xf0] sm:$0xff] }
  0x1b   : > { %1094 = vmatpush3.bf16.msra.mxu1 %v1066_v16  ;;  %1071 = vmatprep.subr.bf16.mxu0 %v1070_v19  ;;  %v302_v54 = vld [vmem:[%s1216_s9 + $0x78] sm:$0xff] }
  0x1c   : > { %1087 = vmatprep.subr.bf16.mxu1 %v1070_v19  ;;  %v318_v55 = vld [vmem:[%s1216_s9 + $0xf8] sm:$0xff] }
  0x1e   : > { %1073 = vmatpush3.bf16.msra.mxu0 %v1070_v19 }
  0x1f   : > { %1095 = vmatpush3.bf16.msra.mxu1 %v1070_v19  ;;  %1075 = vmatprep.subr.bf16.mxu0 %v1074_v22 }
  0x20   : > { %1088 = vmatprep.subr.bf16.mxu1 %v1074_v22 }
  0x22   : > { %1077 = vmatpush3.bf16.msra.mxu0 %v1074_v22 }
  0x23   : > { %1096 = vmatpush3.bf16.msra.mxu1 %v1074_v22  ;;  %1079 = vmatprep.subr.bf16.mxu0 %v1078_v25 }
  0x24   : > { %1089 = vmatprep.subr.bf16.mxu1 %v1078_v25 }
  0x26   : > { %1081 = vmatpush3.bf16.msra.mxu0 %v1078_v25 }
  0x27   : > { %1097 = vmatpush3.bf16.msra.mxu1 %v1078_v25 }
  0x29   : > { %1003 = vmatmul.mubr.f32.vlgmr.msra.gmra.mrb[0].mxu0 %v288_v26 }
  0x2a   : > { %1027 = vmatmul.mubr.f32.vlgmr.msra.gmra.mrb[0].mxu1 %v304_v27  ;;  %1005 = vmatprep.mubr.f32.mxu0 %v289_v28 }
  0x2b   : > { %1029 = vmatprep.mubr.f32.mxu1 %v305_v29 }
  0x2d   : > { %1006 = vmatmul.mubr.f32.gmra.mrb[2].mxu0 %v290_v30 }
  0x2e   : > { %1030 = vmatmul.mubr.f32.gmra.mrb[2].mxu1 %v306_v31  ;;  %1008 = vmatprep.mubr.f32.mxu0 %v291_v32 }
  0x2f   : > { %1032 = vmatprep.mubr.f32.mxu1 %v307_v33 }
  0x31   : > { %1009 = vmatmul.mubr.f32.gmra.mrb[4].mxu0 %v292_v34 }
  0x32   : > { %1033 = vmatmul.mubr.f32.gmra.mrb[4].mxu1 %v308_v35  ;;  %1011 = vmatprep.mubr.f32.mxu0 %v293_v36 }
  0x33   : > { %1035 = vmatprep.mubr.f32.mxu1 %v309_v37 }
  0x35   : > { %1012 = vmatmul.mubr.f32.gmra.mrb[6].mxu0 %v294_v38 }
  0x36   : > { %1036 = vmatmul.mubr.f32.gmra.mrb[6].mxu1 %v310_v39  ;;  %1014 = vmatprep.mubr.f32.mxu0 %v295_v40 }
  0x37   : > { %1038 = vmatprep.mubr.f32.mxu1 %v311_v41 }
  0x39   : > { %1015 = vmatmul.mubr.f32.gmra.mrb[8].mxu0 %v296_v42 }
  0x3a   : > { %1039 = vmatmul.mubr.f32.gmra.mrb[8].mxu1 %v312_v43  ;;  %1017 = vmatprep.mubr.f32.mxu0 %v297_v44 }
  0x3b   : > { %1041 = vmatprep.mubr.f32.mxu1 %v313_v45 }
  0x3d   : > { %1018 = vmatmul.mubr.f32.gmra.mrb[10].mxu0 %v298_v46 }
  0x3e   : > { %1042 = vmatmul.mubr.f32.gmra.mrb[10].mxu1 %v314_v47  ;;  %1020 = vmatprep.mubr.f32.mxu0 %v299_v48 }
  0x3f   : > { %1044 = vmatprep.mubr.f32.mxu1 %v315_v49 }
  0x41   : > { %1021 = vmatmul.mubr.f32.gmra.mrb[12].mxu0 %v300_v50 }
  0x42   : > { %1045 = vmatmul.mubr.f32.gmra.mrb[12].mxu1 %v316_v51  ;;  %1023 = vmatprep.mubr.f32.mxu0 %v301_v52 }
  0x43   : > { %1047 = vmatprep.mubr.f32.mxu1 %v317_v53 }
  0x45   : > { %1024 = vmatmul.mubr.f32.gmra.mrb[14].mxu0 %v302_v54 }
  0x46   : > { %1048 = vmatmul.mubr.f32.gmra.mrb[14].mxu1 %v318_v55 }
  0xfc   : > { %v1004_v57 = vpop.f32.mrb[0].mxu0 }
  0xfd   : > { %v1028_v58 = vpop.f32.mrb[0].mxu1  ;;  %v667_v59 = vadd.f32 %v1004_v57, %v1277_v56  ;;  %v401_v61 = vpop.f32.mrb[1].mxu0 }
  0xfe   : > { %v683_v60 = vadd.f32 %v1028_v58, %v1277_v56  ;;  %v481_v62 = vpop.f32.mrb[1].mxu1  ;;  %v666_v63 = vadd.f32 %v1277_v56, %v401_v61 }
  0xff   : > { %v682_v0 = vadd.f32 %v1277_v56, %v481_v62  ;;  %vm699_vm0 = vcmp.gt.f32.partialorder %v667_v59, 0.0  ;;  %v731_v1 = vmul.f32 0.2, %v667_v59 }
 0x100   : > { %vm715_vm1 = vcmp.gt.f32.partialorder %v683_v60, 0.0  ;;  %v747_v2 = vmul.f32 0.2, %v683_v60  ;;  %vm698_vm2 = vcmp.gt.f32.partialorder %v666_v63, 0.0  ;;  %v730_v3 = vmul.f32 0.2, %v666_v63 }
 0x101   : > { %vm714_vm3 = vcmp.gt.f32.partialorder %v682_v0, 0.0  ;;  %v746_v4 = vmul.f32 0.2, %v682_v0  ;;  %v763_v5 = vsel %vm699_vm0, %v667_v59, %v731_v1  ;;  %v1007_v7 = vpop.f32.mrb[2].mxu0  ;;  %v1031_v8 = vpop.f32.mrb[2].mxu1 }
 0x102   : > { %v779_v6 = vsel %vm715_vm1, %v683_v60, %v747_v2  ;;  %795 = vst [vmem:[%s1288_s8 + $0x8] sm:$0xff] %v763_v5  ;;  %v762_v9 = vsel %vm698_vm2, %v666_v63, %v730_v3  ;;  %v669_v11 = vadd.f32 %v1007_v7, %v1277_v56  ;;  %v685_v12 = vadd.f32 %v1031_v8, %v1277_v56  ;;  %v411_v13 = vpop.f32.mrb[3].mxu0  ;;  %v491_v14 = vpop.f32.mrb[3].mxu1 }
 0x103   : > { %811 = vst [vmem:[%s1288_s8 + $0x88] sm:$0xff] %v779_v6  ;;  %v778_v10 = vsel %vm714_vm3, %v682_v0, %v746_v4  ;;  %794 = vst [vmem:[%s1288_s8] sm:$0xff] %v762_v9  ;;  %v668_v15 = vadd.f32 %v1277_v56, %v411_v13  ;;  %v684_v16 = vadd.f32 %v1277_v56, %v491_v14 }
 0x104   : > { %810 = vst [vmem:[%s1288_s8 + $0x80] sm:$0xff] %v778_v10  ;;  %vm701_vm4 = vcmp.gt.f32.partialorder %v669_v11, 0.0  ;;  %v733_v17 = vmul.f32 0.2, %v669_v11  ;;  %vm717_vm5 = vcmp.gt.f32.partialorder %v685_v12, 0.0  ;;  %v1010_v23 = vpop.f32.mrb[4].mxu0 }
 0x105   : > { %v749_v18 = vmul.f32 0.2, %v685_v12  ;;  %vm700_vm6 = vcmp.gt.f32.partialorder %v668_v15, 0.0  ;;  %v732_v19 = vmul.f32 0.2, %v668_v15  ;;  %vm716_vm7 = vcmp.gt.f32.partialorder %v684_v16, 0.0 }
 0x106   : > { %v748_v20 = vmul.f32 0.2, %v684_v16  ;;  %v765_v21 = vsel %vm701_vm4, %v669_v11, %v733_v17  ;;  %v1034_v24 = vpop.f32.mrb[4].mxu1  ;;  %v671_v27 = vadd.f32 %v1010_v23, %v1277_v56  ;;  %v421_v29 = vpop.f32.mrb[5].mxu0 }
 0x107   : > { %v781_v22 = vsel %vm717_vm5, %v685_v12, %v749_v18  ;;  %797 = vst [vmem:[%s1288_s8 + $0x18] sm:$0xff] %v765_v21  ;;  %v764_v25 = vsel %vm700_vm6, %v668_v15, %v732_v19  ;;  %v687_v28 = vadd.f32 %v1034_v24, %v1277_v56  ;;  %v501_v30 = vpop.f32.mrb[5].mxu1  ;;  %v670_v31 = vadd.f32 %v1277_v56, %v421_v29 }
 0x108   : > { %813 = vst [vmem:[%s1288_s8 + $0x98] sm:$0xff] %v781_v22  ;;  %v780_v26 = vsel %vm716_vm7, %v684_v16, %v748_v20  ;;  %796 = vst [vmem:[%s1288_s8 + $0x10] sm:$0xff] %v764_v25  ;;  %v686_v32 = vadd.f32 %v1277_v56, %v501_v30  ;;  %v1013_v33 = vpop.f32.mrb[6].mxu0  ;;  %vm703_vm8 = vcmp.gt.f32.partialorder %v671_v27, 0.0  ;;  %v735_v35 = vmul.f32 0.2, %v671_v27 }
 0x109   : > { %812 = vst [vmem:[%s1288_s8 + $0x90] sm:$0xff] %v780_v26  ;;  %v1037_v34 = vpop.f32.mrb[6].mxu1  ;;  %vm719_vm9 = vcmp.gt.f32.partialorder %v687_v28, 0.0  ;;  %v751_v36 = vmul.f32 0.2, %v687_v28  ;;  %vm702_vm10 = vcmp.gt.f32.partialorder %v670_v31, 0.0  ;;  %v673_v41 = vadd.f32 %v1013_v33, %v1277_v56 }
 0x10a   : > { %v734_v37 = vmul.f32 0.2, %v670_v31  ;;  %vm718_vm11 = vcmp.gt.f32.partialorder %v686_v32, 0.0  ;;  %v750_v38 = vmul.f32 0.2, %v686_v32  ;;  %v767_v39 = vsel %vm703_vm8, %v671_v27, %v735_v35  ;;  %v431_v43 = vpop.f32.mrb[7].mxu0 }
 0x10b   : > { %v783_v40 = vsel %vm719_vm9, %v687_v28, %v751_v36  ;;  %v689_v42 = vadd.f32 %v1037_v34, %v1277_v56  ;;  %v511_v44 = vpop.f32.mrb[7].mxu1  ;;  %799 = vst [vmem:[%s1288_s8 + $0x28] sm:$0xff] %v767_v39  ;;  %v672_v47 = vadd.f32 %v1277_v56, %v431_v43  ;;  %vm705_vm12 = vcmp.gt.f32.partialorder %v673_v41, 0.0 }
 0x10c   : > { %815 = vst [vmem:[%s1288_s8 + $0xa8] sm:$0xff] %v783_v40  ;;  %v766_v45 = vsel %vm702_vm10, %v670_v31, %v734_v37  ;;  %v782_v46 = vsel %vm718_vm11, %v686_v32, %v750_v38  ;;  %v688_v48 = vadd.f32 %v1277_v56, %v511_v44  ;;  %v1016_v49 = vpop.f32.mrb[8].mxu0  ;;  %v737_v51 = vmul.f32 0.2, %v673_v41 }
 0x10d   : > { %v1040_v50 = vpop.f32.mrb[8].mxu1  ;;  %798 = vst [vmem:[%s1288_s8 + $0x20] sm:$0xff] %v766_v45  ;;  %814 = vst [vmem:[%s1288_s8 + $0xa0] sm:$0xff] %v782_v46  ;;  %vm721_vm13 = vcmp.gt.f32.partialorder %v689_v42, 0.0  ;;  %v753_v52 = vmul.f32 0.2, %v689_v42  ;;  %v675_v58 = vadd.f32 %v1016_v49, %v1277_v56 }
 0x10e   : > { %vm704_vm14 = vcmp.gt.f32.partialorder %v672_v47, 0.0  ;;  %v736_v53 = vmul.f32 0.2, %v672_v47  ;;  %vm720_vm15 = vcmp.gt.f32.partialorder %v688_v48, 0.0  ;;  %v752_v54 = vmul.f32 0.2, %v688_v48 }
 0x10f   : > { %v769_v55 = vsel %vm705_vm12, %v673_v41, %v737_v51  ;;  %v785_v57 = vsel %vm721_vm13, %v689_v42, %v753_v52  ;;  %v691_v59 = vadd.f32 %v1040_v50, %v1277_v56  ;;  %v441_v60 = vpop.f32.mrb[9].mxu0  ;;  %v521_v61 = vpop.f32.mrb[9].mxu1  ;;  %vm707_vm0 = vcmp.gt.f32.partialorder %v675_v58, 0.0 }
 0x110   : > { %801 = vst [vmem:[%s1288_s8 + $0x38] sm:$0xff] %v769_v55  ;;  %817 = vst [vmem:[%s1288_s8 + $0xb8] sm:$0xff] %v785_v57  ;;  %v768_v62 = vsel %vm704_vm14, %v672_v47, %v736_v53  ;;  %v784_v63 = vsel %vm720_vm15, %v688_v48, %v752_v54  ;;  %v674_v0 = vadd.f32 %v1277_v56, %v441_v60  ;;  %v1019_v2 = vpop.f32.mrb[10].mxu0  ;;  %v739_v4 = vmul.f32 0.2, %v675_v58 }
 0x111   : > { %v690_v1 = vadd.f32 %v1277_v56, %v521_v61  ;;  %v1043_v3 = vpop.f32.mrb[10].mxu1  ;;  %800 = vst [vmem:[%s1288_s8 + $0x30] sm:$0xff] %v768_v62  ;;  %816 = vst [vmem:[%s1288_s8 + $0xb0] sm:$0xff] %v784_v63  ;;  %vm723_vm1 = vcmp.gt.f32.partialorder %v691_v59, 0.0  ;;  %v755_v5 = vmul.f32 0.2, %v691_v59  ;;  %v677_v10 = vadd.f32 %v1019_v2, %v1277_v56 }
 0x112   : > { %vm706_vm2 = vcmp.gt.f32.partialorder %v674_v0, 0.0  ;;  %v738_v6 = vmul.f32 0.2, %v674_v0  ;;  %v771_v8 = vsel %vm707_vm0, %v675_v58, %v739_v4  ;;  %v693_v11 = vadd.f32 %v1043_v3, %v1277_v56  ;;  %v451_v12 = vpop.f32.mrb[11].mxu0  ;;  %v531_v13 = vpop.f32.mrb[11].mxu1 }
 0x113   : > { %vm722_vm3 = vcmp.gt.f32.partialorder %v690_v1, 0.0  ;;  %v754_v7 = vmul.f32 0.2, %v690_v1  ;;  %v787_v9 = vsel %vm723_vm1, %v691_v59, %v755_v5  ;;  %803 = vst [vmem:[%s1288_s8 + $0x48] sm:$0xff] %v771_v8  ;;  %v676_v16 = vadd.f32 %v1277_v56, %v451_v12 }
 0x114   : > { %819 = vst [vmem:[%s1288_s8 + $0xc8] sm:$0xff] %v787_v9  ;;  %v770_v14 = vsel %vm706_vm2, %v674_v0, %v738_v6  ;;  %v692_v17 = vadd.f32 %v1277_v56, %v531_v13  ;;  %v1022_v18 = vpop.f32.mrb[12].mxu0  ;;  %vm709_vm4 = vcmp.gt.f32.partialorder %v677_v10, 0.0  ;;  %v741_v20 = vmul.f32 0.2, %v677_v10 }
 0x115   : > { %v786_v15 = vsel %vm722_vm3, %v690_v1, %v754_v7  ;;  %v1046_v19 = vpop.f32.mrb[12].mxu1  ;;  %802 = vst [vmem:[%s1288_s8 + $0x40] sm:$0xff] %v770_v14  ;;  %vm725_vm5 = vcmp.gt.f32.partialorder %v693_v11, 0.0  ;;  %v757_v21 = vmul.f32 0.2, %v693_v11  ;;  %vm708_vm6 = vcmp.gt.f32.partialorder %v676_v16, 0.0 }
 0x116   : > { %818 = vst [vmem:[%s1288_s8 + $0xc0] sm:$0xff] %v786_v15  ;;  %v740_v22 = vmul.f32 0.2, %v676_v16  ;;  %vm724_vm7 = vcmp.gt.f32.partialorder %v692_v17, 0.0  ;;  %v756_v23 = vmul.f32 0.2, %v692_v17  ;;  %v773_v24 = vsel %vm709_vm4, %v677_v10, %v741_v20 }
 0x117   : > { %v789_v25 = vsel %vm725_vm5, %v693_v11, %v757_v21  ;;  %v679_v26 = vadd.f32 %v1022_v18, %v1277_v56  ;;  %v695_v27 = vadd.f32 %v1046_v19, %v1277_v56  ;;  %v461_v28 = vpop.f32.mrb[13].mxu0  ;;  %v541_v29 = vpop.f32.mrb[13].mxu1  ;;  %805 = vst [vmem:[%s1288_s8 + $0x58] sm:$0xff] %v773_v24 }
 0x118   : > { %821 = vst [vmem:[%s1288_s8 + $0xd8] sm:$0xff] %v789_v25  ;;  %v772_v30 = vsel %vm708_vm6, %v676_v16, %v740_v22  ;;  %v788_v31 = vsel %vm724_vm7, %v692_v17, %v756_v23  ;;  %v678_v32 = vadd.f32 %v1277_v56, %v461_v28  ;;  %v694_v33 = vadd.f32 %v1277_v56, %v541_v29  ;;  %v1025_v34 = vpop.f32.mrb[14].mxu0 }
 0x119   : > { %v1049_v35 = vpop.f32.mrb[14].mxu1  ;;  %804 = vst [vmem:[%s1288_s8 + $0x50] sm:$0xff] %v772_v30  ;;  %820 = vst [vmem:[%s1288_s8 + $0xd0] sm:$0xff] %v788_v31  ;;  %vm711_vm8 = vcmp.gt.f32.partialorder %v679_v26, 0.0  ;;  %v743_v36 = vmul.f32 0.2, %v679_v26  ;;  %v681_v42 = vadd.f32 %v1025_v34, %v1277_v56 }
 0x11a   : > { %vm727_vm9 = vcmp.gt.f32.partialorder %v695_v27, 0.0  ;;  %v759_v37 = vmul.f32 0.2, %v695_v27  ;;  %vm710_vm10 = vcmp.gt.f32.partialorder %v678_v32, 0.0  ;;  %v742_v38 = vmul.f32 0.2, %v678_v32 }
 0x11b   : > { %vm726_vm11 = vcmp.gt.f32.partialorder %v694_v33, 0.0  ;;  %v758_v39 = vmul.f32 0.2, %v694_v33  ;;  %v775_v40 = vsel %vm711_vm8, %v679_v26, %v743_v36  ;;  %v697_v43 = vadd.f32 %v1049_v35, %v1277_v56  ;;  %v471_v44 = vpop.f32.mrb[15].mxu0  ;;  %v551_v45 = vpop.f32.mrb[15].mxu1 }
 0x11c   : > { %v791_v41 = vsel %vm727_vm9, %v695_v27, %v759_v37  ;;  %807 = vst [vmem:[%s1288_s8 + $0x68] sm:$0xff] %v775_v40  ;;  %v774_v46 = vsel %vm710_vm10, %v678_v32, %v742_v38  ;;  %v680_v48 = vadd.f32 %v1277_v56, %v471_v44  ;;  %v696_v49 = vadd.f32 %v1277_v56, %v551_v45 }
 0x11d   : > { %823 = vst [vmem:[%s1288_s8 + $0xe8] sm:$0xff] %v791_v41  ;;  %v790_v47 = vsel %vm726_vm11, %v694_v33, %v758_v39  ;;  %806 = vst [vmem:[%s1288_s8 + $0x60] sm:$0xff] %v774_v46  ;;  %vm713_vm12 = vcmp.gt.f32.partialorder %v681_v42, 0.0  ;;  %v745_v50 = vmul.f32 0.2, %v681_v42  ;;  %vm729_vm13 = vcmp.gt.f32.partialorder %v697_v43, 0.0 }
 0x11e   : > { %822 = vst [vmem:[%s1288_s8 + $0xe0] sm:$0xff] %v790_v47  ;;  %v761_v51 = vmul.f32 0.2, %v697_v43  ;;  %vm712_vm14 = vcmp.gt.f32.partialorder %v680_v48, 0.0  ;;  %v744_v52 = vmul.f32 0.2, %v680_v48 }
 0x11f   : > { %vm728_vm15 = vcmp.gt.f32.partialorder %v696_v49, 0.0  ;;  %v760_v53 = vmul.f32 0.2, %v696_v49  ;;  %v777_v54 = vsel %vm713_vm12, %v681_v42, %v745_v50 }
 0x120   : > { %v793_v55 = vsel %vm729_vm13, %v697_v43, %v761_v51  ;;  %809 = vst [vmem:[%s1288_s8 + $0x78] sm:$0xff] %v777_v54  ;;  %v776_v57 = vsel %vm712_vm14, %v680_v48, %v744_v52 }
 0x121   : > { %825 = vst [vmem:[%s1288_s8 + $0xf8] sm:$0xff] %v793_v55  ;;  %v792_v58 = vsel %vm728_vm15, %v696_v49, %v760_v53  ;;  %808 = vst [vmem:[%s1288_s8 + $0x70] sm:$0xff] %v776_v57 }
 0x122   : > { %824 = vst [vmem:[%s1288_s8 + $0xf0] sm:$0xff] %v792_v58 }
 0x123 PF: > { %s13_s14 = sadd.s32 1, %s1144_s14   ;;  %s1363_s12 = smov %s1140_s13 }
 0x124   : > { %p10_p5 = scmp.ge.s32.totalorder %s13_s14, 4   ;;  %s1364_s13 = smov %s1366_s15 }
 0x126   :  { %12 = sbr.rel (!%p10_p5) target bundleno = 2 (0x2), region = 73 }

// kernel: discriminator_forward.6
= control target key start
LH: loop header
LB: loop body
LE: loop exit
PB: predicated region body
PF: predicated region fallthrough
CT: control target
= control target key end

     0   :  { %s4764_s1 = inlined_call_operand.vmem [shape: f32[2048,128], index: 1, kind: input, shape index: {}]   ;;  %s4765_s0 = inlined_call_operand.vmem [shape: f32[128,2048], index: 0, kind: input, shape index: {}]   ;;  %s4766_s2 = inlined_call_operand.vmem [shape: f32[1,128], index: 2, kind: input, shape index: {}]   ;;  %s4767_s3 = inlined_call_operand.vmem [shape: f32[1,128], index: 3, kind: input, shape index: {}]   ;;  %s4768_s4 = inlined_call_operand.vmem [shape: f32[128,128], index: 4, kind: output, shape index: {}]  }
   0x1   :  { %v325_v0 = vld [vmem:[%s4764_s1 + $0x80] sm:$0xff]  ;;  %v326_v1 = vld [vmem:[%s4764_s1 + $0x88] sm:$0xff]  ;;  %v327_v11 = vld [vmem:[%s4764_s1 + $0x90] sm:$0xff] }
   0x2   :  { %v357_v2 = vld [vmem:[%s4764_s1 + $0x180] sm:$0xff]  ;;  %v2611_v3 = vpack.c.bf16 %v326_v1, %v325_v0  ;;  %v358_v4 = vld [vmem:[%s4764_s1 + $0x188] sm:$0xff]  ;;  %v328_v13 = vld [vmem:[%s4764_s1 + $0x98] sm:$0xff] }
   0x3   :  { %v309_v5 = vld [vmem:[%s4764_s1] sm:$0xff]  ;;  %v310_v6 = vld [vmem:[%s4764_s1 + $0x8] sm:$0xff]  ;;  %v2643_v7 = vpack.c.bf16 %v358_v4, %v357_v2  ;;  %v359_v14 = vld [vmem:[%s4764_s1 + $0x190] sm:$0xff]  ;;  %v2615_v16 = vpack.c.bf16 %v328_v13, %v327_v11 }
   0x4   :  { %v2613_v8 = vpack.c.bf16 %v310_v6, %v309_v5  ;;  %v341_v9 = vld [vmem:[%s4764_s1 + $0x100] sm:$0xff]  ;;  %v342_v10 = vld [vmem:[%s4764_s1 + $0x108] sm:$0xff]  ;;  %2612 = vmatprep.subr.bf16.mxu0 %v2611_v3  ;;  %v360_v15 = vld [vmem:[%s4764_s1 + $0x198] sm:$0xff] }
   0x5   :  { %v2645_v12 = vpack.c.bf16 %v342_v10, %v341_v9  ;;  %2644 = vmatprep.subr.bf16.mxu1 %v2643_v7  ;;  %v2647_v17 = vpack.c.bf16 %v360_v15, %v359_v14  ;;  %v311_v18 = vld [vmem:[%s4764_s1 + $0x10] sm:$0xff]  ;;  %v312_v19 = vld [vmem:[%s4764_s1 + $0x18] sm:$0xff]  ;;  %v329_v23 = vld [vmem:[%s4764_s1 + $0xa0] sm:$0xff] }
   0x6   :  { %2614 = vmatpush3.bf16.msra.mxu0 %v2613_v8  ;;  %v343_v20 = vld [vmem:[%s4764_s1 + $0x110] sm:$0xff]  ;;  %v2617_v21 = vpack.c.bf16 %v312_v19, %v311_v18  ;;  %v344_v22 = vld [vmem:[%s4764_s1 + $0x118] sm:$0xff]  ;;  %v330_v24 = vld [vmem:[%s4764_s1 + $0xa8] sm:$0xff] }
   0x7   :  { %2646 = vmatpush3.bf16.msra.mxu1 %v2645_v12  ;;  %2616 = vmatprep.subr.bf16.mxu0 %v2615_v16  ;;  %v2649_v25 = vpack.c.bf16 %v344_v22, %v343_v20  ;;  %v2619_v26 = vpack.c.bf16 %v330_v24, %v329_v23  ;;  %v361_v27 = vld [vmem:[%s4764_s1 + $0x1a0] sm:$0xff]  ;;  %v362_v28 = vld [vmem:[%s4764_s1 + $0x1a8] sm:$0xff]  ;;  %v331_v35 = vld [vmem:[%s4764_s1 + $0xb0] sm:$0xff] }
   0x8   :  { %2648 = vmatprep.subr.bf16.mxu1 %v2647_v17  ;;  %v313_v29 = vld [vmem:[%s4764_s1 + $0x20] sm:$0xff]  ;;  %v2651_v30 = vpack.c.bf16 %v362_v28, %v361_v27  ;;  %v314_v31 = vld [vmem:[%s4764_s1 + $0x28] sm:$0xff]  ;;  %v332_v36 = vld [vmem:[%s4764_s1 + $0xb8] sm:$0xff] }
   0x9   :  { %v345_v32 = vld [vmem:[%s4764_s1 + $0x120] sm:$0xff]  ;;  %v346_v33 = vld [vmem:[%s4764_s1 + $0x128] sm:$0xff]  ;;  %v2621_v34 = vpack.c.bf16 %v314_v31, %v313_v29  ;;  %v363_v37 = vld [vmem:[%s4764_s1 + $0x1b0] sm:$0xff]  ;;  %v2623_v39 = vpack.c.bf16 %v332_v36, %v331_v35 }
   0xa   :  { %2618 = vmatpush3.bf16.msra.mxu0 %v2617_v21  ;;  %v2653_v38 = vpack.c.bf16 %v346_v33, %v345_v32  ;;  %v364_v40 = vld [vmem:[%s4764_s1 + $0x1b8] sm:$0xff]  ;;  %v315_v41 = vld [vmem:[%s4764_s1 + $0x30] sm:$0xff]  ;;  %v333_v46 = vld [vmem:[%s4764_s1 + $0xc0] sm:$0xff] }
   0xb   :  { %2650 = vmatpush3.bf16.msra.mxu1 %v2649_v25  ;;  %2620 = vmatprep.subr.bf16.mxu0 %v2619_v26  ;;  %v316_v42 = vld [vmem:[%s4764_s1 + $0x38] sm:$0xff]  ;;  %v2655_v43 = vpack.c.bf16 %v364_v40, %v363_v37  ;;  %v347_v44 = vld [vmem:[%s4764_s1 + $0x130] sm:$0xff]  ;;  %v334_v47 = vld [vmem:[%s4764_s1 + $0xc8] sm:$0xff] }
   0xc   :  { %2652 = vmatprep.subr.bf16.mxu1 %v2651_v30  ;;  %v348_v45 = vld [vmem:[%s4764_s1 + $0x138] sm:$0xff]  ;;  %v365_v48 = vld [vmem:[%s4764_s1 + $0x1c0] sm:$0xff]  ;;  %v366_v49 = vld [vmem:[%s4764_s1 + $0x1c8] sm:$0xff]  ;;  %v2625_v50 = vpack.c.bf16 %v316_v42, %v315_v41  ;;  %v2627_v52 = vpack.c.bf16 %v334_v47, %v333_v46 }
   0xd   :  { %v2657_v51 = vpack.c.bf16 %v348_v45, %v347_v44  ;;  %v317_v53 = vld [vmem:[%s4764_s1 + $0x40] sm:$0xff]  ;;  %v318_v54 = vld [vmem:[%s4764_s1 + $0x48] sm:$0xff]  ;;  %v2659_v56 = vpack.c.bf16 %v366_v49, %v365_v48  ;;  %v335_v58 = vld [vmem:[%s4764_s1 + $0xd0] sm:$0xff] }
   0xe   :  { %2622 = vmatpush3.bf16.msra.mxu0 %v2621_v34  ;;  %v349_v55 = vld [vmem:[%s4764_s1 + $0x140] sm:$0xff]  ;;  %v350_v57 = vld [vmem:[%s4764_s1 + $0x148] sm:$0xff]  ;;  %v336_v59 = vld [vmem:[%s4764_s1 + $0xd8] sm:$0xff]  ;;  %v2629_v62 = vpack.c.bf16 %v318_v54, %v317_v53 }
   0xf   :  { %2654 = vmatpush3.bf16.msra.mxu1 %v2653_v38  ;;  %2624 = vmatprep.subr.bf16.mxu0 %v2623_v39  ;;  %v367_v60 = vld [vmem:[%s4764_s1 + $0x1d0] sm:$0xff]  ;;  %v368_v61 = vld [vmem:[%s4764_s1 + $0x1d8] sm:$0xff]  ;;  %v2661_v63 = vpack.c.bf16 %v350_v57, %v349_v55  ;;  %v2631_v0 = vpack.c.bf16 %v336_v59, %v335_v58  ;;  %v337_v6 = vld [vmem:[%s4764_s1 + $0xe0] sm:$0xff] }
  0x10   :  { %2656 = vmatprep.subr.bf16.mxu1 %v2655_v43  ;;  %v319_v1 = vld [vmem:[%s4764_s1 + $0x50] sm:$0xff]  ;;  %v320_v2 = vld [vmem:[%s4764_s1 + $0x58] sm:$0xff]  ;;  %v2663_v4 = vpack.c.bf16 %v368_v61, %v367_v60  ;;  %v338_v7 = vld [vmem:[%s4764_s1 + $0xe8] sm:$0xff] }
  0x11   :  { %v351_v3 = vld [vmem:[%s4764_s1 + $0x150] sm:$0xff]  ;;  %v352_v5 = vld [vmem:[%s4764_s1 + $0x158] sm:$0xff]  ;;  %v369_v8 = vld [vmem:[%s4764_s1 + $0x1e0] sm:$0xff]  ;;  %v2633_v10 = vpack.c.bf16 %v320_v2, %v319_v1  ;;  %v2635_v14 = vpack.c.bf16 %v338_v7, %v337_v6 }
  0x12   :  { %2626 = vmatpush3.bf16.msra.mxu0 %v2625_v50  ;;  %v370_v9 = vld [vmem:[%s4764_s1 + $0x1e8] sm:$0xff]  ;;  %v321_v11 = vld [vmem:[%s4764_s1 + $0x60] sm:$0xff]  ;;  %v2665_v13 = vpack.c.bf16 %v352_v5, %v351_v3  ;;  %v56_v17 = vld [vmem:[%s4765_s0 + $0x18] sm:$0xff] }
  0x13   :  { %2658 = vmatpush3.bf16.msra.mxu1 %v2657_v51  ;;  %2628 = vmatprep.subr.bf16.mxu0 %v2627_v52  ;;  %v322_v12 = vld [vmem:[%s4764_s1 + $0x68] sm:$0xff]  ;;  %v353_v15 = vld [vmem:[%s4764_s1 + $0x160] sm:$0xff]  ;;  %v2667_v18 = vpack.c.bf16 %v370_v9, %v369_v8  ;;  %v339_v20 = vld [vmem:[%s4764_s1 + $0xf0] sm:$0xff] }
  0x14   :  { %2660 = vmatprep.subr.bf16.mxu1 %v2659_v56  ;;  %v54_v16 = vld [vmem:[%s4765_s0 + $0x8] sm:$0xff]  ;;  %v340_v21 = vld [vmem:[%s4764_s1 + $0xf8] sm:$0xff]  ;;  %v371_v22 = vld [vmem:[%s4764_s1 + $0x1f0] sm:$0xff]  ;;  %774 = vmatprep.mubr.f32.mxu1 %v56_v17  ;;  %v2637_v24 = vpack.c.bf16 %v322_v12, %v321_v11 }
  0x15   :  { %v354_v19 = vld [vmem:[%s4764_s1 + $0x168] sm:$0xff]  ;;  %629 = vmatprep.mubr.f32.mxu0 %v54_v16  ;;  %v372_v23 = vld [vmem:[%s4764_s1 + $0x1f8] sm:$0xff]  ;;  %v2639_v26 = vpack.c.bf16 %v340_v21, %v339_v20  ;;  %v323_v27 = vld [vmem:[%s4764_s1 + $0x70] sm:$0xff] }
  0x16   :  { %2630 = vmatpush3.bf16.msra.mxu0 %v2629_v62  ;;  %v2669_v25 = vpack.c.bf16 %v354_v19, %v353_v15  ;;  %v324_v28 = vld [vmem:[%s4764_s1 + $0x78] sm:$0xff]  ;;  %v355_v29 = vld [vmem:[%s4764_s1 + $0x170] sm:$0xff]  ;;  %v2671_v30 = vpack.c.bf16 %v372_v23, %v371_v22  ;;  %v389_v32 = vld [vmem:[%s4764_s1 + $0x280] sm:$0xff] }
  0x17   :  { %2662 = vmatpush3.bf16.msra.mxu1 %v2661_v63  ;;  %2632 = vmatprep.subr.bf16.mxu0 %v2631_v0  ;;  %v356_v31 = vld [vmem:[%s4764_s1 + $0x178] sm:$0xff]  ;;  %v390_v33 = vld [vmem:[%s4764_s1 + $0x288] sm:$0xff]  ;;  %v421_v34 = vld [vmem:[%s4764_s1 + $0x380] sm:$0xff]  ;;  %v2641_v36 = vpack.c.bf16 %v324_v28, %v323_v27 }
  0x18   :  { %2664 = vmatprep.subr.bf16.mxu1 %v2663_v4  ;;  %v422_v35 = vld [vmem:[%s4764_s1 + $0x388] sm:$0xff]  ;;  %v2673_v37 = vpack.c.bf16 %v356_v31, %v355_v29  ;;  %v2675_v38 = vpack.c.bf16 %v390_v33, %v389_v32  ;;  %v373_v39 = vld [vmem:[%s4764_s1 + $0x200] sm:$0xff]  ;;  %v391_v44 = vld [vmem:[%s4764_s1 + $0x290] sm:$0xff] }
  0x19   :  { %v374_v40 = vld [vmem:[%s4764_s1 + $0x208] sm:$0xff]  ;;  %v2707_v41 = vpack.c.bf16 %v422_v35, %v421_v34  ;;  %v405_v42 = vld [vmem:[%s4764_s1 + $0x300] sm:$0xff]  ;;  %v392_v45 = vld [vmem:[%s4764_s1 + $0x298] sm:$0xff] }
  0x1a   :  { %2634 = vmatpush3.bf16.msra.mxu0 %v2633_v10  ;;  %v406_v43 = vld [vmem:[%s4764_s1 + $0x308] sm:$0xff]  ;;  %v53_v46 = vld [vmem:[%s4765_s0] sm:$0xff]  ;;  %v2677_v47 = vpack.c.bf16 %v374_v40, %v373_v39  ;;  %v423_v48 = vld [vmem:[%s4764_s1 + $0x390] sm:$0xff]  ;;  %v2679_v54 = vpack.c.bf16 %v392_v45, %v391_v44 }
  0x1b   :  { %2666 = vmatpush3.bf16.msra.mxu1 %v2665_v13  ;;  %2636 = vmatprep.subr.bf16.mxu0 %v2635_v14  ;;  %v424_v49 = vld [vmem:[%s4764_s1 + $0x398] sm:$0xff]  ;;  %v55_v50 = vld [vmem:[%s4765_s0 + $0x10] sm:$0xff]  ;;  %v70_v51 = vld [vmem:[%s4765_s0 + $0x88] sm:$0xff]  ;;  %v2709_v53 = vpack.c.bf16 %v406_v43, %v405_v42 }
  0x1c   :  { %2668 = vmatprep.subr.bf16.mxu1 %v2667_v18  ;;  %v72_v52 = vld [vmem:[%s4765_s0 + $0x98] sm:$0xff]  ;;  %v375_v55 = vld [vmem:[%s4764_s1 + $0x210] sm:$0xff]  ;;  %v2711_v58 = vpack.c.bf16 %v424_v49, %v423_v48  ;;  %v393_v60 = vld [vmem:[%s4764_s1 + $0x2a0] sm:$0xff] }
  0x1d   :  { %v376_v56 = vld [vmem:[%s4764_s1 + $0x218] sm:$0xff]  ;;  %v407_v57 = vld [vmem:[%s4764_s1 + $0x310] sm:$0xff]  ;;  %v394_v61 = vld [vmem:[%s4764_s1 + $0x2a8] sm:$0xff] }
  0x1e   :  { %2638 = vmatpush3.bf16.msra.mxu0 %v2637_v24  ;;  %v408_v59 = vld [vmem:[%s4764_s1 + $0x318] sm:$0xff]  ;;  %v69_v62 = vld [vmem:[%s4765_s0 + $0x80] sm:$0xff]  ;;  %v426_v0 = vld [vmem:[%s4764_s1 + $0x3a8] sm:$0xff]  ;;  %v2681_v4 = vpack.c.bf16 %v376_v56, %v375_v55  ;;  %v2683_v6 = vpack.c.bf16 %v394_v61, %v393_v60 }
  0x1f   :  { %2670 = vmatpush3.bf16.msra.mxu1 %v2669_v25  ;;  %2640 = vmatprep.subr.bf16.mxu0 %v2639_v26  ;;  %v425_v63 = vld [vmem:[%s4764_s1 + $0x3a0] sm:$0xff]  ;;  %v71_v1 = vld [vmem:[%s4765_s0 + $0x90] sm:$0xff]  ;;  %v86_v2 = vld [vmem:[%s4765_s0 + $0x108] sm:$0xff]  ;;  %v2713_v5 = vpack.c.bf16 %v408_v59, %v407_v57 }
  0x20   :  { %2672 = vmatprep.subr.bf16.mxu1 %v2671_v30  ;;  %v88_v3 = vld [vmem:[%s4765_s0 + $0x118] sm:$0xff]  ;;  %v377_v7 = vld [vmem:[%s4764_s1 + $0x220] sm:$0xff]  ;;  %v378_v8 = vld [vmem:[%s4764_s1 + $0x228] sm:$0xff]  ;;  %v2715_v10 = vpack.c.bf16 %v426_v0, %v425_v63 }
  0x21   :  { %v409_v9 = vld [vmem:[%s4764_s1 + $0x320] sm:$0xff]  ;;  %v410_v11 = vld [vmem:[%s4764_s1 + $0x328] sm:$0xff]  ;;  %v395_v12 = vld [vmem:[%s4764_s1 + $0x2b0] sm:$0xff]  ;;  %v2685_v19 = vpack.c.bf16 %v378_v8, %v377_v7 }
  0x22   :  { %2642 = vmatpush3.bf16.msra.mxu0 %v2641_v36  ;;  %v396_v13 = vld [vmem:[%s4764_s1 + $0x2b8] sm:$0xff]  ;;  %v85_v14 = vld [vmem:[%s4765_s0 + $0x100] sm:$0xff]  ;;  %v427_v15 = vld [vmem:[%s4764_s1 + $0x3b0] sm:$0xff]  ;;  %v2717_v21 = vpack.c.bf16 %v410_v11, %v409_v9 }
  0x23   :  { %2674 = vmatpush3.bf16.msra.mxu1 %v2673_v37  ;;  %2676 = vmatprep.subr.bf16.mxu0 %v2675_v38  ;;  %v428_v16 = vld [vmem:[%s4764_s1 + $0x3b8] sm:$0xff]  ;;  %v87_v17 = vld [vmem:[%s4765_s0 + $0x110] sm:$0xff]  ;;  %v102_v18 = vld [vmem:[%s4765_s0 + $0x188] sm:$0xff]  ;;  %v2687_v22 = vpack.c.bf16 %v396_v13, %v395_v12 }
  0x24   :  { %2708 = vmatprep.subr.bf16.mxu1 %v2707_v41  ;;  %v104_v20 = vld [vmem:[%s4765_s0 + $0x198] sm:$0xff]  ;;  %v379_v23 = vld [vmem:[%s4764_s1 + $0x230] sm:$0xff]  ;;  %v101_v25 = vld [vmem:[%s4765_s0 + $0x180] sm:$0xff]  ;;  %v2719_v26 = vpack.c.bf16 %v428_v16, %v427_v15 }
  0x25   :  { %630 = vmatmul.mubr.f32.vlgmr.msra.gmra.mrb[0].mxu0 %v53_v46  ;;  %v380_v24 = vld [vmem:[%s4764_s1 + $0x238] sm:$0xff]  ;;  %v411_v27 = vld [vmem:[%s4764_s1 + $0x330] sm:$0xff]  ;;  %v397_v30 = vld [vmem:[%s4764_s1 + $0x2c0] sm:$0xff] }
  0x26   :  { %775 = vmatmul.mubr.f32.vlgmr.msra.gmra.mrb[0].mxu1 %v55_v50  ;;  %2678 = vmatpush3.bf16.msra.mxu0 %v2677_v47  ;;  %v412_v28 = vld [vmem:[%s4764_s1 + $0x338] sm:$0xff]  ;;  %v103_v29 = vld [vmem:[%s4765_s0 + $0x190] sm:$0xff]  ;;  %v398_v31 = vld [vmem:[%s4764_s1 + $0x2c8] sm:$0xff]  ;;  %v2689_v33 = vpack.c.bf16 %v380_v24, %v379_v23 }
  0x27   :  { %634 = vmatprep.mubr.f32.mxu0 %v70_v51  ;;  %779 = vmatprep.mubr.f32.mxu1 %v72_v52  ;;  %v118_v32 = vld [vmem:[%s4765_s0 + $0x208] sm:$0xff]  ;;  %v429_v34 = vld [vmem:[%s4764_s1 + $0x3c0] sm:$0xff]  ;;  %v120_v36 = vld [vmem:[%s4765_s0 + $0x218] sm:$0xff]  ;;  %v2721_v37 = vpack.c.bf16 %v412_v28, %v411_v27  ;;  %v2691_v38 = vpack.c.bf16 %v398_v31, %v397_v30 }
  0x28   :  { %2710 = vmatpush3.bf16.msra.mxu1 %v2709_v53  ;;  %2680 = vmatprep.subr.bf16.mxu0 %v2679_v54  ;;  %v430_v35 = vld [vmem:[%s4764_s1 + $0x3c8] sm:$0xff]  ;;  %v381_v39 = vld [vmem:[%s4764_s1 + $0x240] sm:$0xff]  ;;  %v119_v45 = vld [vmem:[%s4765_s0 + $0x210] sm:$0xff] }
  0x29   :  { %635 = vmatmul.mubr.f32.gmra.mrb[2].mxu0 %v69_v62  ;;  %2712 = vmatprep.subr.bf16.mxu1 %v2711_v58  ;;  %v382_v40 = vld [vmem:[%s4764_s1 + $0x248] sm:$0xff]  ;;  %v2723_v41 = vpack.c.bf16 %v430_v35, %v429_v34  ;;  %v413_v42 = vld [vmem:[%s4764_s1 + $0x340] sm:$0xff]  ;;  %v136_v47 = vld [vmem:[%s4765_s0 + $0x298] sm:$0xff] }
  0x2a   :  { %780 = vmatmul.mubr.f32.gmra.mrb[2].mxu1 %v71_v1  ;;  %639 = vmatprep.mubr.f32.mxu0 %v86_v2  ;;  %v414_v43 = vld [vmem:[%s4764_s1 + $0x348] sm:$0xff]  ;;  %v117_v44 = vld [vmem:[%s4765_s0 + $0x200] sm:$0xff]  ;;  %v2693_v48 = vpack.c.bf16 %v382_v40, %v381_v39  ;;  %v399_v49 = vld [vmem:[%s4764_s1 + $0x2d0] sm:$0xff] }
  0x2b   :  { %784 = vmatprep.mubr.f32.mxu1 %v88_v3  ;;  %2682 = vmatpush3.bf16.msra.mxu0 %v2681_v4  ;;  %v134_v46 = vld [vmem:[%s4765_s0 + $0x288] sm:$0xff]  ;;  %v400_v50 = vld [vmem:[%s4764_s1 + $0x2d8] sm:$0xff]  ;;  %v2725_v51 = vpack.c.bf16 %v414_v43, %v413_v42  ;;  %v383_v53 = vld [vmem:[%s4764_s1 + $0x250] sm:$0xff] }
  0x2c   :  { %2714 = vmatpush3.bf16.msra.mxu1 %v2713_v5  ;;  %2684 = vmatprep.subr.bf16.mxu0 %v2683_v6  ;;  %v2695_v52 = vpack.c.bf16 %v400_v50, %v399_v49  ;;  %v384_v54 = vld [vmem:[%s4764_s1 + $0x258] sm:$0xff]  ;;  %v431_v55 = vld [vmem:[%s4764_s1 + $0x3d0] sm:$0xff]  ;;  %v133_v57 = vld [vmem:[%s4765_s0 + $0x280] sm:$0xff] }
  0x2d   :  { %640 = vmatmul.mubr.f32.gmra.mrb[4].mxu0 %v85_v14  ;;  %2716 = vmatprep.subr.bf16.mxu1 %v2715_v10  ;;  %v432_v56 = vld [vmem:[%s4764_s1 + $0x3d8] sm:$0xff]  ;;  %v415_v59 = vld [vmem:[%s4764_s1 + $0x350] sm:$0xff]  ;;  %v150_v62 = vld [vmem:[%s4765_s0 + $0x308] sm:$0xff]  ;;  %v2697_v63 = vpack.c.bf16 %v384_v54, %v383_v53 }
  0x2e   :  { %785 = vmatmul.mubr.f32.gmra.mrb[4].mxu1 %v87_v17  ;;  %644 = vmatprep.mubr.f32.mxu0 %v102_v18  ;;  %v2727_v58 = vpack.c.bf16 %v432_v56, %v431_v55  ;;  %v416_v60 = vld [vmem:[%s4764_s1 + $0x358] sm:$0xff]  ;;  %v135_v61 = vld [vmem:[%s4765_s0 + $0x290] sm:$0xff]  ;;  %v149_v1 = vld [vmem:[%s4765_s0 + $0x300] sm:$0xff] }
  0x2f   :  { %789 = vmatprep.mubr.f32.mxu1 %v104_v20  ;;  %2686 = vmatpush3.bf16.msra.mxu0 %v2685_v19  ;;  %v152_v0 = vld [vmem:[%s4765_s0 + $0x318] sm:$0xff]  ;;  %v2729_v2 = vpack.c.bf16 %v416_v60, %v415_v59  ;;  %v401_v3 = vld [vmem:[%s4764_s1 + $0x2e0] sm:$0xff]  ;;  %v402_v4 = vld [vmem:[%s4764_s1 + $0x2e8] sm:$0xff] }
  0x30   :  { %2718 = vmatpush3.bf16.msra.mxu1 %v2717_v21  ;;  %2688 = vmatprep.subr.bf16.mxu0 %v2687_v22  ;;  %v385_v5 = vld [vmem:[%s4764_s1 + $0x260] sm:$0xff]  ;;  %v386_v6 = vld [vmem:[%s4764_s1 + $0x268] sm:$0xff]  ;;  %v151_v7 = vld [vmem:[%s4765_s0 + $0x310] sm:$0xff]  ;;  %v2699_v8 = vpack.c.bf16 %v402_v4, %v401_v3 }
  0x31   :  { %645 = vmatmul.mubr.f32.gmra.mrb[6].mxu0 %v101_v25  ;;  %2720 = vmatprep.subr.bf16.mxu1 %v2719_v26  ;;  %v433_v9 = vld [vmem:[%s4764_s1 + $0x3e0] sm:$0xff]  ;;  %v434_v10 = vld [vmem:[%s4764_s1 + $0x3e8] sm:$0xff]  ;;  %v2701_v12 = vpack.c.bf16 %v386_v6, %v385_v5  ;;  %v168_v16 = vld [vmem:[%s4765_s0 + $0x398] sm:$0xff] }
  0x32   :  { %790 = vmatmul.mubr.f32.gmra.mrb[6].mxu1 %v103_v29  ;;  %649 = vmatprep.mubr.f32.mxu0 %v118_v32  ;;  %v166_v11 = vld [vmem:[%s4765_s0 + $0x388] sm:$0xff]  ;;  %v2731_v13 = vpack.c.bf16 %v434_v10, %v433_v9  ;;  %v417_v14 = vld [vmem:[%s4764_s1 + $0x360] sm:$0xff]  ;;  %v167_v19 = vld [vmem:[%s4765_s0 + $0x390] sm:$0xff] }
  0x33   :  { %794 = vmatprep.mubr.f32.mxu1 %v120_v36  ;;  %2690 = vmatpush3.bf16.msra.mxu0 %v2689_v33  ;;  %v418_v15 = vld [vmem:[%s4764_s1 + $0x368] sm:$0xff]  ;;  %v165_v18 = vld [vmem:[%s4765_s0 + $0x380] sm:$0xff]  ;;  %v403_v21 = vld [vmem:[%s4764_s1 + $0x2f0] sm:$0xff] }
  0x34   :  { %2722 = vmatpush3.bf16.msra.mxu1 %v2721_v37  ;;  %2692 = vmatprep.subr.bf16.mxu0 %v2691_v38  ;;  %v2733_v17 = vpack.c.bf16 %v418_v15, %v417_v14  ;;  %v182_v20 = vld [vmem:[%s4765_s0 + $0x408] sm:$0xff]  ;;  %v404_v22 = vld [vmem:[%s4764_s1 + $0x2f8] sm:$0xff]  ;;  %v387_v23 = vld [vmem:[%s4764_s1 + $0x270] sm:$0xff] }
  0x35   :  { %650 = vmatmul.mubr.f32.gmra.mrb[8].mxu0 %v117_v44  ;;  %2724 = vmatprep.subr.bf16.mxu1 %v2723_v41  ;;  %v2703_v24 = vpack.c.bf16 %v404_v22, %v403_v21  ;;  %v388_v25 = vld [vmem:[%s4764_s1 + $0x278] sm:$0xff]  ;;  %v435_v26 = vld [vmem:[%s4764_s1 + $0x3f0] sm:$0xff]  ;;  %v181_v33 = vld [vmem:[%s4765_s0 + $0x400] sm:$0xff] }
  0x36   :  { %795 = vmatmul.mubr.f32.gmra.mrb[8].mxu1 %v119_v45  ;;  %654 = vmatprep.mubr.f32.mxu0 %v134_v46  ;;  %v436_v27 = vld [vmem:[%s4764_s1 + $0x3f8] sm:$0xff]  ;;  %v2705_v29 = vpack.c.bf16 %v388_v25, %v387_v23  ;;  %v419_v31 = vld [vmem:[%s4764_s1 + $0x370] sm:$0xff]  ;;  %v453_v35 = vld [vmem:[%s4764_s1 + $0x480] sm:$0xff] }
  0x37   :  { %799 = vmatprep.mubr.f32.mxu1 %v136_v47  ;;  %2694 = vmatpush3.bf16.msra.mxu0 %v2693_v48  ;;  %v184_v28 = vld [vmem:[%s4765_s0 + $0x418] sm:$0xff]  ;;  %v2735_v30 = vpack.c.bf16 %v436_v27, %v435_v26  ;;  %v183_v36 = vld [vmem:[%s4765_s0 + $0x410] sm:$0xff]  ;;  %v198_v37 = vld [vmem:[%s4765_s0 + $0x488] sm:$0xff] }
  0x38   :  { %2726 = vmatpush3.bf16.msra.mxu1 %v2725_v51  ;;  %2696 = vmatprep.subr.bf16.mxu0 %v2695_v52  ;;  %v420_v32 = vld [vmem:[%s4764_s1 + $0x378] sm:$0xff]  ;;  %v454_v38 = vld [vmem:[%s4764_s1 + $0x488] sm:$0xff]  ;;  %v485_v41 = vld [vmem:[%s4764_s1 + $0x580] sm:$0xff] }
  0x39   :  { %655 = vmatmul.mubr.f32.gmra.mrb[10].mxu0 %v133_v57  ;;  %2728 = vmatprep.subr.bf16.mxu1 %v2727_v58  ;;  %v2737_v34 = vpack.c.bf16 %v420_v32, %v419_v31  ;;  %v200_v39 = vld [vmem:[%s4765_s0 + $0x498] sm:$0xff]  ;;  %v2739_v40 = vpack.c.bf16 %v454_v38, %v453_v35  ;;  %v486_v42 = vld [vmem:[%s4764_s1 + $0x588] sm:$0xff]  ;;  %v197_v43 = vld [vmem:[%s4765_s0 + $0x480] sm:$0xff] }
  0x3a   :  { %800 = vmatmul.mubr.f32.gmra.mrb[10].mxu1 %v135_v61  ;;  %659 = vmatprep.mubr.f32.mxu0 %v150_v62  ;;  %v2771_v44 = vpack.c.bf16 %v486_v42, %v485_v41  ;;  %v199_v45 = vld [vmem:[%s4765_s0 + $0x490] sm:$0xff]  ;;  %v214_v46 = vld [vmem:[%s4765_s0 + $0x508] sm:$0xff]  ;;  %v216_v47 = vld [vmem:[%s4765_s0 + $0x518] sm:$0xff] }
  0x3b   :  { %804 = vmatprep.mubr.f32.mxu1 %v152_v0  ;;  %2698 = vmatpush3.bf16.msra.mxu0 %v2697_v63  ;;  %v213_v48 = vld [vmem:[%s4765_s0 + $0x500] sm:$0xff]  ;;  %v215_v49 = vld [vmem:[%s4765_s0 + $0x510] sm:$0xff]  ;;  %v230_v50 = vld [vmem:[%s4765_s0 + $0x588] sm:$0xff] }
  0x3c   :  { %2730 = vmatpush3.bf16.msra.mxu1 %v2729_v2  ;;  %2700 = vmatprep.subr.bf16.mxu0 %v2699_v8  ;;  %v232_v51 = vld [vmem:[%s4765_s0 + $0x598] sm:$0xff]  ;;  %v229_v52 = vld [vmem:[%s4765_s0 + $0x580] sm:$0xff]  ;;  %v231_v53 = vld [vmem:[%s4765_s0 + $0x590] sm:$0xff] }
  0x3d   :  { %660 = vmatmul.mubr.f32.gmra.mrb[12].mxu0 %v149_v1  ;;  %2732 = vmatprep.subr.bf16.mxu1 %v2731_v13  ;;  %v246_v54 = vld [vmem:[%s4765_s0 + $0x608] sm:$0xff]  ;;  %v248_v55 = vld [vmem:[%s4765_s0 + $0x618] sm:$0xff]  ;;  %v245_v56 = vld [vmem:[%s4765_s0 + $0x600] sm:$0xff] }
  0x3e   :  { %805 = vmatmul.mubr.f32.gmra.mrb[12].mxu1 %v151_v7  ;;  %664 = vmatprep.mubr.f32.mxu0 %v166_v11  ;;  %v247_v57 = vld [vmem:[%s4765_s0 + $0x610] sm:$0xff]  ;;  %v262_v58 = vld [vmem:[%s4765_s0 + $0x688] sm:$0xff]  ;;  %v264_v59 = vld [vmem:[%s4765_s0 + $0x698] sm:$0xff] }
  0x3f   :  { %809 = vmatprep.mubr.f32.mxu1 %v168_v16  ;;  %2702 = vmatpush3.bf16.msra.mxu0 %v2701_v12  ;;  %v261_v60 = vld [vmem:[%s4765_s0 + $0x680] sm:$0xff]  ;;  %v263_v61 = vld [vmem:[%s4765_s0 + $0x690] sm:$0xff]  ;;  %v278_v62 = vld [vmem:[%s4765_s0 + $0x708] sm:$0xff] }
  0x40   :  { %2734 = vmatpush3.bf16.msra.mxu1 %v2733_v17  ;;  %2704 = vmatprep.subr.bf16.mxu0 %v2703_v24  ;;  %v280_v63 = vld [vmem:[%s4765_s0 + $0x718] sm:$0xff]  ;;  %v277_v0 = vld [vmem:[%s4765_s0 + $0x700] sm:$0xff]  ;;  %v279_v1 = vld [vmem:[%s4765_s0 + $0x710] sm:$0xff] }
  0x41   :  { %665 = vmatmul.mubr.f32.gmra.mrb[14].mxu0 %v165_v18  ;;  %2736 = vmatprep.subr.bf16.mxu1 %v2735_v30  ;;  %v294_v2 = vld [vmem:[%s4765_s0 + $0x788] sm:$0xff]  ;;  %v296_v3 = vld [vmem:[%s4765_s0 + $0x798] sm:$0xff]  ;;  %v293_v4 = vld [vmem:[%s4765_s0 + $0x780] sm:$0xff] }
  0x42   :  { %810 = vmatmul.mubr.f32.gmra.mrb[14].mxu1 %v167_v19  ;;  %669 = vmatprep.mubr.f32.mxu0 %v182_v20  ;;  %v295_v5 = vld [vmem:[%s4765_s0 + $0x790] sm:$0xff]  ;;  %v58_v6 = vld [vmem:[%s4765_s0 + $0x28] sm:$0xff]  ;;  %v437_v7 = vld [vmem:[%s4764_s1 + $0x400] sm:$0xff] }
  0x43   :  { %814 = vmatprep.mubr.f32.mxu1 %v184_v28  ;;  %2706 = vmatpush3.bf16.msra.mxu0 %v2705_v29  ;;  %v438_v8 = vld [vmem:[%s4764_s1 + $0x408] sm:$0xff]  ;;  %v60_v9 = vld [vmem:[%s4765_s0 + $0x38] sm:$0xff]  ;;  %v469_v10 = vld [vmem:[%s4764_s1 + $0x500] sm:$0xff] }
  0x44   :  { %2738 = vmatpush3.bf16.msra.mxu1 %v2737_v34  ;;  %2740 = vmatprep.subr.bf16.mxu0 %v2739_v40  ;;  %v470_v11 = vld [vmem:[%s4764_s1 + $0x508] sm:$0xff]  ;;  %v455_v12 = vld [vmem:[%s4764_s1 + $0x490] sm:$0xff]  ;;  %v456_v13 = vld [vmem:[%s4764_s1 + $0x498] sm:$0xff]  ;;  %v2741_v15 = vpack.c.bf16 %v438_v8, %v437_v7 }
  0x45   :  { %670 = vmatmul.mubr.f32.gmra.mrb[16].mxu0 %v181_v33  ;;  %2772 = vmatprep.subr.bf16.mxu1 %v2771_v44  ;;  %v57_v14 = vld [vmem:[%s4765_s0 + $0x20] sm:$0xff]  ;;  %v487_v16 = vld [vmem:[%s4764_s1 + $0x590] sm:$0xff]  ;;  %v488_v17 = vld [vmem:[%s4764_s1 + $0x598] sm:$0xff]  ;;  %v2773_v20 = vpack.c.bf16 %v470_v11, %v469_v10  ;;  %v2743_v22 = vpack.c.bf16 %v456_v13, %v455_v12 }
  0x46   :  { %815 = vmatmul.mubr.f32.gmra.mrb[16].mxu1 %v183_v36  ;;  %674 = vmatprep.mubr.f32.mxu0 %v198_v37  ;;  %v59_v18 = vld [vmem:[%s4765_s0 + $0x30] sm:$0xff]  ;;  %v74_v19 = vld [vmem:[%s4765_s0 + $0xa8] sm:$0xff]  ;;  %v76_v21 = vld [vmem:[%s4765_s0 + $0xb8] sm:$0xff]  ;;  %v2775_v26 = vpack.c.bf16 %v488_v17, %v487_v16 }
  0x47   :  { %819 = vmatprep.mubr.f32.mxu1 %v200_v39  ;;  %v439_v23 = vld [vmem:[%s4764_s1 + $0x410] sm:$0xff]  ;;  %v440_v24 = vld [vmem:[%s4764_s1 + $0x418] sm:$0xff]  ;;  %v457_v28 = vld [vmem:[%s4764_s1 + $0x4a0] sm:$0xff] }
  0x48   :  { %v471_v25 = vld [vmem:[%s4764_s1 + $0x510] sm:$0xff]  ;;  %v472_v27 = vld [vmem:[%s4764_s1 + $0x518] sm:$0xff]  ;;  %v458_v29 = vld [vmem:[%s4764_s1 + $0x4a8] sm:$0xff]  ;;  %v2745_v36 = vpack.c.bf16 %v440_v24, %v439_v23 }
  0x49   :  { %675 = vmatmul.mubr.f32.gmra.mrb[18].mxu0 %v197_v43  ;;  %v73_v30 = vld [vmem:[%s4765_s0 + $0xa0] sm:$0xff]  ;;  %v490_v32 = vld [vmem:[%s4764_s1 + $0x5a8] sm:$0xff]  ;;  %v75_v33 = vld [vmem:[%s4765_s0 + $0xb0] sm:$0xff]  ;;  %v2777_v37 = vpack.c.bf16 %v472_v27, %v471_v25  ;;  %v2747_v38 = vpack.c.bf16 %v458_v29, %v457_v28 }
  0x4a   :  { %820 = vmatmul.mubr.f32.gmra.mrb[18].mxu1 %v199_v45  ;;  %679 = vmatprep.mubr.f32.mxu0 %v214_v46  ;;  %v489_v31 = vld [vmem:[%s4764_s1 + $0x5a0] sm:$0xff]  ;;  %v90_v34 = vld [vmem:[%s4765_s0 + $0x128] sm:$0xff]  ;;  %v92_v35 = vld [vmem:[%s4765_s0 + $0x138] sm:$0xff] }
  0x4b   :  { %824 = vmatprep.mubr.f32.mxu1 %v216_v47  ;;  %v441_v39 = vld [vmem:[%s4764_s1 + $0x420] sm:$0xff]  ;;  %v442_v40 = vld [vmem:[%s4764_s1 + $0x428] sm:$0xff]  ;;  %v2779_v42 = vpack.c.bf16 %v490_v32, %v489_v31  ;;  %v459_v44 = vld [vmem:[%s4764_s1 + $0x4b0] sm:$0xff] }
  0x4c   :  { %v473_v41 = vld [vmem:[%s4764_s1 + $0x520] sm:$0xff]  ;;  %v474_v43 = vld [vmem:[%s4764_s1 + $0x528] sm:$0xff]  ;;  %v460_v45 = vld [vmem:[%s4764_s1 + $0x4b8] sm:$0xff] }
  0x4d   :  { %680 = vmatmul.mubr.f32.gmra.mrb[20].mxu0 %v213_v48  ;;  %v89_v46 = vld [vmem:[%s4765_s0 + $0x120] sm:$0xff]  ;;  %v491_v47 = vld [vmem:[%s4764_s1 + $0x5b0] sm:$0xff]  ;;  %v492_v48 = vld [vmem:[%s4764_s1 + $0x5b8] sm:$0xff] }
  0x4e   :  { %825 = vmatmul.mubr.f32.gmra.mrb[20].mxu1 %v215_v49  ;;  %684 = vmatprep.mubr.f32.mxu0 %v230_v50  ;;  %v91_v49 = vld [vmem:[%s4765_s0 + $0x130] sm:$0xff]  ;;  %v106_v50 = vld [vmem:[%s4765_s0 + $0x1a8] sm:$0xff]  ;;  %v445_v7 = vld [vmem:[%s4764_s1 + $0x440] sm:$0xff] }
  0x4f   :  { %829 = vmatprep.mubr.f32.mxu1 %v232_v51  ;;  %v108_v51 = vld [vmem:[%s4765_s0 + $0x1b8] sm:$0xff]  ;;  %v446_v8 = vld [vmem:[%s4764_s1 + $0x448] sm:$0xff]  ;;  %v463_v12 = vld [vmem:[%s4764_s1 + $0x4d0] sm:$0xff] }
  0x50   :  { %v478_v11 = vld [vmem:[%s4764_s1 + $0x548] sm:$0xff]  ;;  %v464_v13 = vld [vmem:[%s4764_s1 + $0x4d8] sm:$0xff]  ;;  %v123_v17 = vld [vmem:[%s4765_s0 + $0x230] sm:$0xff] }
  0x51   :  { %685 = vmatmul.mubr.f32.gmra.mrb[22].mxu0 %v229_v52  ;;  %v2749_v52 = vpack.c.bf16 %v442_v40, %v441_v39  ;;  %v496_v16 = vld [vmem:[%s4764_s1 + $0x5d8] sm:$0xff]  ;;  %v447_v23 = vld [vmem:[%s4764_s1 + $0x450] sm:$0xff]  ;;  %v465_v28 = vld [vmem:[%s4764_s1 + $0x4e0] sm:$0xff] }
  0x52   :  { %830 = vmatmul.mubr.f32.gmra.mrb[22].mxu1 %v231_v53  ;;  %689 = vmatprep.mubr.f32.mxu0 %v246_v54  ;;  %v2781_v53 = vpack.c.bf16 %v474_v43, %v473_v41  ;;  %v2751_v54 = vpack.c.bf16 %v460_v45, %v459_v44  ;;  %v448_v24 = vld [vmem:[%s4764_s1 + $0x458] sm:$0xff]  ;;  %v479_v25 = vld [vmem:[%s4764_s1 + $0x550] sm:$0xff]  ;;  %v466_v29 = vld [vmem:[%s4764_s1 + $0x4e8] sm:$0xff] }
  0x53   :  { %834 = vmatprep.mubr.f32.mxu1 %v248_v55  ;;  %v443_v55 = vld [vmem:[%s4764_s1 + $0x430] sm:$0xff]  ;;  %v480_v27 = vld [vmem:[%s4764_s1 + $0x558] sm:$0xff]  ;;  %v497_v31 = vld [vmem:[%s4764_s1 + $0x5e0] sm:$0xff] }
  0x54   :  { %v498_v32 = vld [vmem:[%s4764_s1 + $0x5e8] sm:$0xff]  ;;  %v449_v39 = vld [vmem:[%s4764_s1 + $0x460] sm:$0xff]  ;;  %v467_v44 = vld [vmem:[%s4764_s1 + $0x4f0] sm:$0xff] }
  0x55   :  { %690 = vmatmul.mubr.f32.gmra.mrb[24].mxu0 %v245_v56  ;;  %v444_v56 = vld [vmem:[%s4764_s1 + $0x438] sm:$0xff]  ;;  %v450_v40 = vld [vmem:[%s4764_s1 + $0x468] sm:$0xff]  ;;  %v481_v41 = vld [vmem:[%s4764_s1 + $0x560] sm:$0xff] }
  0x56   :  { %835 = vmatmul.mubr.f32.gmra.mrb[24].mxu1 %v247_v57  ;;  %694 = vmatprep.mubr.f32.mxu0 %v262_v58  ;;  %v475_v57 = vld [vmem:[%s4764_s1 + $0x530] sm:$0xff]  ;;  %v2783_v58 = vpack.c.bf16 %v492_v48, %v491_v47  ;;  %v482_v43 = vld [vmem:[%s4764_s1 + $0x568] sm:$0xff]  ;;  %v468_v45 = vld [vmem:[%s4764_s1 + $0x4f8] sm:$0xff] }
  0x57   :  { %839 = vmatprep.mubr.f32.mxu1 %v264_v59  ;;  %v476_v59 = vld [vmem:[%s4764_s1 + $0x538] sm:$0xff]  ;;  %v499_v47 = vld [vmem:[%s4764_s1 + $0x5f0] sm:$0xff] }
  0x58   :  { %v500_v48 = vld [vmem:[%s4764_s1 + $0x5f8] sm:$0xff] }
  0x59   :  { %695 = vmatmul.mubr.f32.gmra.mrb[26].mxu0 %v261_v60  ;;  %v461_v60 = vld [vmem:[%s4764_s1 + $0x4c0] sm:$0xff] }
  0x5a   :  { %840 = vmatmul.mubr.f32.gmra.mrb[26].mxu1 %v263_v61  ;;  %699 = vmatprep.mubr.f32.mxu0 %v278_v62  ;;  %v462_v61 = vld [vmem:[%s4764_s1 + $0x4c8] sm:$0xff]  ;;  %v105_v62 = vld [vmem:[%s4765_s0 + $0x1a0] sm:$0xff] }
  0x5b   :  { %844 = vmatprep.mubr.f32.mxu1 %v280_v63  ;;  %v493_v63 = vld [vmem:[%s4764_s1 + $0x5c0] sm:$0xff] }
  0x5d   :  { %700 = vmatmul.mubr.f32.gmra.mrb[28].mxu0 %v277_v0  ;;  %v494_v0 = vld [vmem:[%s4764_s1 + $0x5c8] sm:$0xff] }
  0x5e   :  { %845 = vmatmul.mubr.f32.gmra.mrb[28].mxu1 %v279_v1  ;;  %704 = vmatprep.mubr.f32.mxu0 %v294_v2  ;;  %v107_v1 = vld [vmem:[%s4765_s0 + $0x1b0] sm:$0xff]  ;;  %v122_v2 = vld [vmem:[%s4765_s0 + $0x228] sm:$0xff]  ;;  %v2787_v10 = vpack.c.bf16 %v494_v0, %v493_v63  ;;  %v549_v63 = vld [vmem:[%s4764_s1 + $0x780] sm:$0xff] }
  0x5f   :  { %849 = vmatprep.mubr.f32.mxu1 %v296_v3  ;;  %v124_v3 = vld [vmem:[%s4765_s0 + $0x238] sm:$0xff]  ;;  %v550_v0 = vld [vmem:[%s4764_s1 + $0x788] sm:$0xff] }
  0x61   :  { %705 = vmatmul.mubr.f32.gmra.mrb[30].mxu0 %v293_v4  ;;  %v2753_v4 = vpack.c.bf16 %v444_v56, %v443_v55  ;;  %v451_v55 = vld [vmem:[%s4764_s1 + $0x470] sm:$0xff]  ;;  %v452_v56 = vld [vmem:[%s4764_s1 + $0x478] sm:$0xff] }
  0x62   :  { %850 = vmatmul.mubr.f32.gmra.mrb[30].mxu1 %v295_v5  ;;  %919 = vmatprep.mubr.f32.mxu0 %v58_v6  ;;  %v2785_v5 = vpack.c.bf16 %v476_v59, %v475_v57  ;;  %v2755_v6 = vpack.c.bf16 %v462_v61, %v461_v60  ;;  %v483_v57 = vld [vmem:[%s4764_s1 + $0x570] sm:$0xff]  ;;  %v484_v59 = vld [vmem:[%s4764_s1 + $0x578] sm:$0xff]  ;;  %v517_v60 = vld [vmem:[%s4764_s1 + $0x680] sm:$0xff] }
  0x63   :  { %1064 = vmatprep.mubr.f32.mxu1 %v60_v9  ;;  %v477_v9 = vld [vmem:[%s4764_s1 + $0x540] sm:$0xff]  ;;  %v518_v61 = vld [vmem:[%s4764_s1 + $0x688] sm:$0xff] }
  0x65   :  { %920 = vmatmul.mubr.f32.vlgmr.msra.gmra.mrb[32].mxu0 %v57_v14  ;;  %v121_v14 = vld [vmem:[%s4765_s0 + $0x220] sm:$0xff] }
  0x66   :  { %2742 = vmatpush3.bf16.msra.mxu0 %v2741_v15  ;;  %1065 = vmatmul.mubr.f32.vlgmr.msra.gmra.mrb[32].mxu1 %v59_v18  ;;  %v495_v15 = vld [vmem:[%s4764_s1 + $0x5d0] sm:$0xff]  ;;  %v138_v18 = vld [vmem:[%s4765_s0 + $0x2a8] sm:$0xff] }
  0x67   :  { %924 = vmatprep.mubr.f32.mxu0 %v74_v19  ;;  %2774 = vmatpush3.bf16.msra.mxu1 %v2773_v20  ;;  %v140_v19 = vld [vmem:[%s4765_s0 + $0x2b8] sm:$0xff]  ;;  %v2757_v20 = vpack.c.bf16 %v446_v8, %v445_v7  ;;  %v2835_v7 = vpack.c.bf16 %v550_v0, %v549_v63  ;;  %v185_v8 = vld [vmem:[%s4765_s0 + $0x420] sm:$0xff]  ;;  %v554_v0 = vld [vmem:[%s4764_s1 + $0x7a8] sm:$0xff] }
  0x68   :  { %1069 = vmatprep.mubr.f32.mxu1 %v76_v21  ;;  %2744 = vmatprep.subr.bf16.mxu0 %v2743_v22  ;;  %v2789_v21 = vpack.c.bf16 %v478_v11, %v477_v9  ;;  %v2759_v22 = vpack.c.bf16 %v464_v13, %v463_v12  ;;  %v187_v9 = vld [vmem:[%s4765_s0 + $0x430] sm:$0xff]  ;;  %v204_v11 = vld [vmem:[%s4765_s0 + $0x4b8] sm:$0xff]  ;;  %v201_v12 = vld [vmem:[%s4765_s0 + $0x4a0] sm:$0xff] }
  0x69   :  { %925 = vmatmul.mubr.f32.gmra.mrb[34].mxu0 %v73_v30  ;;  %2776 = vmatprep.subr.bf16.mxu1 %v2775_v26  ;;  %v2791_v26 = vpack.c.bf16 %v496_v16, %v495_v15  ;;  %v137_v30 = vld [vmem:[%s4765_s0 + $0x2a0] sm:$0xff]  ;;  %v203_v13 = vld [vmem:[%s4765_s0 + $0x4b0] sm:$0xff]  ;;  %v220_v15 = vld [vmem:[%s4765_s0 + $0x538] sm:$0xff] }
  0x6a   :  { %1070 = vmatmul.mubr.f32.gmra.mrb[34].mxu1 %v75_v33  ;;  %929 = vmatprep.mubr.f32.mxu0 %v90_v34  ;;  %v139_v33 = vld [vmem:[%s4765_s0 + $0x2b0] sm:$0xff]  ;;  %v154_v34 = vld [vmem:[%s4765_s0 + $0x328] sm:$0xff]  ;;  %v217_v16 = vld [vmem:[%s4765_s0 + $0x520] sm:$0xff] }
  0x6b   :  { %1074 = vmatprep.mubr.f32.mxu1 %v92_v35  ;;  %2746 = vmatpush3.bf16.msra.mxu0 %v2745_v36  ;;  %v156_v35 = vld [vmem:[%s4765_s0 + $0x338] sm:$0xff]  ;;  %v2761_v36 = vpack.c.bf16 %v448_v24, %v447_v23  ;;  %v249_v24 = vld [vmem:[%s4765_s0 + $0x620] sm:$0xff] }
  0x6c   :  { %2778 = vmatpush3.bf16.msra.mxu1 %v2777_v37  ;;  %2748 = vmatprep.subr.bf16.mxu0 %v2747_v38  ;;  %v2793_v37 = vpack.c.bf16 %v480_v27, %v479_v25  ;;  %v2763_v38 = vpack.c.bf16 %v466_v29, %v465_v28  ;;  %v252_v23 = vld [vmem:[%s4765_s0 + $0x638] sm:$0xff]  ;;  %v251_v25 = vld [vmem:[%s4765_s0 + $0x630] sm:$0xff]  ;;  %v265_v28 = vld [vmem:[%s4765_s0 + $0x6a0] sm:$0xff] }
  0x6d   :  { %930 = vmatmul.mubr.f32.gmra.mrb[36].mxu0 %v89_v46  ;;  %2780 = vmatprep.subr.bf16.mxu1 %v2779_v42  ;;  %v2795_v42 = vpack.c.bf16 %v498_v32, %v497_v31  ;;  %v153_v46 = vld [vmem:[%s4765_s0 + $0x320] sm:$0xff]  ;;  %v268_v27 = vld [vmem:[%s4765_s0 + $0x6b8] sm:$0xff]  ;;  %v267_v29 = vld [vmem:[%s4765_s0 + $0x6b0] sm:$0xff] }
  0x6e   :  { %1075 = vmatmul.mubr.f32.gmra.mrb[36].mxu1 %v91_v49  ;;  %934 = vmatprep.mubr.f32.mxu0 %v106_v50  ;;  %v155_v49 = vld [vmem:[%s4765_s0 + $0x330] sm:$0xff]  ;;  %v170_v50 = vld [vmem:[%s4765_s0 + $0x3a8] sm:$0xff]  ;;  %v284_v31 = vld [vmem:[%s4765_s0 + $0x738] sm:$0xff] }
  0x6f   :  { %1079 = vmatprep.mubr.f32.mxu1 %v108_v51  ;;  %2750 = vmatpush3.bf16.msra.mxu0 %v2749_v52  ;;  %v172_v51 = vld [vmem:[%s4765_s0 + $0x3b8] sm:$0xff]  ;;  %v2765_v52 = vpack.c.bf16 %v450_v40, %v449_v39  ;;  %v281_v32 = vld [vmem:[%s4765_s0 + $0x720] sm:$0xff]  ;;  %v502_v40 = vld [vmem:[%s4764_s1 + $0x608] sm:$0xff] }
  0x70   :  { %2782 = vmatpush3.bf16.msra.mxu1 %v2781_v53  ;;  %2752 = vmatprep.subr.bf16.mxu0 %v2751_v54  ;;  %v2797_v53 = vpack.c.bf16 %v482_v43, %v481_v41  ;;  %v2767_v54 = vpack.c.bf16 %v468_v45, %v467_v44  ;;  %v501_v39 = vld [vmem:[%s4764_s1 + $0x600] sm:$0xff]  ;;  %v64_v41 = vld [vmem:[%s4765_s0 + $0x58] sm:$0xff]  ;;  %v534_v43 = vld [vmem:[%s4764_s1 + $0x708] sm:$0xff] }
  0x71   :  { %935 = vmatmul.mubr.f32.gmra.mrb[38].mxu0 %v105_v62  ;;  %2784 = vmatprep.subr.bf16.mxu1 %v2783_v58  ;;  %v2799_v58 = vpack.c.bf16 %v500_v48, %v499_v47  ;;  %v169_v62 = vld [vmem:[%s4765_s0 + $0x3a0] sm:$0xff]  ;;  %v519_v44 = vld [vmem:[%s4764_s1 + $0x690] sm:$0xff]  ;;  %v520_v45 = vld [vmem:[%s4764_s1 + $0x698] sm:$0xff]  ;;  %v2805_v47 = vpack.c.bf16 %v502_v40, %v501_v39 }
  0x72   :  { %1080 = vmatmul.mubr.f32.gmra.mrb[38].mxu1 %v107_v1  ;;  %939 = vmatprep.mubr.f32.mxu0 %v122_v2  ;;  %v171_v1 = vld [vmem:[%s4765_s0 + $0x3b0] sm:$0xff]  ;;  %v186_v2 = vld [vmem:[%s4765_s0 + $0x428] sm:$0xff]  ;;  %v553_v63 = vld [vmem:[%s4764_s1 + $0x7a0] sm:$0xff] }
  0x73   :  { %1084 = vmatprep.mubr.f32.mxu1 %v124_v3  ;;  %2754 = vmatpush3.bf16.msra.mxu0 %v2753_v4  ;;  %v2769_v3 = vpack.c.bf16 %v452_v56, %v451_v55  ;;  %v188_v4 = vld [vmem:[%s4765_s0 + $0x438] sm:$0xff]  ;;  %v551_v48 = vld [vmem:[%s4764_s1 + $0x790] sm:$0xff]  ;;  %v509_v39 = vld [vmem:[%s4764_s1 + $0x640] sm:$0xff] }
  0x74   :  { %2786 = vmatpush3.bf16.msra.mxu1 %v2785_v5  ;;  %2756 = vmatprep.subr.bf16.mxu0 %v2755_v6  ;;  %v2801_v5 = vpack.c.bf16 %v484_v59, %v483_v57  ;;  %v2803_v6 = vpack.c.bf16 %v518_v61, %v517_v60  ;;  %v503_v55 = vld [vmem:[%s4764_s1 + $0x610] sm:$0xff]  ;;  %v504_v56 = vld [vmem:[%s4764_s1 + $0x618] sm:$0xff]  ;;  %v521_v60 = vld [vmem:[%s4764_s1 + $0x6a0] sm:$0xff] }
  0x75   :  { %940 = vmatmul.mubr.f32.gmra.mrb[40].mxu0 %v121_v14  ;;  %2788 = vmatprep.subr.bf16.mxu1 %v2787_v10  ;;  %v202_v10 = vld [vmem:[%s4765_s0 + $0x4a8] sm:$0xff]  ;;  %v535_v57 = vld [vmem:[%s4764_s1 + $0x710] sm:$0xff]  ;;  %v536_v59 = vld [vmem:[%s4764_s1 + $0x718] sm:$0xff] }
  0x76   :  { %1085 = vmatmul.mubr.f32.gmra.mrb[40].mxu1 %v123_v17  ;;  %944 = vmatprep.mubr.f32.mxu0 %v138_v18  ;;  %v218_v14 = vld [vmem:[%s4765_s0 + $0x528] sm:$0xff]  ;;  %v219_v17 = vld [vmem:[%s4765_s0 + $0x530] sm:$0xff] }
  0x77   :  { %1089 = vmatprep.mubr.f32.mxu1 %v140_v19  ;;  %2758 = vmatpush3.bf16.msra.mxu0 %v2757_v20  ;;  %v234_v18 = vld [vmem:[%s4765_s0 + $0x5a8] sm:$0xff]  ;;  %v236_v19 = vld [vmem:[%s4765_s0 + $0x5b8] sm:$0xff]  ;;  %v233_v20 = vld [vmem:[%s4765_s0 + $0x5a0] sm:$0xff] }
  0x78   :  { %2790 = vmatpush3.bf16.msra.mxu1 %v2789_v21  ;;  %2760 = vmatprep.subr.bf16.mxu0 %v2759_v22  ;;  %v235_v21 = vld [vmem:[%s4765_s0 + $0x5b0] sm:$0xff]  ;;  %v250_v22 = vld [vmem:[%s4765_s0 + $0x628] sm:$0xff] }
  0x79   :  { %945 = vmatmul.mubr.f32.gmra.mrb[42].mxu0 %v137_v30  ;;  %2792 = vmatprep.subr.bf16.mxu1 %v2791_v26  ;;  %v266_v26 = vld [vmem:[%s4765_s0 + $0x6a8] sm:$0xff] }
  0x7a   :  { %1090 = vmatmul.mubr.f32.gmra.mrb[42].mxu1 %v139_v33  ;;  %949 = vmatprep.mubr.f32.mxu0 %v154_v34  ;;  %v282_v30 = vld [vmem:[%s4765_s0 + $0x728] sm:$0xff]  ;;  %v283_v33 = vld [vmem:[%s4765_s0 + $0x730] sm:$0xff] }
  0x7b   :  { %1094 = vmatprep.mubr.f32.mxu1 %v156_v35  ;;  %2762 = vmatpush3.bf16.msra.mxu0 %v2761_v36  ;;  %v298_v34 = vld [vmem:[%s4765_s0 + $0x7a8] sm:$0xff]  ;;  %v300_v35 = vld [vmem:[%s4765_s0 + $0x7b8] sm:$0xff]  ;;  %v297_v36 = vld [vmem:[%s4765_s0 + $0x7a0] sm:$0xff] }
  0x7c   :  { %2794 = vmatpush3.bf16.msra.mxu1 %v2793_v37  ;;  %2764 = vmatprep.subr.bf16.mxu0 %v2763_v38  ;;  %v299_v37 = vld [vmem:[%s4765_s0 + $0x7b0] sm:$0xff]  ;;  %v62_v38 = vld [vmem:[%s4765_s0 + $0x48] sm:$0xff] }
  0x7d   :  { %950 = vmatmul.mubr.f32.gmra.mrb[44].mxu0 %v153_v46  ;;  %2796 = vmatprep.subr.bf16.mxu1 %v2795_v42  ;;  %v533_v42 = vld [vmem:[%s4764_s1 + $0x700] sm:$0xff]  ;;  %v522_v61 = vld [vmem:[%s4764_s1 + $0x6a8] sm:$0xff] }
  0x7e   :  { %1095 = vmatmul.mubr.f32.gmra.mrb[44].mxu1 %v155_v49  ;;  %954 = vmatprep.mubr.f32.mxu0 %v170_v50  ;;  %v61_v46 = vld [vmem:[%s4765_s0 + $0x40] sm:$0xff]  ;;  %v552_v49 = vld [vmem:[%s4764_s1 + $0x798] sm:$0xff]  ;;  %v63_v50 = vld [vmem:[%s4765_s0 + $0x50] sm:$0xff] }
  0x7f   :  { %1099 = vmatprep.mubr.f32.mxu1 %v172_v51  ;;  %2766 = vmatpush3.bf16.msra.mxu0 %v2765_v52  ;;  %v78_v51 = vld [vmem:[%s4765_s0 + $0xc8] sm:$0xff]  ;;  %v2837_v52 = vpack.c.bf16 %v534_v43, %v533_v42 }
  0x80   :  { %2798 = vmatpush3.bf16.msra.mxu1 %v2797_v53  ;;  %2768 = vmatprep.subr.bf16.mxu0 %v2767_v54  ;;  %v80_v53 = vld [vmem:[%s4765_s0 + $0xd8] sm:$0xff]  ;;  %v2807_v54 = vpack.c.bf16 %v520_v45, %v519_v44  ;;  %v510_v40 = vld [vmem:[%s4764_s1 + $0x648] sm:$0xff]  ;;  %v527_v44 = vld [vmem:[%s4764_s1 + $0x6d0] sm:$0xff] }
  0x81   :  { %955 = vmatmul.mubr.f32.gmra.mrb[46].mxu0 %v169_v62  ;;  %2800 = vmatprep.subr.bf16.mxu1 %v2799_v58  ;;  %v2839_v58 = vpack.c.bf16 %v552_v49, %v551_v48  ;;  %v77_v62 = vld [vmem:[%s4765_s0 + $0xc0] sm:$0xff]  ;;  %v542_v43 = vld [vmem:[%s4764_s1 + $0x748] sm:$0xff]  ;;  %v528_v45 = vld [vmem:[%s4764_s1 + $0x6d8] sm:$0xff] }
  0x82   :  { %1100 = vmatmul.mubr.f32.gmra.mrb[46].mxu1 %v171_v1  ;;  %959 = vmatprep.mubr.f32.mxu0 %v186_v2  ;;  %v79_v1 = vld [vmem:[%s4765_s0 + $0xd0] sm:$0xff]  ;;  %v94_v2 = vld [vmem:[%s4765_s0 + $0x148] sm:$0xff]  ;;  %v560_v48 = vld [vmem:[%s4764_s1 + $0x7d8] sm:$0xff] }
  0x83   :  { %1104 = vmatprep.mubr.f32.mxu1 %v188_v4  ;;  %2770 = vmatpush3.bf16.msra.mxu0 %v2769_v3  ;;  %v96_v3 = vld [vmem:[%s4765_s0 + $0x158] sm:$0xff]  ;;  %v2809_v4 = vpack.c.bf16 %v504_v56, %v503_v55  ;;  %v127_v49 = vld [vmem:[%s4765_s0 + $0x250] sm:$0xff] }
  0x84   :  { %2802 = vmatpush3.bf16.msra.mxu1 %v2801_v5  ;;  %2804 = vmatprep.subr.bf16.mxu0 %v2803_v6  ;;  %v2841_v5 = vpack.c.bf16 %v536_v59, %v535_v57  ;;  %v2811_v6 = vpack.c.bf16 %v522_v61, %v521_v60  ;;  %v511_v55 = vld [vmem:[%s4764_s1 + $0x650] sm:$0xff]  ;;  %v512_v56 = vld [vmem:[%s4764_s1 + $0x658] sm:$0xff]  ;;  %v529_v60 = vld [vmem:[%s4764_s1 + $0x6e0] sm:$0xff] }
  0x85   :  { %960 = vmatmul.mubr.f32.gmra.mrb[48].mxu0 %v185_v8  ;;  %2836 = vmatprep.subr.bf16.mxu1 %v2835_v7  ;;  %v505_v7 = vld [vmem:[%s4764_s1 + $0x620] sm:$0xff]  ;;  %v506_v8 = vld [vmem:[%s4764_s1 + $0x628] sm:$0xff]  ;;  %v543_v57 = vld [vmem:[%s4764_s1 + $0x750] sm:$0xff] }
  0x86   :  { %1105 = vmatmul.mubr.f32.gmra.mrb[48].mxu1 %v187_v9  ;;  %964 = vmatprep.mubr.f32.mxu0 %v202_v10  ;;  %v537_v9 = vld [vmem:[%s4764_s1 + $0x720] sm:$0xff]  ;;  %v2843_v10 = vpack.c.bf16 %v554_v0, %v553_v63  ;;  %v544_v59 = vld [vmem:[%s4764_s1 + $0x758] sm:$0xff]  ;;  %v530_v61 = vld [vmem:[%s4764_s1 + $0x6e8] sm:$0xff] }
  0x87   :  { %1109 = vmatprep.mubr.f32.mxu1 %v204_v11  ;;  %v538_v11 = vld [vmem:[%s4764_s1 + $0x728] sm:$0xff]  ;;  %v561_v63 = vld [vmem:[%s4764_s1 + $0x7e0] sm:$0xff] }
  0x88   :  { %v562_v0 = vld [vmem:[%s4764_s1 + $0x7e8] sm:$0xff] }
  0x89   :  { %965 = vmatmul.mubr.f32.gmra.mrb[50].mxu0 %v201_v12  ;;  %v523_v12 = vld [vmem:[%s4764_s1 + $0x6b0] sm:$0xff] }
  0x8a   :  { %1110 = vmatmul.mubr.f32.gmra.mrb[50].mxu1 %v203_v13  ;;  %969 = vmatprep.mubr.f32.mxu0 %v218_v14  ;;  %v524_v13 = vld [vmem:[%s4764_s1 + $0x6b8] sm:$0xff]  ;;  %v93_v14 = vld [vmem:[%s4765_s0 + $0x140] sm:$0xff] }
  0x8b   :  { %1114 = vmatprep.mubr.f32.mxu1 %v220_v15  ;;  %v555_v15 = vld [vmem:[%s4764_s1 + $0x7b0] sm:$0xff] }
  0x8d   :  { %970 = vmatmul.mubr.f32.gmra.mrb[52].mxu0 %v217_v16  ;;  %v556_v16 = vld [vmem:[%s4764_s1 + $0x7b8] sm:$0xff] }
  0x8e   :  { %1115 = vmatmul.mubr.f32.gmra.mrb[52].mxu1 %v219_v17  ;;  %974 = vmatprep.mubr.f32.mxu0 %v234_v18  ;;  %v95_v17 = vld [vmem:[%s4765_s0 + $0x150] sm:$0xff]  ;;  %v110_v18 = vld [vmem:[%s4765_s0 + $0x1c8] sm:$0xff] }
  0x8f   :  { %1119 = vmatprep.mubr.f32.mxu1 %v236_v19  ;;  %v112_v19 = vld [vmem:[%s4765_s0 + $0x1d8] sm:$0xff] }
  0x91   :  { %975 = vmatmul.mubr.f32.gmra.mrb[54].mxu0 %v233_v20  ;;  %v2813_v20 = vpack.c.bf16 %v506_v8, %v505_v7  ;;  %v513_v7 = vld [vmem:[%s4764_s1 + $0x660] sm:$0xff]  ;;  %v514_v8 = vld [vmem:[%s4764_s1 + $0x668] sm:$0xff] }
  0x92   :  { %1120 = vmatmul.mubr.f32.gmra.mrb[54].mxu1 %v235_v21  ;;  %979 = vmatprep.mubr.f32.mxu0 %v250_v22  ;;  %v2845_v21 = vpack.c.bf16 %v538_v11, %v537_v9  ;;  %v2815_v22 = vpack.c.bf16 %v524_v13, %v523_v12  ;;  %v545_v9 = vld [vmem:[%s4764_s1 + $0x760] sm:$0xff]  ;;  %v546_v11 = vld [vmem:[%s4764_s1 + $0x768] sm:$0xff]  ;;  %v531_v12 = vld [vmem:[%s4764_s1 + $0x6f0] sm:$0xff] }
  0x93   :  { %1124 = vmatprep.mubr.f32.mxu1 %v252_v23  ;;  %v507_v23 = vld [vmem:[%s4764_s1 + $0x630] sm:$0xff]  ;;  %v532_v13 = vld [vmem:[%s4764_s1 + $0x6f8] sm:$0xff] }
  0x95   :  { %980 = vmatmul.mubr.f32.gmra.mrb[56].mxu0 %v249_v24  ;;  %v508_v24 = vld [vmem:[%s4764_s1 + $0x638] sm:$0xff] }
  0x96   :  { %1125 = vmatmul.mubr.f32.gmra.mrb[56].mxu1 %v251_v25  ;;  %984 = vmatprep.mubr.f32.mxu0 %v266_v26  ;;  %v539_v25 = vld [vmem:[%s4764_s1 + $0x730] sm:$0xff]  ;;  %v2847_v26 = vpack.c.bf16 %v556_v16, %v555_v15  ;;  %v564_v16 = vld [vmem:[%s4764_s1 + $0x7f8] sm:$0xff] }
  0x97   :  { %1129 = vmatprep.mubr.f32.mxu1 %v268_v27  ;;  %v540_v27 = vld [vmem:[%s4764_s1 + $0x738] sm:$0xff]  ;;  %v563_v15 = vld [vmem:[%s4764_s1 + $0x7f0] sm:$0xff] }
  0x99   :  { %985 = vmatmul.mubr.f32.gmra.mrb[58].mxu0 %v265_v28  ;;  %v525_v28 = vld [vmem:[%s4764_s1 + $0x6c0] sm:$0xff] }
  0x9a   :  { %1130 = vmatmul.mubr.f32.gmra.mrb[58].mxu1 %v267_v29  ;;  %989 = vmatprep.mubr.f32.mxu0 %v282_v30  ;;  %v526_v29 = vld [vmem:[%s4764_s1 + $0x6c8] sm:$0xff]  ;;  %v109_v30 = vld [vmem:[%s4765_s0 + $0x1c0] sm:$0xff] }
  0x9b   :  { %1134 = vmatprep.mubr.f32.mxu1 %v284_v31  ;;  %v557_v31 = vld [vmem:[%s4764_s1 + $0x7c0] sm:$0xff] }
  0x9d   :  { %990 = vmatmul.mubr.f32.gmra.mrb[60].mxu0 %v281_v32  ;;  %v558_v32 = vld [vmem:[%s4764_s1 + $0x7c8] sm:$0xff] }
  0x9e   :  { %1135 = vmatmul.mubr.f32.gmra.mrb[60].mxu1 %v283_v33  ;;  %994 = vmatprep.mubr.f32.mxu0 %v298_v34  ;;  %v111_v33 = vld [vmem:[%s4765_s0 + $0x1d0] sm:$0xff]  ;;  %v126_v34 = vld [vmem:[%s4765_s0 + $0x248] sm:$0xff]  ;;  %v2851_v42 = vpack.c.bf16 %v558_v32, %v557_v31  ;;  %v192_v32 = vld [vmem:[%s4765_s0 + $0x458] sm:$0xff] }
  0x9f   :  { %1139 = vmatprep.mubr.f32.mxu1 %v300_v35  ;;  %v128_v35 = vld [vmem:[%s4765_s0 + $0x258] sm:$0xff] }
  0xa1   :  { %995 = vmatmul.mubr.f32.gmra.mrb[62].mxu0 %v297_v36  ;;  %v2817_v36 = vpack.c.bf16 %v508_v24, %v507_v23  ;;  %v515_v23 = vld [vmem:[%s4764_s1 + $0x670] sm:$0xff]  ;;  %v516_v24 = vld [vmem:[%s4764_s1 + $0x678] sm:$0xff] }
  0xa2   :  { %1140 = vmatmul.mubr.f32.gmra.mrb[62].mxu1 %v299_v37  ;;  %1209 = vmatprep.mubr.f32.mxu0 %v62_v38  ;;  %v2849_v37 = vpack.c.bf16 %v540_v27, %v539_v25  ;;  %v2819_v38 = vpack.c.bf16 %v526_v29, %v525_v28  ;;  %v2863_v25 = vpack.c.bf16 %v564_v16, %v563_v15  ;;  %v548_v27 = vld [vmem:[%s4764_s1 + $0x778] sm:$0xff]  ;;  %v173_v28 = vld [vmem:[%s4765_s0 + $0x3c0] sm:$0xff]  ;;  %v175_v29 = vld [vmem:[%s4765_s0 + $0x3d0] sm:$0xff] }
  0xa3   :  { %1354 = vmatprep.mubr.f32.mxu1 %v64_v41  ;;  %v541_v41 = vld [vmem:[%s4764_s1 + $0x740] sm:$0xff]  ;;  %v2833_v31 = vpack.c.bf16 %v516_v24, %v515_v23  ;;  %v115_v15 = vld [vmem:[%s4765_s0 + $0x1f0] sm:$0xff]  ;;  %v130_v16 = vld [vmem:[%s4765_s0 + $0x268] sm:$0xff] }
  0xa4   :  { %v147_v23 = vld [vmem:[%s4765_s0 + $0x2f0] sm:$0xff]  ;;  %v162_v24 = vld [vmem:[%s4765_s0 + $0x368] sm:$0xff] }
  0xa5   :  { %1210 = vmatmul.mubr.f32.vlgmr.msra.gmra.mrb[64].mxu0 %v61_v46  ;;  %v125_v46 = vld [vmem:[%s4765_s0 + $0x240] sm:$0xff] }
  0xa6   :  { %2806 = vmatpush3.bf16.msra.mxu0 %v2805_v47  ;;  %1355 = vmatmul.mubr.f32.vlgmr.msra.gmra.mrb[64].mxu1 %v63_v50  ;;  %v559_v47 = vld [vmem:[%s4764_s1 + $0x7d0] sm:$0xff]  ;;  %v142_v50 = vld [vmem:[%s4765_s0 + $0x2c8] sm:$0xff] }
  0xa7   :  { %1214 = vmatprep.mubr.f32.mxu0 %v78_v51  ;;  %2838 = vmatpush3.bf16.msra.mxu1 %v2837_v52  ;;  %v144_v51 = vld [vmem:[%s4765_s0 + $0x2d8] sm:$0xff]  ;;  %v2821_v52 = vpack.c.bf16 %v510_v40, %v509_v39  ;;  %v207_v39 = vld [vmem:[%s4765_s0 + $0x4d0] sm:$0xff]  ;;  %v222_v40 = vld [vmem:[%s4765_s0 + $0x548] sm:$0xff] }
  0xa8   :  { %1359 = vmatprep.mubr.f32.mxu1 %v80_v53  ;;  %2808 = vmatprep.subr.bf16.mxu0 %v2807_v54  ;;  %v2853_v53 = vpack.c.bf16 %v542_v43, %v541_v41  ;;  %v2823_v54 = vpack.c.bf16 %v528_v45, %v527_v44  ;;  %v224_v41 = vld [vmem:[%s4765_s0 + $0x558] sm:$0xff]  ;;  %v223_v43 = vld [vmem:[%s4765_s0 + $0x550] sm:$0xff]  ;;  %v238_v44 = vld [vmem:[%s4765_s0 + $0x5c8] sm:$0xff] }
  0xa9   :  { %1215 = vmatmul.mubr.f32.gmra.mrb[66].mxu0 %v77_v62  ;;  %2840 = vmatprep.subr.bf16.mxu1 %v2839_v58  ;;  %v2855_v58 = vpack.c.bf16 %v560_v48, %v559_v47  ;;  %v141_v62 = vld [vmem:[%s4765_s0 + $0x2c0] sm:$0xff]  ;;  %v240_v45 = vld [vmem:[%s4765_s0 + $0x5d8] sm:$0xff]  ;;  %v239_v47 = vld [vmem:[%s4765_s0 + $0x5d0] sm:$0xff] }
  0xaa   :  { %1360 = vmatmul.mubr.f32.gmra.mrb[66].mxu1 %v79_v1  ;;  %1219 = vmatprep.mubr.f32.mxu0 %v94_v2  ;;  %v143_v1 = vld [vmem:[%s4765_s0 + $0x2d0] sm:$0xff]  ;;  %v158_v2 = vld [vmem:[%s4765_s0 + $0x348] sm:$0xff] }
  0xab   :  { %1364 = vmatprep.mubr.f32.mxu1 %v96_v3  ;;  %2810 = vmatpush3.bf16.msra.mxu0 %v2809_v4  ;;  %v160_v3 = vld [vmem:[%s4765_s0 + $0x358] sm:$0xff]  ;;  %v2825_v4 = vpack.c.bf16 %v512_v56, %v511_v55  ;;  %v254_v48 = vld [vmem:[%s4765_s0 + $0x648] sm:$0xff]  ;;  %v271_v55 = vld [vmem:[%s4765_s0 + $0x6d0] sm:$0xff] }
  0xac   :  { %2842 = vmatpush3.bf16.msra.mxu1 %v2841_v5  ;;  %2812 = vmatprep.subr.bf16.mxu0 %v2811_v6  ;;  %v2857_v5 = vpack.c.bf16 %v544_v59, %v543_v57  ;;  %v2827_v6 = vpack.c.bf16 %v530_v61, %v529_v60  ;;  %v286_v56 = vld [vmem:[%s4765_s0 + $0x748] sm:$0xff]  ;;  %v288_v57 = vld [vmem:[%s4765_s0 + $0x758] sm:$0xff]  ;;  %v287_v59 = vld [vmem:[%s4765_s0 + $0x750] sm:$0xff] }
  0xad   :  { %1220 = vmatmul.mubr.f32.gmra.mrb[68].mxu0 %v93_v14  ;;  %2844 = vmatprep.subr.bf16.mxu1 %v2843_v10  ;;  %v2859_v10 = vpack.c.bf16 %v562_v0, %v561_v63  ;;  %v157_v14 = vld [vmem:[%s4765_s0 + $0x340] sm:$0xff]  ;;  %v302_v60 = vld [vmem:[%s4765_s0 + $0x7c8] sm:$0xff]  ;;  %v304_v61 = vld [vmem:[%s4765_s0 + $0x7d8] sm:$0xff] }
  0xae   :  { %1365 = vmatmul.mubr.f32.gmra.mrb[68].mxu1 %v95_v17  ;;  %1224 = vmatprep.mubr.f32.mxu0 %v110_v18  ;;  %v159_v17 = vld [vmem:[%s4765_s0 + $0x350] sm:$0xff]  ;;  %v174_v18 = vld [vmem:[%s4765_s0 + $0x3c8] sm:$0xff] }
  0xaf   :  { %1369 = vmatprep.mubr.f32.mxu1 %v112_v19  ;;  %2814 = vmatpush3.bf16.msra.mxu0 %v2813_v20  ;;  %v2829_v19 = vpack.c.bf16 %v514_v8, %v513_v7  ;;  %v176_v20 = vld [vmem:[%s4765_s0 + $0x3d8] sm:$0xff]  ;;  %v303_v63 = vld [vmem:[%s4765_s0 + $0x7d0] sm:$0xff]  ;;  %v66_v0 = vld [vmem:[%s4765_s0 + $0x68] sm:$0xff] }
  0xb0   :  { %2846 = vmatpush3.bf16.msra.mxu1 %v2845_v21  ;;  %2816 = vmatprep.subr.bf16.mxu0 %v2815_v22  ;;  %v2861_v21 = vpack.c.bf16 %v546_v11, %v545_v9  ;;  %v2831_v22 = vpack.c.bf16 %v532_v13, %v531_v12  ;;  %v83_v7 = vld [vmem:[%s4765_s0 + $0xf0] sm:$0xff]  ;;  %v98_v8 = vld [vmem:[%s4765_s0 + $0x168] sm:$0xff]  ;;  %v100_v9 = vld [vmem:[%s4765_s0 + $0x178] sm:$0xff] }
  0xb1   :  { %1225 = vmatmul.mubr.f32.gmra.mrb[70].mxu0 %v109_v30  ;;  %2848 = vmatprep.subr.bf16.mxu1 %v2847_v26  ;;  %v547_v26 = vld [vmem:[%s4764_s1 + $0x770] sm:$0xff]  ;;  %v190_v30 = vld [vmem:[%s4765_s0 + $0x448] sm:$0xff]  ;;  %v116_v13 = vld [vmem:[%s4765_s0 + $0x1f8] sm:$0xff] }
  0xb2   :  { %1370 = vmatmul.mubr.f32.gmra.mrb[70].mxu1 %v111_v33  ;;  %1229 = vmatprep.mubr.f32.mxu0 %v126_v34  ;;  %v2865_v33 = vpack.c.bf16 %v548_v27, %v547_v26  ;;  %v189_v34 = vld [vmem:[%s4765_s0 + $0x440] sm:$0xff]  ;;  %v99_v11 = vld [vmem:[%s4765_s0 + $0x170] sm:$0xff]  ;;  %v114_v12 = vld [vmem:[%s4765_s0 + $0x1e8] sm:$0xff] }
  0xb3   :  { %1374 = vmatprep.mubr.f32.mxu1 %v128_v35  ;;  %2818 = vmatpush3.bf16.msra.mxu0 %v2817_v36  ;;  %v191_v35 = vld [vmem:[%s4765_s0 + $0x450] sm:$0xff]  ;;  %v206_v36 = vld [vmem:[%s4765_s0 + $0x4c8] sm:$0xff]  ;;  %v164_v26 = vld [vmem:[%s4765_s0 + $0x378] sm:$0xff] }
  0xb4   :  { %2850 = vmatpush3.bf16.msra.mxu1 %v2849_v37  ;;  %2820 = vmatprep.subr.bf16.mxu0 %v2819_v38  ;;  %v208_v37 = vld [vmem:[%s4765_s0 + $0x4d8] sm:$0xff]  ;;  %v205_v38 = vld [vmem:[%s4765_s0 + $0x4c0] sm:$0xff] }
  0xb5   :  { %1230 = vmatmul.mubr.f32.gmra.mrb[72].mxu0 %v125_v46  ;;  %2852 = vmatprep.subr.bf16.mxu1 %v2851_v42  ;;  %v221_v42 = vld [vmem:[%s4765_s0 + $0x540] sm:$0xff] }
  0xb6   :  { %1375 = vmatmul.mubr.f32.gmra.mrb[72].mxu1 %v127_v49  ;;  %1234 = vmatprep.mubr.f32.mxu0 %v142_v50  ;;  %v237_v46 = vld [vmem:[%s4765_s0 + $0x5c0] sm:$0xff]  ;;  %v256_v49 = vld [vmem:[%s4765_s0 + $0x658] sm:$0xff] }
  0xb7   :  { %1379 = vmatprep.mubr.f32.mxu1 %v144_v51  ;;  %2822 = vmatpush3.bf16.msra.mxu0 %v2821_v52  ;;  %v253_v50 = vld [vmem:[%s4765_s0 + $0x640] sm:$0xff]  ;;  %v255_v51 = vld [vmem:[%s4765_s0 + $0x650] sm:$0xff]  ;;  %v270_v52 = vld [vmem:[%s4765_s0 + $0x6c8] sm:$0xff] }
  0xb8   :  { %2854 = vmatpush3.bf16.msra.mxu1 %v2853_v53  ;;  %2824 = vmatprep.subr.bf16.mxu0 %v2823_v54  ;;  %v272_v53 = vld [vmem:[%s4765_s0 + $0x6d8] sm:$0xff]  ;;  %v269_v54 = vld [vmem:[%s4765_s0 + $0x6c0] sm:$0xff] }
  0xb9   :  { %1235 = vmatmul.mubr.f32.gmra.mrb[74].mxu0 %v141_v62  ;;  %2856 = vmatprep.subr.bf16.mxu1 %v2855_v58  ;;  %v285_v58 = vld [vmem:[%s4765_s0 + $0x740] sm:$0xff] }
  0xba   :  { %1380 = vmatmul.mubr.f32.gmra.mrb[74].mxu1 %v143_v1  ;;  %1239 = vmatprep.mubr.f32.mxu0 %v158_v2  ;;  %v301_v62 = vld [vmem:[%s4765_s0 + $0x7c0] sm:$0xff]  ;;  %v68_v1 = vld [vmem:[%s4765_s0 + $0x78] sm:$0xff] }
  0xbb   :  { %1384 = vmatprep.mubr.f32.mxu1 %v160_v3  ;;  %2826 = vmatpush3.bf16.msra.mxu0 %v2825_v4  ;;  %v65_v2 = vld [vmem:[%s4765_s0 + $0x60] sm:$0xff]  ;;  %v67_v3 = vld [vmem:[%s4765_s0 + $0x70] sm:$0xff]  ;;  %v82_v4 = vld [vmem:[%s4765_s0 + $0xe8] sm:$0xff] }
  0xbc   :  { %2858 = vmatpush3.bf16.msra.mxu1 %v2857_v5  ;;  %2828 = vmatprep.subr.bf16.mxu0 %v2827_v6  ;;  %v84_v5 = vld [vmem:[%s4765_s0 + $0xf8] sm:$0xff]  ;;  %v81_v6 = vld [vmem:[%s4765_s0 + $0xe0] sm:$0xff] }
  0xbd   :  { %1240 = vmatmul.mubr.f32.gmra.mrb[76].mxu0 %v157_v14  ;;  %2860 = vmatprep.subr.bf16.mxu1 %v2859_v10  ;;  %v97_v10 = vld [vmem:[%s4765_s0 + $0x160] sm:$0xff] }
  0xbe   :  { %1385 = vmatmul.mubr.f32.gmra.mrb[76].mxu1 %v159_v17  ;;  %1244 = vmatprep.mubr.f32.mxu0 %v174_v18  ;;  %v113_v14 = vld [vmem:[%s4765_s0 + $0x1e0] sm:$0xff]  ;;  %v132_v17 = vld [vmem:[%s4765_s0 + $0x278] sm:$0xff] }
  0xbf   :  { %1389 = vmatprep.mubr.f32.mxu1 %v176_v20  ;;  %2830 = vmatpush3.bf16.msra.mxu0 %v2829_v19  ;;  %v129_v18 = vld [vmem:[%s4765_s0 + $0x260] sm:$0xff]  ;;  %v131_v19 = vld [vmem:[%s4765_s0 + $0x270] sm:$0xff]  ;;  %v146_v20 = vld [vmem:[%s4765_s0 + $0x2e8] sm:$0xff] }
  0xc0   :  { %2862 = vmatpush3.bf16.msra.mxu1 %v2861_v21  ;;  %2832 = vmatprep.subr.bf16.mxu0 %v2831_v22  ;;  %v148_v21 = vld [vmem:[%s4765_s0 + $0x2f8] sm:$0xff]  ;;  %v145_v22 = vld [vmem:[%s4765_s0 + $0x2e0] sm:$0xff] }
  0xc1   :  { %1245 = vmatmul.mubr.f32.gmra.mrb[78].mxu0 %v173_v28  ;;  %2864 = vmatprep.subr.bf16.mxu1 %v2863_v25 }
  0xc2   :  { %1390 = vmatmul.mubr.f32.gmra.mrb[78].mxu1 %v175_v29  ;;  %1249 = vmatprep.mubr.f32.mxu0 %v190_v30 }
  0xc3   :  { %1394 = vmatprep.mubr.f32.mxu1 %v192_v32  ;;  %2834 = vmatpush3.bf16.msra.mxu0 %v2833_v31  ;;  %v161_v31 = vld [vmem:[%s4765_s0 + $0x360] sm:$0xff] }
  0xc4   :  { %2866 = vmatpush3.bf16.msra.mxu1 %v2865_v33  ;;  %v163_v33 = vld [vmem:[%s4765_s0 + $0x370] sm:$0xff] }
  0xc5   :  { %1250 = vmatmul.mubr.f32.gmra.mrb[80].mxu0 %v189_v34  ;;  %v178_v34 = vld [vmem:[%s4765_s0 + $0x3e8] sm:$0xff] }
  0xc6   :  { %1395 = vmatmul.mubr.f32.gmra.mrb[80].mxu1 %v191_v35  ;;  %1254 = vmatprep.mubr.f32.mxu0 %v206_v36  ;;  %v180_v36 = vld [vmem:[%s4765_s0 + $0x3f8] sm:$0xff] }
  0xc7   :  { %1399 = vmatprep.mubr.f32.mxu1 %v208_v37 }
  0xc9   :  { %1255 = vmatmul.mubr.f32.gmra.mrb[82].mxu0 %v205_v38 }
  0xca   :  { %1400 = vmatmul.mubr.f32.gmra.mrb[82].mxu1 %v207_v39  ;;  %1259 = vmatprep.mubr.f32.mxu0 %v222_v40 }
  0xcb   :  { %1404 = vmatprep.mubr.f32.mxu1 %v224_v41 }
  0xcd   :  { %1260 = vmatmul.mubr.f32.gmra.mrb[84].mxu0 %v221_v42  ;;  %v177_v42 = vld [vmem:[%s4765_s0 + $0x3e0] sm:$0xff] }
  0xce   :  { %1405 = vmatmul.mubr.f32.gmra.mrb[84].mxu1 %v223_v43  ;;  %1264 = vmatprep.mubr.f32.mxu0 %v238_v44  ;;  %v179_v44 = vld [vmem:[%s4765_s0 + $0x3f0] sm:$0xff] }
  0xcf   :  { %1409 = vmatprep.mubr.f32.mxu1 %v240_v45  ;;  %v194_v45 = vld [vmem:[%s4765_s0 + $0x468] sm:$0xff] }
  0xd1   :  { %1265 = vmatmul.mubr.f32.gmra.mrb[86].mxu0 %v237_v46 }
  0xd2   :  { %1410 = vmatmul.mubr.f32.gmra.mrb[86].mxu1 %v239_v47  ;;  %1269 = vmatprep.mubr.f32.mxu0 %v254_v48  ;;  %v196_v47 = vld [vmem:[%s4765_s0 + $0x478] sm:$0xff] }
  0xd3   :  { %1414 = vmatprep.mubr.f32.mxu1 %v256_v49 }
  0xd5   :  { %1270 = vmatmul.mubr.f32.gmra.mrb[88].mxu0 %v253_v50 }
  0xd6   :  { %1415 = vmatmul.mubr.f32.gmra.mrb[88].mxu1 %v255_v51  ;;  %1274 = vmatprep.mubr.f32.mxu0 %v270_v52 }
  0xd7   :  { %1419 = vmatprep.mubr.f32.mxu1 %v272_v53  ;;  %v193_v53 = vld [vmem:[%s4765_s0 + $0x460] sm:$0xff] }
  0xd9   :  { %1275 = vmatmul.mubr.f32.gmra.mrb[90].mxu0 %v269_v54 }
  0xda   :  { %1420 = vmatmul.mubr.f32.gmra.mrb[90].mxu1 %v271_v55  ;;  %1279 = vmatprep.mubr.f32.mxu0 %v286_v56  ;;  %v195_v55 = vld [vmem:[%s4765_s0 + $0x470] sm:$0xff]  ;;  %v210_v56 = vld [vmem:[%s4765_s0 + $0x4e8] sm:$0xff] }
  0xdb   :  { %1424 = vmatprep.mubr.f32.mxu1 %v288_v57 }
  0xdd   :  { %1280 = vmatmul.mubr.f32.gmra.mrb[92].mxu0 %v285_v58  ;;  %v212_v58 = vld [vmem:[%s4765_s0 + $0x4f8] sm:$0xff] }
  0xde   :  { %1425 = vmatmul.mubr.f32.gmra.mrb[92].mxu1 %v287_v59  ;;  %1284 = vmatprep.mubr.f32.mxu0 %v302_v60 }
  0xdf   :  { %1429 = vmatprep.mubr.f32.mxu1 %v304_v61 }
  0xe1   :  { %1285 = vmatmul.mubr.f32.gmra.mrb[94].mxu0 %v301_v62 }
  0xe2   :  { %1430 = vmatmul.mubr.f32.gmra.mrb[94].mxu1 %v303_v63  ;;  %1499 = vmatprep.mubr.f32.mxu0 %v66_v0  ;;  %v209_v0 = vld [vmem:[%s4765_s0 + $0x4e0] sm:$0xff] }
  0xe3   :  { %1644 = vmatprep.mubr.f32.mxu1 %v68_v1 }
  0xe5   :  { %1500 = vmatmul.mubr.f32.vlgmr.msra.gmra.mrb[96].mxu0 %v65_v2  ;;  %v211_v2 = vld [vmem:[%s4765_s0 + $0x4f0] sm:$0xff] }
  0xe6   :  { %1645 = vmatmul.mubr.f32.vlgmr.msra.gmra.mrb[96].mxu1 %v67_v3  ;;  %1504 = vmatprep.mubr.f32.mxu0 %v82_v4  ;;  %v226_v3 = vld [vmem:[%s4765_s0 + $0x568] sm:$0xff] }
  0xe7   :  { %1649 = vmatprep.mubr.f32.mxu1 %v84_v5  ;;  %v228_v5 = vld [vmem:[%s4765_s0 + $0x578] sm:$0xff] }
  0xe9   :  { %1505 = vmatmul.mubr.f32.gmra.mrb[98].mxu0 %v81_v6 }
  0xea   :  { %1650 = vmatmul.mubr.f32.gmra.mrb[98].mxu1 %v83_v7  ;;  %1509 = vmatprep.mubr.f32.mxu0 %v98_v8 }
  0xeb   :  { %1654 = vmatprep.mubr.f32.mxu1 %v100_v9 }
  0xed   :  { %1510 = vmatmul.mubr.f32.gmra.mrb[100].mxu0 %v97_v10 }
  0xee   :  { %1655 = vmatmul.mubr.f32.gmra.mrb[100].mxu1 %v99_v11  ;;  %1514 = vmatprep.mubr.f32.mxu0 %v114_v12  ;;  %v225_v11 = vld [vmem:[%s4765_s0 + $0x560] sm:$0xff] }
  0xef   :  { %1659 = vmatprep.mubr.f32.mxu1 %v116_v13  ;;  %v227_v13 = vld [vmem:[%s4765_s0 + $0x570] sm:$0xff] }
  0xf1   :  { %1515 = vmatmul.mubr.f32.gmra.mrb[102].mxu0 %v113_v14  ;;  %v242_v14 = vld [vmem:[%s4765_s0 + $0x5e8] sm:$0xff] }
  0xf2   :  { %1660 = vmatmul.mubr.f32.gmra.mrb[102].mxu1 %v115_v15  ;;  %1519 = vmatprep.mubr.f32.mxu0 %v130_v16  ;;  %v244_v16 = vld [vmem:[%s4765_s0 + $0x5f8] sm:$0xff] }
  0xf3   :  { %1664 = vmatprep.mubr.f32.mxu1 %v132_v17 }
  0xf5   :  { %1520 = vmatmul.mubr.f32.gmra.mrb[104].mxu0 %v129_v18 }
  0xf6   :  { %1665 = vmatmul.mubr.f32.gmra.mrb[104].mxu1 %v131_v19  ;;  %1524 = vmatprep.mubr.f32.mxu0 %v146_v20 }
  0xf7   :  { %1669 = vmatprep.mubr.f32.mxu1 %v148_v21 }
  0xf8   :  { %v2003_v25 = vpop.f32.mrb[0].mxu0 }
  0xf9   :  { %v2083_v27 = vpop.f32.mrb[0].mxu1  ;;  %v2004_v28 = vpop.f32.mrb[1].mxu0  ;;  %1525 = vmatmul.mubr.f32.gmra.mrb[106].mxu0 %v145_v22  ;;  %v241_v22 = vld [vmem:[%s4765_s0 + $0x5e0] sm:$0xff] }
  0xfa   :  { %v2005_v29 = vadd.f32 %v2004_v28, %v2003_v25  ;;  %v2084_v30 = vpop.f32.mrb[1].mxu1  ;;  %1670 = vmatmul.mubr.f32.gmra.mrb[106].mxu1 %v147_v23  ;;  %1529 = vmatprep.mubr.f32.mxu0 %v162_v24  ;;  %v243_v24 = vld [vmem:[%s4765_s0 + $0x5f0] sm:$0xff]  ;;  %v258_v25 = vld [vmem:[%s4765_s0 + $0x668] sm:$0xff] }
  0xfb   :  { %v2085_v32 = vadd.f32 %v2084_v30, %v2083_v27  ;;  %1674 = vmatprep.mubr.f32.mxu1 %v164_v26  ;;  %v260_v27 = vld [vmem:[%s4765_s0 + $0x678] sm:$0xff] }
  0xfc   :  { %v2006_v35 = vpop.f32.mrb[2].mxu0 }
  0xfd   :  { %v4328_v37 = vadd.f32 %v2085_v32, %v2005_v29  ;;  %v2086_v38 = vpop.f32.mrb[2].mxu1  ;;  %v2007_v39 = vpop.f32.mrb[3].mxu0  ;;  %1530 = vmatmul.mubr.f32.gmra.mrb[108].mxu0 %v161_v31 }
  0xfe   :  { %v2008_v40 = vadd.f32 %v2007_v39, %v2006_v35  ;;  %v2087_v41 = vpop.f32.mrb[3].mxu1  ;;  %1675 = vmatmul.mubr.f32.gmra.mrb[108].mxu1 %v163_v33  ;;  %1534 = vmatprep.mubr.f32.mxu0 %v178_v34  ;;  %v257_v33 = vld [vmem:[%s4765_s0 + $0x660] sm:$0xff]  ;;  %v259_v35 = vld [vmem:[%s4765_s0 + $0x670] sm:$0xff]  ;;  %v276_v39 = vld [vmem:[%s4765_s0 + $0x6f8] sm:$0xff] }
  0xff   :  { %v2088_v43 = vadd.f32 %v2087_v41, %v2086_v38  ;;  %1679 = vmatprep.mubr.f32.mxu1 %v180_v36  ;;  %v274_v36 = vld [vmem:[%s4765_s0 + $0x6e8] sm:$0xff] }
 0x100   :  { %v2009_v46 = vpop.f32.mrb[4].mxu0 }
 0x101   :  { %v4342_v48 = vadd.f32 %v2088_v43, %v2008_v40  ;;  %v2089_v49 = vpop.f32.mrb[4].mxu1  ;;  %v2010_v50 = vpop.f32.mrb[5].mxu0  ;;  %1535 = vmatmul.mubr.f32.gmra.mrb[110].mxu0 %v177_v42 }
 0x102   :  { %v2011_v51 = vadd.f32 %v2010_v50, %v2009_v46  ;;  %v2090_v52 = vpop.f32.mrb[5].mxu1  ;;  %1680 = vmatmul.mubr.f32.gmra.mrb[110].mxu1 %v179_v44  ;;  %1539 = vmatprep.mubr.f32.mxu0 %v194_v45  ;;  %v273_v45 = vld [vmem:[%s4765_s0 + $0x6e0] sm:$0xff] }
 0x103   :  { %v2091_v54 = vadd.f32 %v2090_v52, %v2089_v49  ;;  %1684 = vmatprep.mubr.f32.mxu1 %v196_v47  ;;  %v275_v47 = vld [vmem:[%s4765_s0 + $0x6f0] sm:$0xff]  ;;  %v290_v49 = vld [vmem:[%s4765_s0 + $0x768] sm:$0xff] }
 0x104   :  { %v2012_v57 = vpop.f32.mrb[6].mxu0 }
 0x105   :  { %v4356_v59 = vadd.f32 %v2091_v54, %v2011_v51  ;;  %v2092_v60 = vpop.f32.mrb[6].mxu1  ;;  %v2013_v61 = vpop.f32.mrb[7].mxu0  ;;  %1540 = vmatmul.mubr.f32.gmra.mrb[112].mxu0 %v193_v53  ;;  %v292_v51 = vld [vmem:[%s4765_s0 + $0x778] sm:$0xff] }
 0x106   :  { %v2014_v62 = vadd.f32 %v2013_v61, %v2012_v57  ;;  %v2093_v63 = vpop.f32.mrb[7].mxu1  ;;  %1685 = vmatmul.mubr.f32.gmra.mrb[112].mxu1 %v195_v55  ;;  %1544 = vmatprep.mubr.f32.mxu0 %v210_v56  ;;  %v289_v57 = vld [vmem:[%s4765_s0 + $0x760] sm:$0xff]  ;;  %v306_v61 = vld [vmem:[%s4765_s0 + $0x7e8] sm:$0xff] }
 0x107   :  { %v2094_v1 = vadd.f32 %v2093_v63, %v2092_v60  ;;  %1689 = vmatprep.mubr.f32.mxu1 %v212_v58  ;;  %v291_v60 = vld [vmem:[%s4765_s0 + $0x770] sm:$0xff]  ;;  %v308_v63 = vld [vmem:[%s4765_s0 + $0x7f8] sm:$0xff] }
 0x108   :  { %v2015_v4 = vpop.f32.mrb[8].mxu0 }
 0x109   :  { %v4370_v6 = vadd.f32 %v2094_v1, %v2014_v62  ;;  %v2095_v7 = vpop.f32.mrb[8].mxu1  ;;  %v2016_v8 = vpop.f32.mrb[9].mxu0  ;;  %1545 = vmatmul.mubr.f32.gmra.mrb[114].mxu0 %v209_v0 }
 0x10a   :  { %v2017_v9 = vadd.f32 %v2016_v8, %v2015_v4  ;;  %v2096_v10 = vpop.f32.mrb[9].mxu1  ;;  %1690 = vmatmul.mubr.f32.gmra.mrb[114].mxu1 %v211_v2  ;;  %1549 = vmatprep.mubr.f32.mxu0 %v226_v3  ;;  %v307_v8 = vld [vmem:[%s4765_s0 + $0x7f0] sm:$0xff] }
 0x10b   :  { %v2097_v12 = vadd.f32 %v2096_v10, %v2095_v7  ;;  %1694 = vmatprep.mubr.f32.mxu1 %v228_v5  ;;  %v305_v5 = vld [vmem:[%s4765_s0 + $0x7e0] sm:$0xff] }
 0x10c   :  { %v2018_v15 = vpop.f32.mrb[10].mxu0 }
 0x10d   :  { %v4384_v17 = vadd.f32 %v2097_v12, %v2017_v9  ;;  %v2098_v18 = vpop.f32.mrb[10].mxu1  ;;  %v2019_v19 = vpop.f32.mrb[11].mxu0  ;;  %1550 = vmatmul.mubr.f32.gmra.mrb[116].mxu0 %v225_v11 }
 0x10e   :  { %v2020_v20 = vadd.f32 %v2019_v19, %v2018_v15  ;;  %v2099_v21 = vpop.f32.mrb[11].mxu1  ;;  %1695 = vmatmul.mubr.f32.gmra.mrb[116].mxu1 %v227_v13  ;;  %1554 = vmatprep.mubr.f32.mxu0 %v242_v14 }
 0x10f   :  { %v2100_v23 = vadd.f32 %v2099_v21, %v2098_v18  ;;  %1699 = vmatprep.mubr.f32.mxu1 %v244_v16 }
 0x110   :  { %v2021_v26 = vpop.f32.mrb[12].mxu0 }
 0x111   :  { %v4398_v28 = vadd.f32 %v2100_v23, %v2020_v20  ;;  %v2101_v29 = vpop.f32.mrb[12].mxu1  ;;  %v2022_v30 = vpop.f32.mrb[13].mxu0  ;;  %1555 = vmatmul.mubr.f32.gmra.mrb[118].mxu0 %v241_v22 }
 0x112   :  { %v2023_v31 = vadd.f32 %v2022_v30, %v2021_v26  ;;  %v2102_v32 = vpop.f32.mrb[13].mxu1  ;;  %1700 = vmatmul.mubr.f32.gmra.mrb[118].mxu1 %v243_v24  ;;  %1559 = vmatprep.mubr.f32.mxu0 %v258_v25 }
 0x113   :  { %v2103_v34 = vadd.f32 %v2102_v32, %v2101_v29  ;;  %1704 = vmatprep.mubr.f32.mxu1 %v260_v27 }
 0x114   :  { %v2024_v38 = vpop.f32.mrb[14].mxu0 }
 0x115   :  { %v4412_v40 = vadd.f32 %v2103_v34, %v2023_v31  ;;  %v2104_v41 = vpop.f32.mrb[14].mxu1  ;;  %v2025_v42 = vpop.f32.mrb[15].mxu0  ;;  %1560 = vmatmul.mubr.f32.gmra.mrb[120].mxu0 %v257_v33 }
 0x116   :  { %v2026_v43 = vadd.f32 %v2025_v42, %v2024_v38  ;;  %v2105_v44 = vpop.f32.mrb[15].mxu1  ;;  %1705 = vmatmul.mubr.f32.gmra.mrb[120].mxu1 %v259_v35  ;;  %1564 = vmatprep.mubr.f32.mxu0 %v274_v36 }
 0x117   :  { %v2106_v46 = vadd.f32 %v2105_v44, %v2104_v41  ;;  %1709 = vmatprep.mubr.f32.mxu1 %v276_v39 }
 0x118   :  { %v2027_v50 = vpop.f32.mrb[16].mxu0 }
 0x119   :  { %v4426_v52 = vadd.f32 %v2106_v46, %v2026_v43  ;;  %v2107_v53 = vpop.f32.mrb[16].mxu1  ;;  %v2028_v54 = vpop.f32.mrb[17].mxu0  ;;  %1565 = vmatmul.mubr.f32.gmra.mrb[122].mxu0 %v273_v45 }
 0x11a   :  { %v2029_v55 = vadd.f32 %v2028_v54, %v2027_v50  ;;  %v2108_v56 = vpop.f32.mrb[17].mxu1  ;;  %1710 = vmatmul.mubr.f32.gmra.mrb[122].mxu1 %v275_v47  ;;  %1569 = vmatprep.mubr.f32.mxu0 %v290_v49 }
 0x11b   :  { %v2109_v58 = vadd.f32 %v2108_v56, %v2107_v53  ;;  %1714 = vmatprep.mubr.f32.mxu1 %v292_v51 }
 0x11c   :  { %v2030_v62 = vpop.f32.mrb[18].mxu0 }
 0x11d   :  { %v4440_v0 = vadd.f32 %v2109_v58, %v2029_v55  ;;  %v2110_v1 = vpop.f32.mrb[18].mxu1  ;;  %v2031_v2 = vpop.f32.mrb[19].mxu0  ;;  %1570 = vmatmul.mubr.f32.gmra.mrb[124].mxu0 %v289_v57 }
 0x11e   :  { %v2032_v3 = vadd.f32 %v2031_v2, %v2030_v62  ;;  %v2111_v4 = vpop.f32.mrb[19].mxu1  ;;  %1715 = vmatmul.mubr.f32.gmra.mrb[124].mxu1 %v291_v60  ;;  %1574 = vmatprep.mubr.f32.mxu0 %v306_v61 }
 0x11f   :  { %v2112_v7 = vadd.f32 %v2111_v4, %v2110_v1  ;;  %1719 = vmatprep.mubr.f32.mxu1 %v308_v63 }
 0x120   :  { %v2033_v9 = vpop.f32.mrb[20].mxu0 }
 0x121   :  { %v4448_v10 = vadd.f32 %v2112_v7, %v2032_v3  ;;  %v2113_v11 = vpop.f32.mrb[20].mxu1  ;;  %v2034_v12 = vpop.f32.mrb[21].mxu0  ;;  %1575 = vmatmul.mubr.f32.gmra.mrb[126].mxu0 %v305_v5 }
 0x122   :  { %v2035_v13 = vadd.f32 %v2034_v12, %v2033_v9  ;;  %v2114_v14 = vpop.f32.mrb[21].mxu1  ;;  %1720 = vmatmul.mubr.f32.gmra.mrb[126].mxu1 %v307_v8 }
 0x123   :  { %v2115_v15 = vadd.f32 %v2114_v14, %v2113_v11 }
 0x124   :  { %v2036_v16 = vpop.f32.mrb[22].mxu0 }
 0x125   :  { %v4450_v18 = vadd.f32 %v2115_v15, %v2035_v13  ;;  %v2116_v19 = vpop.f32.mrb[22].mxu1  ;;  %v2037_v20 = vpop.f32.mrb[23].mxu0 }
 0x126   :  { %v2038_v21 = vadd.f32 %v2037_v20, %v2036_v16  ;;  %v2117_v22 = vpop.f32.mrb[23].mxu1 }
 0x127   :  { %v2118_v23 = vadd.f32 %v2117_v22, %v2116_v19 }
 0x128   :  { %v2039_v24 = vpop.f32.mrb[24].mxu0 }
 0x129   :  { %v4452_v25 = vadd.f32 %v2118_v23, %v2038_v21  ;;  %v2119_v26 = vpop.f32.mrb[24].mxu1  ;;  %v2040_v27 = vpop.f32.mrb[25].mxu0 }
 0x12a   :  { %v2041_v29 = vadd.f32 %v2040_v27, %v2039_v24  ;;  %v2120_v30 = vpop.f32.mrb[25].mxu1 }
 0x12b   :  { %v2121_v31 = vadd.f32 %v2120_v30, %v2119_v26 }
 0x12c   :  { %v2042_v32 = vpop.f32.mrb[26].mxu0 }
 0x12d   :  { %v4454_v33 = vadd.f32 %v2121_v31, %v2041_v29  ;;  %v2122_v34 = vpop.f32.mrb[26].mxu1  ;;  %v2043_v35 = vpop.f32.mrb[27].mxu0 }
 0x12e   :  { %v2044_v36 = vadd.f32 %v2043_v35, %v2042_v32  ;;  %v2123_v38 = vpop.f32.mrb[27].mxu1 }
 0x12f   :  { %v2124_v39 = vadd.f32 %v2123_v38, %v2122_v34 }
 0x130   :  { %v2045_v41 = vpop.f32.mrb[28].mxu0 }
 0x131   :  { %v4456_v42 = vadd.f32 %v2124_v39, %v2044_v36  ;;  %v2125_v43 = vpop.f32.mrb[28].mxu1  ;;  %v2046_v44 = vpop.f32.mrb[29].mxu0 }
 0x132   :  { %v2047_v45 = vadd.f32 %v2046_v44, %v2045_v41  ;;  %v2126_v46 = vpop.f32.mrb[29].mxu1 }
 0x133   :  { %v2127_v47 = vadd.f32 %v2126_v46, %v2125_v43 }
 0x134   :  { %v2048_v49 = vpop.f32.mrb[30].mxu0 }
 0x135   :  { %v4458_v50 = vadd.f32 %v2127_v47, %v2047_v45  ;;  %v2128_v51 = vpop.f32.mrb[30].mxu1  ;;  %v2049_v53 = vpop.f32.mrb[31].mxu0 }
 0x136   :  { %v2050_v54 = vadd.f32 %v2049_v53, %v2048_v49  ;;  %v2129_v55 = vpop.f32.mrb[31].mxu1 }
 0x137   :  { %v2130_v56 = vadd.f32 %v2129_v55, %v2128_v51 }
 0x138   :  { %v2163_v57 = vpop.f32.mrb[32].mxu0 }
 0x139   :  { %v4460_v58 = vadd.f32 %v2130_v56, %v2050_v54  ;;  %v2164_v60 = vpop.f32.mrb[33].mxu0  ;;  %v2243_v61 = vpop.f32.mrb[32].mxu1 }
 0x13a   :  { %v2165_v62 = vadd.f32 %v2164_v60, %v2163_v57  ;;  %v2244_v63 = vpop.f32.mrb[33].mxu1 }
 0x13b   :  { %v2245_v1 = vadd.f32 %v2244_v63, %v2243_v61 }
 0x13c   :  { %v922_v2 = vadd.f32 %v2165_v62, %v4328_v37  ;;  %v2166_v3 = vpop.f32.mrb[34].mxu0 }
 0x13d   :  { %v2167_v4 = vpop.f32.mrb[35].mxu0  ;;  %v2246_v5 = vpop.f32.mrb[34].mxu1 }
 0x13e   :  { %v4463_v7 = vadd.f32 %v2245_v1, %v922_v2  ;;  %v2168_v8 = vadd.f32 %v2167_v4, %v2166_v3  ;;  %v2247_v9 = vpop.f32.mrb[35].mxu1 }
 0x13f   :  { %v2248_v11 = vadd.f32 %v2247_v9, %v2246_v5 }
 0x140   :  { %v927_v12 = vadd.f32 %v2168_v8, %v4342_v48  ;;  %v2169_v13 = vpop.f32.mrb[36].mxu0 }
 0x141   :  { %v2170_v14 = vpop.f32.mrb[37].mxu0  ;;  %v2249_v15 = vpop.f32.mrb[36].mxu1 }
 0x142   :  { %v4466_v16 = vadd.f32 %v2248_v11, %v927_v12  ;;  %v2171_v19 = vadd.f32 %v2170_v14, %v2169_v13  ;;  %v2250_v20 = vpop.f32.mrb[37].mxu1 }
 0x143   :  { %v2251_v21 = vadd.f32 %v2250_v20, %v2249_v15 }
 0x144   :  { %v932_v37 = vadd.f32 %v2171_v19, %v4356_v59  ;;  %v2172_v22 = vpop.f32.mrb[38].mxu0 }
 0x145   :  { %v2173_v23 = vpop.f32.mrb[39].mxu0  ;;  %v2252_v24 = vpop.f32.mrb[38].mxu1 }
 0x146   :  { %v4469_v26 = vadd.f32 %v2251_v21, %v932_v37  ;;  %v2174_v27 = vadd.f32 %v2173_v23, %v2172_v22  ;;  %v2253_v29 = vpop.f32.mrb[39].mxu1 }
 0x147   :  { %v2254_v30 = vadd.f32 %v2253_v29, %v2252_v24 }
 0x148   :  { %v937_v48 = vadd.f32 %v2174_v27, %v4370_v6  ;;  %v2175_v31 = vpop.f32.mrb[40].mxu0 }
 0x149   :  { %v2176_v32 = vpop.f32.mrb[41].mxu0  ;;  %v2255_v34 = vpop.f32.mrb[40].mxu1 }
 0x14a   :  { %v4472_v35 = vadd.f32 %v2254_v30, %v937_v48  ;;  %v2177_v36 = vadd.f32 %v2176_v32, %v2175_v31  ;;  %v2256_v38 = vpop.f32.mrb[41].mxu1 }
 0x14b   :  { %v2257_v39 = vadd.f32 %v2256_v38, %v2255_v34 }
 0x14c   :  { %v942_v59 = vadd.f32 %v2177_v36, %v4384_v17  ;;  %v2178_v41 = vpop.f32.mrb[42].mxu0 }
 0x14d   :  { %v2179_v43 = vpop.f32.mrb[43].mxu0  ;;  %v2258_v44 = vpop.f32.mrb[42].mxu1 }
 0x14e   :  { %v4475_v45 = vadd.f32 %v2257_v39, %v942_v59  ;;  %v2180_v46 = vadd.f32 %v2179_v43, %v2178_v41  ;;  %v2259_v47 = vpop.f32.mrb[43].mxu1 }
 0x14f   :  { %v2260_v49 = vadd.f32 %v2259_v47, %v2258_v44 }
 0x150   :  { %v947_v6 = vadd.f32 %v2180_v46, %v4398_v28  ;;  %v2181_v51 = vpop.f32.mrb[44].mxu0 }
 0x151   :  { %v2182_v53 = vpop.f32.mrb[45].mxu0  ;;  %v2261_v54 = vpop.f32.mrb[44].mxu1 }
 0x152   :  { %v4478_v55 = vadd.f32 %v2260_v49, %v947_v6  ;;  %v2183_v56 = vadd.f32 %v2182_v53, %v2181_v51  ;;  %v2262_v57 = vpop.f32.mrb[45].mxu1 }
 0x153   :  { %v2263_v60 = vadd.f32 %v2262_v57, %v2261_v54 }
 0x154   :  { %v952_v17 = vadd.f32 %v2183_v56, %v4412_v40  ;;  %v2184_v61 = vpop.f32.mrb[46].mxu0 }
 0x155   :  { %v2185_v62 = vpop.f32.mrb[47].mxu0  ;;  %v2264_v63 = vpop.f32.mrb[46].mxu1 }
 0x156   :  { %v4481_v1 = vadd.f32 %v2263_v60, %v952_v17  ;;  %v2186_v2 = vadd.f32 %v2185_v62, %v2184_v61  ;;  %v2265_v3 = vpop.f32.mrb[47].mxu1 }
 0x157   :  { %v2266_v4 = vadd.f32 %v2265_v3, %v2264_v63 }
 0x158   :  { %v957_v28 = vadd.f32 %v2186_v2, %v4426_v52  ;;  %v2187_v5 = vpop.f32.mrb[48].mxu0 }
 0x159   :  { %v2188_v8 = vpop.f32.mrb[49].mxu0  ;;  %v2267_v9 = vpop.f32.mrb[48].mxu1 }
 0x15a   :  { %v4484_v11 = vadd.f32 %v2266_v4, %v957_v28  ;;  %v2189_v12 = vadd.f32 %v2188_v8, %v2187_v5  ;;  %v2268_v13 = vpop.f32.mrb[49].mxu1 }
 0x15b   :  { %v2269_v14 = vadd.f32 %v2268_v13, %v2267_v9 }
 0x15c   :  { %v962_v40 = vadd.f32 %v2189_v12, %v4440_v0  ;;  %v2190_v15 = vpop.f32.mrb[50].mxu0 }
 0x15d   :  { %v2191_v19 = vpop.f32.mrb[51].mxu0  ;;  %v2270_v20 = vpop.f32.mrb[50].mxu1 }
 0x15e   :  { %v4487_v21 = vadd.f32 %v2269_v14, %v962_v40  ;;  %v2192_v37 = vadd.f32 %v2191_v19, %v2190_v15  ;;  %v2271_v22 = vpop.f32.mrb[51].mxu1 }
 0x15f   :  { %v2272_v23 = vadd.f32 %v2271_v22, %v2270_v20 }
 0x160   :  { %v967_v52 = vadd.f32 %v2192_v37, %v4448_v10  ;;  %v2193_v24 = vpop.f32.mrb[52].mxu0 }
 0x161   :  { %v2194_v27 = vpop.f32.mrb[53].mxu0  ;;  %v2273_v29 = vpop.f32.mrb[52].mxu1 }
 0x162   :  { %v4490_v30 = vadd.f32 %v2272_v23, %v967_v52  ;;  %v2195_v48 = vadd.f32 %v2194_v27, %v2193_v24  ;;  %v2274_v31 = vpop.f32.mrb[53].mxu1 }
 0x163   :  { %v2275_v32 = vadd.f32 %v2274_v31, %v2273_v29 }
 0x164   :  { %v972_v0 = vadd.f32 %v2195_v48, %v4450_v18  ;;  %v2196_v34 = vpop.f32.mrb[54].mxu0 }
 0x165   :  { %v2197_v36 = vpop.f32.mrb[55].mxu0  ;;  %v2276_v38 = vpop.f32.mrb[54].mxu1 }
 0x166   :  { %v4493_v39 = vadd.f32 %v2275_v32, %v972_v0  ;;  %v2198_v59 = vadd.f32 %v2197_v36, %v2196_v34  ;;  %v2277_v41 = vpop.f32.mrb[55].mxu1 }
 0x167   :  { %v2278_v43 = vadd.f32 %v2277_v41, %v2276_v38 }
 0x168   :  { %v977_v10 = vadd.f32 %v2198_v59, %v4452_v25  ;;  %v2199_v44 = vpop.f32.mrb[56].mxu0 }
 0x169   :  { %v2200_v46 = vpop.f32.mrb[57].mxu0  ;;  %v2279_v47 = vpop.f32.mrb[56].mxu1 }
 0x16a   :  { %v4496_v49 = vadd.f32 %v2278_v43, %v977_v10  ;;  %v2201_v6 = vadd.f32 %v2200_v46, %v2199_v44  ;;  %v2280_v51 = vpop.f32.mrb[57].mxu1 }
 0x16b   :  { %v2281_v53 = vadd.f32 %v2280_v51, %v2279_v47 }
 0x16c   :  { %v982_v18 = vadd.f32 %v2201_v6, %v4454_v33  ;;  %v2202_v54 = vpop.f32.mrb[58].mxu0 }
 0x16d   :  { %v2203_v56 = vpop.f32.mrb[59].mxu0  ;;  %v2282_v57 = vpop.f32.mrb[58].mxu1 }
 0x16e   :  { %v4499_v60 = vadd.f32 %v2281_v53, %v982_v18  ;;  %v2204_v17 = vadd.f32 %v2203_v56, %v2202_v54  ;;  %v2283_v61 = vpop.f32.mrb[59].mxu1 }
 0x16f   :  { %v2284_v62 = vadd.f32 %v2283_v61, %v2282_v57 }
 0x170   :  { %v987_v25 = vadd.f32 %v2204_v17, %v4456_v42  ;;  %v2205_v63 = vpop.f32.mrb[60].mxu0 }
 0x171   :  { %v2206_v2 = vpop.f32.mrb[61].mxu0  ;;  %v2285_v3 = vpop.f32.mrb[60].mxu1 }
 0x172   :  { %v4502_v4 = vadd.f32 %v2284_v62, %v987_v25  ;;  %v2207_v28 = vadd.f32 %v2206_v2, %v2205_v63  ;;  %v2286_v5 = vpop.f32.mrb[61].mxu1 }
 0x173   :  { %v2287_v8 = vadd.f32 %v2286_v5, %v2285_v3 }
 0x174   :  { %v992_v33 = vadd.f32 %v2207_v28, %v4458_v50  ;;  %v2208_v9 = vpop.f32.mrb[62].mxu0 }
 0x175   :  { %v2209_v12 = vpop.f32.mrb[63].mxu0  ;;  %v2288_v13 = vpop.f32.mrb[62].mxu1 }
 0x176   :  { %v4505_v14 = vadd.f32 %v2287_v8, %v992_v33  ;;  %v2210_v40 = vadd.f32 %v2209_v12, %v2208_v9  ;;  %v2289_v15 = vpop.f32.mrb[63].mxu1 }
 0x177   :  { %v2290_v19 = vadd.f32 %v2289_v15, %v2288_v13 }
 0x178   :  { %v997_v42 = vadd.f32 %v2210_v40, %v4460_v58  ;;  %v2323_v20 = vpop.f32.mrb[64].mxu0 }
 0x179   :  { %v2324_v37 = vpop.f32.mrb[65].mxu0  ;;  %v2403_v22 = vpop.f32.mrb[64].mxu1 }
 0x17a   :  { %v4508_v23 = vadd.f32 %v2290_v19, %v997_v42  ;;  %v2325_v52 = vadd.f32 %v2324_v37, %v2323_v20  ;;  %v2404_v24 = vpop.f32.mrb[65].mxu1 }
 0x17b   :  { %v2405_v27 = vadd.f32 %v2404_v24, %v2403_v22 }
 0x17c   :  { %v1212_v50 = vadd.f32 %v2325_v52, %v4463_v7  ;;  %v2326_v29 = vpop.f32.mrb[66].mxu0 }
 0x17d   :  { %v2327_v48 = vpop.f32.mrb[67].mxu0  ;;  %v2406_v31 = vpop.f32.mrb[66].mxu1 }
 0x17e   :  { %v4511_v32 = vadd.f32 %v2405_v27, %v1212_v50  ;;  %v2328_v0 = vadd.f32 %v2327_v48, %v2326_v29  ;;  %v2407_v34 = vpop.f32.mrb[67].mxu1 }
 0x17f   :  { %v2408_v36 = vadd.f32 %v2407_v34, %v2406_v31 }
 0x180   :  { %v1217_v58 = vadd.f32 %v2328_v0, %v4466_v16  ;;  %v2329_v38 = vpop.f32.mrb[68].mxu0 }
 0x181   :  { %v2330_v59 = vpop.f32.mrb[69].mxu0  ;;  %v2409_v41 = vpop.f32.mrb[68].mxu1 }
 0x182   :  { %v4514_v43 = vadd.f32 %v2408_v36, %v1217_v58  ;;  %v2331_v10 = vadd.f32 %v2330_v59, %v2329_v38  ;;  %v2410_v44 = vpop.f32.mrb[69].mxu1 }
 0x183   :  { %v2411_v46 = vadd.f32 %v2410_v44, %v2409_v41 }
 0x184   :  { %v1222_v7 = vadd.f32 %v2331_v10, %v4469_v26  ;;  %v2332_v47 = vpop.f32.mrb[70].mxu0 }
 0x185   :  { %v2333_v6 = vpop.f32.mrb[71].mxu0  ;;  %v2412_v51 = vpop.f32.mrb[70].mxu1 }
 0x186   :  { %v4517_v53 = vadd.f32 %v2411_v46, %v1222_v7  ;;  %v2334_v18 = vadd.f32 %v2333_v6, %v2332_v47  ;;  %v2413_v54 = vpop.f32.mrb[71].mxu1 }
 0x187   :  { %v2414_v56 = vadd.f32 %v2413_v54, %v2412_v51 }
 0x188   :  { %v1227_v16 = vadd.f32 %v2334_v18, %v4472_v35  ;;  %v2335_v57 = vpop.f32.mrb[72].mxu0 }
 0x189   :  { %v2336_v17 = vpop.f32.mrb[73].mxu0  ;;  %v2415_v61 = vpop.f32.mrb[72].mxu1 }
 0x18a   :  { %v4520_v62 = vadd.f32 %v2414_v56, %v1227_v16  ;;  %v2337_v25 = vadd.f32 %v2336_v17, %v2335_v57  ;;  %v2416_v63 = vpop.f32.mrb[73].mxu1 }
 0x18b   :  { %v2417_v2 = vadd.f32 %v2416_v63, %v2415_v61 }
 0x18c   :  { %v1232_v26 = vadd.f32 %v2337_v25, %v4475_v45  ;;  %v2338_v3 = vpop.f32.mrb[74].mxu0 }
 0x18d   :  { %v2339_v28 = vpop.f32.mrb[75].mxu0  ;;  %v2418_v5 = vpop.f32.mrb[74].mxu1 }
 0x18e   :  { %v4523_v8 = vadd.f32 %v2417_v2, %v1232_v26  ;;  %v2340_v33 = vadd.f32 %v2339_v28, %v2338_v3  ;;  %v2419_v9 = vpop.f32.mrb[75].mxu1 }
 0x18f   :  { %v2420_v12 = vadd.f32 %v2419_v9, %v2418_v5 }
 0x190   :  { %v1237_v35 = vadd.f32 %v2340_v33, %v4478_v55  ;;  %v2341_v13 = vpop.f32.mrb[76].mxu0 }
 0x191   :  { %v2342_v40 = vpop.f32.mrb[77].mxu0  ;;  %v2421_v15 = vpop.f32.mrb[76].mxu1 }
 0x192   :  { %v4526_v19 = vadd.f32 %v2420_v12, %v1237_v35  ;;  %v2343_v42 = vadd.f32 %v2342_v40, %v2341_v13  ;;  %v2422_v20 = vpop.f32.mrb[77].mxu1 }
 0x193   :  { %v2423_v37 = vadd.f32 %v2422_v20, %v2421_v15 }
 0x194   :  { %v1242_v45 = vadd.f32 %v2343_v42, %v4481_v1  ;;  %v2344_v22 = vpop.f32.mrb[78].mxu0 }
 0x195   :  { %v2345_v52 = vpop.f32.mrb[79].mxu0  ;;  %v2424_v24 = vpop.f32.mrb[78].mxu1 }
 0x196   :  { %v4529_v27 = vadd.f32 %v2423_v37, %v1242_v45  ;;  %v2346_v50 = vadd.f32 %v2345_v52, %v2344_v22  ;;  %v2425_v29 = vpop.f32.mrb[79].mxu1 }
 0x197   :  { %v2426_v48 = vadd.f32 %v2425_v29, %v2424_v24 }
 0x198   :  { %v1247_v55 = vadd.f32 %v2346_v50, %v4484_v11  ;;  %v2347_v31 = vpop.f32.mrb[80].mxu0 }
 0x199   :  { %v2348_v0 = vpop.f32.mrb[81].mxu0  ;;  %v2427_v34 = vpop.f32.mrb[80].mxu1 }
 0x19a   :  { %v4532_v36 = vadd.f32 %v2426_v48, %v1247_v55  ;;  %v2349_v58 = vadd.f32 %v2348_v0, %v2347_v31  ;;  %v2428_v38 = vpop.f32.mrb[81].mxu1 }
 0x19b   :  { %v2429_v59 = vadd.f32 %v2428_v38, %v2427_v34 }
 0x19c   :  { %v1252_v1 = vadd.f32 %v2349_v58, %v4487_v21  ;;  %v2350_v41 = vpop.f32.mrb[82].mxu0 }
 0x19d   :  { %v2351_v10 = vpop.f32.mrb[83].mxu0  ;;  %v2430_v44 = vpop.f32.mrb[82].mxu1 }
 0x19e   :  { %v4535_v46 = vadd.f32 %v2429_v59, %v1252_v1  ;;  %v2352_v7 = vadd.f32 %v2351_v10, %v2350_v41  ;;  %v2431_v47 = vpop.f32.mrb[83].mxu1 }
 0x19f   :  { %v2432_v6 = vadd.f32 %v2431_v47, %v2430_v44 }
 0x1a0   :  { %v1257_v11 = vadd.f32 %v2352_v7, %v4490_v30  ;;  %v2353_v51 = vpop.f32.mrb[84].mxu0 }
 0x1a1   :  { %v2354_v18 = vpop.f32.mrb[85].mxu0  ;;  %v2433_v54 = vpop.f32.mrb[84].mxu1 }
 0x1a2   :  { %v4538_v56 = vadd.f32 %v2432_v6, %v1257_v11  ;;  %v2355_v16 = vadd.f32 %v2354_v18, %v2353_v51  ;;  %v2434_v57 = vpop.f32.mrb[85].mxu1 }
 0x1a3   :  { %v2435_v17 = vadd.f32 %v2434_v57, %v2433_v54 }
 0x1a4   :  { %v1262_v21 = vadd.f32 %v2355_v16, %v4493_v39  ;;  %v2356_v61 = vpop.f32.mrb[86].mxu0 }
 0x1a5   :  { %v2357_v25 = vpop.f32.mrb[87].mxu0  ;;  %v2436_v63 = vpop.f32.mrb[86].mxu1 }
 0x1a6   :  { %v4541_v2 = vadd.f32 %v2435_v17, %v1262_v21  ;;  %v2358_v26 = vadd.f32 %v2357_v25, %v2356_v61  ;;  %v2437_v3 = vpop.f32.mrb[87].mxu1 }
 0x1a7   :  { %v2438_v28 = vadd.f32 %v2437_v3, %v2436_v63 }
 0x1a8   :  { %v1267_v30 = vadd.f32 %v2358_v26, %v4496_v49  ;;  %v2359_v5 = vpop.f32.mrb[88].mxu0 }
 0x1a9   :  { %v2360_v33 = vpop.f32.mrb[89].mxu0  ;;  %v2439_v9 = vpop.f32.mrb[88].mxu1 }
 0x1aa   :  { %v4544_v12 = vadd.f32 %v2438_v28, %v1267_v30  ;;  %v2361_v35 = vadd.f32 %v2360_v33, %v2359_v5  ;;  %v2440_v13 = vpop.f32.mrb[89].mxu1 }
 0x1ab   :  { %v2441_v40 = vadd.f32 %v2440_v13, %v2439_v9 }
 0x1ac   :  { %v1272_v39 = vadd.f32 %v2361_v35, %v4499_v60  ;;  %v2362_v15 = vpop.f32.mrb[90].mxu0 }
 0x1ad   :  { %v2363_v42 = vpop.f32.mrb[91].mxu0  ;;  %v2442_v20 = vpop.f32.mrb[90].mxu1 }
 0x1ae   :  { %v4547_v37 = vadd.f32 %v2441_v40, %v1272_v39  ;;  %v2364_v45 = vadd.f32 %v2363_v42, %v2362_v15  ;;  %v2443_v22 = vpop.f32.mrb[91].mxu1 }
 0x1af   :  { %v2444_v52 = vadd.f32 %v2443_v22, %v2442_v20 }
 0x1b0   :  { %v1277_v49 = vadd.f32 %v2364_v45, %v4502_v4  ;;  %v2365_v24 = vpop.f32.mrb[92].mxu0 }
 0x1b1   :  { %v2366_v50 = vpop.f32.mrb[93].mxu0  ;;  %v2445_v29 = vpop.f32.mrb[92].mxu1 }
 0x1b2   :  { %v4550_v48 = vadd.f32 %v2444_v52, %v1277_v49  ;;  %v2367_v55 = vadd.f32 %v2366_v50, %v2365_v24  ;;  %v2446_v31 = vpop.f32.mrb[93].mxu1 }
 0x1b3   :  { %v2447_v0 = vadd.f32 %v2446_v31, %v2445_v29 }
 0x1b4   :  { %v1282_v60 = vadd.f32 %v2367_v55, %v4505_v14  ;;  %v2368_v34 = vpop.f32.mrb[94].mxu0 }
 0x1b5   :  { %v2369_v58 = vpop.f32.mrb[95].mxu0  ;;  %v2448_v38 = vpop.f32.mrb[94].mxu1 }
 0x1b6   :  { %v4553_v59 = vadd.f32 %v2447_v0, %v1282_v60  ;;  %v2370_v1 = vadd.f32 %v2369_v58, %v2368_v34  ;;  %v2449_v41 = vpop.f32.mrb[95].mxu1 }
 0x1b7   :  { %v2450_v10 = vadd.f32 %v2449_v41, %v2448_v38 }
 0x1b8   :  { %v1287_v4 = vadd.f32 %v2370_v1, %v4508_v23  ;;  %v2483_v44 = vpop.f32.mrb[96].mxu0 }
 0x1b9   :  { %v2484_v7 = vpop.f32.mrb[97].mxu0  ;;  %v2563_v47 = vpop.f32.mrb[96].mxu1 }
 0x1ba   :  { %v4556_v6 = vadd.f32 %v2450_v10, %v1287_v4  ;;  %v2485_v11 = vadd.f32 %v2484_v7, %v2483_v44  ;;  %v2564_v51 = vpop.f32.mrb[97].mxu1 }
 0x1bb   :  { %v2565_v18 = vadd.f32 %v2564_v51, %v2563_v47 }
 0x1bc   :  { %v1502_v14 = vadd.f32 %v2485_v11, %v4511_v32  ;;  %v2486_v54 = vpop.f32.mrb[98].mxu0 }
 0x1bd   :  { %v2487_v16 = vpop.f32.mrb[99].mxu0  ;;  %v2566_v57 = vpop.f32.mrb[98].mxu1 }
 0x1be   :  { %v4559_v17 = vadd.f32 %v2565_v18, %v1502_v14  ;;  %v2488_v21 = vadd.f32 %v2487_v16, %v2486_v54  ;;  %v2567_v61 = vpop.f32.mrb[99].mxu1 }
 0x1bf   :  { %v2568_v25 = vadd.f32 %v2567_v61, %v2566_v57 }
 0x1c0   :  { %v1507_v23 = vadd.f32 %v2488_v21, %v4514_v43  ;;  %v2489_v63 = vpop.f32.mrb[100].mxu0 }
 0x1c1   :  { %v2490_v26 = vpop.f32.mrb[101].mxu0  ;;  %v2569_v3 = vpop.f32.mrb[100].mxu1 }
 0x1c2   :  { %v4562_v28 = vadd.f32 %v2568_v25, %v1507_v23  ;;  %v2491_v30 = vadd.f32 %v2490_v26, %v2489_v63  ;;  %v2570_v5 = vpop.f32.mrb[101].mxu1 }
 0x1c3   :  { %v2571_v33 = vadd.f32 %v2570_v5, %v2569_v3 }
 0x1c4   :  { %v1776_v32 = vadd.f32 %v4562_v28, %v4559_v17  ;;  %v1512_v9 = vadd.f32 %v2491_v30, %v4517_v53  ;;  %v2492_v35 = vpop.f32.mrb[102].mxu0 }
 0x1c5   :  { %v2493_v13 = vpop.f32.mrb[103].mxu0  ;;  %v2572_v40 = vpop.f32.mrb[102].mxu1 }
 0x1c6   :  { %v4567_v39 = vadd.f32 %v2571_v33, %v1512_v9  ;;  %v2494_v15 = vadd.f32 %v2493_v13, %v2492_v35  ;;  %v2573_v43 = vpop.f32.mrb[103].mxu1 }
 0x1c7   :  { %v2574_v42 = vadd.f32 %v2573_v43, %v2572_v40 }
 0x1c8   :  { %v1777_v20 = vadd.f32 %v1776_v32, %v4567_v39  ;;  %v1517_v45 = vadd.f32 %v2494_v15, %v4520_v62  ;;  %v2495_v22 = vpop.f32.mrb[104].mxu0 }
 0x1c9   :  { %v2496_v52 = vpop.f32.mrb[105].mxu0  ;;  %v2575_v49 = vpop.f32.mrb[104].mxu1 }
 0x1ca   :  { %v4571_v24 = vadd.f32 %v2574_v42, %v1517_v45  ;;  %v2497_v50 = vadd.f32 %v2496_v52, %v2495_v22  ;;  %v2576_v29 = vpop.f32.mrb[105].mxu1 }
 0x1cb   :  { %v2577_v53 = vadd.f32 %v2576_v29, %v2575_v49 }
 0x1cc   :  { %v1778_v55 = vadd.f32 %v1777_v20, %v4571_v24  ;;  %v1522_v31 = vadd.f32 %v2497_v50, %v4523_v8  ;;  %v2498_v0 = vpop.f32.mrb[106].mxu0 }
 0x1cd   :  { %v2499_v60 = vpop.f32.mrb[107].mxu0  ;;  %v2578_v34 = vpop.f32.mrb[106].mxu1 }
 0x1ce   :  { %v4575_v58 = vadd.f32 %v2577_v53, %v1522_v31  ;;  %v2500_v38 = vadd.f32 %v2499_v60, %v2498_v0  ;;  %v2579_v1 = vpop.f32.mrb[107].mxu1 }
 0x1cf   :  { %v2580_v62 = vadd.f32 %v2579_v1, %v2578_v34 }
 0x1d0   :  { %v1779_v41 = vadd.f32 %v1778_v55, %v4575_v58  ;;  %v1527_v10 = vadd.f32 %v2500_v38, %v4526_v19  ;;  %v2501_v4 = vpop.f32.mrb[108].mxu0 }
 0x1d1   :  { %v2502_v44 = vpop.f32.mrb[109].mxu0  ;;  %v2581_v7 = vpop.f32.mrb[108].mxu1 }
 0x1d2   :  { %v4579_v47 = vadd.f32 %v2580_v62, %v1527_v10  ;;  %v2503_v11 = vadd.f32 %v2502_v44, %v2501_v4  ;;  %v2582_v51 = vpop.f32.mrb[109].mxu1 }
 0x1d3   :  { %v2583_v8 = vadd.f32 %v2582_v51, %v2581_v7 }
 0x1d4   :  { %v1780_v18 = vadd.f32 %v1779_v41, %v4579_v47  ;;  %v1532_v14 = vadd.f32 %v2503_v11, %v4529_v27  ;;  %v2504_v54 = vpop.f32.mrb[110].mxu0 }
 0x1d5   :  { %v2505_v16 = vpop.f32.mrb[111].mxu0  ;;  %v2584_v57 = vpop.f32.mrb[110].mxu1 }
 0x1d6   :  { %v4583_v21 = vadd.f32 %v2583_v8, %v1532_v14  ;;  %v2506_v61 = vadd.f32 %v2505_v16, %v2504_v54  ;;  %v2585_v25 = vpop.f32.mrb[111].mxu1 }
 0x1d7   :  { %v2586_v19 = vadd.f32 %v2585_v25, %v2584_v57 }
 0x1d8   :  { %v1781_v23 = vadd.f32 %v1780_v18, %v4583_v21  ;;  %v1537_v63 = vadd.f32 %v2506_v61, %v4532_v36  ;;  %v2507_v26 = vpop.f32.mrb[112].mxu0 }
 0x1d9   :  { %v2508_v3 = vpop.f32.mrb[113].mxu0  ;;  %v2587_v30 = vpop.f32.mrb[112].mxu1 }
 0x1da   :  { %v4587_v5 = vadd.f32 %v2586_v19, %v1537_v63  ;;  %v2509_v33 = vadd.f32 %v2508_v3, %v2507_v26  ;;  %v2588_v32 = vpop.f32.mrb[113].mxu1 }
 0x1db   :  { %v2589_v27 = vadd.f32 %v2588_v32, %v2587_v30 }
 0x1dc   :  { %v1782_v9 = vadd.f32 %v1781_v23, %v4587_v5  ;;  %v1542_v35 = vadd.f32 %v2509_v33, %v4535_v46  ;;  %v2510_v13 = vpop.f32.mrb[114].mxu0 }
 0x1dd   :  { %v2511_v40 = vpop.f32.mrb[115].mxu0  ;;  %v2590_v15 = vpop.f32.mrb[114].mxu1 }
 0x1de   :  { %v4591_v43 = vadd.f32 %v2589_v27, %v1542_v35  ;;  %v2512_v42 = vadd.f32 %v2511_v40, %v2510_v13  ;;  %v2591_v20 = vpop.f32.mrb[115].mxu1 }
 0x1df   :  { %v2592_v36 = vadd.f32 %v2591_v20, %v2590_v15 }
 0x1e0   :  { %v1783_v45 = vadd.f32 %v1782_v9, %v4591_v43  ;;  %v1547_v22 = vadd.f32 %v2512_v42, %v4538_v56  ;;  %v2513_v52 = vpop.f32.mrb[116].mxu0 }
 0x1e1   :  { %v2514_v49 = vpop.f32.mrb[117].mxu0  ;;  %v2593_v50 = vpop.f32.mrb[116].mxu1 }
 0x1e2   :  { %v4595_v29 = vadd.f32 %v2592_v36, %v1547_v22  ;;  %v2515_v53 = vadd.f32 %v2514_v49, %v2513_v52  ;;  %v2594_v55 = vpop.f32.mrb[117].mxu1 }
 0x1e3   :  { %v2595_v46 = vadd.f32 %v2594_v55, %v2593_v50 }
 0x1e4   :  { %v1784_v31 = vadd.f32 %v1783_v45, %v4595_v29  ;;  %v1552_v0 = vadd.f32 %v2515_v53, %v4541_v2  ;;  %v2516_v60 = vpop.f32.mrb[118].mxu0 }
 0x1e5   :  { %v2517_v34 = vpop.f32.mrb[119].mxu0  ;;  %v2596_v38 = vpop.f32.mrb[118].mxu1 }
 0x1e6   :  { %v1697_v1 = vadd.f32 %v2595_v46, %v1552_v0  ;;  %v2518_v62 = vadd.f32 %v2517_v34, %v2516_v60  ;;  %v2597_v41 = vpop.f32.mrb[119].mxu1 }
 0x1e7   :  { %v2598_v10 = vadd.f32 %v2597_v41, %v2596_v38 }
 0x1e8   :  { %v1785_v56 = vadd.f32 %v1784_v31, %v1697_v1  ;;  %v1557_v4 = vadd.f32 %v2518_v62, %v4544_v12  ;;  %v2519_v44 = vpop.f32.mrb[120].mxu0 }
 0x1e9   :  { %v2520_v7 = vpop.f32.mrb[121].mxu0  ;;  %v2599_v11 = vpop.f32.mrb[120].mxu1 }
 0x1ea   :  { %v1702_v51 = vadd.f32 %v2598_v10, %v1557_v4  ;;  %v2521_v8 = vadd.f32 %v2520_v7, %v2519_v44  ;;  %v2600_v18 = vpop.f32.mrb[121].mxu1 }
 0x1eb   :  { %v2601_v14 = vadd.f32 %v2600_v18, %v2599_v11 }
 0x1ec   :  { %v1786_v54 = vadd.f32 %v1785_v56, %v1702_v51  ;;  %v1562_v2 = vadd.f32 %v2521_v8, %v4547_v37  ;;  %v2522_v16 = vpop.f32.mrb[122].mxu0 }
 0x1ed   :  { %v2523_v57 = vpop.f32.mrb[123].mxu0  ;;  %v2602_v61 = vpop.f32.mrb[122].mxu1 }
 0x1ee   :  { %v1707_v25 = vadd.f32 %v2601_v14, %v1562_v2  ;;  %v2524_v19 = vadd.f32 %v2523_v57, %v2522_v16  ;;  %v2603_v23 = vpop.f32.mrb[123].mxu1 }
 0x1ef   :  { %v2604_v63 = vadd.f32 %v2603_v23, %v2602_v61 }
 0x1f0   :  { %v1787_v26 = vadd.f32 %v1786_v54, %v1707_v25  ;;  %v1567_v12 = vadd.f32 %v2524_v19, %v4550_v48  ;;  %v2525_v3 = vpop.f32.mrb[124].mxu0 }
 0x1f1   :  { %v2526_v30 = vpop.f32.mrb[125].mxu0  ;;  %v2605_v33 = vpop.f32.mrb[124].mxu1 }
 0x1f2   :  { %v1712_v32 = vadd.f32 %v2604_v63, %v1567_v12  ;;  %v2527_v27 = vadd.f32 %v2526_v30, %v2525_v3  ;;  %v2606_v9 = vpop.f32.mrb[125].mxu1 }
 0x1f3   :  { %v2607_v35 = vadd.f32 %v2606_v9, %v2605_v33 }
 0x1f4   :  { %v1788_v13 = vadd.f32 %v1787_v26, %v1712_v32  ;;  %v1572_v37 = vadd.f32 %v2527_v27, %v4553_v59  ;;  %v2528_v40 = vpop.f32.mrb[126].mxu0 }
 0x1f5   :  { %v2529_v15 = vpop.f32.mrb[127].mxu0  ;;  %v2608_v42 = vpop.f32.mrb[126].mxu1 }
 0x1f6   :  { %v1717_v20 = vadd.f32 %v2607_v35, %v1572_v37  ;;  %v2530_v36 = vadd.f32 %v2529_v15, %v2528_v40  ;;  %v2609_v45 = vpop.f32.mrb[127].mxu1 }
 0x1f7   :  { %v2610_v22 = vadd.f32 %v2609_v45, %v2608_v42 }
 0x1f8   :  { %v1789_v52 = vadd.f32 %v1788_v13, %v1717_v20  ;;  %v1577_v48 = vadd.f32 %v2530_v36, %v4556_v6 }
 0x1fa   :  { %v1722_v49 = vadd.f32 %v2610_v22, %v1577_v48 }
 0x1fc   :  { %v1790_v50 = vadd.f32 %v1789_v52, %v1722_v49 }
 0x1fe   :  { %v1791_v53 = vrot.slane %v1790_v50, 4 }
 0x200   :  { %v1792_v55 = vadd.f32 %v1791_v53, %v1790_v50  ;;  %v1853_v53 = vld [vmem:[%s4766_s2] sm:$0x1] }
 0x202   :  { %v1793_v46 = vrot.slane %v1792_v55, 2 }
 0x204   :  { %v1794_v31 = vadd.f32 %v1793_v46, %v1792_v55 }
 0x206   :  { %v1795_v0 = vrot.slane %v1794_v31, 1 }
 0x208   :  { %v1796_v60 = vadd.f32 %v1795_v0, %v1794_v31 }
 0x20a   :  { %v1798_v34 = vmul.f32 0.0078125, %v1796_v60 }
 0x20c   :  { %v4605_v59 = vsub.f32 %v4559_v17, %v1798_v34  ;;  %v4608_v38 = vsub.f32 %v4562_v28, %v1798_v34  ;;  %v4611_v62 = vsub.f32 %v4567_v39, %v1798_v34  ;;  %v4614_v6 = vsub.f32 %v4571_v24, %v1798_v34 }
 0x20d   :  { %v4617_v41 = vsub.f32 %v4575_v58, %v1798_v34  ;;  %v4620_v10 = vsub.f32 %v4579_v47, %v1798_v34  ;;  %v4623_v56 = vsub.f32 %v4583_v21, %v1798_v34  ;;  %v4626_v17 = vsub.f32 %v4587_v5, %v1798_v34 }
 0x20e   :  { %v4629_v28 = vsub.f32 %v4591_v43, %v1798_v34  ;;  %v4632_v39 = vsub.f32 %v4595_v29, %v1798_v34  ;;  %v4634_v24 = vsub.f32 %v1697_v1, %v1798_v34  ;;  %v4636_v4 = vsub.f32 %v1702_v51, %v1798_v34 }
 0x20f   :  { %v4638_v58 = vsub.f32 %v1707_v25, %v1798_v34  ;;  %v4640_v47 = vsub.f32 %v1712_v32, %v1798_v34  ;;  %v4642_v44 = vsub.f32 %v1717_v20, %v1798_v34  ;;  %v4644_v21 = vsub.f32 %v1722_v49, %v1798_v34 }
 0x210   :  { %v1815_v5 = vmul.f32 %v4605_v59, %v4605_v59  ;;  %v1816_v43 = vmul.f32 %v4608_v38, %v4608_v38  ;;  %v1817_v29 = vmul.f32 %v4611_v62, %v4611_v62  ;;  %v1818_v7 = vmul.f32 %v4614_v6, %v4614_v6 }
 0x211   :  { %v1819_v51 = vmul.f32 %v4617_v41, %v4617_v41  ;;  %v1820_v18 = vmul.f32 %v4620_v10, %v4620_v10  ;;  %v1821_v54 = vmul.f32 %v4623_v56, %v4623_v56  ;;  %v1822_v16 = vmul.f32 %v4626_v17, %v4626_v17 }
 0x212   :  { %v1831_v1 = vadd.f32 %v1816_v43, %v1815_v5  ;;  %v1823_v61 = vmul.f32 %v4629_v28, %v4629_v28  ;;  %v1824_v19 = vmul.f32 %v4632_v39, %v4632_v39  ;;  %v1825_v63 = vmul.f32 %v4634_v24, %v4634_v24 }
 0x213   :  { %v1826_v12 = vmul.f32 %v4636_v4, %v4636_v4  ;;  %v1827_v30 = vmul.f32 %v4638_v58, %v4638_v58  ;;  %v1828_v32 = vmul.f32 %v4640_v47, %v4640_v47  ;;  %v1829_v9 = vmul.f32 %v4642_v44, %v4642_v44 }
 0x214   :  { %v1832_v11 = vadd.f32 %v1831_v1, %v1817_v29  ;;  %v1830_v13 = vmul.f32 %v4644_v21, %v4644_v21  ;;  %v1858_v49 = vlaneseq }
 0x216   :  { %v1833_v8 = vadd.f32 %v1832_v11, %v1818_v7  ;;  %v1859_v50 = vshrl.u32 %v1858_v49, 7 }
 0x218   :  { %v1834_v14 = vadd.f32 %v1833_v8, %v1819_v51  ;;  %v1860_v55 = vsub.s32 0, %v1859_v50  ;;  %v1970_v51 = vld [vmem:[%s4767_s3] ss:$0 sm:$0xff] }
 0x21a   :  { %v1835_v2 = vadd.f32 %v1834_v14, %v1820_v18 }
 0x21c   :  { %v1836_v57 = vadd.f32 %v1835_v2, %v1821_v54 }
 0x21e   :  { %v1837_v25 = vadd.f32 %v1836_v57, %v1822_v16 }
 0x220   :  { %v1838_v23 = vadd.f32 %v1837_v25, %v1823_v61 }
 0x222   :  { %v1839_v26 = vadd.f32 %v1838_v23, %v1824_v19 }
 0x224   :  { %v1840_v3 = vadd.f32 %v1839_v26, %v1825_v63 }
 0x226   :  { %v1841_v33 = vadd.f32 %v1840_v3, %v1826_v12 }
 0x228   :  { %v1842_v27 = vadd.f32 %v1841_v33, %v1827_v30 }
 0x22a   :  { %v1843_v35 = vadd.f32 %v1842_v27, %v1828_v32 }
 0x22c   :  { %v1844_v37 = vadd.f32 %v1843_v35, %v1829_v9 }
 0x22e   :  { %v1845_v40 = vadd.f32 %v1844_v37, %v1830_v13 }
 0x230   :  { %v1846_v15 = vrot.slane %v1845_v40, 4 }
 0x232   :  { %v1847_v42 = vadd.f32 %v1846_v15, %v1845_v40 }
 0x234   :  { %v1848_v20 = vrot.slane %v1847_v42, 2 }
 0x236   :  { %v1849_v36 = vadd.f32 %v1848_v20, %v1847_v42 }
 0x238   :  { %v1850_v45 = vrot.slane %v1849_v36, 1 }
 0x23a   :  { %v1851_v22 = vadd.f32 %v1850_v45, %v1849_v36 }
 0x23c   :  { %v1852_v52 = vmul.f32 0.0078125, %v1851_v22 }
 0x23e   :  { %v1854_v48 = vadd.f32 1e-05, %v1852_v52 }
 0x240   :  { %2867 = vrsqrt.f32 %v1854_v48 }
 0x24a   :  { %v2868_v46 = vpop.eup %2867 }
 0x24b   :  { %v1856_v31 = vmul.f32 %v2868_v46, %v1853_v53 }
 0x24d   :  { %v1861_v0 = vrot.slane %v1856_v31, %v1860_v55 }
 0x24f   :  { %v1863_v60 = vmul.f32 %v1861_v0, %v4605_v59  ;;  %v1864_v34 = vmul.f32 %v1861_v0, %v4608_v38  ;;  %v1865_v5 = vmul.f32 %v1861_v0, %v4611_v62  ;;  %v1866_v43 = vmul.f32 %v1861_v0, %v4614_v6 }
 0x250   :  { %v1867_v29 = vmul.f32 %v1861_v0, %v4617_v41  ;;  %v1868_v1 = vmul.f32 %v1861_v0, %v4620_v10  ;;  %v1869_v7 = vmul.f32 %v1861_v0, %v4623_v56  ;;  %v1870_v11 = vmul.f32 %v1861_v0, %v4626_v17 }
 0x251   :  { %v1871_v59 = vmul.f32 %v1861_v0, %v4629_v28  ;;  %v1872_v38 = vmul.f32 %v1861_v0, %v4632_v39  ;;  %v1873_v62 = vmul.f32 %v1861_v0, %v4634_v24  ;;  %v1874_v6 = vmul.f32 %v1861_v0, %v4636_v4 }
 0x252   :  { %v1875_v41 = vmul.f32 %v1861_v0, %v4638_v58  ;;  %v1876_v10 = vmul.f32 %v1861_v0, %v4640_v47  ;;  %v1877_v56 = vmul.f32 %v1861_v0, %v4642_v44  ;;  %v1878_v17 = vmul.f32 %v1861_v0, %v4644_v21 }
 0x253   :  { %v1886_v8 = vadd.f32 %v1970_v51, %v1863_v60  ;;  %v1887_v18 = vadd.f32 %v1970_v51, %v1864_v34  ;;  %v1888_v14 = vadd.f32 %v1970_v51, %v1865_v5  ;;  %v1889_v54 = vadd.f32 %v1970_v51, %v1866_v43 }
 0x254   :  { %v1890_v2 = vadd.f32 %v1970_v51, %v1867_v29  ;;  %v1891_v28 = vadd.f32 %v1970_v51, %v1868_v1  ;;  %v1892_v16 = vadd.f32 %v1970_v51, %v1869_v7  ;;  %v1893_v39 = vadd.f32 %v1970_v51, %v1870_v11 }
 0x255   :  { %v1894_v57 = vadd.f32 %v1970_v51, %v1871_v59  ;;  %v1895_v24 = vadd.f32 %v1970_v51, %v1872_v38  ;;  %v1896_v61 = vadd.f32 %v1970_v51, %v1873_v62  ;;  %v1897_v4 = vadd.f32 %v1970_v51, %v1874_v6 }
 0x256   :  { %v1898_v25 = vadd.f32 %v1970_v51, %v1875_v41  ;;  %v1899_v58 = vadd.f32 %v1970_v51, %v1876_v10  ;;  %v1900_v19 = vadd.f32 %v1970_v51, %v1877_v56  ;;  %v1901_v47 = vadd.f32 %v1970_v51, %v1878_v17 }
 0x257   :  { %vm1902_vm0 = vcmp.gt.f32.partialorder %v1886_v8, 0.0  ;;  %vm1903_vm1 = vcmp.gt.f32.partialorder %v1887_v18, 0.0  ;;  %vm1904_vm2 = vcmp.gt.f32.partialorder %v1888_v14, 0.0  ;;  %vm1905_vm3 = vcmp.gt.f32.partialorder %v1889_v54, 0.0 }
 0x258   :  { %vm1906_vm4 = vcmp.gt.f32.partialorder %v1890_v2, 0.0  ;;  %vm1907_vm5 = vcmp.gt.f32.partialorder %v1891_v28, 0.0  ;;  %vm1908_vm6 = vcmp.gt.f32.partialorder %v1892_v16, 0.0  ;;  %vm1909_vm7 = vcmp.gt.f32.partialorder %v1893_v39, 0.0 }
 0x259   :  { %vm1910_vm8 = vcmp.gt.f32.partialorder %v1894_v57, 0.0  ;;  %vm1911_vm9 = vcmp.gt.f32.partialorder %v1895_v24, 0.0  ;;  %vm1912_vm10 = vcmp.gt.f32.partialorder %v1896_v61, 0.0  ;;  %vm1913_vm11 = vcmp.gt.f32.partialorder %v1897_v4, 0.0 }
 0x25a   :  { %vm1914_vm12 = vcmp.gt.f32.partialorder %v1898_v25, 0.0  ;;  %vm1915_vm13 = vcmp.gt.f32.partialorder %v1899_v58, 0.0  ;;  %vm1916_vm14 = vcmp.gt.f32.partialorder %v1900_v19, 0.0  ;;  %vm1917_vm15 = vcmp.gt.f32.partialorder %v1901_v47, 0.0 }
 0x25b   :  { %v1918_v44 = vmul.f32 0.2, %v1886_v8  ;;  %v1919_v21 = vmul.f32 0.2, %v1887_v18  ;;  %v1920_v23 = vmul.f32 0.2, %v1888_v14 }
 0x25c   :  { %v1921_v63 = vmul.f32 0.2, %v1889_v54  ;;  %v1922_v26 = vmul.f32 0.2, %v1890_v2  ;;  %v1923_v12 = vmul.f32 0.2, %v1891_v28 }
 0x25d   :  { %v1924_v3 = vmul.f32 0.2, %v1892_v16  ;;  %v1925_v30 = vmul.f32 0.2, %v1893_v39  ;;  %v1926_v33 = vmul.f32 0.2, %v1894_v57  ;;  %v1934_v32 = vsel %vm1902_vm0, %v1886_v8, %v1918_v44 }
 0x25e   :  { %v1927_v27 = vmul.f32 0.2, %v1895_v24  ;;  %v1928_v9 = vmul.f32 0.2, %v1896_v61  ;;  %v1929_v35 = vmul.f32 0.2, %v1897_v4  ;;  %v1935_v13 = vsel %vm1903_vm1, %v1887_v18, %v1919_v21  ;;  %1950 = vst [vmem:[%s4768_s4] sm:$0xff] %v1934_v32 }
 0x25f   :  { %v1930_v37 = vmul.f32 0.2, %v1898_v25  ;;  %v1931_v40 = vmul.f32 0.2, %v1899_v58  ;;  %v1932_v15 = vmul.f32 0.2, %v1900_v19  ;;  %v1936_v42 = vsel %vm1904_vm2, %v1888_v14, %v1920_v23 }
 0x260   :  { %1951 = vst [vmem:[%s4768_s4 + $0x8] sm:$0xff] %v1935_v13  ;;  %v1933_v20 = vmul.f32 0.2, %v1901_v47  ;;  %v1937_v36 = vsel %vm1905_vm3, %v1889_v54, %v1921_v63  ;;  %v1938_v45 = vsel %vm1906_vm4, %v1890_v2, %v1922_v26  ;;  %v1939_v22 = vsel %vm1907_vm5, %v1891_v28, %v1923_v12  ;;  %1952 = vst [vmem:[%s4768_s4 + $0x10] sm:$0xff] %v1936_v42 }
 0x261   :  { %v1940_v52 = vsel %vm1908_vm6, %v1892_v16, %v1924_v3  ;;  %v1941_v48 = vsel %vm1909_vm7, %v1893_v39, %v1925_v30  ;;  %v1942_v49 = vsel %vm1910_vm8, %v1894_v57, %v1926_v33  ;;  %v1943_v50 = vsel %vm1911_vm9, %v1895_v24, %v1927_v27  ;;  %1953 = vst [vmem:[%s4768_s4 + $0x18] sm:$0xff] %v1937_v36 }
 0x262   :  { %1954 = vst [vmem:[%s4768_s4 + $0x20] sm:$0xff] %v1938_v45  ;;  %1955 = vst [vmem:[%s4768_s4 + $0x28] sm:$0xff] %v1939_v22  ;;  %v1944_v53 = vsel %vm1912_vm10, %v1896_v61, %v1928_v9  ;;  %v1945_v55 = vsel %vm1913_vm11, %v1897_v4, %v1929_v35  ;;  %v1946_v46 = vsel %vm1914_vm12, %v1898_v25, %v1930_v37 }
 0x263   :  { %v1947_v31 = vsel %vm1915_vm13, %v1899_v58, %v1931_v40  ;;  %1956 = vst [vmem:[%s4768_s4 + $0x30] sm:$0xff] %v1940_v52  ;;  %1957 = vst [vmem:[%s4768_s4 + $0x38] sm:$0xff] %v1941_v48  ;;  %v1948_v0 = vsel %vm1916_vm14, %v1900_v19, %v1932_v15  ;;  %v1949_v60 = vsel %vm1917_vm15, %v1901_v47, %v1933_v20 }
 0x264   :  { %1958 = vst [vmem:[%s4768_s4 + $0x40] sm:$0xff] %v1942_v49  ;;  %1959 = vst [vmem:[%s4768_s4 + $0x48] sm:$0xff] %v1943_v50 }
 0x265   :  { %1960 = vst [vmem:[%s4768_s4 + $0x50] sm:$0xff] %v1944_v53  ;;  %1961 = vst [vmem:[%s4768_s4 + $0x58] sm:$0xff] %v1945_v55 }
 0x266   :  { %1962 = vst [vmem:[%s4768_s4 + $0x60] sm:$0xff] %v1946_v46  ;;  %1963 = vst [vmem:[%s4768_s4 + $0x68] sm:$0xff] %v1947_v31 }
 0x267   :  { %1964 = vst [vmem:[%s4768_s4 + $0x70] sm:$0xff] %v1948_v0  ;;  %1965 = vst [vmem:[%s4768_s4 + $0x78] sm:$0xff] %v1949_v60 }

// kernel: discriminator_forward.7
= control target key start
LH: loop header
LB: loop body
LE: loop exit
PB: predicated region body
PF: predicated region fallthrough
CT: control target
= control target key end

     0   :  { %s2732_s1 = inlined_call_operand.vmem [shape: f32[2048,128], index: 1, kind: input, shape index: {}]   ;;  %s2733_s0 = inlined_call_operand.vmem [shape: f32[32,2048], index: 0, kind: input, shape index: {}]   ;;  %s2734_s2 = inlined_call_operand.vmem [shape: f32[1,128], index: 2, kind: input, shape index: {}]   ;;  %s2735_s3 = inlined_call_operand.vmem [shape: f32[1,128], index: 3, kind: input, shape index: {}]   ;;  %s2736_s4 = inlined_call_operand.vmem [shape: f32[32,128], index: 4, kind: output, shape index: {}]  }
   0x1   :  { %v109_v0 = vld [vmem:[%s2732_s1 + $0x80] sm:$0xff]  ;;  %v110_v1 = vld [vmem:[%s2732_s1 + $0x88] sm:$0xff]  ;;  %v111_v11 = vld [vmem:[%s2732_s1 + $0x90] sm:$0xff] }
   0x2   :  { %v141_v2 = vld [vmem:[%s2732_s1 + $0x180] sm:$0xff]  ;;  %v1471_v3 = vpack.c.bf16 %v110_v1, %v109_v0  ;;  %v142_v4 = vld [vmem:[%s2732_s1 + $0x188] sm:$0xff]  ;;  %v112_v13 = vld [vmem:[%s2732_s1 + $0x98] sm:$0xff] }
   0x3   :  { %v93_v5 = vld [vmem:[%s2732_s1] sm:$0xff]  ;;  %v94_v6 = vld [vmem:[%s2732_s1 + $0x8] sm:$0xff]  ;;  %v1503_v7 = vpack.c.bf16 %v142_v4, %v141_v2  ;;  %v143_v14 = vld [vmem:[%s2732_s1 + $0x190] sm:$0xff]  ;;  %v1475_v16 = vpack.c.bf16 %v112_v13, %v111_v11 }
   0x4   :  { %v1473_v8 = vpack.c.bf16 %v94_v6, %v93_v5  ;;  %v125_v9 = vld [vmem:[%s2732_s1 + $0x100] sm:$0xff]  ;;  %v126_v10 = vld [vmem:[%s2732_s1 + $0x108] sm:$0xff]  ;;  %1472 = vmatprep.subr.bf16.mxu0 %v1471_v3  ;;  %v144_v15 = vld [vmem:[%s2732_s1 + $0x198] sm:$0xff] }
   0x5   :  { %v1505_v12 = vpack.c.bf16 %v126_v10, %v125_v9  ;;  %1504 = vmatprep.subr.bf16.mxu1 %v1503_v7  ;;  %v1507_v17 = vpack.c.bf16 %v144_v15, %v143_v14  ;;  %v95_v18 = vld [vmem:[%s2732_s1 + $0x10] sm:$0xff]  ;;  %v96_v19 = vld [vmem:[%s2732_s1 + $0x18] sm:$0xff]  ;;  %v113_v23 = vld [vmem:[%s2732_s1 + $0xa0] sm:$0xff] }
   0x6   :  { %1474 = vmatpush3.bf16.msra.mxu0 %v1473_v8  ;;  %v127_v20 = vld [vmem:[%s2732_s1 + $0x110] sm:$0xff]  ;;  %v1477_v21 = vpack.c.bf16 %v96_v19, %v95_v18  ;;  %v128_v22 = vld [vmem:[%s2732_s1 + $0x118] sm:$0xff]  ;;  %v114_v24 = vld [vmem:[%s2732_s1 + $0xa8] sm:$0xff] }
   0x7   :  { %1506 = vmatpush3.bf16.msra.mxu1 %v1505_v12  ;;  %1476 = vmatprep.subr.bf16.mxu0 %v1475_v16  ;;  %v1509_v25 = vpack.c.bf16 %v128_v22, %v127_v20  ;;  %v1479_v26 = vpack.c.bf16 %v114_v24, %v113_v23  ;;  %v145_v27 = vld [vmem:[%s2732_s1 + $0x1a0] sm:$0xff]  ;;  %v146_v28 = vld [vmem:[%s2732_s1 + $0x1a8] sm:$0xff]  ;;  %v115_v35 = vld [vmem:[%s2732_s1 + $0xb0] sm:$0xff] }
   0x8   :  { %1508 = vmatprep.subr.bf16.mxu1 %v1507_v17  ;;  %v97_v29 = vld [vmem:[%s2732_s1 + $0x20] sm:$0xff]  ;;  %v1511_v30 = vpack.c.bf16 %v146_v28, %v145_v27  ;;  %v98_v31 = vld [vmem:[%s2732_s1 + $0x28] sm:$0xff]  ;;  %v116_v36 = vld [vmem:[%s2732_s1 + $0xb8] sm:$0xff] }
   0x9   :  { %v129_v32 = vld [vmem:[%s2732_s1 + $0x120] sm:$0xff]  ;;  %v130_v33 = vld [vmem:[%s2732_s1 + $0x128] sm:$0xff]  ;;  %v1481_v34 = vpack.c.bf16 %v98_v31, %v97_v29  ;;  %v147_v37 = vld [vmem:[%s2732_s1 + $0x1b0] sm:$0xff]  ;;  %v1483_v39 = vpack.c.bf16 %v116_v36, %v115_v35 }
   0xa   :  { %1478 = vmatpush3.bf16.msra.mxu0 %v1477_v21  ;;  %v1513_v38 = vpack.c.bf16 %v130_v33, %v129_v32  ;;  %v148_v40 = vld [vmem:[%s2732_s1 + $0x1b8] sm:$0xff]  ;;  %v99_v41 = vld [vmem:[%s2732_s1 + $0x30] sm:$0xff]  ;;  %v117_v46 = vld [vmem:[%s2732_s1 + $0xc0] sm:$0xff] }
   0xb   :  { %1510 = vmatpush3.bf16.msra.mxu1 %v1509_v25  ;;  %1480 = vmatprep.subr.bf16.mxu0 %v1479_v26  ;;  %v100_v42 = vld [vmem:[%s2732_s1 + $0x38] sm:$0xff]  ;;  %v1515_v43 = vpack.c.bf16 %v148_v40, %v147_v37  ;;  %v131_v44 = vld [vmem:[%s2732_s1 + $0x130] sm:$0xff]  ;;  %v118_v47 = vld [vmem:[%s2732_s1 + $0xc8] sm:$0xff] }
   0xc   :  { %1512 = vmatprep.subr.bf16.mxu1 %v1511_v30  ;;  %v132_v45 = vld [vmem:[%s2732_s1 + $0x138] sm:$0xff]  ;;  %v149_v48 = vld [vmem:[%s2732_s1 + $0x1c0] sm:$0xff]  ;;  %v150_v49 = vld [vmem:[%s2732_s1 + $0x1c8] sm:$0xff]  ;;  %v1485_v50 = vpack.c.bf16 %v100_v42, %v99_v41  ;;  %v1487_v52 = vpack.c.bf16 %v118_v47, %v117_v46 }
   0xd   :  { %v1517_v51 = vpack.c.bf16 %v132_v45, %v131_v44  ;;  %v101_v53 = vld [vmem:[%s2732_s1 + $0x40] sm:$0xff]  ;;  %v102_v54 = vld [vmem:[%s2732_s1 + $0x48] sm:$0xff]  ;;  %v1519_v56 = vpack.c.bf16 %v150_v49, %v149_v48  ;;  %v119_v58 = vld [vmem:[%s2732_s1 + $0xd0] sm:$0xff] }
   0xe   :  { %1482 = vmatpush3.bf16.msra.mxu0 %v1481_v34  ;;  %v133_v55 = vld [vmem:[%s2732_s1 + $0x140] sm:$0xff]  ;;  %v134_v57 = vld [vmem:[%s2732_s1 + $0x148] sm:$0xff]  ;;  %v120_v59 = vld [vmem:[%s2732_s1 + $0xd8] sm:$0xff]  ;;  %v1489_v62 = vpack.c.bf16 %v102_v54, %v101_v53 }
   0xf   :  { %1514 = vmatpush3.bf16.msra.mxu1 %v1513_v38  ;;  %1484 = vmatprep.subr.bf16.mxu0 %v1483_v39  ;;  %v151_v60 = vld [vmem:[%s2732_s1 + $0x1d0] sm:$0xff]  ;;  %v152_v61 = vld [vmem:[%s2732_s1 + $0x1d8] sm:$0xff]  ;;  %v1521_v63 = vpack.c.bf16 %v134_v57, %v133_v55  ;;  %v1491_v0 = vpack.c.bf16 %v120_v59, %v119_v58  ;;  %v121_v6 = vld [vmem:[%s2732_s1 + $0xe0] sm:$0xff] }
  0x10   :  { %1516 = vmatprep.subr.bf16.mxu1 %v1515_v43  ;;  %v103_v1 = vld [vmem:[%s2732_s1 + $0x50] sm:$0xff]  ;;  %v104_v2 = vld [vmem:[%s2732_s1 + $0x58] sm:$0xff]  ;;  %v1523_v4 = vpack.c.bf16 %v152_v61, %v151_v60  ;;  %v122_v7 = vld [vmem:[%s2732_s1 + $0xe8] sm:$0xff] }
  0x11   :  { %v135_v3 = vld [vmem:[%s2732_s1 + $0x150] sm:$0xff]  ;;  %v136_v5 = vld [vmem:[%s2732_s1 + $0x158] sm:$0xff]  ;;  %v153_v8 = vld [vmem:[%s2732_s1 + $0x1e0] sm:$0xff]  ;;  %v1493_v10 = vpack.c.bf16 %v104_v2, %v103_v1  ;;  %v1495_v14 = vpack.c.bf16 %v122_v7, %v121_v6 }
  0x12   :  { %1486 = vmatpush3.bf16.msra.mxu0 %v1485_v50  ;;  %v154_v9 = vld [vmem:[%s2732_s1 + $0x1e8] sm:$0xff]  ;;  %v105_v11 = vld [vmem:[%s2732_s1 + $0x60] sm:$0xff]  ;;  %v1525_v13 = vpack.c.bf16 %v136_v5, %v135_v3  ;;  %v32_v17 = vld [vmem:[%s2733_s0 + $0x18] sm:$0xff] }
  0x13   :  { %1518 = vmatpush3.bf16.msra.mxu1 %v1517_v51  ;;  %1488 = vmatprep.subr.bf16.mxu0 %v1487_v52  ;;  %v106_v12 = vld [vmem:[%s2732_s1 + $0x68] sm:$0xff]  ;;  %v137_v15 = vld [vmem:[%s2732_s1 + $0x160] sm:$0xff]  ;;  %v1527_v18 = vpack.c.bf16 %v154_v9, %v153_v8  ;;  %v123_v20 = vld [vmem:[%s2732_s1 + $0xf0] sm:$0xff] }
  0x14   :  { %1520 = vmatprep.subr.bf16.mxu1 %v1519_v56  ;;  %v30_v16 = vld [vmem:[%s2733_s0 + $0x8] sm:$0xff]  ;;  %v124_v21 = vld [vmem:[%s2732_s1 + $0xf8] sm:$0xff]  ;;  %v155_v22 = vld [vmem:[%s2732_s1 + $0x1f0] sm:$0xff]  ;;  %498 = vmatprep.mubr.f32.mxu1 %v32_v17  ;;  %v1497_v24 = vpack.c.bf16 %v106_v12, %v105_v11 }
  0x15   :  { %v138_v19 = vld [vmem:[%s2732_s1 + $0x168] sm:$0xff]  ;;  %413 = vmatprep.mubr.f32.mxu0 %v30_v16  ;;  %v156_v23 = vld [vmem:[%s2732_s1 + $0x1f8] sm:$0xff]  ;;  %v1499_v26 = vpack.c.bf16 %v124_v21, %v123_v20  ;;  %v107_v27 = vld [vmem:[%s2732_s1 + $0x70] sm:$0xff] }
  0x16   :  { %1490 = vmatpush3.bf16.msra.mxu0 %v1489_v62  ;;  %v1529_v25 = vpack.c.bf16 %v138_v19, %v137_v15  ;;  %v108_v28 = vld [vmem:[%s2732_s1 + $0x78] sm:$0xff]  ;;  %v139_v29 = vld [vmem:[%s2732_s1 + $0x170] sm:$0xff]  ;;  %v1531_v30 = vpack.c.bf16 %v156_v23, %v155_v22  ;;  %v173_v32 = vld [vmem:[%s2732_s1 + $0x280] sm:$0xff] }
  0x17   :  { %1522 = vmatpush3.bf16.msra.mxu1 %v1521_v63  ;;  %1492 = vmatprep.subr.bf16.mxu0 %v1491_v0  ;;  %v140_v31 = vld [vmem:[%s2732_s1 + $0x178] sm:$0xff]  ;;  %v174_v33 = vld [vmem:[%s2732_s1 + $0x288] sm:$0xff]  ;;  %v205_v34 = vld [vmem:[%s2732_s1 + $0x380] sm:$0xff]  ;;  %v1501_v36 = vpack.c.bf16 %v108_v28, %v107_v27 }
  0x18   :  { %1524 = vmatprep.subr.bf16.mxu1 %v1523_v4  ;;  %v206_v35 = vld [vmem:[%s2732_s1 + $0x388] sm:$0xff]  ;;  %v1533_v37 = vpack.c.bf16 %v140_v31, %v139_v29  ;;  %v1535_v38 = vpack.c.bf16 %v174_v33, %v173_v32  ;;  %v157_v39 = vld [vmem:[%s2732_s1 + $0x200] sm:$0xff]  ;;  %v175_v44 = vld [vmem:[%s2732_s1 + $0x290] sm:$0xff] }
  0x19   :  { %v158_v40 = vld [vmem:[%s2732_s1 + $0x208] sm:$0xff]  ;;  %v189_v41 = vld [vmem:[%s2732_s1 + $0x300] sm:$0xff]  ;;  %v1567_v42 = vpack.c.bf16 %v206_v35, %v205_v34  ;;  %v176_v45 = vld [vmem:[%s2732_s1 + $0x298] sm:$0xff] }
  0x1a   :  { %1494 = vmatpush3.bf16.msra.mxu0 %v1493_v10  ;;  %v190_v43 = vld [vmem:[%s2732_s1 + $0x308] sm:$0xff]  ;;  %v207_v46 = vld [vmem:[%s2732_s1 + $0x390] sm:$0xff]  ;;  %v208_v47 = vld [vmem:[%s2732_s1 + $0x398] sm:$0xff]  ;;  %v1537_v50 = vpack.c.bf16 %v158_v40, %v157_v39  ;;  %v1539_v52 = vpack.c.bf16 %v176_v45, %v175_v44 }
  0x1b   :  { %1526 = vmatpush3.bf16.msra.mxu1 %v1525_v13  ;;  %1496 = vmatprep.subr.bf16.mxu0 %v1495_v14  ;;  %v29_v48 = vld [vmem:[%s2733_s0] sm:$0xff]  ;;  %v31_v49 = vld [vmem:[%s2733_s0 + $0x10] sm:$0xff]  ;;  %v1569_v51 = vpack.c.bf16 %v190_v43, %v189_v41  ;;  %v160_v54 = vld [vmem:[%s2732_s1 + $0x218] sm:$0xff]  ;;  %v1571_v56 = vpack.c.bf16 %v208_v47, %v207_v46 }
  0x1c   :  { %1528 = vmatprep.subr.bf16.mxu1 %v1527_v18  ;;  %v159_v53 = vld [vmem:[%s2732_s1 + $0x210] sm:$0xff]  ;;  %v192_v57 = vld [vmem:[%s2732_s1 + $0x318] sm:$0xff]  ;;  %v177_v58 = vld [vmem:[%s2732_s1 + $0x2a0] sm:$0xff] }
  0x1d   :  { %v191_v55 = vld [vmem:[%s2732_s1 + $0x310] sm:$0xff]  ;;  %v178_v59 = vld [vmem:[%s2732_s1 + $0x2a8] sm:$0xff]  ;;  %v161_v60 = vld [vmem:[%s2732_s1 + $0x220] sm:$0xff]  ;;  %v1541_v63 = vpack.c.bf16 %v160_v54, %v159_v53 }
  0x1e   :  { %1498 = vmatpush3.bf16.msra.mxu0 %v1497_v24  ;;  %v209_v61 = vld [vmem:[%s2732_s1 + $0x3a0] sm:$0xff]  ;;  %v210_v62 = vld [vmem:[%s2732_s1 + $0x3a8] sm:$0xff]  ;;  %v48_v1 = vld [vmem:[%s2733_s0 + $0x98] sm:$0xff]  ;;  %v1573_v3 = vpack.c.bf16 %v192_v57, %v191_v55  ;;  %v1543_v4 = vpack.c.bf16 %v178_v59, %v177_v58 }
  0x1f   :  { %1530 = vmatpush3.bf16.msra.mxu1 %v1529_v25  ;;  %1500 = vmatprep.subr.bf16.mxu0 %v1499_v26  ;;  %v46_v0 = vld [vmem:[%s2733_s0 + $0x88] sm:$0xff]  ;;  %v45_v2 = vld [vmem:[%s2733_s0 + $0x80] sm:$0xff]  ;;  %v47_v7 = vld [vmem:[%s2733_s0 + $0x90] sm:$0xff]  ;;  %v1575_v8 = vpack.c.bf16 %v210_v62, %v209_v61 }
  0x20   :  { %1532 = vmatprep.subr.bf16.mxu1 %v1531_v30  ;;  %v162_v5 = vld [vmem:[%s2732_s1 + $0x228] sm:$0xff]  ;;  %v193_v6 = vld [vmem:[%s2732_s1 + $0x320] sm:$0xff]  ;;  %v179_v10 = vld [vmem:[%s2732_s1 + $0x2b0] sm:$0xff] }
  0x21   :  { %v194_v9 = vld [vmem:[%s2732_s1 + $0x328] sm:$0xff]  ;;  %v180_v11 = vld [vmem:[%s2732_s1 + $0x2b8] sm:$0xff]  ;;  %v163_v12 = vld [vmem:[%s2732_s1 + $0x230] sm:$0xff]  ;;  %v1545_v15 = vpack.c.bf16 %v162_v5, %v161_v60 }
  0x22   :  { %1502 = vmatpush3.bf16.msra.mxu0 %v1501_v36  ;;  %v211_v13 = vld [vmem:[%s2732_s1 + $0x3b0] sm:$0xff]  ;;  %v212_v14 = vld [vmem:[%s2732_s1 + $0x3b8] sm:$0xff]  ;;  %v62_v16 = vld [vmem:[%s2733_s0 + $0x108] sm:$0xff]  ;;  %v1577_v19 = vpack.c.bf16 %v194_v9, %v193_v6  ;;  %v1547_v20 = vpack.c.bf16 %v180_v11, %v179_v10 }
  0x23   :  { %1534 = vmatpush3.bf16.msra.mxu1 %v1533_v37  ;;  %1536 = vmatprep.subr.bf16.mxu0 %v1535_v38  ;;  %v64_v17 = vld [vmem:[%s2733_s0 + $0x118] sm:$0xff]  ;;  %v61_v18 = vld [vmem:[%s2733_s0 + $0x100] sm:$0xff]  ;;  %v195_v22 = vld [vmem:[%s2732_s1 + $0x330] sm:$0xff]  ;;  %v1579_v24 = vpack.c.bf16 %v212_v14, %v211_v13 }
  0x24   :  { %1568 = vmatprep.subr.bf16.mxu1 %v1567_v42  ;;  %v164_v21 = vld [vmem:[%s2732_s1 + $0x238] sm:$0xff]  ;;  %v63_v23 = vld [vmem:[%s2733_s0 + $0x110] sm:$0xff]  ;;  %v181_v26 = vld [vmem:[%s2732_s1 + $0x2c0] sm:$0xff] }
  0x25   :  { %414 = vmatmul.mubr.f32.vlgmr.msra.gmra.mrb[0].mxu0 %v29_v48  ;;  %v196_v25 = vld [vmem:[%s2732_s1 + $0x338] sm:$0xff]  ;;  %v182_v27 = vld [vmem:[%s2732_s1 + $0x2c8] sm:$0xff]  ;;  %v165_v28 = vld [vmem:[%s2732_s1 + $0x240] sm:$0xff]  ;;  %v1549_v31 = vpack.c.bf16 %v164_v21, %v163_v12 }
  0x26   :  { %499 = vmatmul.mubr.f32.vlgmr.msra.gmra.mrb[0].mxu1 %v31_v49  ;;  %1538 = vmatpush3.bf16.msra.mxu0 %v1537_v50  ;;  %v213_v29 = vld [vmem:[%s2732_s1 + $0x3c0] sm:$0xff]  ;;  %v214_v30 = vld [vmem:[%s2732_s1 + $0x3c8] sm:$0xff]  ;;  %v80_v33 = vld [vmem:[%s2733_s0 + $0x198] sm:$0xff]  ;;  %v1581_v35 = vpack.c.bf16 %v196_v25, %v195_v22  ;;  %v1551_v36 = vpack.c.bf16 %v182_v27, %v181_v26 }
  0x27   :  { %1570 = vmatpush3.bf16.msra.mxu1 %v1569_v51  ;;  %1540 = vmatprep.subr.bf16.mxu0 %v1539_v52  ;;  %v78_v32 = vld [vmem:[%s2733_s0 + $0x188] sm:$0xff]  ;;  %v77_v34 = vld [vmem:[%s2733_s0 + $0x180] sm:$0xff]  ;;  %v79_v39 = vld [vmem:[%s2733_s0 + $0x190] sm:$0xff]  ;;  %v1583_v40 = vpack.c.bf16 %v214_v30, %v213_v29 }
  0x28   :  { %1572 = vmatprep.subr.bf16.mxu1 %v1571_v56  ;;  %418 = vmatprep.mubr.f32.mxu0 %v46_v0  ;;  %v166_v37 = vld [vmem:[%s2732_s1 + $0x248] sm:$0xff]  ;;  %v197_v38 = vld [vmem:[%s2732_s1 + $0x340] sm:$0xff]  ;;  %v183_v42 = vld [vmem:[%s2732_s1 + $0x2d0] sm:$0xff] }
  0x29   :  { %503 = vmatprep.mubr.f32.mxu1 %v48_v1  ;;  %419 = vmatmul.mubr.f32.gmra.mrb[2].mxu0 %v45_v2  ;;  %v198_v41 = vld [vmem:[%s2732_s1 + $0x348] sm:$0xff]  ;;  %v184_v43 = vld [vmem:[%s2732_s1 + $0x2d8] sm:$0xff]  ;;  %v215_v44 = vld [vmem:[%s2732_s1 + $0x3d0] sm:$0xff]  ;;  %v1553_v46 = vpack.c.bf16 %v166_v37, %v165_v28 }
  0x2a   :  { %1542 = vmatpush3.bf16.msra.mxu0 %v1541_v63  ;;  %504 = vmatmul.mubr.f32.gmra.mrb[2].mxu1 %v47_v7  ;;  %v216_v45 = vld [vmem:[%s2732_s1 + $0x3d8] sm:$0xff]  ;;  %v167_v47 = vld [vmem:[%s2732_s1 + $0x250] sm:$0xff]  ;;  %v34_v48 = vld [vmem:[%s2733_s0 + $0x28] sm:$0xff]  ;;  %v1585_v49 = vpack.c.bf16 %v198_v41, %v197_v38  ;;  %v1555_v50 = vpack.c.bf16 %v184_v43, %v183_v42 }
  0x2b   :  { %1574 = vmatpush3.bf16.msra.mxu1 %v1573_v3  ;;  %1544 = vmatprep.subr.bf16.mxu0 %v1543_v4  ;;  %v168_v51 = vld [vmem:[%s2732_s1 + $0x258] sm:$0xff]  ;;  %v199_v52 = vld [vmem:[%s2732_s1 + $0x350] sm:$0xff]  ;;  %v1587_v54 = vpack.c.bf16 %v216_v45, %v215_v44  ;;  %v185_v56 = vld [vmem:[%s2732_s1 + $0x2e0] sm:$0xff] }
  0x2c   :  { %1576 = vmatprep.subr.bf16.mxu1 %v1575_v8  ;;  %423 = vmatprep.mubr.f32.mxu0 %v62_v16  ;;  %v36_v53 = vld [vmem:[%s2733_s0 + $0x38] sm:$0xff]  ;;  %v186_v57 = vld [vmem:[%s2732_s1 + $0x2e8] sm:$0xff]  ;;  %v217_v58 = vld [vmem:[%s2732_s1 + $0x3e0] sm:$0xff]  ;;  %v1557_v60 = vpack.c.bf16 %v168_v51, %v167_v47 }
  0x2d   :  { %508 = vmatprep.mubr.f32.mxu1 %v64_v17  ;;  %424 = vmatmul.mubr.f32.gmra.mrb[4].mxu0 %v61_v18  ;;  %v200_v55 = vld [vmem:[%s2732_s1 + $0x358] sm:$0xff]  ;;  %v218_v59 = vld [vmem:[%s2732_s1 + $0x3e8] sm:$0xff]  ;;  %v1559_v62 = vpack.c.bf16 %v186_v57, %v185_v56  ;;  %v169_v63 = vld [vmem:[%s2732_s1 + $0x260] sm:$0xff] }
  0x2e   :  { %1546 = vmatpush3.bf16.msra.mxu0 %v1545_v15  ;;  %509 = vmatmul.mubr.f32.gmra.mrb[4].mxu1 %v63_v23  ;;  %v1589_v61 = vpack.c.bf16 %v200_v55, %v199_v52  ;;  %v170_v0 = vld [vmem:[%s2732_s1 + $0x268] sm:$0xff]  ;;  %v201_v1 = vld [vmem:[%s2732_s1 + $0x360] sm:$0xff]  ;;  %v1591_v2 = vpack.c.bf16 %v218_v59, %v217_v58  ;;  %v187_v4 = vld [vmem:[%s2732_s1 + $0x2f0] sm:$0xff] }
  0x2f   :  { %1578 = vmatpush3.bf16.msra.mxu1 %v1577_v19  ;;  %1548 = vmatprep.subr.bf16.mxu0 %v1547_v20  ;;  %v202_v3 = vld [vmem:[%s2732_s1 + $0x368] sm:$0xff]  ;;  %v188_v5 = vld [vmem:[%s2732_s1 + $0x2f8] sm:$0xff]  ;;  %v219_v6 = vld [vmem:[%s2732_s1 + $0x3f0] sm:$0xff]  ;;  %v1561_v8 = vpack.c.bf16 %v170_v0, %v169_v63 }
  0x30   :  { %1580 = vmatprep.subr.bf16.mxu1 %v1579_v24  ;;  %428 = vmatprep.mubr.f32.mxu0 %v78_v32  ;;  %v220_v7 = vld [vmem:[%s2732_s1 + $0x3f8] sm:$0xff]  ;;  %v1593_v9 = vpack.c.bf16 %v202_v3, %v201_v1  ;;  %v1563_v10 = vpack.c.bf16 %v188_v5, %v187_v4  ;;  %v171_v11 = vld [vmem:[%s2732_s1 + $0x270] sm:$0xff]  ;;  %v237_v16 = vld [vmem:[%s2732_s1 + $0x480] sm:$0xff] }
  0x31   :  { %513 = vmatprep.mubr.f32.mxu1 %v80_v33  ;;  %429 = vmatmul.mubr.f32.gmra.mrb[6].mxu0 %v77_v34  ;;  %v172_v12 = vld [vmem:[%s2732_s1 + $0x278] sm:$0xff]  ;;  %v203_v13 = vld [vmem:[%s2732_s1 + $0x370] sm:$0xff]  ;;  %v1595_v14 = vpack.c.bf16 %v220_v7, %v219_v6  ;;  %v238_v17 = vld [vmem:[%s2732_s1 + $0x488] sm:$0xff] }
  0x32   :  { %1550 = vmatpush3.bf16.msra.mxu0 %v1549_v31  ;;  %514 = vmatmul.mubr.f32.gmra.mrb[6].mxu1 %v79_v39  ;;  %v204_v15 = vld [vmem:[%s2732_s1 + $0x378] sm:$0xff]  ;;  %v269_v18 = vld [vmem:[%s2732_s1 + $0x580] sm:$0xff]  ;;  %v270_v19 = vld [vmem:[%s2732_s1 + $0x588] sm:$0xff]  ;;  %v1565_v20 = vpack.c.bf16 %v172_v12, %v171_v11  ;;  %v1599_v22 = vpack.c.bf16 %v238_v17, %v237_v16 }
  0x33   :  { %1582 = vmatpush3.bf16.msra.mxu1 %v1581_v35  ;;  %1552 = vmatprep.subr.bf16.mxu0 %v1551_v36  ;;  %v1597_v21 = vpack.c.bf16 %v204_v15, %v203_v13  ;;  %v221_v23 = vld [vmem:[%s2732_s1 + $0x400] sm:$0xff]  ;;  %v222_v24 = vld [vmem:[%s2732_s1 + $0x408] sm:$0xff]  ;;  %v1631_v25 = vpack.c.bf16 %v270_v19, %v269_v18  ;;  %v239_v29 = vld [vmem:[%s2732_s1 + $0x490] sm:$0xff] }
  0x34   :  { %1584 = vmatprep.subr.bf16.mxu1 %v1583_v40  ;;  %583 = vmatprep.mubr.f32.mxu0 %v34_v48  ;;  %v253_v26 = vld [vmem:[%s2732_s1 + $0x500] sm:$0xff]  ;;  %v254_v27 = vld [vmem:[%s2732_s1 + $0x508] sm:$0xff]  ;;  %v240_v30 = vld [vmem:[%s2732_s1 + $0x498] sm:$0xff]  ;;  %v1601_v31 = vpack.c.bf16 %v222_v24, %v221_v23 }
  0x35   :  { %668 = vmatprep.mubr.f32.mxu1 %v36_v53  ;;  %v33_v28 = vld [vmem:[%s2733_s0 + $0x20] sm:$0xff]  ;;  %v35_v32 = vld [vmem:[%s2733_s0 + $0x30] sm:$0xff]  ;;  %v272_v34 = vld [vmem:[%s2732_s1 + $0x598] sm:$0xff]  ;;  %v1633_v35 = vpack.c.bf16 %v254_v27, %v253_v26  ;;  %v1603_v40 = vpack.c.bf16 %v240_v30, %v239_v29 }
  0x36   :  { %1554 = vmatpush3.bf16.msra.mxu0 %v1553_v46  ;;  %v271_v33 = vld [vmem:[%s2732_s1 + $0x590] sm:$0xff]  ;;  %v50_v36 = vld [vmem:[%s2733_s0 + $0xa8] sm:$0xff]  ;;  %v224_v38 = vld [vmem:[%s2732_s1 + $0x418] sm:$0xff] }
  0x37   :  { %1586 = vmatpush3.bf16.msra.mxu1 %v1585_v49  ;;  %1556 = vmatprep.subr.bf16.mxu0 %v1555_v50  ;;  %v223_v37 = vld [vmem:[%s2732_s1 + $0x410] sm:$0xff]  ;;  %v49_v39 = vld [vmem:[%s2733_s0 + $0xa0] sm:$0xff]  ;;  %v256_v42 = vld [vmem:[%s2732_s1 + $0x518] sm:$0xff]  ;;  %v1635_v44 = vpack.c.bf16 %v272_v34, %v271_v33 }
  0x38   :  { %1588 = vmatprep.subr.bf16.mxu1 %v1587_v54  ;;  %v255_v41 = vld [vmem:[%s2732_s1 + $0x510] sm:$0xff]  ;;  %v52_v43 = vld [vmem:[%s2733_s0 + $0xb8] sm:$0xff]  ;;  %v241_v45 = vld [vmem:[%s2732_s1 + $0x4a0] sm:$0xff]  ;;  %v1605_v47 = vpack.c.bf16 %v224_v38, %v223_v37 }
  0x39   :  { %v242_v46 = vld [vmem:[%s2732_s1 + $0x4a8] sm:$0xff]  ;;  %v51_v48 = vld [vmem:[%s2733_s0 + $0xb0] sm:$0xff]  ;;  %v273_v49 = vld [vmem:[%s2732_s1 + $0x5a0] sm:$0xff]  ;;  %v1637_v51 = vpack.c.bf16 %v256_v42, %v255_v41 }
  0x3a   :  { %1558 = vmatpush3.bf16.msra.mxu0 %v1557_v60  ;;  %v274_v50 = vld [vmem:[%s2732_s1 + $0x5a8] sm:$0xff]  ;;  %v225_v53 = vld [vmem:[%s2732_s1 + $0x420] sm:$0xff]  ;;  %v1607_v56 = vpack.c.bf16 %v242_v46, %v241_v45  ;;  %v68_v57 = vld [vmem:[%s2733_s0 + $0x138] sm:$0xff] }
  0x3b   :  { %1590 = vmatpush3.bf16.msra.mxu1 %v1589_v61  ;;  %1560 = vmatprep.subr.bf16.mxu0 %v1559_v62  ;;  %v66_v52 = vld [vmem:[%s2733_s0 + $0x128] sm:$0xff]  ;;  %v65_v55 = vld [vmem:[%s2733_s0 + $0x120] sm:$0xff]  ;;  %v1639_v60 = vpack.c.bf16 %v274_v50, %v273_v49  ;;  %v67_v61 = vld [vmem:[%s2733_s0 + $0x130] sm:$0xff] }
  0x3c   :  { %1592 = vmatprep.subr.bf16.mxu1 %v1591_v2  ;;  %v226_v54 = vld [vmem:[%s2732_s1 + $0x428] sm:$0xff]  ;;  %v257_v58 = vld [vmem:[%s2732_s1 + $0x520] sm:$0xff]  ;;  %v243_v62 = vld [vmem:[%s2732_s1 + $0x4b0] sm:$0xff] }
  0x3d   :  { %v258_v59 = vld [vmem:[%s2732_s1 + $0x528] sm:$0xff]  ;;  %v244_v63 = vld [vmem:[%s2732_s1 + $0x4b8] sm:$0xff]  ;;  %v1609_v0 = vpack.c.bf16 %v226_v54, %v225_v53  ;;  %v275_v2 = vld [vmem:[%s2732_s1 + $0x5b0] sm:$0xff] }
  0x3e   :  { %1562 = vmatpush3.bf16.msra.mxu0 %v1561_v8  ;;  %v82_v1 = vld [vmem:[%s2733_s0 + $0x1a8] sm:$0xff]  ;;  %v276_v3 = vld [vmem:[%s2732_s1 + $0x5b8] sm:$0xff]  ;;  %v1641_v4 = vpack.c.bf16 %v258_v59, %v257_v58  ;;  %v227_v5 = vld [vmem:[%s2732_s1 + $0x430] sm:$0xff]  ;;  %v1611_v8 = vpack.c.bf16 %v244_v63, %v243_v62 }
  0x3f   :  { %1594 = vmatpush3.bf16.msra.mxu1 %v1593_v9  ;;  %1564 = vmatprep.subr.bf16.mxu0 %v1563_v10  ;;  %v228_v6 = vld [vmem:[%s2732_s1 + $0x438] sm:$0xff]  ;;  %v259_v7 = vld [vmem:[%s2732_s1 + $0x530] sm:$0xff]  ;;  %v245_v10 = vld [vmem:[%s2732_s1 + $0x4c0] sm:$0xff]  ;;  %v1643_v13 = vpack.c.bf16 %v276_v3, %v275_v2 }
  0x40   :  { %1596 = vmatprep.subr.bf16.mxu1 %v1595_v14  ;;  %v260_v9 = vld [vmem:[%s2732_s1 + $0x538] sm:$0xff]  ;;  %v246_v11 = vld [vmem:[%s2732_s1 + $0x4c8] sm:$0xff]  ;;  %v277_v14 = vld [vmem:[%s2732_s1 + $0x5c0] sm:$0xff]  ;;  %v1613_v17 = vpack.c.bf16 %v228_v6, %v227_v5 }
  0x41   :  { %v84_v12 = vld [vmem:[%s2733_s0 + $0x1b8] sm:$0xff]  ;;  %v278_v15 = vld [vmem:[%s2732_s1 + $0x5c8] sm:$0xff]  ;;  %v81_v16 = vld [vmem:[%s2733_s0 + $0x1a0] sm:$0xff]  ;;  %v1645_v19 = vpack.c.bf16 %v260_v9, %v259_v7 }
  0x42   :  { %1566 = vmatpush3.bf16.msra.mxu0 %v1565_v20  ;;  %v83_v18 = vld [vmem:[%s2733_s0 + $0x1b0] sm:$0xff]  ;;  %v1615_v20 = vpack.c.bf16 %v246_v11, %v245_v10  ;;  %v261_v23 = vld [vmem:[%s2732_s1 + $0x540] sm:$0xff]  ;;  %v1647_v24 = vpack.c.bf16 %v278_v15, %v277_v14  ;;  %v248_v27 = vld [vmem:[%s2732_s1 + $0x4d8] sm:$0xff] }
  0x43   :  { %1598 = vmatpush3.bf16.msra.mxu1 %v1597_v21  ;;  %1600 = vmatprep.subr.bf16.mxu0 %v1599_v22  ;;  %v229_v21 = vld [vmem:[%s2732_s1 + $0x440] sm:$0xff]  ;;  %v230_v22 = vld [vmem:[%s2732_s1 + $0x448] sm:$0xff]  ;;  %v247_v26 = vld [vmem:[%s2732_s1 + $0x4d0] sm:$0xff] }
  0x44   :  { %1632 = vmatprep.subr.bf16.mxu1 %v1631_v25  ;;  %v262_v25 = vld [vmem:[%s2732_s1 + $0x548] sm:$0xff]  ;;  %v280_v29 = vld [vmem:[%s2732_s1 + $0x5d8] sm:$0xff]  ;;  %v1619_v34 = vpack.c.bf16 %v248_v27, %v247_v26  ;;  %v263_v37 = vld [vmem:[%s2732_s1 + $0x550] sm:$0xff] }
  0x45   :  { %584 = vmatmul.mubr.f32.vlgmr.msra.gmra.mrb[8].mxu0 %v33_v28  ;;  %v279_v28 = vld [vmem:[%s2732_s1 + $0x5d0] sm:$0xff]  ;;  %v38_v30 = vld [vmem:[%s2733_s0 + $0x48] sm:$0xff]  ;;  %v1649_v33 = vpack.c.bf16 %v262_v25, %v261_v23  ;;  %v281_v42 = vld [vmem:[%s2732_s1 + $0x5e0] sm:$0xff] }
  0x46   :  { %1602 = vmatpush3.bf16.msra.mxu0 %v1601_v31  ;;  %669 = vmatmul.mubr.f32.vlgmr.msra.gmra.mrb[8].mxu1 %v35_v32  ;;  %v1617_v31 = vpack.c.bf16 %v230_v22, %v229_v21  ;;  %v40_v32 = vld [vmem:[%s2733_s0 + $0x58] sm:$0xff]  ;;  %v1651_v38 = vpack.c.bf16 %v280_v29, %v279_v28  ;;  %v250_v41 = vld [vmem:[%s2732_s1 + $0x4e8] sm:$0xff]  ;;  %v265_v49 = vld [vmem:[%s2732_s1 + $0x560] sm:$0xff] }
  0x47   :  { %1634 = vmatpush3.bf16.msra.mxu1 %v1633_v35  ;;  %588 = vmatprep.mubr.f32.mxu0 %v50_v36  ;;  %v231_v35 = vld [vmem:[%s2732_s1 + $0x450] sm:$0xff]  ;;  %v232_v36 = vld [vmem:[%s2732_s1 + $0x458] sm:$0xff]  ;;  %v333_v2 = vld [vmem:[%s2732_s1 + $0x780] sm:$0xff] }
  0x48   :  { %1604 = vmatprep.subr.bf16.mxu0 %v1603_v40  ;;  %673 = vmatprep.mubr.f32.mxu1 %v52_v43  ;;  %v249_v40 = vld [vmem:[%s2732_s1 + $0x4e0] sm:$0xff]  ;;  %v282_v43 = vld [vmem:[%s2732_s1 + $0x5e8] sm:$0xff]  ;;  %v252_v53 = vld [vmem:[%s2732_s1 + $0x4f8] sm:$0xff] }
  0x49   :  { %589 = vmatmul.mubr.f32.gmra.mrb[10].mxu0 %v49_v39  ;;  %1636 = vmatprep.subr.bf16.mxu1 %v1635_v44  ;;  %v264_v39 = vld [vmem:[%s2732_s1 + $0x558] sm:$0xff]  ;;  %v1621_v44 = vpack.c.bf16 %v232_v36, %v231_v35  ;;  %v1623_v46 = vpack.c.bf16 %v250_v41, %v249_v40  ;;  %v1655_v50 = vpack.c.bf16 %v282_v43, %v281_v42  ;;  %v283_v54 = vld [vmem:[%s2732_s1 + $0x5f0] sm:$0xff]  ;;  %v334_v3 = vld [vmem:[%s2732_s1 + $0x788] sm:$0xff] }
  0x4a   :  { %1606 = vmatpush3.bf16.msra.mxu0 %v1605_v47  ;;  %674 = vmatmul.mubr.f32.gmra.mrb[10].mxu1 %v51_v48  ;;  %v1653_v45 = vpack.c.bf16 %v264_v39, %v263_v37  ;;  %v233_v47 = vld [vmem:[%s2732_s1 + $0x460] sm:$0xff]  ;;  %v234_v48 = vld [vmem:[%s2732_s1 + $0x468] sm:$0xff]  ;;  %v235_v59 = vld [vmem:[%s2732_s1 + $0x470] sm:$0xff]  ;;  %v1695_v9 = vpack.c.bf16 %v334_v3, %v333_v2 }
  0x4b   :  { %1638 = vmatpush3.bf16.msra.mxu1 %v1637_v51  ;;  %593 = vmatprep.mubr.f32.mxu0 %v66_v52  ;;  %v266_v51 = vld [vmem:[%s2732_s1 + $0x568] sm:$0xff]  ;;  %v251_v52 = vld [vmem:[%s2732_s1 + $0x4f0] sm:$0xff]  ;;  %v268_v63 = vld [vmem:[%s2732_s1 + $0x578] sm:$0xff] }
  0x4c   :  { %1608 = vmatprep.subr.bf16.mxu0 %v1607_v56  ;;  %678 = vmatprep.mubr.f32.mxu1 %v68_v57  ;;  %v1625_v56 = vpack.c.bf16 %v234_v48, %v233_v47  ;;  %v1657_v57 = vpack.c.bf16 %v266_v51, %v265_v49  ;;  %v1627_v58 = vpack.c.bf16 %v252_v53, %v251_v52  ;;  %v285_v7 = vld [vmem:[%s2732_s1 + $0x600] sm:$0xff]  ;;  %v318_v11 = vld [vmem:[%s2732_s1 + $0x708] sm:$0xff]  ;;  %v304_v14 = vld [vmem:[%s2732_s1 + $0x698] sm:$0xff] }
  0x4d   :  { %594 = vmatmul.mubr.f32.gmra.mrb[12].mxu0 %v65_v55  ;;  %1640 = vmatprep.subr.bf16.mxu1 %v1639_v60  ;;  %v284_v55 = vld [vmem:[%s2732_s1 + $0x5f8] sm:$0xff]  ;;  %v317_v10 = vld [vmem:[%s2732_s1 + $0x700] sm:$0xff]  ;;  %v287_v21 = vld [vmem:[%s2732_s1 + $0x610] sm:$0xff] }
  0x4e   :  { %1610 = vmatpush3.bf16.msra.mxu0 %v1609_v0  ;;  %679 = vmatmul.mubr.f32.gmra.mrb[12].mxu1 %v67_v61  ;;  %v236_v60 = vld [vmem:[%s2732_s1 + $0x478] sm:$0xff]  ;;  %v267_v61 = vld [vmem:[%s2732_s1 + $0x570] sm:$0xff]  ;;  %v1659_v62 = vpack.c.bf16 %v284_v55, %v283_v54  ;;  %v301_v0 = vld [vmem:[%s2732_s1 + $0x680] sm:$0xff] }
  0x4f   :  { %1642 = vmatpush3.bf16.msra.mxu1 %v1641_v4  ;;  %598 = vmatprep.mubr.f32.mxu0 %v82_v1  ;;  %v302_v1 = vld [vmem:[%s2732_s1 + $0x688] sm:$0xff]  ;;  %v1629_v4 = vpack.c.bf16 %v236_v60, %v235_v59  ;;  %v1661_v5 = vpack.c.bf16 %v268_v63, %v267_v61  ;;  %v288_v22 = vld [vmem:[%s2732_s1 + $0x618] sm:$0xff]  ;;  %v53_v23 = vld [vmem:[%s2733_s0 + $0xc0] sm:$0xff] }
  0x50   :  { %1612 = vmatprep.subr.bf16.mxu0 %v1611_v8  ;;  %683 = vmatprep.mubr.f32.mxu1 %v84_v12  ;;  %v1663_v6 = vpack.c.bf16 %v302_v1, %v301_v0  ;;  %v286_v8 = vld [vmem:[%s2732_s1 + $0x608] sm:$0xff]  ;;  %v37_v12 = vld [vmem:[%s2733_s0 + $0x40] sm:$0xff]  ;;  %v319_v25 = vld [vmem:[%s2732_s1 + $0x710] sm:$0xff] }
  0x51   :  { %599 = vmatmul.mubr.f32.gmra.mrb[14].mxu0 %v81_v16  ;;  %1644 = vmatprep.subr.bf16.mxu1 %v1643_v13  ;;  %v303_v13 = vld [vmem:[%s2732_s1 + $0x690] sm:$0xff]  ;;  %v1665_v15 = vpack.c.bf16 %v286_v8, %v285_v7  ;;  %v320_v26 = vld [vmem:[%s2732_s1 + $0x718] sm:$0xff]  ;;  %v305_v29 = vld [vmem:[%s2732_s1 + $0x6a0] sm:$0xff] }
  0x52   :  { %1614 = vmatpush3.bf16.msra.mxu0 %v1613_v17  ;;  %684 = vmatmul.mubr.f32.gmra.mrb[14].mxu1 %v83_v18  ;;  %v39_v16 = vld [vmem:[%s2733_s0 + $0x50] sm:$0xff]  ;;  %v336_v18 = vld [vmem:[%s2732_s1 + $0x798] sm:$0xff]  ;;  %v1701_v35 = vpack.c.bf16 %v320_v26, %v319_v25  ;;  %v70_v36 = vld [vmem:[%s2733_s0 + $0x148] sm:$0xff] }
  0x53   :  { %1646 = vmatpush3.bf16.msra.mxu1 %v1645_v19  ;;  %1616 = vmatprep.subr.bf16.mxu0 %v1615_v20  ;;  %v335_v17 = vld [vmem:[%s2732_s1 + $0x790] sm:$0xff]  ;;  %v1697_v19 = vpack.c.bf16 %v318_v11, %v317_v10  ;;  %v54_v20 = vld [vmem:[%s2733_s0 + $0xc8] sm:$0xff]  ;;  %v56_v27 = vld [vmem:[%s2733_s0 + $0xd8] sm:$0xff] }
  0x54   :  { %1648 = vmatprep.subr.bf16.mxu1 %v1647_v24  ;;  %753 = vmatprep.mubr.f32.mxu0 %v38_v30  ;;  %v1667_v24 = vpack.c.bf16 %v304_v14, %v303_v13  ;;  %v1699_v28 = vpack.c.bf16 %v336_v18, %v335_v17  ;;  %v306_v30 = vld [vmem:[%s2732_s1 + $0x6a8] sm:$0xff]  ;;  %v289_v37 = vld [vmem:[%s2732_s1 + $0x620] sm:$0xff]  ;;  %v72_v41 = vld [vmem:[%s2733_s0 + $0x158] sm:$0xff] }
  0x55   :  { %838 = vmatprep.mubr.f32.mxu1 %v40_v32  ;;  %v55_v32 = vld [vmem:[%s2733_s0 + $0xd0] sm:$0xff]  ;;  %v69_v39 = vld [vmem:[%s2733_s0 + $0x140] sm:$0xff]  ;;  %v1671_v40 = vpack.c.bf16 %v306_v30, %v305_v29  ;;  %v322_v43 = vld [vmem:[%s2732_s1 + $0x728] sm:$0xff] }
  0x56   :  { %1618 = vmatpush3.bf16.msra.mxu0 %v1617_v31  ;;  %v1669_v31 = vpack.c.bf16 %v288_v22, %v287_v21  ;;  %v321_v42 = vld [vmem:[%s2732_s1 + $0x720] sm:$0xff]  ;;  %v308_v47 = vld [vmem:[%s2732_s1 + $0x6b8] sm:$0xff]  ;;  %v86_v49 = vld [vmem:[%s2733_s0 + $0x1c8] sm:$0xff] }
  0x57   :  { %1650 = vmatpush3.bf16.msra.mxu1 %v1649_v33  ;;  %1620 = vmatprep.subr.bf16.mxu0 %v1619_v34  ;;  %v337_v33 = vld [vmem:[%s2732_s1 + $0x7a0] sm:$0xff]  ;;  %v338_v34 = vld [vmem:[%s2732_s1 + $0x7a8] sm:$0xff]  ;;  %v340_v51 = vld [vmem:[%s2732_s1 + $0x7b8] sm:$0xff]  ;;  %v1705_v52 = vpack.c.bf16 %v322_v43, %v321_v42 }
  0x58   :  { %1652 = vmatprep.subr.bf16.mxu1 %v1651_v38  ;;  %v290_v38 = vld [vmem:[%s2732_s1 + $0x628] sm:$0xff]  ;;  %v291_v53 = vld [vmem:[%s2732_s1 + $0x630] sm:$0xff]  ;;  %v292_v54 = vld [vmem:[%s2732_s1 + $0x638] sm:$0xff] }
  0x59   :  { %v1673_v48 = vpack.c.bf16 %v290_v38, %v289_v37  ;;  %v323_v55 = vld [vmem:[%s2732_s1 + $0x730] sm:$0xff]  ;;  %v310_v59 = vld [vmem:[%s2732_s1 + $0x6c8] sm:$0xff]  ;;  %v88_v60 = vld [vmem:[%s2733_s0 + $0x1d8] sm:$0xff]  ;;  %v1677_v1 = vpack.c.bf16 %v292_v54, %v291_v53 }
  0x5a   :  { %1622 = vmatpush3.bf16.msra.mxu0 %v1621_v44  ;;  %v1703_v44 = vpack.c.bf16 %v338_v34, %v337_v33  ;;  %v342_v63 = vld [vmem:[%s2732_s1 + $0x7c8] sm:$0xff]  ;;  %v85_v0 = vld [vmem:[%s2733_s0 + $0x1c0] sm:$0xff]  ;;  %v87_v2 = vld [vmem:[%s2733_s0 + $0x1d0] sm:$0xff] }
  0x5b   :  { %1654 = vmatpush3.bf16.msra.mxu1 %v1653_v45  ;;  %1624 = vmatprep.subr.bf16.mxu0 %v1623_v46  ;;  %v71_v45 = vld [vmem:[%s2733_s0 + $0x150] sm:$0xff]  ;;  %v325_v7 = vld [vmem:[%s2732_s1 + $0x740] sm:$0xff]  ;;  %v312_v11 = vld [vmem:[%s2732_s1 + $0x6d8] sm:$0xff] }
  0x5c   :  { %1656 = vmatprep.subr.bf16.mxu1 %v1655_v50  ;;  %v307_v46 = vld [vmem:[%s2732_s1 + $0x6b0] sm:$0xff]  ;;  %v344_v13 = vld [vmem:[%s2732_s1 + $0x7d8] sm:$0xff]  ;;  %v42_v14 = vld [vmem:[%s2733_s0 + $0x68] sm:$0xff] }
  0x5d   :  { %v339_v50 = vld [vmem:[%s2732_s1 + $0x7b0] sm:$0xff]  ;;  %v314_v25 = vld [vmem:[%s2732_s1 + $0x6e8] sm:$0xff]  ;;  %v345_v26 = vld [vmem:[%s2732_s1 + $0x7e0] sm:$0xff] }
  0x5e   :  { %1626 = vmatpush3.bf16.msra.mxu0 %v1625_v56  ;;  %v1675_v56 = vpack.c.bf16 %v308_v47, %v307_v46  ;;  %v1707_v61 = vpack.c.bf16 %v340_v51, %v339_v50  ;;  %v311_v10 = vld [vmem:[%s2732_s1 + $0x6d0] sm:$0xff]  ;;  %v329_v33 = vld [vmem:[%s2732_s1 + $0x760] sm:$0xff]  ;;  %v316_v37 = vld [vmem:[%s2732_s1 + $0x6f8] sm:$0xff] }
  0x5f   :  { %1658 = vmatpush3.bf16.msra.mxu1 %v1657_v57  ;;  %1628 = vmatprep.subr.bf16.mxu0 %v1627_v58  ;;  %v324_v57 = vld [vmem:[%s2732_s1 + $0x738] sm:$0xff]  ;;  %v309_v58 = vld [vmem:[%s2732_s1 + $0x6c0] sm:$0xff]  ;;  %v1683_v18 = vpack.c.bf16 %v312_v11, %v311_v10  ;;  %v327_v21 = vld [vmem:[%s2732_s1 + $0x750] sm:$0xff] }
  0x60   :  { %1660 = vmatprep.subr.bf16.mxu1 %v1659_v62  ;;  %v341_v62 = vld [vmem:[%s2732_s1 + $0x7c0] sm:$0xff]  ;;  %v1709_v3 = vpack.c.bf16 %v324_v57, %v323_v55  ;;  %v347_v38 = vld [vmem:[%s2732_s1 + $0x7f0] sm:$0xff]  ;;  %v332_v47 = vld [vmem:[%s2732_s1 + $0x778] sm:$0xff] }
  0x61   :  { %v1711_v8 = vpack.c.bf16 %v342_v63, %v341_v62  ;;  %v299_v43 = vld [vmem:[%s2732_s1 + $0x670] sm:$0xff]  ;;  %v41_v50 = vld [vmem:[%s2733_s0 + $0x60] sm:$0xff]  ;;  %v60_v53 = vld [vmem:[%s2733_s0 + $0xf8] sm:$0xff] }
  0x62   :  { %1630 = vmatpush3.bf16.msra.mxu0 %v1629_v4  ;;  %v1679_v4 = vpack.c.bf16 %v310_v59, %v309_v58  ;;  %v331_v46 = vld [vmem:[%s2732_s1 + $0x770] sm:$0xff]  ;;  %v57_v54 = vld [vmem:[%s2733_s0 + $0xe0] sm:$0xff]  ;;  %v76_v57 = vld [vmem:[%s2733_s0 + $0x178] sm:$0xff] }
  0x63   :  { %1662 = vmatpush3.bf16.msra.mxu1 %v1661_v5  ;;  %1664 = vmatprep.subr.bf16.mxu0 %v1663_v6  ;;  %v293_v5 = vld [vmem:[%s2732_s1 + $0x640] sm:$0xff]  ;;  %v294_v6 = vld [vmem:[%s2732_s1 + $0x648] sm:$0xff]  ;;  %v43_v51 = vld [vmem:[%s2733_s0 + $0x70] sm:$0xff] }
  0x64   :  { %1696 = vmatprep.subr.bf16.mxu1 %v1695_v9  ;;  %v326_v9 = vld [vmem:[%s2732_s1 + $0x748] sm:$0xff]  ;;  %v59_v55 = vld [vmem:[%s2733_s0 + $0xf0] sm:$0xff]  ;;  %v73_v58 = vld [vmem:[%s2733_s0 + $0x160] sm:$0xff] }
  0x65   :  { %754 = vmatmul.mubr.f32.vlgmr.msra.gmra.mrb[16].mxu0 %v37_v12  ;;  %v343_v12 = vld [vmem:[%s2732_s1 + $0x7d0] sm:$0xff]  ;;  %v1713_v17 = vpack.c.bf16 %v326_v9, %v325_v7  ;;  %v89_v62 = vld [vmem:[%s2733_s0 + $0x1e0] sm:$0xff] }
  0x66   :  { %1666 = vmatpush3.bf16.msra.mxu0 %v1665_v15  ;;  %839 = vmatmul.mubr.f32.vlgmr.msra.gmra.mrb[16].mxu1 %v39_v16  ;;  %v1681_v15 = vpack.c.bf16 %v294_v6, %v293_v5  ;;  %v44_v16 = vld [vmem:[%s2733_s0 + $0x78] sm:$0xff]  ;;  %v1715_v22 = vpack.c.bf16 %v344_v13, %v343_v12  ;;  %v75_v59 = vld [vmem:[%s2733_s0 + $0x170] sm:$0xff] }
  0x67   :  { %1698 = vmatpush3.bf16.msra.mxu1 %v1697_v19  ;;  %758 = vmatprep.mubr.f32.mxu0 %v54_v20  ;;  %v295_v19 = vld [vmem:[%s2732_s1 + $0x650] sm:$0xff]  ;;  %v296_v20 = vld [vmem:[%s2732_s1 + $0x658] sm:$0xff] }
  0x68   :  { %1668 = vmatprep.subr.bf16.mxu0 %v1667_v24  ;;  %843 = vmatprep.mubr.f32.mxu1 %v56_v27  ;;  %v313_v24 = vld [vmem:[%s2732_s1 + $0x6e0] sm:$0xff]  ;;  %v346_v27 = vld [vmem:[%s2732_s1 + $0x7e8] sm:$0xff]  ;;  %v91_v63 = vld [vmem:[%s2733_s0 + $0x1f0] sm:$0xff] }
  0x69   :  { %759 = vmatmul.mubr.f32.gmra.mrb[18].mxu0 %v53_v23  ;;  %1700 = vmatprep.subr.bf16.mxu1 %v1699_v28  ;;  %v328_v23 = vld [vmem:[%s2732_s1 + $0x758] sm:$0xff]  ;;  %v1685_v28 = vpack.c.bf16 %v296_v20, %v295_v19  ;;  %v1687_v30 = vpack.c.bf16 %v314_v25, %v313_v24  ;;  %v1719_v34 = vpack.c.bf16 %v346_v27, %v345_v26 }
  0x6a   :  { %1670 = vmatpush3.bf16.msra.mxu0 %v1669_v31  ;;  %844 = vmatmul.mubr.f32.gmra.mrb[18].mxu1 %v55_v32  ;;  %v1717_v29 = vpack.c.bf16 %v328_v23, %v327_v21  ;;  %v297_v31 = vld [vmem:[%s2732_s1 + $0x660] sm:$0xff]  ;;  %v298_v32 = vld [vmem:[%s2732_s1 + $0x668] sm:$0xff] }
  0x6b   :  { %1702 = vmatpush3.bf16.msra.mxu1 %v1701_v35  ;;  %763 = vmatprep.mubr.f32.mxu0 %v70_v36  ;;  %v330_v35 = vld [vmem:[%s2732_s1 + $0x768] sm:$0xff]  ;;  %v315_v36 = vld [vmem:[%s2732_s1 + $0x6f0] sm:$0xff] }
  0x6c   :  { %1672 = vmatprep.subr.bf16.mxu0 %v1671_v40  ;;  %848 = vmatprep.mubr.f32.mxu1 %v72_v41  ;;  %v1689_v40 = vpack.c.bf16 %v298_v32, %v297_v31  ;;  %v1721_v41 = vpack.c.bf16 %v330_v35, %v329_v33  ;;  %v1691_v42 = vpack.c.bf16 %v316_v37, %v315_v36 }
  0x6d   :  { %764 = vmatmul.mubr.f32.gmra.mrb[20].mxu0 %v69_v39  ;;  %1704 = vmatprep.subr.bf16.mxu1 %v1703_v44  ;;  %v348_v39 = vld [vmem:[%s2732_s1 + $0x7f8] sm:$0xff] }
  0x6e   :  { %1674 = vmatpush3.bf16.msra.mxu0 %v1673_v48  ;;  %849 = vmatmul.mubr.f32.gmra.mrb[20].mxu1 %v71_v45  ;;  %v300_v44 = vld [vmem:[%s2732_s1 + $0x678] sm:$0xff]  ;;  %v1723_v45 = vpack.c.bf16 %v348_v39, %v347_v38 }
  0x6f   :  { %1706 = vmatpush3.bf16.msra.mxu1 %v1705_v52  ;;  %768 = vmatprep.mubr.f32.mxu0 %v86_v49  ;;  %v1693_v48 = vpack.c.bf16 %v300_v44, %v299_v43  ;;  %v1725_v49 = vpack.c.bf16 %v332_v47, %v331_v46  ;;  %v58_v52 = vld [vmem:[%s2733_s0 + $0xe8] sm:$0xff] }
  0x70   :  { %1676 = vmatprep.subr.bf16.mxu0 %v1675_v56  ;;  %853 = vmatprep.mubr.f32.mxu1 %v88_v60  ;;  %v74_v56 = vld [vmem:[%s2733_s0 + $0x168] sm:$0xff] }
  0x71   :  { %769 = vmatmul.mubr.f32.gmra.mrb[22].mxu0 %v85_v0  ;;  %1708 = vmatprep.subr.bf16.mxu1 %v1707_v61  ;;  %v90_v60 = vld [vmem:[%s2733_s0 + $0x1e8] sm:$0xff]  ;;  %v92_v61 = vld [vmem:[%s2733_s0 + $0x1f8] sm:$0xff] }
  0x72   :  { %1678 = vmatpush3.bf16.msra.mxu0 %v1677_v1  ;;  %854 = vmatmul.mubr.f32.gmra.mrb[22].mxu1 %v87_v2 }
  0x73   :  { %1710 = vmatpush3.bf16.msra.mxu1 %v1709_v3  ;;  %1680 = vmatprep.subr.bf16.mxu0 %v1679_v4 }
  0x74   :  { %1712 = vmatprep.subr.bf16.mxu1 %v1711_v8  ;;  %923 = vmatprep.mubr.f32.mxu0 %v42_v14 }
  0x75   :  { %1008 = vmatprep.mubr.f32.mxu1 %v44_v16 }
  0x76   :  { %1682 = vmatpush3.bf16.msra.mxu0 %v1681_v15 }
  0x77   :  { %1714 = vmatpush3.bf16.msra.mxu1 %v1713_v17  ;;  %1684 = vmatprep.subr.bf16.mxu0 %v1683_v18 }
  0x78   :  { %1716 = vmatprep.subr.bf16.mxu1 %v1715_v22 }
  0x7a   :  { %1686 = vmatpush3.bf16.msra.mxu0 %v1685_v28 }
  0x7b   :  { %1718 = vmatpush3.bf16.msra.mxu1 %v1717_v29  ;;  %1688 = vmatprep.subr.bf16.mxu0 %v1687_v30 }
  0x7c   :  { %1720 = vmatprep.subr.bf16.mxu1 %v1719_v34 }
  0x7e   :  { %1690 = vmatpush3.bf16.msra.mxu0 %v1689_v40 }
  0x7f   :  { %1722 = vmatpush3.bf16.msra.mxu1 %v1721_v41  ;;  %1692 = vmatprep.subr.bf16.mxu0 %v1691_v42 }
  0x80   :  { %1724 = vmatprep.subr.bf16.mxu1 %v1723_v45 }
  0x82   :  { %1694 = vmatpush3.bf16.msra.mxu0 %v1693_v48 }
  0x83   :  { %1726 = vmatpush3.bf16.msra.mxu1 %v1725_v49 }
  0x85   :  { %924 = vmatmul.mubr.f32.vlgmr.msra.gmra.mrb[24].mxu0 %v41_v50 }
  0x86   :  { %1009 = vmatmul.mubr.f32.vlgmr.msra.gmra.mrb[24].mxu1 %v43_v51  ;;  %928 = vmatprep.mubr.f32.mxu0 %v58_v52 }
  0x87   :  { %1013 = vmatprep.mubr.f32.mxu1 %v60_v53 }
  0x89   :  { %929 = vmatmul.mubr.f32.gmra.mrb[26].mxu0 %v57_v54 }
  0x8a   :  { %1014 = vmatmul.mubr.f32.gmra.mrb[26].mxu1 %v59_v55  ;;  %933 = vmatprep.mubr.f32.mxu0 %v74_v56 }
  0x8b   :  { %1018 = vmatprep.mubr.f32.mxu1 %v76_v57 }
  0x8d   :  { %934 = vmatmul.mubr.f32.gmra.mrb[28].mxu0 %v73_v58 }
  0x8e   :  { %1019 = vmatmul.mubr.f32.gmra.mrb[28].mxu1 %v75_v59  ;;  %938 = vmatprep.mubr.f32.mxu0 %v90_v60 }
  0x8f   :  { %1023 = vmatprep.mubr.f32.mxu1 %v92_v61 }
  0x91   :  { %939 = vmatmul.mubr.f32.gmra.mrb[30].mxu0 %v89_v62 }
  0x92   :  { %1024 = vmatmul.mubr.f32.gmra.mrb[30].mxu1 %v91_v63 }
  0xf8   :  { %v1151_v0 = vpop.f32.mrb[0].mxu0 }
  0xf9   :  { %v1195_v1 = vpop.f32.mrb[0].mxu1  ;;  %v1152_v2 = vpop.f32.mrb[1].mxu0 }
  0xfa   :  { %v1153_v3 = vadd.f32 %v1152_v2, %v1151_v0  ;;  %v1196_v4 = vpop.f32.mrb[1].mxu1 }
  0xfb   :  { %v1197_v5 = vadd.f32 %v1196_v4, %v1195_v1 }
  0xfc   :  { %v1154_v6 = vpop.f32.mrb[2].mxu0 }
  0xfd   :  { %v501_v7 = vadd.f32 %v1197_v5, %v1153_v3  ;;  %v1198_v8 = vpop.f32.mrb[2].mxu1  ;;  %v1155_v9 = vpop.f32.mrb[3].mxu0 }
  0xfe   :  { %v1156_v10 = vadd.f32 %v1155_v9, %v1154_v6  ;;  %v1199_v11 = vpop.f32.mrb[3].mxu1 }
  0xff   :  { %v1200_v12 = vadd.f32 %v1199_v11, %v1198_v8 }
 0x100   :  { %v1157_v13 = vpop.f32.mrb[4].mxu0 }
 0x101   :  { %v506_v14 = vadd.f32 %v1200_v12, %v1156_v10  ;;  %v1201_v15 = vpop.f32.mrb[4].mxu1  ;;  %v1158_v16 = vpop.f32.mrb[5].mxu0 }
 0x102   :  { %v1159_v17 = vadd.f32 %v1158_v16, %v1157_v13  ;;  %v1202_v18 = vpop.f32.mrb[5].mxu1 }
 0x103   :  { %v1203_v19 = vadd.f32 %v1202_v18, %v1201_v15 }
 0x104   :  { %v1160_v20 = vpop.f32.mrb[6].mxu0 }
 0x105   :  { %v511_v21 = vadd.f32 %v1203_v19, %v1159_v17  ;;  %v1204_v22 = vpop.f32.mrb[6].mxu1  ;;  %v1161_v23 = vpop.f32.mrb[7].mxu0 }
 0x106   :  { %v1162_v24 = vadd.f32 %v1161_v23, %v1160_v20  ;;  %v1205_v25 = vpop.f32.mrb[7].mxu1 }
 0x107   :  { %v1206_v26 = vadd.f32 %v1205_v25, %v1204_v22 }
 0x109   :  { %v516_v27 = vadd.f32 %v1206_v26, %v1162_v24 }
 0x118   :  { %v1239_v28 = vpop.f32.mrb[8].mxu0 }
 0x119   :  { %v1240_v29 = vpop.f32.mrb[9].mxu0  ;;  %v1283_v30 = vpop.f32.mrb[8].mxu1 }
 0x11a   :  { %v1241_v31 = vadd.f32 %v1240_v29, %v1239_v28  ;;  %v1284_v32 = vpop.f32.mrb[9].mxu1 }
 0x11b   :  { %v1285_v33 = vadd.f32 %v1284_v32, %v1283_v30 }
 0x11c   :  { %v586_v34 = vadd.f32 %v1241_v31, %v501_v7  ;;  %v1242_v35 = vpop.f32.mrb[10].mxu0 }
 0x11d   :  { %v1243_v36 = vpop.f32.mrb[11].mxu0  ;;  %v1286_v37 = vpop.f32.mrb[10].mxu1 }
 0x11e   :  { %v671_v38 = vadd.f32 %v1285_v33, %v586_v34  ;;  %v1244_v39 = vadd.f32 %v1243_v36, %v1242_v35  ;;  %v1287_v40 = vpop.f32.mrb[11].mxu1 }
 0x11f   :  { %v1288_v41 = vadd.f32 %v1287_v40, %v1286_v37 }
 0x120   :  { %v591_v42 = vadd.f32 %v1244_v39, %v506_v14  ;;  %v1245_v43 = vpop.f32.mrb[12].mxu0 }
 0x121   :  { %v1246_v44 = vpop.f32.mrb[13].mxu0  ;;  %v1289_v45 = vpop.f32.mrb[12].mxu1 }
 0x122   :  { %v676_v46 = vadd.f32 %v1288_v41, %v591_v42  ;;  %v1247_v47 = vadd.f32 %v1246_v44, %v1245_v43  ;;  %v1290_v48 = vpop.f32.mrb[13].mxu1 }
 0x123   :  { %v1291_v49 = vadd.f32 %v1290_v48, %v1289_v45 }
 0x124   :  { %v596_v50 = vadd.f32 %v1247_v47, %v511_v21  ;;  %v1248_v51 = vpop.f32.mrb[14].mxu0 }
 0x125   :  { %v1249_v52 = vpop.f32.mrb[15].mxu0  ;;  %v1292_v53 = vpop.f32.mrb[14].mxu1 }
 0x126   :  { %v681_v54 = vadd.f32 %v1291_v49, %v596_v50  ;;  %v1250_v55 = vadd.f32 %v1249_v52, %v1248_v51  ;;  %v1293_v56 = vpop.f32.mrb[15].mxu1 }
 0x127   :  { %v1294_v57 = vadd.f32 %v1293_v56, %v1292_v53 }
 0x128   :  { %v601_v58 = vadd.f32 %v1250_v55, %v516_v27 }
 0x12a   :  { %v686_v59 = vadd.f32 %v1294_v57, %v601_v58 }
 0x138   :  { %v1327_v60 = vpop.f32.mrb[16].mxu0 }
 0x139   :  { %v1328_v61 = vpop.f32.mrb[17].mxu0  ;;  %v1371_v62 = vpop.f32.mrb[16].mxu1 }
 0x13a   :  { %v1329_v63 = vadd.f32 %v1328_v61, %v1327_v60  ;;  %v1372_v0 = vpop.f32.mrb[17].mxu1 }
 0x13b   :  { %v1373_v1 = vadd.f32 %v1372_v0, %v1371_v62 }
 0x13c   :  { %v756_v2 = vadd.f32 %v1329_v63, %v671_v38  ;;  %v1330_v3 = vpop.f32.mrb[18].mxu0 }
 0x13d   :  { %v1331_v4 = vpop.f32.mrb[19].mxu0  ;;  %v1374_v5 = vpop.f32.mrb[18].mxu1 }
 0x13e   :  { %v841_v6 = vadd.f32 %v1373_v1, %v756_v2  ;;  %v1332_v7 = vadd.f32 %v1331_v4, %v1330_v3  ;;  %v1375_v8 = vpop.f32.mrb[19].mxu1 }
 0x13f   :  { %v1376_v9 = vadd.f32 %v1375_v8, %v1374_v5 }
 0x140   :  { %v761_v10 = vadd.f32 %v1332_v7, %v676_v46  ;;  %v1333_v11 = vpop.f32.mrb[20].mxu0 }
 0x141   :  { %v1334_v12 = vpop.f32.mrb[21].mxu0  ;;  %v1377_v13 = vpop.f32.mrb[20].mxu1 }
 0x142   :  { %v846_v14 = vadd.f32 %v1376_v9, %v761_v10  ;;  %v1335_v15 = vadd.f32 %v1334_v12, %v1333_v11  ;;  %v1378_v16 = vpop.f32.mrb[21].mxu1 }
 0x143   :  { %v1379_v17 = vadd.f32 %v1378_v16, %v1377_v13 }
 0x144   :  { %v766_v18 = vadd.f32 %v1335_v15, %v681_v54  ;;  %v1336_v19 = vpop.f32.mrb[22].mxu0 }
 0x145   :  { %v1337_v20 = vpop.f32.mrb[23].mxu0  ;;  %v1380_v21 = vpop.f32.mrb[22].mxu1 }
 0x146   :  { %v851_v22 = vadd.f32 %v1379_v17, %v766_v18  ;;  %v1338_v23 = vadd.f32 %v1337_v20, %v1336_v19  ;;  %v1381_v24 = vpop.f32.mrb[23].mxu1 }
 0x147   :  { %v1382_v25 = vadd.f32 %v1381_v24, %v1380_v21 }
 0x148   :  { %v771_v26 = vadd.f32 %v1338_v23, %v686_v59 }
 0x14a   :  { %v856_v27 = vadd.f32 %v1382_v25, %v771_v26  ;;  %v1078_v25 = vlaneseq }
 0x14c   :  { %v1079_v26 = vshrl.u32 %v1078_v25, 7 }
 0x158   :  { %v1415_v28 = vpop.f32.mrb[24].mxu0 }
 0x159   :  { %v1416_v29 = vpop.f32.mrb[25].mxu0  ;;  %v1459_v30 = vpop.f32.mrb[24].mxu1 }
 0x15a   :  { %v1417_v31 = vadd.f32 %v1416_v29, %v1415_v28  ;;  %v1460_v32 = vpop.f32.mrb[25].mxu1  ;;  %v1080_v28 = vsub.s32 0, %v1079_v26 }
 0x15b   :  { %v1461_v33 = vadd.f32 %v1460_v32, %v1459_v30  ;;  %v1118_v32 = vld [vmem:[%s2735_s3] ss:$0 sm:$0xff] }
 0x15c   :  { %v926_v34 = vadd.f32 %v1417_v31, %v841_v6  ;;  %v1418_v35 = vpop.f32.mrb[26].mxu0 }
 0x15d   :  { %v1419_v36 = vpop.f32.mrb[27].mxu0  ;;  %v1462_v37 = vpop.f32.mrb[26].mxu1 }
 0x15e   :  { %v1011_v38 = vadd.f32 %v1461_v33, %v926_v34  ;;  %v1420_v39 = vadd.f32 %v1419_v36, %v1418_v35  ;;  %v1463_v40 = vpop.f32.mrb[27].mxu1 }
 0x15f   :  { %v1464_v41 = vadd.f32 %v1463_v40, %v1462_v37 }
 0x160   :  { %v931_v42 = vadd.f32 %v1420_v39, %v846_v14  ;;  %v1421_v43 = vpop.f32.mrb[28].mxu0 }
 0x161   :  { %v1422_v44 = vpop.f32.mrb[29].mxu0  ;;  %v1465_v45 = vpop.f32.mrb[28].mxu1 }
 0x162   :  { %v1016_v46 = vadd.f32 %v1464_v41, %v931_v42  ;;  %v1423_v47 = vadd.f32 %v1422_v44, %v1421_v43  ;;  %v1466_v48 = vpop.f32.mrb[29].mxu1 }
 0x163   :  { %v1467_v49 = vadd.f32 %v1466_v48, %v1465_v45 }
 0x164   :  { %v1044_v50 = vadd.f32 %v1016_v46, %v1011_v38  ;;  %v936_v51 = vadd.f32 %v1423_v47, %v851_v22  ;;  %v1424_v52 = vpop.f32.mrb[30].mxu0 }
 0x165   :  { %v1425_v53 = vpop.f32.mrb[31].mxu0  ;;  %v1468_v54 = vpop.f32.mrb[30].mxu1 }
 0x166   :  { %v1021_v55 = vadd.f32 %v1467_v49, %v936_v51  ;;  %v1426_v56 = vadd.f32 %v1425_v53, %v1424_v52  ;;  %v1469_v57 = vpop.f32.mrb[31].mxu1 }
 0x167   :  { %v1470_v58 = vadd.f32 %v1469_v57, %v1468_v54 }
 0x168   :  { %v1045_v59 = vadd.f32 %v1044_v50, %v1021_v55  ;;  %v941_v60 = vadd.f32 %v1426_v56, %v856_v27  ;;  %v1073_v27 = vld [vmem:[%s2734_s2] sm:$0x1] }
 0x16a   :  { %v1026_v61 = vadd.f32 %v1470_v58, %v941_v60 }
 0x16c   :  { %v1046_v62 = vadd.f32 %v1045_v59, %v1026_v61 }
 0x16e   :  { %v1047_v63 = vrot.slane %v1046_v62, 4 }
 0x170   :  { %v1048_v0 = vadd.f32 %v1047_v63, %v1046_v62 }
 0x172   :  { %v1049_v1 = vrot.slane %v1048_v0, 2 }
 0x174   :  { %v1050_v2 = vadd.f32 %v1049_v1, %v1048_v0 }
 0x176   :  { %v1051_v3 = vrot.slane %v1050_v2, 1 }
 0x178   :  { %v1052_v4 = vadd.f32 %v1051_v3, %v1050_v2 }
 0x17a   :  { %v1054_v5 = vmul.f32 0.03125, %v1052_v4 }
 0x17c   :  { %v1055_v6 = vsub.f32 %v1011_v38, %v1054_v5  ;;  %v1056_v7 = vsub.f32 %v1016_v46, %v1054_v5  ;;  %v1057_v8 = vsub.f32 %v1021_v55, %v1054_v5  ;;  %v1058_v9 = vsub.f32 %v1026_v61, %v1054_v5 }
 0x17e   :  { %v1059_v10 = vmul.f32 %v1055_v6, %v1055_v6  ;;  %v1060_v11 = vmul.f32 %v1056_v7, %v1056_v7  ;;  %v1061_v12 = vmul.f32 %v1057_v8, %v1057_v8  ;;  %v1062_v14 = vmul.f32 %v1058_v9, %v1058_v9 }
 0x180   :  { %v1063_v13 = vadd.f32 %v1060_v11, %v1059_v10 }
 0x182   :  { %v1064_v15 = vadd.f32 %v1063_v13, %v1061_v12 }
 0x184   :  { %v1065_v16 = vadd.f32 %v1064_v15, %v1062_v14 }
 0x186   :  { %v1066_v17 = vrot.slane %v1065_v16, 4 }
 0x188   :  { %v1067_v18 = vadd.f32 %v1066_v17, %v1065_v16 }
 0x18a   :  { %v1068_v19 = vrot.slane %v1067_v18, 2 }
 0x18c   :  { %v1069_v20 = vadd.f32 %v1068_v19, %v1067_v18 }
 0x18e   :  { %v1070_v21 = vrot.slane %v1069_v20, 1 }
 0x190   :  { %v1071_v22 = vadd.f32 %v1070_v21, %v1069_v20 }
 0x192   :  { %v1072_v23 = vmul.f32 0.03125, %v1071_v22 }
 0x194   :  { %v1074_v24 = vadd.f32 1e-05, %v1072_v23 }
 0x196   :  { %1727 = vrsqrt.f32 %v1074_v24 }
 0x1a0   :  { %v1728_v29 = vpop.eup %1727 }
 0x1a1   :  { %v1076_v30 = vmul.f32 %v1728_v29, %v1073_v27 }
 0x1a3   :  { %v1081_v31 = vrot.slane %v1076_v30, %v1080_v28 }
 0x1a5   :  { %v1083_v33 = vmul.f32 %v1081_v31, %v1055_v6  ;;  %v1084_v34 = vmul.f32 %v1081_v31, %v1056_v7  ;;  %v1085_v35 = vmul.f32 %v1081_v31, %v1057_v8  ;;  %v1086_v36 = vmul.f32 %v1081_v31, %v1058_v9 }
 0x1a7   :  { %v1094_v37 = vadd.f32 %v1118_v32, %v1083_v33  ;;  %v1095_v38 = vadd.f32 %v1118_v32, %v1084_v34  ;;  %v1096_v39 = vadd.f32 %v1118_v32, %v1085_v35  ;;  %v1097_v40 = vadd.f32 %v1118_v32, %v1086_v36 }
 0x1a9   :  { %vm1098_vm0 = vcmp.gt.f32.partialorder %v1094_v37, 0.0  ;;  %vm1099_vm1 = vcmp.gt.f32.partialorder %v1095_v38, 0.0  ;;  %vm1100_vm2 = vcmp.gt.f32.partialorder %v1096_v39, 0.0  ;;  %vm1101_vm3 = vcmp.gt.f32.partialorder %v1097_v40, 0.0 }
 0x1aa   :  { %v1102_v41 = vmul.f32 0.2, %v1094_v37  ;;  %v1103_v42 = vmul.f32 0.2, %v1095_v38  ;;  %v1104_v43 = vmul.f32 0.2, %v1096_v39 }
 0x1ab   :  { %v1105_v44 = vmul.f32 0.2, %v1097_v40 }
 0x1ac   :  { %v1106_v45 = vsel %vm1098_vm0, %v1094_v37, %v1102_v41  ;;  %v1107_v46 = vsel %vm1099_vm1, %v1095_v38, %v1103_v42  ;;  %v1108_v47 = vsel %vm1100_vm2, %v1096_v39, %v1104_v43 }
 0x1ad   :  { %v1109_v48 = vsel %vm1101_vm3, %v1097_v40, %v1105_v44  ;;  %1110 = vst [vmem:[%s2736_s4] sm:$0xff] %v1106_v45  ;;  %1111 = vst [vmem:[%s2736_s4 + $0x8] sm:$0xff] %v1107_v46 }
 0x1ae   :  { %1112 = vst [vmem:[%s2736_s4 + $0x10] sm:$0xff] %v1108_v47  ;;  %1113 = vst [vmem:[%s2736_s4 + $0x18] sm:$0xff] %v1109_v48 }

// kernel: discriminator_forward.8
= control target key start
LH: loop header
LB: loop body
LE: loop exit
PB: predicated region body
PF: predicated region fallthrough
CT: control target
= control target key end

     0   :  { %s2294_s1 = inlined_call_operand.vmem [shape: f32[2048,128], index: 1, kind: input, shape index: {}]   ;;  %s2295_s0 = inlined_call_operand.vmem [shape: f32[8,2048], index: 0, kind: input, shape index: {}]   ;;  %s2296_s2 = inlined_call_operand.vmem [shape: f32[1,128], index: 2, kind: input, shape index: {}]   ;;  %s2297_s3 = inlined_call_operand.vmem [shape: f32[1,128], index: 3, kind: input, shape index: {}]   ;;  %s2298_s4 = inlined_call_operand.vmem [shape: f32[8,128], index: 4, kind: output, shape index: {}]  }
   0x1   :  { %v55_v0 = vld [vmem:[%s2294_s1 + $0x80] sm:$0xff]  ;;  %v56_v1 = vld [vmem:[%s2294_s1 + $0x88] sm:$0xff]  ;;  %v57_v11 = vld [vmem:[%s2294_s1 + $0x90] sm:$0xff] }
   0x2   :  { %v87_v2 = vld [vmem:[%s2294_s1 + $0x180] sm:$0xff]  ;;  %v1186_v3 = vpack.c.bf16 %v56_v1, %v55_v0  ;;  %v88_v4 = vld [vmem:[%s2294_s1 + $0x188] sm:$0xff]  ;;  %v58_v13 = vld [vmem:[%s2294_s1 + $0x98] sm:$0xff] }
   0x3   :  { %v39_v5 = vld [vmem:[%s2294_s1] sm:$0xff]  ;;  %v40_v6 = vld [vmem:[%s2294_s1 + $0x8] sm:$0xff]  ;;  %v1218_v7 = vpack.c.bf16 %v88_v4, %v87_v2  ;;  %v89_v14 = vld [vmem:[%s2294_s1 + $0x190] sm:$0xff]  ;;  %v1190_v16 = vpack.c.bf16 %v58_v13, %v57_v11 }
   0x4   :  { %v1188_v8 = vpack.c.bf16 %v40_v6, %v39_v5  ;;  %v71_v9 = vld [vmem:[%s2294_s1 + $0x100] sm:$0xff]  ;;  %v72_v10 = vld [vmem:[%s2294_s1 + $0x108] sm:$0xff]  ;;  %1187 = vmatprep.subr.bf16.mxu0 %v1186_v3  ;;  %v90_v15 = vld [vmem:[%s2294_s1 + $0x198] sm:$0xff] }
   0x5   :  { %v1220_v12 = vpack.c.bf16 %v72_v10, %v71_v9  ;;  %1219 = vmatprep.subr.bf16.mxu1 %v1218_v7  ;;  %v1222_v17 = vpack.c.bf16 %v90_v15, %v89_v14  ;;  %v41_v18 = vld [vmem:[%s2294_s1 + $0x10] sm:$0xff]  ;;  %v42_v19 = vld [vmem:[%s2294_s1 + $0x18] sm:$0xff]  ;;  %v59_v23 = vld [vmem:[%s2294_s1 + $0xa0] sm:$0xff] }
   0x6   :  { %1189 = vmatpush3.bf16.msra.mxu0 %v1188_v8  ;;  %v73_v20 = vld [vmem:[%s2294_s1 + $0x110] sm:$0xff]  ;;  %v1192_v21 = vpack.c.bf16 %v42_v19, %v41_v18  ;;  %v74_v22 = vld [vmem:[%s2294_s1 + $0x118] sm:$0xff]  ;;  %v60_v24 = vld [vmem:[%s2294_s1 + $0xa8] sm:$0xff] }
   0x7   :  { %1221 = vmatpush3.bf16.msra.mxu1 %v1220_v12  ;;  %1191 = vmatprep.subr.bf16.mxu0 %v1190_v16  ;;  %v1224_v25 = vpack.c.bf16 %v74_v22, %v73_v20  ;;  %v1194_v26 = vpack.c.bf16 %v60_v24, %v59_v23  ;;  %v91_v27 = vld [vmem:[%s2294_s1 + $0x1a0] sm:$0xff]  ;;  %v92_v28 = vld [vmem:[%s2294_s1 + $0x1a8] sm:$0xff]  ;;  %v61_v35 = vld [vmem:[%s2294_s1 + $0xb0] sm:$0xff] }
   0x8   :  { %1223 = vmatprep.subr.bf16.mxu1 %v1222_v17  ;;  %v43_v29 = vld [vmem:[%s2294_s1 + $0x20] sm:$0xff]  ;;  %v1226_v30 = vpack.c.bf16 %v92_v28, %v91_v27  ;;  %v44_v31 = vld [vmem:[%s2294_s1 + $0x28] sm:$0xff]  ;;  %v62_v36 = vld [vmem:[%s2294_s1 + $0xb8] sm:$0xff] }
   0x9   :  { %v75_v32 = vld [vmem:[%s2294_s1 + $0x120] sm:$0xff]  ;;  %v76_v33 = vld [vmem:[%s2294_s1 + $0x128] sm:$0xff]  ;;  %v1196_v34 = vpack.c.bf16 %v44_v31, %v43_v29  ;;  %v93_v37 = vld [vmem:[%s2294_s1 + $0x1b0] sm:$0xff]  ;;  %v1198_v39 = vpack.c.bf16 %v62_v36, %v61_v35 }
   0xa   :  { %1193 = vmatpush3.bf16.msra.mxu0 %v1192_v21  ;;  %v1228_v38 = vpack.c.bf16 %v76_v33, %v75_v32  ;;  %v94_v40 = vld [vmem:[%s2294_s1 + $0x1b8] sm:$0xff]  ;;  %v45_v41 = vld [vmem:[%s2294_s1 + $0x30] sm:$0xff]  ;;  %v63_v46 = vld [vmem:[%s2294_s1 + $0xc0] sm:$0xff] }
   0xb   :  { %1225 = vmatpush3.bf16.msra.mxu1 %v1224_v25  ;;  %1195 = vmatprep.subr.bf16.mxu0 %v1194_v26  ;;  %v46_v42 = vld [vmem:[%s2294_s1 + $0x38] sm:$0xff]  ;;  %v1230_v43 = vpack.c.bf16 %v94_v40, %v93_v37  ;;  %v77_v44 = vld [vmem:[%s2294_s1 + $0x130] sm:$0xff]  ;;  %v64_v47 = vld [vmem:[%s2294_s1 + $0xc8] sm:$0xff] }
   0xc   :  { %1227 = vmatprep.subr.bf16.mxu1 %v1226_v30  ;;  %v78_v45 = vld [vmem:[%s2294_s1 + $0x138] sm:$0xff]  ;;  %v95_v48 = vld [vmem:[%s2294_s1 + $0x1c0] sm:$0xff]  ;;  %v96_v49 = vld [vmem:[%s2294_s1 + $0x1c8] sm:$0xff]  ;;  %v1200_v50 = vpack.c.bf16 %v46_v42, %v45_v41  ;;  %v1202_v52 = vpack.c.bf16 %v64_v47, %v63_v46 }
   0xd   :  { %v1232_v51 = vpack.c.bf16 %v78_v45, %v77_v44  ;;  %v47_v53 = vld [vmem:[%s2294_s1 + $0x40] sm:$0xff]  ;;  %v48_v54 = vld [vmem:[%s2294_s1 + $0x48] sm:$0xff]  ;;  %v1234_v56 = vpack.c.bf16 %v96_v49, %v95_v48  ;;  %v65_v58 = vld [vmem:[%s2294_s1 + $0xd0] sm:$0xff] }
   0xe   :  { %1197 = vmatpush3.bf16.msra.mxu0 %v1196_v34  ;;  %v79_v55 = vld [vmem:[%s2294_s1 + $0x140] sm:$0xff]  ;;  %v80_v57 = vld [vmem:[%s2294_s1 + $0x148] sm:$0xff]  ;;  %v66_v59 = vld [vmem:[%s2294_s1 + $0xd8] sm:$0xff]  ;;  %v1204_v62 = vpack.c.bf16 %v48_v54, %v47_v53 }
   0xf   :  { %1229 = vmatpush3.bf16.msra.mxu1 %v1228_v38  ;;  %1199 = vmatprep.subr.bf16.mxu0 %v1198_v39  ;;  %v97_v60 = vld [vmem:[%s2294_s1 + $0x1d0] sm:$0xff]  ;;  %v98_v61 = vld [vmem:[%s2294_s1 + $0x1d8] sm:$0xff]  ;;  %v1236_v63 = vpack.c.bf16 %v80_v57, %v79_v55  ;;  %v1206_v0 = vpack.c.bf16 %v66_v59, %v65_v58  ;;  %v67_v6 = vld [vmem:[%s2294_s1 + $0xe0] sm:$0xff] }
  0x10   :  { %1231 = vmatprep.subr.bf16.mxu1 %v1230_v43  ;;  %v49_v1 = vld [vmem:[%s2294_s1 + $0x50] sm:$0xff]  ;;  %v50_v2 = vld [vmem:[%s2294_s1 + $0x58] sm:$0xff]  ;;  %v1238_v4 = vpack.c.bf16 %v98_v61, %v97_v60  ;;  %v68_v7 = vld [vmem:[%s2294_s1 + $0xe8] sm:$0xff] }
  0x11   :  { %v81_v3 = vld [vmem:[%s2294_s1 + $0x150] sm:$0xff]  ;;  %v82_v5 = vld [vmem:[%s2294_s1 + $0x158] sm:$0xff]  ;;  %v99_v8 = vld [vmem:[%s2294_s1 + $0x1e0] sm:$0xff]  ;;  %v1208_v10 = vpack.c.bf16 %v50_v2, %v49_v1  ;;  %v1210_v14 = vpack.c.bf16 %v68_v7, %v67_v6 }
  0x12   :  { %1201 = vmatpush3.bf16.msra.mxu0 %v1200_v50  ;;  %v100_v9 = vld [vmem:[%s2294_s1 + $0x1e8] sm:$0xff]  ;;  %v51_v11 = vld [vmem:[%s2294_s1 + $0x60] sm:$0xff]  ;;  %v1240_v13 = vpack.c.bf16 %v82_v5, %v81_v3  ;;  %v26_v17 = vld [vmem:[%s2295_s0 + $0x18] sm:$0xff] }
  0x13   :  { %1233 = vmatpush3.bf16.msra.mxu1 %v1232_v51  ;;  %1203 = vmatprep.subr.bf16.mxu0 %v1202_v52  ;;  %v52_v12 = vld [vmem:[%s2294_s1 + $0x68] sm:$0xff]  ;;  %v83_v15 = vld [vmem:[%s2294_s1 + $0x160] sm:$0xff]  ;;  %v1242_v18 = vpack.c.bf16 %v100_v9, %v99_v8  ;;  %v69_v20 = vld [vmem:[%s2294_s1 + $0xf0] sm:$0xff] }
  0x14   :  { %1235 = vmatprep.subr.bf16.mxu1 %v1234_v56  ;;  %v24_v16 = vld [vmem:[%s2295_s0 + $0x8] sm:$0xff]  ;;  %v70_v21 = vld [vmem:[%s2294_s1 + $0xf8] sm:$0xff]  ;;  %v101_v22 = vld [vmem:[%s2294_s1 + $0x1f0] sm:$0xff]  ;;  %429 = vmatprep.mubr.f32.mxu1 %v26_v17  ;;  %v1212_v24 = vpack.c.bf16 %v52_v12, %v51_v11 }
  0x15   :  { %v84_v19 = vld [vmem:[%s2294_s1 + $0x168] sm:$0xff]  ;;  %359 = vmatprep.mubr.f32.mxu0 %v24_v16  ;;  %v102_v23 = vld [vmem:[%s2294_s1 + $0x1f8] sm:$0xff]  ;;  %v1214_v26 = vpack.c.bf16 %v70_v21, %v69_v20  ;;  %v53_v27 = vld [vmem:[%s2294_s1 + $0x70] sm:$0xff] }
  0x16   :  { %1205 = vmatpush3.bf16.msra.mxu0 %v1204_v62  ;;  %v1244_v25 = vpack.c.bf16 %v84_v19, %v83_v15  ;;  %v54_v28 = vld [vmem:[%s2294_s1 + $0x78] sm:$0xff]  ;;  %v85_v29 = vld [vmem:[%s2294_s1 + $0x170] sm:$0xff]  ;;  %v1246_v30 = vpack.c.bf16 %v102_v23, %v101_v22  ;;  %v119_v32 = vld [vmem:[%s2294_s1 + $0x280] sm:$0xff] }
  0x17   :  { %1237 = vmatpush3.bf16.msra.mxu1 %v1236_v63  ;;  %1207 = vmatprep.subr.bf16.mxu0 %v1206_v0  ;;  %v86_v31 = vld [vmem:[%s2294_s1 + $0x178] sm:$0xff]  ;;  %v120_v33 = vld [vmem:[%s2294_s1 + $0x288] sm:$0xff]  ;;  %v151_v34 = vld [vmem:[%s2294_s1 + $0x380] sm:$0xff]  ;;  %v1216_v36 = vpack.c.bf16 %v54_v28, %v53_v27 }
  0x18   :  { %1239 = vmatprep.subr.bf16.mxu1 %v1238_v4  ;;  %v152_v35 = vld [vmem:[%s2294_s1 + $0x388] sm:$0xff]  ;;  %v1248_v37 = vpack.c.bf16 %v86_v31, %v85_v29  ;;  %v1250_v38 = vpack.c.bf16 %v120_v33, %v119_v32  ;;  %v103_v39 = vld [vmem:[%s2294_s1 + $0x200] sm:$0xff]  ;;  %v121_v44 = vld [vmem:[%s2294_s1 + $0x290] sm:$0xff] }
  0x19   :  { %v104_v40 = vld [vmem:[%s2294_s1 + $0x208] sm:$0xff]  ;;  %v135_v41 = vld [vmem:[%s2294_s1 + $0x300] sm:$0xff]  ;;  %v1282_v42 = vpack.c.bf16 %v152_v35, %v151_v34  ;;  %v122_v45 = vld [vmem:[%s2294_s1 + $0x298] sm:$0xff] }
  0x1a   :  { %1209 = vmatpush3.bf16.msra.mxu0 %v1208_v10  ;;  %v136_v43 = vld [vmem:[%s2294_s1 + $0x308] sm:$0xff]  ;;  %v153_v46 = vld [vmem:[%s2294_s1 + $0x390] sm:$0xff]  ;;  %v154_v47 = vld [vmem:[%s2294_s1 + $0x398] sm:$0xff]  ;;  %v1252_v50 = vpack.c.bf16 %v104_v40, %v103_v39  ;;  %v1254_v52 = vpack.c.bf16 %v122_v45, %v121_v44 }
  0x1b   :  { %1241 = vmatpush3.bf16.msra.mxu1 %v1240_v13  ;;  %1211 = vmatprep.subr.bf16.mxu0 %v1210_v14  ;;  %v23_v48 = vld [vmem:[%s2295_s0] sm:$0xff]  ;;  %v25_v49 = vld [vmem:[%s2295_s0 + $0x10] sm:$0xff]  ;;  %v1284_v51 = vpack.c.bf16 %v136_v43, %v135_v41  ;;  %v106_v54 = vld [vmem:[%s2294_s1 + $0x218] sm:$0xff]  ;;  %v1286_v56 = vpack.c.bf16 %v154_v47, %v153_v46 }
  0x1c   :  { %1243 = vmatprep.subr.bf16.mxu1 %v1242_v18  ;;  %v105_v53 = vld [vmem:[%s2294_s1 + $0x210] sm:$0xff]  ;;  %v138_v57 = vld [vmem:[%s2294_s1 + $0x318] sm:$0xff]  ;;  %v123_v58 = vld [vmem:[%s2294_s1 + $0x2a0] sm:$0xff] }
  0x1d   :  { %v137_v55 = vld [vmem:[%s2294_s1 + $0x310] sm:$0xff]  ;;  %v124_v59 = vld [vmem:[%s2294_s1 + $0x2a8] sm:$0xff]  ;;  %v155_v60 = vld [vmem:[%s2294_s1 + $0x3a0] sm:$0xff]  ;;  %v1256_v62 = vpack.c.bf16 %v106_v54, %v105_v53 }
  0x1e   :  { %1213 = vmatpush3.bf16.msra.mxu0 %v1212_v24  ;;  %v156_v61 = vld [vmem:[%s2294_s1 + $0x3a8] sm:$0xff]  ;;  %v1288_v63 = vpack.c.bf16 %v138_v57, %v137_v55  ;;  %v1258_v0 = vpack.c.bf16 %v124_v59, %v123_v58  ;;  %v107_v1 = vld [vmem:[%s2294_s1 + $0x220] sm:$0xff]  ;;  %v125_v6 = vld [vmem:[%s2294_s1 + $0x2b0] sm:$0xff] }
  0x1f   :  { %1245 = vmatpush3.bf16.msra.mxu1 %v1244_v25  ;;  %1215 = vmatprep.subr.bf16.mxu0 %v1214_v26  ;;  %v108_v2 = vld [vmem:[%s2294_s1 + $0x228] sm:$0xff]  ;;  %v139_v3 = vld [vmem:[%s2294_s1 + $0x320] sm:$0xff]  ;;  %v1290_v4 = vpack.c.bf16 %v156_v61, %v155_v60  ;;  %v126_v7 = vld [vmem:[%s2294_s1 + $0x2b8] sm:$0xff] }
  0x20   :  { %1247 = vmatprep.subr.bf16.mxu1 %v1246_v30  ;;  %v140_v5 = vld [vmem:[%s2294_s1 + $0x328] sm:$0xff]  ;;  %v157_v8 = vld [vmem:[%s2294_s1 + $0x3b0] sm:$0xff]  ;;  %v158_v9 = vld [vmem:[%s2294_s1 + $0x3b8] sm:$0xff]  ;;  %v1260_v10 = vpack.c.bf16 %v108_v2, %v107_v1  ;;  %v1262_v12 = vpack.c.bf16 %v126_v7, %v125_v6 }
  0x21   :  { %v1292_v11 = vpack.c.bf16 %v140_v5, %v139_v3  ;;  %v109_v13 = vld [vmem:[%s2294_s1 + $0x230] sm:$0xff]  ;;  %v110_v14 = vld [vmem:[%s2294_s1 + $0x238] sm:$0xff]  ;;  %v1294_v16 = vpack.c.bf16 %v158_v9, %v157_v8  ;;  %v127_v18 = vld [vmem:[%s2294_s1 + $0x2c0] sm:$0xff] }
  0x22   :  { %1217 = vmatpush3.bf16.msra.mxu0 %v1216_v36  ;;  %v141_v15 = vld [vmem:[%s2294_s1 + $0x330] sm:$0xff]  ;;  %v142_v17 = vld [vmem:[%s2294_s1 + $0x338] sm:$0xff]  ;;  %v128_v19 = vld [vmem:[%s2294_s1 + $0x2c8] sm:$0xff]  ;;  %v1264_v22 = vpack.c.bf16 %v110_v14, %v109_v13 }
  0x23   :  { %1249 = vmatpush3.bf16.msra.mxu1 %v1248_v37  ;;  %1251 = vmatprep.subr.bf16.mxu0 %v1250_v38  ;;  %v159_v20 = vld [vmem:[%s2294_s1 + $0x3c0] sm:$0xff]  ;;  %v160_v21 = vld [vmem:[%s2294_s1 + $0x3c8] sm:$0xff]  ;;  %v1296_v25 = vpack.c.bf16 %v142_v17, %v141_v15  ;;  %v1266_v26 = vpack.c.bf16 %v128_v19, %v127_v18  ;;  %v30_v29 = vld [vmem:[%s2295_s0 + $0x38] sm:$0xff] }
  0x24   :  { %1283 = vmatprep.subr.bf16.mxu1 %v1282_v42  ;;  %v111_v23 = vld [vmem:[%s2294_s1 + $0x240] sm:$0xff]  ;;  %v28_v24 = vld [vmem:[%s2295_s0 + $0x28] sm:$0xff]  ;;  %v1298_v30 = vpack.c.bf16 %v160_v21, %v159_v20  ;;  %v129_v32 = vld [vmem:[%s2294_s1 + $0x2d0] sm:$0xff] }
  0x25   :  { %360 = vmatmul.mubr.f32.vlgmr.msra.gmra.mrb[0].mxu0 %v23_v48  ;;  %v112_v27 = vld [vmem:[%s2294_s1 + $0x248] sm:$0xff]  ;;  %v143_v28 = vld [vmem:[%s2294_s1 + $0x340] sm:$0xff]  ;;  %v130_v33 = vld [vmem:[%s2294_s1 + $0x2d8] sm:$0xff] }
  0x26   :  { %430 = vmatmul.mubr.f32.vlgmr.msra.gmra.mrb[0].mxu1 %v25_v49  ;;  %1253 = vmatpush3.bf16.msra.mxu0 %v1252_v50  ;;  %v144_v31 = vld [vmem:[%s2294_s1 + $0x348] sm:$0xff]  ;;  %v161_v34 = vld [vmem:[%s2294_s1 + $0x3d0] sm:$0xff]  ;;  %v162_v35 = vld [vmem:[%s2294_s1 + $0x3d8] sm:$0xff]  ;;  %v1268_v36 = vpack.c.bf16 %v112_v27, %v111_v23  ;;  %v1270_v38 = vpack.c.bf16 %v130_v33, %v129_v32 }
  0x27   :  { %1285 = vmatpush3.bf16.msra.mxu1 %v1284_v51  ;;  %1255 = vmatprep.subr.bf16.mxu0 %v1254_v52  ;;  %v1300_v37 = vpack.c.bf16 %v144_v31, %v143_v28  ;;  %v113_v39 = vld [vmem:[%s2294_s1 + $0x250] sm:$0xff]  ;;  %v114_v40 = vld [vmem:[%s2294_s1 + $0x258] sm:$0xff]  ;;  %v1302_v42 = vpack.c.bf16 %v162_v35, %v161_v34  ;;  %v131_v44 = vld [vmem:[%s2294_s1 + $0x2e0] sm:$0xff] }
  0x28   :  { %1287 = vmatprep.subr.bf16.mxu1 %v1286_v56  ;;  %499 = vmatprep.mubr.f32.mxu0 %v28_v24  ;;  %v145_v41 = vld [vmem:[%s2294_s1 + $0x350] sm:$0xff]  ;;  %v146_v43 = vld [vmem:[%s2294_s1 + $0x358] sm:$0xff]  ;;  %v132_v45 = vld [vmem:[%s2294_s1 + $0x2e8] sm:$0xff]  ;;  %v1272_v48 = vpack.c.bf16 %v114_v40, %v113_v39 }
  0x29   :  { %569 = vmatprep.mubr.f32.mxu1 %v30_v29  ;;  %v163_v46 = vld [vmem:[%s2294_s1 + $0x3e0] sm:$0xff]  ;;  %v164_v47 = vld [vmem:[%s2294_s1 + $0x3e8] sm:$0xff]  ;;  %v1304_v49 = vpack.c.bf16 %v146_v43, %v145_v41  ;;  %v1274_v50 = vpack.c.bf16 %v132_v45, %v131_v44  ;;  %v133_v56 = vld [vmem:[%s2294_s1 + $0x2f0] sm:$0xff] }
  0x2a   :  { %1257 = vmatpush3.bf16.msra.mxu0 %v1256_v62  ;;  %v115_v51 = vld [vmem:[%s2294_s1 + $0x260] sm:$0xff]  ;;  %v116_v52 = vld [vmem:[%s2294_s1 + $0x268] sm:$0xff]  ;;  %v1306_v54 = vpack.c.bf16 %v164_v47, %v163_v46  ;;  %v134_v57 = vld [vmem:[%s2294_s1 + $0x2f8] sm:$0xff] }
  0x2b   :  { %1289 = vmatpush3.bf16.msra.mxu1 %v1288_v63  ;;  %1259 = vmatprep.subr.bf16.mxu0 %v1258_v0  ;;  %v147_v53 = vld [vmem:[%s2294_s1 + $0x360] sm:$0xff]  ;;  %v148_v55 = vld [vmem:[%s2294_s1 + $0x368] sm:$0xff]  ;;  %v165_v58 = vld [vmem:[%s2294_s1 + $0x3f0] sm:$0xff]  ;;  %v1276_v60 = vpack.c.bf16 %v116_v52, %v115_v51  ;;  %v1278_v62 = vpack.c.bf16 %v134_v57, %v133_v56 }
  0x2c   :  { %1291 = vmatprep.subr.bf16.mxu1 %v1290_v4  ;;  %v166_v59 = vld [vmem:[%s2294_s1 + $0x3f8] sm:$0xff]  ;;  %v1308_v61 = vpack.c.bf16 %v148_v55, %v147_v53  ;;  %v117_v63 = vld [vmem:[%s2294_s1 + $0x270] sm:$0xff]  ;;  %v183_v4 = vld [vmem:[%s2294_s1 + $0x480] sm:$0xff] }
  0x2d   :  { %v118_v0 = vld [vmem:[%s2294_s1 + $0x278] sm:$0xff]  ;;  %v149_v1 = vld [vmem:[%s2294_s1 + $0x370] sm:$0xff]  ;;  %v1310_v2 = vpack.c.bf16 %v166_v59, %v165_v58  ;;  %v184_v5 = vld [vmem:[%s2294_s1 + $0x488] sm:$0xff] }
  0x2e   :  { %1261 = vmatpush3.bf16.msra.mxu0 %v1260_v10  ;;  %v150_v3 = vld [vmem:[%s2294_s1 + $0x378] sm:$0xff]  ;;  %v215_v6 = vld [vmem:[%s2294_s1 + $0x580] sm:$0xff]  ;;  %v216_v7 = vld [vmem:[%s2294_s1 + $0x588] sm:$0xff]  ;;  %v1280_v8 = vpack.c.bf16 %v118_v0, %v117_v63  ;;  %v1314_v10 = vpack.c.bf16 %v184_v5, %v183_v4 }
  0x2f   :  { %1293 = vmatpush3.bf16.msra.mxu1 %v1292_v11  ;;  %1263 = vmatprep.subr.bf16.mxu0 %v1262_v12  ;;  %v1312_v9 = vpack.c.bf16 %v150_v3, %v149_v1  ;;  %v167_v11 = vld [vmem:[%s2294_s1 + $0x400] sm:$0xff]  ;;  %v168_v12 = vld [vmem:[%s2294_s1 + $0x408] sm:$0xff]  ;;  %v1346_v14 = vpack.c.bf16 %v216_v7, %v215_v6  ;;  %v186_v17 = vld [vmem:[%s2294_s1 + $0x498] sm:$0xff] }
  0x30   :  { %1295 = vmatprep.subr.bf16.mxu1 %v1294_v16  ;;  %v199_v13 = vld [vmem:[%s2294_s1 + $0x500] sm:$0xff]  ;;  %v200_v15 = vld [vmem:[%s2294_s1 + $0x508] sm:$0xff]  ;;  %v185_v16 = vld [vmem:[%s2294_s1 + $0x490] sm:$0xff]  ;;  %v1316_v21 = vpack.c.bf16 %v168_v12, %v167_v11 }
  0x31   :  { %v217_v18 = vld [vmem:[%s2294_s1 + $0x590] sm:$0xff]  ;;  %v218_v19 = vld [vmem:[%s2294_s1 + $0x598] sm:$0xff]  ;;  %v27_v20 = vld [vmem:[%s2295_s0 + $0x20] sm:$0xff]  ;;  %v1348_v23 = vpack.c.bf16 %v200_v15, %v199_v13  ;;  %v1318_v24 = vpack.c.bf16 %v186_v17, %v185_v16 }
  0x32   :  { %1265 = vmatpush3.bf16.msra.mxu0 %v1264_v22  ;;  %v29_v22 = vld [vmem:[%s2295_s0 + $0x30] sm:$0xff]  ;;  %v1350_v28 = vpack.c.bf16 %v218_v19, %v217_v18  ;;  %v202_v29 = vld [vmem:[%s2294_s1 + $0x518] sm:$0xff]  ;;  %v188_v31 = vld [vmem:[%s2294_s1 + $0x4a8] sm:$0xff] }
  0x33   :  { %1297 = vmatpush3.bf16.msra.mxu1 %v1296_v25  ;;  %1267 = vmatprep.subr.bf16.mxu0 %v1266_v26  ;;  %v169_v25 = vld [vmem:[%s2294_s1 + $0x410] sm:$0xff]  ;;  %v170_v26 = vld [vmem:[%s2294_s1 + $0x418] sm:$0xff]  ;;  %v219_v32 = vld [vmem:[%s2294_s1 + $0x5a0] sm:$0xff] }
  0x34   :  { %1299 = vmatprep.subr.bf16.mxu1 %v1298_v30  ;;  %v201_v27 = vld [vmem:[%s2294_s1 + $0x510] sm:$0xff]  ;;  %v187_v30 = vld [vmem:[%s2294_s1 + $0x4a0] sm:$0xff]  ;;  %v220_v33 = vld [vmem:[%s2294_s1 + $0x5a8] sm:$0xff]  ;;  %v1320_v35 = vpack.c.bf16 %v170_v26, %v169_v25 }
  0x35   :  { %v32_v34 = vld [vmem:[%s2295_s0 + $0x48] sm:$0xff]  ;;  %v171_v39 = vld [vmem:[%s2294_s1 + $0x420] sm:$0xff]  ;;  %v189_v44 = vld [vmem:[%s2294_s1 + $0x4b0] sm:$0xff] }
  0x36   :  { %1269 = vmatpush3.bf16.msra.mxu0 %v1268_v36  ;;  %v34_v36 = vld [vmem:[%s2295_s0 + $0x58] sm:$0xff]  ;;  %v172_v40 = vld [vmem:[%s2294_s1 + $0x428] sm:$0xff]  ;;  %v203_v41 = vld [vmem:[%s2294_s1 + $0x520] sm:$0xff] }
  0x37   :  { %1301 = vmatpush3.bf16.msra.mxu1 %v1300_v37  ;;  %1271 = vmatprep.subr.bf16.mxu0 %v1270_v38  ;;  %v1352_v37 = vpack.c.bf16 %v202_v29, %v201_v27  ;;  %v1322_v38 = vpack.c.bf16 %v188_v31, %v187_v30  ;;  %v204_v43 = vld [vmem:[%s2294_s1 + $0x528] sm:$0xff]  ;;  %v190_v45 = vld [vmem:[%s2294_s1 + $0x4b8] sm:$0xff]  ;;  %v221_v46 = vld [vmem:[%s2294_s1 + $0x5b0] sm:$0xff] }
  0x38   :  { %1303 = vmatprep.subr.bf16.mxu1 %v1302_v42  ;;  %v1354_v42 = vpack.c.bf16 %v220_v33, %v219_v32  ;;  %v222_v47 = vld [vmem:[%s2294_s1 + $0x5b8] sm:$0xff]  ;;  %v173_v51 = vld [vmem:[%s2294_s1 + $0x430] sm:$0xff]  ;;  %v191_v56 = vld [vmem:[%s2294_s1 + $0x4c0] sm:$0xff] }
  0x39   :  { %v174_v52 = vld [vmem:[%s2294_s1 + $0x438] sm:$0xff]  ;;  %v205_v53 = vld [vmem:[%s2294_s1 + $0x530] sm:$0xff]  ;;  %v192_v57 = vld [vmem:[%s2294_s1 + $0x4c8] sm:$0xff] }
  0x3a   :  { %1273 = vmatpush3.bf16.msra.mxu0 %v1272_v48  ;;  %v1324_v48 = vpack.c.bf16 %v172_v40, %v171_v39  ;;  %v206_v55 = vld [vmem:[%s2294_s1 + $0x538] sm:$0xff]  ;;  %v223_v58 = vld [vmem:[%s2294_s1 + $0x5c0] sm:$0xff]  ;;  %v224_v59 = vld [vmem:[%s2294_s1 + $0x5c8] sm:$0xff] }
  0x3b   :  { %1305 = vmatpush3.bf16.msra.mxu1 %v1304_v49  ;;  %1275 = vmatprep.subr.bf16.mxu0 %v1274_v50  ;;  %v1356_v49 = vpack.c.bf16 %v204_v43, %v203_v41  ;;  %v1326_v50 = vpack.c.bf16 %v190_v45, %v189_v44  ;;  %v175_v63 = vld [vmem:[%s2294_s1 + $0x440] sm:$0xff]  ;;  %v176_v0 = vld [vmem:[%s2294_s1 + $0x448] sm:$0xff]  ;;  %v193_v4 = vld [vmem:[%s2294_s1 + $0x4d0] sm:$0xff] }
  0x3c   :  { %1307 = vmatprep.subr.bf16.mxu1 %v1306_v54  ;;  %v1358_v54 = vpack.c.bf16 %v222_v47, %v221_v46  ;;  %v207_v1 = vld [vmem:[%s2294_s1 + $0x540] sm:$0xff]  ;;  %v208_v3 = vld [vmem:[%s2294_s1 + $0x548] sm:$0xff]  ;;  %v194_v5 = vld [vmem:[%s2294_s1 + $0x4d8] sm:$0xff] }
  0x3d   :  { %v225_v6 = vld [vmem:[%s2294_s1 + $0x5d0] sm:$0xff]  ;;  %v226_v7 = vld [vmem:[%s2294_s1 + $0x5d8] sm:$0xff]  ;;  %v195_v16 = vld [vmem:[%s2294_s1 + $0x4e0] sm:$0xff] }
  0x3e   :  { %1277 = vmatpush3.bf16.msra.mxu0 %v1276_v60  ;;  %v1328_v60 = vpack.c.bf16 %v174_v52, %v173_v51  ;;  %v177_v11 = vld [vmem:[%s2294_s1 + $0x450] sm:$0xff]  ;;  %v178_v12 = vld [vmem:[%s2294_s1 + $0x458] sm:$0xff]  ;;  %v196_v17 = vld [vmem:[%s2294_s1 + $0x4e8] sm:$0xff] }
  0x3f   :  { %1309 = vmatpush3.bf16.msra.mxu1 %v1308_v61  ;;  %1279 = vmatprep.subr.bf16.mxu0 %v1278_v62  ;;  %v1360_v61 = vpack.c.bf16 %v206_v55, %v205_v53  ;;  %v1330_v62 = vpack.c.bf16 %v192_v57, %v191_v56  ;;  %v209_v13 = vld [vmem:[%s2294_s1 + $0x550] sm:$0xff]  ;;  %v210_v15 = vld [vmem:[%s2294_s1 + $0x558] sm:$0xff]  ;;  %v227_v18 = vld [vmem:[%s2294_s1 + $0x5e0] sm:$0xff] }
  0x40   :  { %1311 = vmatprep.subr.bf16.mxu1 %v1310_v2  ;;  %v1362_v2 = vpack.c.bf16 %v224_v59, %v223_v58  ;;  %v228_v19 = vld [vmem:[%s2294_s1 + $0x5e8] sm:$0xff]  ;;  %v211_v25 = vld [vmem:[%s2294_s1 + $0x560] sm:$0xff]  ;;  %v198_v29 = vld [vmem:[%s2294_s1 + $0x4f8] sm:$0xff] }
  0x41   :  { %v1370_v26 = vpack.c.bf16 %v228_v19, %v227_v18  ;;  %v212_v27 = vld [vmem:[%s2294_s1 + $0x568] sm:$0xff]  ;;  %v229_v30 = vld [vmem:[%s2294_s1 + $0x5f0] sm:$0xff]  ;;  %v230_v31 = vld [vmem:[%s2294_s1 + $0x5f8] sm:$0xff] }
  0x42   :  { %1281 = vmatpush3.bf16.msra.mxu0 %v1280_v8  ;;  %v1332_v8 = vpack.c.bf16 %v176_v0, %v175_v63  ;;  %v1372_v33 = vpack.c.bf16 %v212_v27, %v211_v25  ;;  %v214_v39 = vld [vmem:[%s2294_s1 + $0x578] sm:$0xff]  ;;  %v247_v40 = vld [vmem:[%s2294_s1 + $0x680] sm:$0xff]  ;;  %v248_v41 = vld [vmem:[%s2294_s1 + $0x688] sm:$0xff] }
  0x43   :  { %1313 = vmatpush3.bf16.msra.mxu1 %v1312_v9  ;;  %1315 = vmatprep.subr.bf16.mxu0 %v1314_v10  ;;  %v1364_v9 = vpack.c.bf16 %v208_v3, %v207_v1  ;;  %v1334_v10 = vpack.c.bf16 %v194_v5, %v193_v4  ;;  %v280_v43 = vld [vmem:[%s2294_s1 + $0x788] sm:$0xff]  ;;  %v1378_v46 = vpack.c.bf16 %v248_v41, %v247_v40  ;;  %v231_v47 = vld [vmem:[%s2294_s1 + $0x600] sm:$0xff]  ;;  %v249_v52 = vld [vmem:[%s2294_s1 + $0x690] sm:$0xff] }
  0x44   :  { %1347 = vmatprep.subr.bf16.mxu1 %v1346_v14  ;;  %v1366_v14 = vpack.c.bf16 %v226_v7, %v225_v6  ;;  %v264_v51 = vld [vmem:[%s2294_s1 + $0x708] sm:$0xff]  ;;  %v250_v53 = vld [vmem:[%s2294_s1 + $0x698] sm:$0xff]  ;;  %v31_v56 = vld [vmem:[%s2295_s0 + $0x40] sm:$0xff] }
  0x45   :  { %500 = vmatmul.mubr.f32.vlgmr.msra.gmra.mrb[2].mxu0 %v27_v20  ;;  %v1336_v20 = vpack.c.bf16 %v178_v12, %v177_v11  ;;  %v282_v55 = vld [vmem:[%s2294_s1 + $0x798] sm:$0xff]  ;;  %v33_v58 = vld [vmem:[%s2295_s0 + $0x50] sm:$0xff]  ;;  %v252_v3 = vld [vmem:[%s2294_s1 + $0x6a8] sm:$0xff] }
  0x46   :  { %1317 = vmatpush3.bf16.msra.mxu0 %v1316_v21  ;;  %570 = vmatmul.mubr.f32.vlgmr.msra.gmra.mrb[2].mxu1 %v29_v22  ;;  %v1368_v21 = vpack.c.bf16 %v210_v15, %v209_v13  ;;  %v1338_v22 = vpack.c.bf16 %v196_v17, %v195_v16  ;;  %v265_v63 = vld [vmem:[%s2294_s1 + $0x710] sm:$0xff]  ;;  %v266_v1 = vld [vmem:[%s2294_s1 + $0x718] sm:$0xff]  ;;  %v283_v4 = vld [vmem:[%s2294_s1 + $0x7a0] sm:$0xff] }
  0x47   :  { %1349 = vmatpush3.bf16.msra.mxu1 %v1348_v23  ;;  %1319 = vmatprep.subr.bf16.mxu0 %v1318_v24  ;;  %v179_v23 = vld [vmem:[%s2294_s1 + $0x460] sm:$0xff]  ;;  %v180_v24 = vld [vmem:[%s2294_s1 + $0x468] sm:$0xff]  ;;  %v253_v16 = vld [vmem:[%s2294_s1 + $0x6b0] sm:$0xff] }
  0x48   :  { %1351 = vmatprep.subr.bf16.mxu1 %v1350_v28  ;;  %639 = vmatprep.mubr.f32.mxu0 %v32_v34  ;;  %v197_v28 = vld [vmem:[%s2294_s1 + $0x4f0] sm:$0xff]  ;;  %v1340_v32 = vpack.c.bf16 %v180_v24, %v179_v23  ;;  %v284_v5 = vld [vmem:[%s2294_s1 + $0x7a8] sm:$0xff]  ;;  %v235_v11 = vld [vmem:[%s2294_s1 + $0x620] sm:$0xff] }
  0x49   :  { %709 = vmatprep.mubr.f32.mxu1 %v34_v36  ;;  %v1342_v34 = vpack.c.bf16 %v198_v29, %v197_v28  ;;  %v182_v36 = vld [vmem:[%s2294_s1 + $0x478] sm:$0xff]  ;;  %v36_v6 = vld [vmem:[%s2295_s0 + $0x68] sm:$0xff]  ;;  %v267_v13 = vld [vmem:[%s2294_s1 + $0x720] sm:$0xff] }
  0x4a   :  { %1321 = vmatpush3.bf16.msra.mxu0 %v1320_v35  ;;  %v181_v35 = vld [vmem:[%s2294_s1 + $0x470] sm:$0xff]  ;;  %v236_v12 = vld [vmem:[%s2294_s1 + $0x628] sm:$0xff]  ;;  %v254_v17 = vld [vmem:[%s2294_s1 + $0x6b8] sm:$0xff] }
  0x4b   :  { %1353 = vmatpush3.bf16.msra.mxu1 %v1352_v37  ;;  %1323 = vmatprep.subr.bf16.mxu0 %v1322_v38  ;;  %v213_v37 = vld [vmem:[%s2294_s1 + $0x570] sm:$0xff]  ;;  %v1374_v38 = vpack.c.bf16 %v230_v31, %v229_v30  ;;  %v1344_v44 = vpack.c.bf16 %v182_v36, %v181_v35  ;;  %v268_v15 = vld [vmem:[%s2294_s1 + $0x728] sm:$0xff]  ;;  %v286_v19 = vld [vmem:[%s2294_s1 + $0x7b8] sm:$0xff] }
  0x4c   :  { %1355 = vmatprep.subr.bf16.mxu1 %v1354_v42  ;;  %v279_v42 = vld [vmem:[%s2294_s1 + $0x780] sm:$0xff]  ;;  %v1376_v45 = vpack.c.bf16 %v214_v39, %v213_v37  ;;  %v285_v18 = vld [vmem:[%s2294_s1 + $0x7b0] sm:$0xff]  ;;  %v238_v24 = vld [vmem:[%s2294_s1 + $0x638] sm:$0xff] }
  0x4d   :  { %v237_v23 = vld [vmem:[%s2294_s1 + $0x630] sm:$0xff]  ;;  %v270_v27 = vld [vmem:[%s2294_s1 + $0x738] sm:$0xff]  ;;  %v255_v28 = vld [vmem:[%s2294_s1 + $0x6c0] sm:$0xff] }
  0x4e   :  { %1325 = vmatpush3.bf16.msra.mxu0 %v1324_v48  ;;  %v232_v48 = vld [vmem:[%s2294_s1 + $0x608] sm:$0xff]  ;;  %v269_v25 = vld [vmem:[%s2294_s1 + $0x730] sm:$0xff]  ;;  %v287_v30 = vld [vmem:[%s2294_s1 + $0x7c0] sm:$0xff] }
  0x4f   :  { %1357 = vmatpush3.bf16.msra.mxu1 %v1356_v49  ;;  %1327 = vmatprep.subr.bf16.mxu0 %v1326_v50  ;;  %v263_v49 = vld [vmem:[%s2294_s1 + $0x700] sm:$0xff]  ;;  %v1410_v50 = vpack.c.bf16 %v280_v43, %v279_v42  ;;  %v1380_v57 = vpack.c.bf16 %v232_v48, %v231_v47  ;;  %v256_v29 = vld [vmem:[%s2294_s1 + $0x6c8] sm:$0xff]  ;;  %v257_v40 = vld [vmem:[%s2294_s1 + $0x6d0] sm:$0xff] }
  0x50   :  { %1359 = vmatprep.subr.bf16.mxu1 %v1358_v54  ;;  %v281_v54 = vld [vmem:[%s2294_s1 + $0x790] sm:$0xff]  ;;  %v1412_v59 = vpack.c.bf16 %v264_v51, %v263_v49  ;;  %v288_v31 = vld [vmem:[%s2294_s1 + $0x7c8] sm:$0xff]  ;;  %v239_v35 = vld [vmem:[%s2294_s1 + $0x640] sm:$0xff] }
  0x51   :  { %v1414_v0 = vpack.c.bf16 %v282_v55, %v281_v54  ;;  %v240_v36 = vld [vmem:[%s2294_s1 + $0x648] sm:$0xff]  ;;  %v271_v37 = vld [vmem:[%s2294_s1 + $0x740] sm:$0xff]  ;;  %v258_v41 = vld [vmem:[%s2294_s1 + $0x6d8] sm:$0xff] }
  0x52   :  { %1329 = vmatpush3.bf16.msra.mxu0 %v1328_v60  ;;  %v1382_v60 = vpack.c.bf16 %v250_v53, %v249_v52  ;;  %v272_v39 = vld [vmem:[%s2294_s1 + $0x748] sm:$0xff]  ;;  %v289_v42 = vld [vmem:[%s2294_s1 + $0x7d0] sm:$0xff]  ;;  %v290_v43 = vld [vmem:[%s2294_s1 + $0x7d8] sm:$0xff] }
  0x53   :  { %1361 = vmatpush3.bf16.msra.mxu1 %v1360_v61  ;;  %1331 = vmatprep.subr.bf16.mxu0 %v1330_v62  ;;  %v233_v61 = vld [vmem:[%s2294_s1 + $0x610] sm:$0xff]  ;;  %v234_v62 = vld [vmem:[%s2294_s1 + $0x618] sm:$0xff]  ;;  %v259_v52 = vld [vmem:[%s2294_s1 + $0x6e0] sm:$0xff] }
  0x54   :  { %1363 = vmatprep.subr.bf16.mxu1 %v1362_v2  ;;  %v251_v2 = vld [vmem:[%s2294_s1 + $0x6a0] sm:$0xff]  ;;  %v1384_v7 = vpack.c.bf16 %v234_v62, %v233_v61  ;;  %v241_v47 = vld [vmem:[%s2294_s1 + $0x650] sm:$0xff]  ;;  %v242_v48 = vld [vmem:[%s2294_s1 + $0x658] sm:$0xff] }
  0x55   :  { %v273_v49 = vld [vmem:[%s2294_s1 + $0x750] sm:$0xff]  ;;  %v274_v51 = vld [vmem:[%s2294_s1 + $0x758] sm:$0xff]  ;;  %v260_v53 = vld [vmem:[%s2294_s1 + $0x6e8] sm:$0xff] }
  0x56   :  { %1333 = vmatpush3.bf16.msra.mxu0 %v1332_v8  ;;  %v38_v8 = vld [vmem:[%s2295_s0 + $0x78] sm:$0xff]  ;;  %v291_v54 = vld [vmem:[%s2294_s1 + $0x7e0] sm:$0xff]  ;;  %v292_v55 = vld [vmem:[%s2294_s1 + $0x7e8] sm:$0xff] }
  0x57   :  { %1365 = vmatpush3.bf16.msra.mxu1 %v1364_v9  ;;  %1335 = vmatprep.subr.bf16.mxu0 %v1334_v10  ;;  %v1416_v9 = vpack.c.bf16 %v266_v1, %v265_v63  ;;  %v1386_v10 = vpack.c.bf16 %v252_v3, %v251_v2  ;;  %v275_v61 = vld [vmem:[%s2294_s1 + $0x760] sm:$0xff]  ;;  %v1434_v62 = vpack.c.bf16 %v292_v55, %v291_v54  ;;  %v276_v63 = vld [vmem:[%s2294_s1 + $0x768] sm:$0xff]  ;;  %v262_v1 = vld [vmem:[%s2294_s1 + $0x6f8] sm:$0xff] }
  0x58   :  { %1367 = vmatprep.subr.bf16.mxu1 %v1366_v14  ;;  %v1418_v14 = vpack.c.bf16 %v284_v5, %v283_v4  ;;  %v293_v2 = vld [vmem:[%s2294_s1 + $0x7f0] sm:$0xff]  ;;  %v294_v3 = vld [vmem:[%s2294_s1 + $0x7f8] sm:$0xff]  ;;  %v1436_v5 = vpack.c.bf16 %v276_v63, %v275_v61 }
  0x5a   :  { %1337 = vmatpush3.bf16.msra.mxu0 %v1336_v20  ;;  %v1388_v20 = vpack.c.bf16 %v236_v12, %v235_v11  ;;  %v278_v11 = vld [vmem:[%s2294_s1 + $0x778] sm:$0xff] }
  0x5b   :  { %1369 = vmatpush3.bf16.msra.mxu1 %v1368_v21  ;;  %1339 = vmatprep.subr.bf16.mxu0 %v1338_v22  ;;  %v1420_v21 = vpack.c.bf16 %v268_v15, %v267_v13  ;;  %v1390_v22 = vpack.c.bf16 %v254_v17, %v253_v16  ;;  %v37_v15 = vld [vmem:[%s2295_s0 + $0x70] sm:$0xff] }
  0x5c   :  { %1371 = vmatprep.subr.bf16.mxu1 %v1370_v26  ;;  %v1422_v26 = vpack.c.bf16 %v286_v19, %v285_v18 }
  0x5e   :  { %1341 = vmatpush3.bf16.msra.mxu0 %v1340_v32  ;;  %v1392_v32 = vpack.c.bf16 %v238_v24, %v237_v23 }
  0x5f   :  { %1373 = vmatpush3.bf16.msra.mxu1 %v1372_v33  ;;  %1343 = vmatprep.subr.bf16.mxu0 %v1342_v34  ;;  %v1424_v33 = vpack.c.bf16 %v270_v27, %v269_v25  ;;  %v1394_v34 = vpack.c.bf16 %v256_v29, %v255_v28 }
  0x60   :  { %1375 = vmatprep.subr.bf16.mxu1 %v1374_v38  ;;  %v1426_v38 = vpack.c.bf16 %v288_v31, %v287_v30 }
  0x62   :  { %1345 = vmatpush3.bf16.msra.mxu0 %v1344_v44  ;;  %v1396_v44 = vpack.c.bf16 %v240_v36, %v239_v35 }
  0x63   :  { %1377 = vmatpush3.bf16.msra.mxu1 %v1376_v45  ;;  %1379 = vmatprep.subr.bf16.mxu0 %v1378_v46  ;;  %v1428_v45 = vpack.c.bf16 %v272_v39, %v271_v37  ;;  %v1398_v46 = vpack.c.bf16 %v258_v41, %v257_v40 }
  0x64   :  { %1411 = vmatprep.subr.bf16.mxu1 %v1410_v50  ;;  %v1430_v50 = vpack.c.bf16 %v290_v43, %v289_v42 }
  0x65   :  { %640 = vmatmul.mubr.f32.vlgmr.msra.gmra.mrb[4].mxu0 %v31_v56  ;;  %v1400_v56 = vpack.c.bf16 %v242_v48, %v241_v47 }
  0x66   :  { %1381 = vmatpush3.bf16.msra.mxu0 %v1380_v57  ;;  %710 = vmatmul.mubr.f32.vlgmr.msra.gmra.mrb[4].mxu1 %v33_v58  ;;  %v1432_v57 = vpack.c.bf16 %v274_v51, %v273_v49  ;;  %v1402_v58 = vpack.c.bf16 %v260_v53, %v259_v52 }
  0x67   :  { %1413 = vmatpush3.bf16.msra.mxu1 %v1412_v59  ;;  %1383 = vmatprep.subr.bf16.mxu0 %v1382_v60  ;;  %v243_v59 = vld [vmem:[%s2294_s1 + $0x660] sm:$0xff]  ;;  %v244_v60 = vld [vmem:[%s2294_s1 + $0x668] sm:$0xff] }
  0x68   :  { %1415 = vmatprep.subr.bf16.mxu1 %v1414_v0  ;;  %779 = vmatprep.mubr.f32.mxu0 %v36_v6  ;;  %v261_v0 = vld [vmem:[%s2294_s1 + $0x6f0] sm:$0xff]  ;;  %v1404_v4 = vpack.c.bf16 %v244_v60, %v243_v59 }
  0x69   :  { %849 = vmatprep.mubr.f32.mxu1 %v38_v8  ;;  %v1406_v6 = vpack.c.bf16 %v262_v1, %v261_v0  ;;  %v246_v8 = vld [vmem:[%s2294_s1 + $0x678] sm:$0xff]  ;;  %v883_v0 = vlaneseq }
  0x6a   :  { %1385 = vmatpush3.bf16.msra.mxu0 %v1384_v7  ;;  %v245_v7 = vld [vmem:[%s2294_s1 + $0x670] sm:$0xff] }
  0x6b   :  { %1417 = vmatpush3.bf16.msra.mxu1 %v1416_v9  ;;  %1387 = vmatprep.subr.bf16.mxu0 %v1386_v10  ;;  %v1438_v9 = vpack.c.bf16 %v294_v3, %v293_v2  ;;  %v277_v10 = vld [vmem:[%s2294_s1 + $0x770] sm:$0xff]  ;;  %v1408_v12 = vpack.c.bf16 %v246_v8, %v245_v7  ;;  %v884_v1 = vshrl.u32 %v883_v0, 7  ;;  %v878_v2 = vld [vmem:[%s2296_s2] sm:$0x1] }
  0x6c   :  { %1419 = vmatprep.subr.bf16.mxu1 %v1418_v14  ;;  %v1440_v13 = vpack.c.bf16 %v278_v11, %v277_v10  ;;  %v35_v14 = vld [vmem:[%s2295_s0 + $0x60] sm:$0xff] }
  0x6d   :  { %v885_v3 = vsub.s32 0, %v884_v1  ;;  %v905_v7 = vld [vmem:[%s2297_s3] ss:$0 sm:$0xff] }
  0x6e   :  { %1389 = vmatpush3.bf16.msra.mxu0 %v1388_v20 }
  0x6f   :  { %1421 = vmatpush3.bf16.msra.mxu1 %v1420_v21  ;;  %1391 = vmatprep.subr.bf16.mxu0 %v1390_v22 }
  0x70   :  { %1423 = vmatprep.subr.bf16.mxu1 %v1422_v26 }
  0x72   :  { %1393 = vmatpush3.bf16.msra.mxu0 %v1392_v32 }
  0x73   :  { %1425 = vmatpush3.bf16.msra.mxu1 %v1424_v33  ;;  %1395 = vmatprep.subr.bf16.mxu0 %v1394_v34 }
  0x74   :  { %1427 = vmatprep.subr.bf16.mxu1 %v1426_v38 }
  0x76   :  { %1397 = vmatpush3.bf16.msra.mxu0 %v1396_v44 }
  0x77   :  { %1429 = vmatpush3.bf16.msra.mxu1 %v1428_v45  ;;  %1399 = vmatprep.subr.bf16.mxu0 %v1398_v46 }
  0x78   :  { %1431 = vmatprep.subr.bf16.mxu1 %v1430_v50 }
  0x7a   :  { %1401 = vmatpush3.bf16.msra.mxu0 %v1400_v56 }
  0x7b   :  { %1433 = vmatpush3.bf16.msra.mxu1 %v1432_v57  ;;  %1403 = vmatprep.subr.bf16.mxu0 %v1402_v58 }
  0x7c   :  { %1435 = vmatprep.subr.bf16.mxu1 %v1434_v62 }
  0x7e   :  { %1405 = vmatpush3.bf16.msra.mxu0 %v1404_v4 }
  0x7f   :  { %1437 = vmatpush3.bf16.msra.mxu1 %v1436_v5  ;;  %1407 = vmatprep.subr.bf16.mxu0 %v1406_v6 }
  0x80   :  { %1439 = vmatprep.subr.bf16.mxu1 %v1438_v9 }
  0x82   :  { %1409 = vmatpush3.bf16.msra.mxu0 %v1408_v12 }
  0x83   :  { %1441 = vmatpush3.bf16.msra.mxu1 %v1440_v13 }
  0x85   :  { %780 = vmatmul.mubr.f32.vlgmr.msra.gmra.mrb[6].mxu0 %v35_v14 }
  0x86   :  { %850 = vmatmul.mubr.f32.vlgmr.msra.gmra.mrb[6].mxu1 %v37_v15 }
  0xf8   :  { %v938_v16 = vpop.f32.mrb[0].mxu0 }
  0xf9   :  { %v973_v17 = vpop.f32.mrb[0].mxu1  ;;  %v939_v18 = vpop.f32.mrb[1].mxu0 }
  0xfa   :  { %v940_v19 = vadd.f32 %v939_v18, %v938_v16  ;;  %v974_v20 = vpop.f32.mrb[1].mxu1 }
  0xfb   :  { %v975_v21 = vadd.f32 %v974_v20, %v973_v17 }
  0xfd   :  { %v432_v22 = vadd.f32 %v975_v21, %v940_v19 }
 0x118   :  { %v1008_v23 = vpop.f32.mrb[2].mxu0 }
 0x119   :  { %v1009_v24 = vpop.f32.mrb[3].mxu0  ;;  %v1043_v25 = vpop.f32.mrb[2].mxu1 }
 0x11a   :  { %v1010_v26 = vadd.f32 %v1009_v24, %v1008_v23  ;;  %v1044_v27 = vpop.f32.mrb[3].mxu1 }
 0x11b   :  { %v1045_v28 = vadd.f32 %v1044_v27, %v1043_v25 }
 0x11c   :  { %v502_v29 = vadd.f32 %v1010_v26, %v432_v22 }
 0x11e   :  { %v572_v30 = vadd.f32 %v1045_v28, %v502_v29 }
 0x138   :  { %v1078_v31 = vpop.f32.mrb[4].mxu0 }
 0x139   :  { %v1079_v32 = vpop.f32.mrb[5].mxu0  ;;  %v1113_v33 = vpop.f32.mrb[4].mxu1 }
 0x13a   :  { %v1080_v34 = vadd.f32 %v1079_v32, %v1078_v31  ;;  %v1114_v35 = vpop.f32.mrb[5].mxu1 }
 0x13b   :  { %v1115_v36 = vadd.f32 %v1114_v35, %v1113_v33 }
 0x13c   :  { %v642_v37 = vadd.f32 %v1080_v34, %v572_v30 }
 0x13e   :  { %v712_v38 = vadd.f32 %v1115_v36, %v642_v37 }
 0x158   :  { %v1148_v39 = vpop.f32.mrb[6].mxu0 }
 0x159   :  { %v1149_v40 = vpop.f32.mrb[7].mxu0  ;;  %v1183_v41 = vpop.f32.mrb[6].mxu1 }
 0x15a   :  { %v1150_v42 = vadd.f32 %v1149_v40, %v1148_v39  ;;  %v1184_v43 = vpop.f32.mrb[7].mxu1 }
 0x15b   :  { %v1185_v44 = vadd.f32 %v1184_v43, %v1183_v41 }
 0x15c   :  { %v782_v45 = vadd.f32 %v1150_v42, %v712_v38 }
 0x15e   :  { %v852_v46 = vadd.f32 %v1185_v44, %v782_v45 }
 0x160   :  { %v861_v47 = vrot.slane %v852_v46, 4 }
 0x162   :  { %v862_v48 = vadd.f32 %v861_v47, %v852_v46 }
 0x164   :  { %v863_v49 = vrot.slane %v862_v48, 2 }
 0x166   :  { %v864_v50 = vadd.f32 %v863_v49, %v862_v48 }
 0x168   :  { %v865_v51 = vrot.slane %v864_v50, 1 }
 0x16a   :  { %v866_v52 = vadd.f32 %v865_v51, %v864_v50 }
 0x16c   :  { %v868_v53 = vmul.f32 0.125, %v866_v52 }
 0x16e   :  { %v869_v54 = vsub.f32 %v852_v46, %v868_v53 }
 0x170   :  { %v870_v55 = vmul.f32 %v869_v54, %v869_v54 }
 0x172   :  { %v871_v56 = vrot.slane %v870_v55, 4 }
 0x174   :  { %v872_v57 = vadd.f32 %v871_v56, %v870_v55 }
 0x176   :  { %v873_v58 = vrot.slane %v872_v57, 2 }
 0x178   :  { %v874_v59 = vadd.f32 %v873_v58, %v872_v57 }
 0x17a   :  { %v875_v60 = vrot.slane %v874_v59, 1 }
 0x17c   :  { %v876_v61 = vadd.f32 %v875_v60, %v874_v59 }
 0x17e   :  { %v877_v62 = vmul.f32 0.125, %v876_v61 }
 0x180   :  { %v879_v63 = vadd.f32 1e-05, %v877_v62 }
 0x182   :  { %1442 = vrsqrt.f32 %v879_v63 }
 0x18c   :  { %v1443_v4 = vpop.eup %1442 }
 0x18d   :  { %v881_v5 = vmul.f32 %v1443_v4, %v878_v2 }
 0x18f   :  { %v886_v6 = vrot.slane %v881_v5, %v885_v3 }
 0x191   :  { %v888_v8 = vmul.f32 %v886_v6, %v869_v54 }
 0x193   :  { %v896_v9 = vadd.f32 %v905_v7, %v888_v8 }
 0x195   :  { %vm897_vm0 = vcmp.gt.f32.partialorder %v896_v9, 0.0  ;;  %v898_v10 = vmul.f32 0.2, %v896_v9 }
 0x197   :  { %v899_v11 = vsel %vm897_vm0, %v896_v9, %v898_v10 }
 0x198   :  { %900 = vst [vmem:[%s2298_s4] sm:$0xff] %v899_v11 }

// kernel: discriminator_forward.9
= control target key start
LH: loop header
LB: loop body
LE: loop exit
PB: predicated region body
PF: predicated region fallthrough
CT: control target
= control target key end

     0   :  { %v1500_v47 = vmov 1983009808   ;;  %v288_v49 = vlaneseq  ;;  %s2348_s1 = inlined_call_operand.vmem [shape: f32[2048,128], index: 1, kind: input, shape index: {}]   ;;  %s2349_s0 = inlined_call_operand.vmem [shape: f32[2,2048], index: 0, kind: input, shape index: {}]   ;;  %s2350_s2 = inlined_call_operand.vmem [shape: f32[1,128], index: 2, kind: input, shape index: {}]   ;;  %s2351_s3 = inlined_call_operand.vmem [shape: f32[2,128], index: 3, kind: output, shape index: {}]  }
   0x1   :  { %v40_v0 = vld [vmem:[%s2348_s1 + $0x80] sm:$0xff]  ;;  %v41_v1 = vld [vmem:[%s2348_s1 + $0x88] sm:$0xff]  ;;  %v42_v11 = vld [vmem:[%s2348_s1 + $0x90] sm:$0xff]  ;;  %v286_v48 = vunpack.c.l.s4 %v1500_v47 }
   0x2   :  { %v72_v2 = vld [vmem:[%s2348_s1 + $0x180] sm:$0xff]  ;;  %v1234_v3 = vpack.c.bf16 %v41_v1, %v40_v0  ;;  %v73_v4 = vld [vmem:[%s2348_s1 + $0x188] sm:$0xff]  ;;  %v43_v13 = vld [vmem:[%s2348_s1 + $0x98] sm:$0xff]  ;;  %v289_v0 = vshrl.u32 %v288_v49, 7 }
   0x3   :  { %v24_v5 = vld [vmem:[%s2348_s1] sm:$0xff]  ;;  %v25_v6 = vld [vmem:[%s2348_s1 + $0x8] sm:$0xff]  ;;  %v1266_v7 = vpack.c.bf16 %v73_v4, %v72_v2  ;;  %v74_v14 = vld [vmem:[%s2348_s1 + $0x190] sm:$0xff]  ;;  %v1238_v16 = vpack.c.bf16 %v43_v13, %v42_v11  ;;  %v287_v63 = vunpack.c.0.s8 %v286_v48 }
   0x4   :  { %v1236_v8 = vpack.c.bf16 %v25_v6, %v24_v5  ;;  %v56_v9 = vld [vmem:[%s2348_s1 + $0x100] sm:$0xff]  ;;  %v57_v10 = vld [vmem:[%s2348_s1 + $0x108] sm:$0xff]  ;;  %1235 = vmatprep.subr.bf16.mxu0 %v1234_v3  ;;  %v75_v15 = vld [vmem:[%s2348_s1 + $0x198] sm:$0xff] }
   0x5   :  { %v1268_v12 = vpack.c.bf16 %v57_v10, %v56_v9  ;;  %1267 = vmatprep.subr.bf16.mxu1 %v1266_v7  ;;  %v1270_v17 = vpack.c.bf16 %v75_v15, %v74_v14  ;;  %v26_v18 = vld [vmem:[%s2348_s1 + $0x10] sm:$0xff]  ;;  %v27_v19 = vld [vmem:[%s2348_s1 + $0x18] sm:$0xff]  ;;  %v44_v23 = vld [vmem:[%s2348_s1 + $0xa0] sm:$0xff]  ;;  %v1672_v13 = vsub.s32 %v287_v63, %v289_v0 }
   0x6   :  { %1237 = vmatpush3.bf16.msra.mxu0 %v1236_v8  ;;  %v58_v20 = vld [vmem:[%s2348_s1 + $0x110] sm:$0xff]  ;;  %v1240_v21 = vpack.c.bf16 %v27_v19, %v26_v18  ;;  %v59_v22 = vld [vmem:[%s2348_s1 + $0x118] sm:$0xff]  ;;  %v45_v24 = vld [vmem:[%s2348_s1 + $0xa8] sm:$0xff] }
   0x7   :  { %1269 = vmatpush3.bf16.msra.mxu1 %v1268_v12  ;;  %1239 = vmatprep.subr.bf16.mxu0 %v1238_v16  ;;  %v1272_v25 = vpack.c.bf16 %v59_v22, %v58_v20  ;;  %v1242_v26 = vpack.c.bf16 %v45_v24, %v44_v23  ;;  %v76_v27 = vld [vmem:[%s2348_s1 + $0x1a0] sm:$0xff]  ;;  %v77_v28 = vld [vmem:[%s2348_s1 + $0x1a8] sm:$0xff]  ;;  %v46_v35 = vld [vmem:[%s2348_s1 + $0xb0] sm:$0xff] }
   0x8   :  { %1271 = vmatprep.subr.bf16.mxu1 %v1270_v17  ;;  %v28_v29 = vld [vmem:[%s2348_s1 + $0x20] sm:$0xff]  ;;  %v1274_v30 = vpack.c.bf16 %v77_v28, %v76_v27  ;;  %v29_v31 = vld [vmem:[%s2348_s1 + $0x28] sm:$0xff]  ;;  %v47_v36 = vld [vmem:[%s2348_s1 + $0xb8] sm:$0xff] }
   0x9   :  { %v60_v32 = vld [vmem:[%s2348_s1 + $0x120] sm:$0xff]  ;;  %v61_v33 = vld [vmem:[%s2348_s1 + $0x128] sm:$0xff]  ;;  %v1244_v34 = vpack.c.bf16 %v29_v31, %v28_v29  ;;  %v78_v37 = vld [vmem:[%s2348_s1 + $0x1b0] sm:$0xff]  ;;  %v1246_v39 = vpack.c.bf16 %v47_v36, %v46_v35 }
   0xa   :  { %1241 = vmatpush3.bf16.msra.mxu0 %v1240_v21  ;;  %v1276_v38 = vpack.c.bf16 %v61_v33, %v60_v32  ;;  %v79_v40 = vld [vmem:[%s2348_s1 + $0x1b8] sm:$0xff]  ;;  %v30_v41 = vld [vmem:[%s2348_s1 + $0x30] sm:$0xff]  ;;  %v48_v46 = vld [vmem:[%s2348_s1 + $0xc0] sm:$0xff] }
   0xb   :  { %1273 = vmatpush3.bf16.msra.mxu1 %v1272_v25  ;;  %1243 = vmatprep.subr.bf16.mxu0 %v1242_v26  ;;  %v31_v42 = vld [vmem:[%s2348_s1 + $0x38] sm:$0xff]  ;;  %v1278_v43 = vpack.c.bf16 %v79_v40, %v78_v37  ;;  %v62_v44 = vld [vmem:[%s2348_s1 + $0x130] sm:$0xff]  ;;  %v49_v50 = vld [vmem:[%s2348_s1 + $0xc8] sm:$0xff] }
   0xc   :  { %1275 = vmatprep.subr.bf16.mxu1 %v1274_v30  ;;  %v63_v45 = vld [vmem:[%s2348_s1 + $0x138] sm:$0xff]  ;;  %v80_v51 = vld [vmem:[%s2348_s1 + $0x1c0] sm:$0xff]  ;;  %v81_v52 = vld [vmem:[%s2348_s1 + $0x1c8] sm:$0xff]  ;;  %v1248_v53 = vpack.c.bf16 %v31_v42, %v30_v41  ;;  %v1250_v55 = vpack.c.bf16 %v49_v50, %v48_v46 }
   0xd   :  { %v1280_v54 = vpack.c.bf16 %v63_v45, %v62_v44  ;;  %v32_v56 = vld [vmem:[%s2348_s1 + $0x40] sm:$0xff]  ;;  %v33_v57 = vld [vmem:[%s2348_s1 + $0x48] sm:$0xff]  ;;  %v1282_v59 = vpack.c.bf16 %v81_v52, %v80_v51  ;;  %v50_v61 = vld [vmem:[%s2348_s1 + $0xd0] sm:$0xff] }
   0xe   :  { %1245 = vmatpush3.bf16.msra.mxu0 %v1244_v34  ;;  %v64_v58 = vld [vmem:[%s2348_s1 + $0x140] sm:$0xff]  ;;  %v65_v60 = vld [vmem:[%s2348_s1 + $0x148] sm:$0xff]  ;;  %v51_v62 = vld [vmem:[%s2348_s1 + $0xd8] sm:$0xff]  ;;  %v1252_v3 = vpack.c.bf16 %v33_v57, %v32_v56 }
   0xf   :  { %1277 = vmatpush3.bf16.msra.mxu1 %v1276_v38  ;;  %1247 = vmatprep.subr.bf16.mxu0 %v1246_v39  ;;  %v82_v1 = vld [vmem:[%s2348_s1 + $0x1d0] sm:$0xff]  ;;  %v83_v2 = vld [vmem:[%s2348_s1 + $0x1d8] sm:$0xff]  ;;  %v1284_v4 = vpack.c.bf16 %v65_v60, %v64_v58  ;;  %v1254_v5 = vpack.c.bf16 %v51_v62, %v50_v61  ;;  %v52_v11 = vld [vmem:[%s2348_s1 + $0xe0] sm:$0xff] }
  0x10   :  { %1279 = vmatprep.subr.bf16.mxu1 %v1278_v43  ;;  %v34_v6 = vld [vmem:[%s2348_s1 + $0x50] sm:$0xff]  ;;  %v35_v7 = vld [vmem:[%s2348_s1 + $0x58] sm:$0xff]  ;;  %v1286_v9 = vpack.c.bf16 %v83_v2, %v82_v1  ;;  %v53_v12 = vld [vmem:[%s2348_s1 + $0xe8] sm:$0xff] }
  0x11   :  { %v66_v8 = vld [vmem:[%s2348_s1 + $0x150] sm:$0xff]  ;;  %v67_v10 = vld [vmem:[%s2348_s1 + $0x158] sm:$0xff]  ;;  %v84_v14 = vld [vmem:[%s2348_s1 + $0x1e0] sm:$0xff]  ;;  %v1256_v16 = vpack.c.bf16 %v35_v7, %v34_v6  ;;  %v1258_v19 = vpack.c.bf16 %v53_v12, %v52_v11 }
  0x12   :  { %1249 = vmatpush3.bf16.msra.mxu0 %v1248_v53  ;;  %v85_v15 = vld [vmem:[%s2348_s1 + $0x1e8] sm:$0xff]  ;;  %v36_v17 = vld [vmem:[%s2348_s1 + $0x60] sm:$0xff]  ;;  %v1288_v18 = vpack.c.bf16 %v67_v10, %v66_v8  ;;  %v54_v25 = vld [vmem:[%s2348_s1 + $0xf0] sm:$0xff] }
  0x13   :  { %1281 = vmatpush3.bf16.msra.mxu1 %v1280_v54  ;;  %1251 = vmatprep.subr.bf16.mxu0 %v1250_v55  ;;  %v37_v20 = vld [vmem:[%s2348_s1 + $0x68] sm:$0xff]  ;;  %v68_v21 = vld [vmem:[%s2348_s1 + $0x160] sm:$0xff]  ;;  %v1290_v23 = vpack.c.bf16 %v85_v15, %v84_v14  ;;  %v55_v26 = vld [vmem:[%s2348_s1 + $0xf8] sm:$0xff] }
  0x14   :  { %1283 = vmatprep.subr.bf16.mxu1 %v1282_v59  ;;  %v20_v22 = vld [vmem:[%s2349_s0] sm:$0xff]  ;;  %v69_v24 = vld [vmem:[%s2348_s1 + $0x168] sm:$0xff]  ;;  %v86_v29 = vld [vmem:[%s2348_s1 + $0x1f0] sm:$0xff]  ;;  %v1260_v31 = vpack.c.bf16 %v37_v20, %v36_v17  ;;  %v1262_v35 = vpack.c.bf16 %v55_v26, %v54_v25 }
  0x15   :  { %v291_v27 = vrot.slane %v20_v22, %v1672_v13  ;;  %v284_v28 = vcombine.high %v20_v22, %v20_v22  ;;  %v87_v30 = vld [vmem:[%s2348_s1 + $0x1f8] sm:$0xff]  ;;  %v1292_v34 = vpack.c.bf16 %v69_v24, %v68_v21  ;;  %v38_v36 = vld [vmem:[%s2348_s1 + $0x70] sm:$0xff]  ;;  %v104_v42 = vld [vmem:[%s2348_s1 + $0x280] sm:$0xff] }
  0x16   :  { %1253 = vmatpush3.bf16.msra.mxu0 %v1252_v3  ;;  %v39_v37 = vld [vmem:[%s2348_s1 + $0x78] sm:$0xff]  ;;  %v70_v38 = vld [vmem:[%s2348_s1 + $0x170] sm:$0xff]  ;;  %v1294_v39 = vpack.c.bf16 %v87_v30, %v86_v29  ;;  %v105_v43 = vld [vmem:[%s2348_s1 + $0x288] sm:$0xff] }
  0x17   :  { %1285 = vmatpush3.bf16.msra.mxu1 %v1284_v4  ;;  %1255 = vmatprep.subr.bf16.mxu0 %v1254_v5  ;;  %v299_v32 = vcombine.high %v291_v27, %v291_v27  ;;  %v298_v33 = vrot.slane %v284_v28, %v1672_v13  ;;  %v71_v40 = vld [vmem:[%s2348_s1 + $0x178] sm:$0xff]  ;;  %v136_v44 = vld [vmem:[%s2348_s1 + $0x380] sm:$0xff]  ;;  %v137_v45 = vld [vmem:[%s2348_s1 + $0x388] sm:$0xff]  ;;  %v1264_v46 = vpack.c.bf16 %v39_v37, %v38_v36 }
  0x18   :  { %1287 = vmatprep.subr.bf16.mxu1 %v1286_v9  ;;  %v1296_v47 = vpack.c.bf16 %v71_v40, %v70_v38  ;;  %v1298_v48 = vpack.c.bf16 %v105_v43, %v104_v42  ;;  %v88_v49 = vld [vmem:[%s2348_s1 + $0x200] sm:$0xff]  ;;  %v89_v50 = vld [vmem:[%s2348_s1 + $0x208] sm:$0xff]  ;;  %v1330_v52 = vpack.c.bf16 %v137_v45, %v136_v44  ;;  %v106_v54 = vld [vmem:[%s2348_s1 + $0x290] sm:$0xff] }
  0x19   :  { %432 = vmatprep.mubr.f32.mxu0 %v299_v32  ;;  %v300_v41 = vcombine.high %v298_v33, %v298_v33  ;;  %v120_v51 = vld [vmem:[%s2348_s1 + $0x300] sm:$0xff]  ;;  %v121_v53 = vld [vmem:[%s2348_s1 + $0x308] sm:$0xff]  ;;  %v107_v55 = vld [vmem:[%s2348_s1 + $0x298] sm:$0xff]  ;;  %v1300_v58 = vpack.c.bf16 %v89_v50, %v88_v49 }
  0x1a   :  { %1257 = vmatpush3.bf16.msra.mxu0 %v1256_v16  ;;  %v138_v56 = vld [vmem:[%s2348_s1 + $0x390] sm:$0xff]  ;;  %v139_v57 = vld [vmem:[%s2348_s1 + $0x398] sm:$0xff]  ;;  %v1332_v59 = vpack.c.bf16 %v121_v53, %v120_v51  ;;  %v1302_v60 = vpack.c.bf16 %v107_v55, %v106_v54  ;;  %v108_v2 = vld [vmem:[%s2348_s1 + $0x2a0] sm:$0xff] }
  0x1b   :  { %1289 = vmatpush3.bf16.msra.mxu1 %v1288_v18  ;;  %1259 = vmatprep.subr.bf16.mxu0 %v1258_v19  ;;  %v90_v61 = vld [vmem:[%s2348_s1 + $0x210] sm:$0xff]  ;;  %v91_v62 = vld [vmem:[%s2348_s1 + $0x218] sm:$0xff]  ;;  %v1334_v0 = vpack.c.bf16 %v139_v57, %v138_v56  ;;  %v109_v3 = vld [vmem:[%s2348_s1 + $0x2a8] sm:$0xff] }
  0x1c   :  { %1291 = vmatprep.subr.bf16.mxu1 %v1290_v23  ;;  %502 = vmatprep.mubr.f32.mxu1 %v300_v41  ;;  %v122_v63 = vld [vmem:[%s2348_s1 + $0x310] sm:$0xff]  ;;  %v123_v1 = vld [vmem:[%s2348_s1 + $0x318] sm:$0xff]  ;;  %v140_v4 = vld [vmem:[%s2348_s1 + $0x3a0] sm:$0xff]  ;;  %v1304_v6 = vpack.c.bf16 %v91_v62, %v90_v61  ;;  %v1306_v8 = vpack.c.bf16 %v109_v3, %v108_v2 }
  0x1d   :  { %v141_v5 = vld [vmem:[%s2348_s1 + $0x3a8] sm:$0xff]  ;;  %v1336_v7 = vpack.c.bf16 %v123_v1, %v122_v63  ;;  %v92_v9 = vld [vmem:[%s2348_s1 + $0x220] sm:$0xff]  ;;  %v110_v15 = vld [vmem:[%s2348_s1 + $0x2b0] sm:$0xff] }
  0x1e   :  { %1261 = vmatpush3.bf16.msra.mxu0 %v1260_v31  ;;  %v93_v10 = vld [vmem:[%s2348_s1 + $0x228] sm:$0xff]  ;;  %v124_v11 = vld [vmem:[%s2348_s1 + $0x320] sm:$0xff]  ;;  %v1338_v12 = vpack.c.bf16 %v141_v5, %v140_v4  ;;  %v111_v16 = vld [vmem:[%s2348_s1 + $0x2b8] sm:$0xff] }
  0x1f   :  { %1293 = vmatpush3.bf16.msra.mxu1 %v1292_v34  ;;  %1263 = vmatprep.subr.bf16.mxu0 %v1262_v35  ;;  %v125_v14 = vld [vmem:[%s2348_s1 + $0x328] sm:$0xff]  ;;  %v142_v17 = vld [vmem:[%s2348_s1 + $0x3b0] sm:$0xff]  ;;  %v143_v18 = vld [vmem:[%s2348_s1 + $0x3b8] sm:$0xff]  ;;  %v1308_v19 = vpack.c.bf16 %v93_v10, %v92_v9  ;;  %v1310_v21 = vpack.c.bf16 %v111_v16, %v110_v15 }
  0x20   :  { %1295 = vmatprep.subr.bf16.mxu1 %v1294_v39  ;;  %v1340_v20 = vpack.c.bf16 %v125_v14, %v124_v11  ;;  %v94_v22 = vld [vmem:[%s2348_s1 + $0x230] sm:$0xff]  ;;  %v95_v23 = vld [vmem:[%s2348_s1 + $0x238] sm:$0xff]  ;;  %v1342_v25 = vpack.c.bf16 %v143_v18, %v142_v17  ;;  %v113_v28 = vld [vmem:[%s2348_s1 + $0x2c8] sm:$0xff] }
  0x21   :  { %v126_v24 = vld [vmem:[%s2348_s1 + $0x330] sm:$0xff]  ;;  %v127_v26 = vld [vmem:[%s2348_s1 + $0x338] sm:$0xff]  ;;  %v144_v29 = vld [vmem:[%s2348_s1 + $0x3c0] sm:$0xff]  ;;  %v1312_v32 = vpack.c.bf16 %v95_v23, %v94_v22 }
  0x22   :  { %1265 = vmatpush3.bf16.msra.mxu0 %v1264_v46  ;;  %v145_v30 = vld [vmem:[%s2348_s1 + $0x3c8] sm:$0xff]  ;;  %v1344_v35 = vpack.c.bf16 %v127_v26, %v126_v24  ;;  %v96_v37 = vld [vmem:[%s2348_s1 + $0x240] sm:$0xff]  ;;  %v114_v42 = vld [vmem:[%s2348_s1 + $0x2d0] sm:$0xff] }
  0x23   :  { %1297 = vmatpush3.bf16.msra.mxu1 %v1296_v47  ;;  %1299 = vmatprep.subr.bf16.mxu0 %v1298_v48  ;;  %v21_v31 = vld [vmem:[%s2349_s0 + $0x8] sm:$0xff]  ;;  %v128_v39 = vld [vmem:[%s2348_s1 + $0x340] sm:$0xff]  ;;  %v1346_v40 = vpack.c.bf16 %v145_v30, %v144_v29  ;;  %v115_v43 = vld [vmem:[%s2348_s1 + $0x2d8] sm:$0xff] }
  0x24   :  { %1331 = vmatprep.subr.bf16.mxu1 %v1330_v52  ;;  %v301_v34 = vcombine.high %v21_v31, %v21_v31  ;;  %v97_v38 = vld [vmem:[%s2348_s1 + $0x248] sm:$0xff]  ;;  %v146_v46 = vld [vmem:[%s2348_s1 + $0x3d0] sm:$0xff]  ;;  %v147_v47 = vld [vmem:[%s2348_s1 + $0x3d8] sm:$0xff]  ;;  %v1318_v51 = vpack.c.bf16 %v115_v43, %v114_v42 }
  0x25   :  { %433 = vmatmul.mubr.f32.vlgmr.msra.gmra.mrb[0].mxu0 %v291_v27  ;;  %v112_v27 = vld [vmem:[%s2348_s1 + $0x2c0] sm:$0xff]  ;;  %v129_v41 = vld [vmem:[%s2348_s1 + $0x348] sm:$0xff]  ;;  %v1316_v48 = vpack.c.bf16 %v97_v38, %v96_v37  ;;  %v98_v52 = vld [vmem:[%s2348_s1 + $0x250] sm:$0xff]  ;;  %v1350_v55 = vpack.c.bf16 %v147_v47, %v146_v46 }
  0x26   :  { %503 = vmatmul.mubr.f32.vlgmr.msra.gmra.mrb[0].mxu1 %v298_v33  ;;  %1301 = vmatpush3.bf16.msra.mxu0 %v1300_v58  ;;  %v1833_v33 = vrot.slane %v21_v31, %v1672_v13  ;;  %v1314_v36 = vpack.c.bf16 %v113_v28, %v112_v27  ;;  %v1856_v45 = vrot.slane %v301_v34, %v1672_v13  ;;  %v99_v53 = vld [vmem:[%s2348_s1 + $0x258] sm:$0xff]  ;;  %v130_v54 = vld [vmem:[%s2348_s1 + $0x350] sm:$0xff]  ;;  %v116_v57 = vld [vmem:[%s2348_s1 + $0x2e0] sm:$0xff] }
  0x27   :  { %1333 = vmatpush3.bf16.msra.mxu1 %v1332_v59  ;;  %1303 = vmatprep.subr.bf16.mxu0 %v1302_v60  ;;  %v1348_v50 = vpack.c.bf16 %v129_v41, %v128_v39  ;;  %v131_v56 = vld [vmem:[%s2348_s1 + $0x358] sm:$0xff]  ;;  %v117_v58 = vld [vmem:[%s2348_s1 + $0x2e8] sm:$0xff]  ;;  %v148_v59 = vld [vmem:[%s2348_s1 + $0x3e0] sm:$0xff]  ;;  %v1320_v61 = vpack.c.bf16 %v99_v53, %v98_v52 }
  0x28   :  { %1335 = vmatprep.subr.bf16.mxu1 %v1334_v0  ;;  %v316_v44 = vcombine.high %v1833_v33, %v1833_v33  ;;  %v317_v49 = vcombine.high %v1856_v45, %v1856_v45  ;;  %v149_v60 = vld [vmem:[%s2348_s1 + $0x3e8] sm:$0xff]  ;;  %v1352_v62 = vpack.c.bf16 %v131_v56, %v130_v54  ;;  %v1322_v63 = vpack.c.bf16 %v117_v58, %v116_v57  ;;  %v100_v0 = vld [vmem:[%s2348_s1 + $0x260] sm:$0xff]  ;;  %v118_v5 = vld [vmem:[%s2348_s1 + $0x2f0] sm:$0xff] }
  0x29   :  { %v101_v1 = vld [vmem:[%s2348_s1 + $0x268] sm:$0xff]  ;;  %v132_v2 = vld [vmem:[%s2348_s1 + $0x360] sm:$0xff]  ;;  %v1354_v3 = vpack.c.bf16 %v149_v60, %v148_v59  ;;  %v103_v14 = vld [vmem:[%s2348_s1 + $0x278] sm:$0xff] }
  0x2a   :  { %1305 = vmatpush3.bf16.msra.mxu0 %v1304_v6  ;;  %572 = vmatprep.mubr.f32.mxu0 %v316_v44  ;;  %v133_v4 = vld [vmem:[%s2348_s1 + $0x368] sm:$0xff]  ;;  %v119_v6 = vld [vmem:[%s2348_s1 + $0x2f8] sm:$0xff]  ;;  %v1324_v9 = vpack.c.bf16 %v101_v1, %v100_v0  ;;  %v134_v15 = vld [vmem:[%s2348_s1 + $0x370] sm:$0xff] }
  0x2b   :  { %1337 = vmatpush3.bf16.msra.mxu1 %v1336_v7  ;;  %1307 = vmatprep.subr.bf16.mxu0 %v1306_v8  ;;  %v150_v7 = vld [vmem:[%s2348_s1 + $0x3f0] sm:$0xff]  ;;  %v151_v8 = vld [vmem:[%s2348_s1 + $0x3f8] sm:$0xff]  ;;  %v1356_v10 = vpack.c.bf16 %v133_v4, %v132_v2  ;;  %v1326_v11 = vpack.c.bf16 %v119_v6, %v118_v5  ;;  %v168_v18 = vld [vmem:[%s2348_s1 + $0x480] sm:$0xff] }
  0x2c   :  { %1339 = vmatprep.subr.bf16.mxu1 %v1338_v12  ;;  %642 = vmatprep.mubr.f32.mxu1 %v317_v49  ;;  %v102_v12 = vld [vmem:[%s2348_s1 + $0x270] sm:$0xff]  ;;  %v1358_v16 = vpack.c.bf16 %v151_v8, %v150_v7  ;;  %v135_v17 = vld [vmem:[%s2348_s1 + $0x378] sm:$0xff]  ;;  %v152_v23 = vld [vmem:[%s2348_s1 + $0x400] sm:$0xff] }
  0x2d   :  { %v1328_v22 = vpack.c.bf16 %v103_v14, %v102_v12  ;;  %v1360_v24 = vpack.c.bf16 %v135_v17, %v134_v15  ;;  %v153_v26 = vld [vmem:[%s2348_s1 + $0x408] sm:$0xff]  ;;  %v184_v27 = vld [vmem:[%s2348_s1 + $0x500] sm:$0xff]  ;;  %v170_v30 = vld [vmem:[%s2348_s1 + $0x490] sm:$0xff] }
  0x2e   :  { %1309 = vmatpush3.bf16.msra.mxu0 %v1308_v19  ;;  %v169_v19 = vld [vmem:[%s2348_s1 + $0x488] sm:$0xff]  ;;  %v171_v31 = vld [vmem:[%s2348_s1 + $0x498] sm:$0xff]  ;;  %v22_v37 = vld [vmem:[%s2349_s0 + $0x10] sm:$0xff] }
  0x2f   :  { %1341 = vmatpush3.bf16.msra.mxu1 %v1340_v20  ;;  %1311 = vmatprep.subr.bf16.mxu0 %v1310_v21  ;;  %v200_v20 = vld [vmem:[%s2348_s1 + $0x580] sm:$0xff]  ;;  %v201_v21 = vld [vmem:[%s2348_s1 + $0x588] sm:$0xff]  ;;  %v203_v34 = vld [vmem:[%s2348_s1 + $0x598] sm:$0xff]  ;;  %v1366_v38 = vpack.c.bf16 %v171_v31, %v170_v30  ;;  %v1975_v42 = vrot.slane %v22_v37, %v1672_v13  ;;  %v318_v43 = vcombine.high %v22_v37, %v22_v37 }
  0x30   :  { %1343 = vmatprep.subr.bf16.mxu1 %v1342_v25  ;;  %v1362_v25 = vpack.c.bf16 %v169_v19, %v168_v18  ;;  %v185_v28 = vld [vmem:[%s2348_s1 + $0x508] sm:$0xff]  ;;  %v1394_v29 = vpack.c.bf16 %v201_v21, %v200_v20  ;;  %v154_v39 = vld [vmem:[%s2348_s1 + $0x410] sm:$0xff]  ;;  %v187_v46 = vld [vmem:[%s2348_s1 + $0x518] sm:$0xff] }
  0x31   :  { %v186_v41 = vld [vmem:[%s2348_s1 + $0x510] sm:$0xff]  ;;  %v172_v47 = vld [vmem:[%s2348_s1 + $0x4a0] sm:$0xff]  ;;  %v1996_v52 = vrot.slane %v318_v43, %v1672_v13  ;;  %v157_v56 = vld [vmem:[%s2348_s1 + $0x428] sm:$0xff] }
  0x32   :  { %1313 = vmatpush3.bf16.msra.mxu0 %v1312_v32  ;;  %v202_v32 = vld [vmem:[%s2348_s1 + $0x590] sm:$0xff]  ;;  %v204_v49 = vld [vmem:[%s2348_s1 + $0x5a0] sm:$0xff]  ;;  %v189_v59 = vld [vmem:[%s2348_s1 + $0x528] sm:$0xff] }
  0x33   :  { %1345 = vmatpush3.bf16.msra.mxu1 %v1344_v35  ;;  %1315 = vmatprep.subr.bf16.mxu0 %v1314_v36  ;;  %v1364_v35 = vpack.c.bf16 %v153_v26, %v152_v23  ;;  %v1396_v36 = vpack.c.bf16 %v185_v28, %v184_v27  ;;  %v1398_v44 = vpack.c.bf16 %v203_v34, %v202_v32  ;;  %v188_v57 = vld [vmem:[%s2348_s1 + $0x520] sm:$0xff]  ;;  %v174_v60 = vld [vmem:[%s2348_s1 + $0x4b0] sm:$0xff]  ;;  %v159_v4 = vld [vmem:[%s2348_s1 + $0x438] sm:$0xff] }
  0x34   :  { %1347 = vmatprep.subr.bf16.mxu1 %v1346_v40  ;;  %v155_v40 = vld [vmem:[%s2348_s1 + $0x418] sm:$0xff]  ;;  %v1404_v1 = vpack.c.bf16 %v189_v59, %v188_v57  ;;  %v190_v5 = vld [vmem:[%s2348_s1 + $0x530] sm:$0xff]  ;;  %v176_v8 = vld [vmem:[%s2348_s1 + $0x4c0] sm:$0xff] }
  0x35   :  { %v1368_v53 = vpack.c.bf16 %v155_v40, %v154_v39  ;;  %v191_v7 = vld [vmem:[%s2348_s1 + $0x538] sm:$0xff]  ;;  %v161_v17 = vld [vmem:[%s2348_s1 + $0x448] sm:$0xff]  ;;  %v192_v18 = vld [vmem:[%s2348_s1 + $0x540] sm:$0xff] }
  0x36   :  { %1317 = vmatpush3.bf16.msra.mxu0 %v1316_v48  ;;  %v173_v48 = vld [vmem:[%s2348_s1 + $0x4a8] sm:$0xff]  ;;  %v1408_v14 = vpack.c.bf16 %v191_v7, %v190_v5  ;;  %v178_v21 = vld [vmem:[%s2348_s1 + $0x4d0] sm:$0xff]  ;;  %v195_v32 = vld [vmem:[%s2348_s1 + $0x558] sm:$0xff] }
  0x37   :  { %1349 = vmatpush3.bf16.msra.mxu1 %v1348_v50  ;;  %1319 = vmatprep.subr.bf16.mxu0 %v1318_v51  ;;  %v205_v50 = vld [vmem:[%s2348_s1 + $0x5a8] sm:$0xff]  ;;  %v333_v51 = vcombine.high %v1975_v42, %v1975_v42  ;;  %v1370_v54 = vpack.c.bf16 %v173_v48, %v172_v47  ;;  %v210_v23 = vld [vmem:[%s2348_s1 + $0x5d0] sm:$0xff]  ;;  %v180_v34 = vld [vmem:[%s2348_s1 + $0x4e0] sm:$0xff] }
  0x38   :  { %1351 = vmatprep.subr.bf16.mxu1 %v1350_v55  ;;  %v156_v55 = vld [vmem:[%s2348_s1 + $0x420] sm:$0xff]  ;;  %v1402_v58 = vpack.c.bf16 %v205_v50, %v204_v49  ;;  %v193_v20 = vld [vmem:[%s2348_s1 + $0x548] sm:$0xff]  ;;  %v162_v28 = vld [vmem:[%s2348_s1 + $0x450] sm:$0xff] }
  0x39   :  { %v1372_v0 = vpack.c.bf16 %v157_v56, %v156_v55  ;;  %v1412_v26 = vpack.c.bf16 %v193_v20, %v192_v18  ;;  %v194_v30 = vld [vmem:[%s2348_s1 + $0x550] sm:$0xff]  ;;  %v213_v37 = vld [vmem:[%s2348_s1 + $0x5e8] sm:$0xff]  ;;  %v183_v49 = vld [vmem:[%s2348_s1 + $0x4f8] sm:$0xff] }
  0x3a   :  { %1321 = vmatpush3.bf16.msra.mxu0 %v1320_v61  ;;  %v175_v61 = vld [vmem:[%s2348_s1 + $0x4b8] sm:$0xff]  ;;  %v1416_v39 = vpack.c.bf16 %v195_v32, %v194_v30  ;;  %v165_v43 = vld [vmem:[%s2348_s1 + $0x468] sm:$0xff]  ;;  %v182_v48 = vld [vmem:[%s2348_s1 + $0x4f0] sm:$0xff] }
  0x3b   :  { %1353 = vmatpush3.bf16.msra.mxu1 %v1352_v62  ;;  %1323 = vmatprep.subr.bf16.mxu0 %v1322_v63  ;;  %v206_v62 = vld [vmem:[%s2348_s1 + $0x5b0] sm:$0xff]  ;;  %v207_v63 = vld [vmem:[%s2348_s1 + $0x5b8] sm:$0xff]  ;;  %v1374_v2 = vpack.c.bf16 %v175_v61, %v174_v60  ;;  %v197_v47 = vld [vmem:[%s2348_s1 + $0x568] sm:$0xff]  ;;  %v1390_v55 = vpack.c.bf16 %v183_v49, %v182_v48 }
  0x3c   :  { %1355 = vmatprep.subr.bf16.mxu1 %v1354_v3  ;;  %v158_v3 = vld [vmem:[%s2348_s1 + $0x430] sm:$0xff]  ;;  %v1406_v6 = vpack.c.bf16 %v207_v63, %v206_v62  ;;  %v167_v57 = vld [vmem:[%s2348_s1 + $0x478] sm:$0xff]  ;;  %v232_v60 = vld [vmem:[%s2348_s1 + $0x680] sm:$0xff] }
  0x3d   :  { %v1376_v12 = vpack.c.bf16 %v159_v4, %v158_v3  ;;  %v214_v50 = vld [vmem:[%s2348_s1 + $0x5f0] sm:$0xff]  ;;  %v199_v59 = vld [vmem:[%s2348_s1 + $0x578] sm:$0xff]  ;;  %v233_v61 = vld [vmem:[%s2348_s1 + $0x688] sm:$0xff] }
  0x3e   :  { %1325 = vmatpush3.bf16.msra.mxu0 %v1324_v9  ;;  %v177_v9 = vld [vmem:[%s2348_s1 + $0x4c8] sm:$0xff]  ;;  %v166_v56 = vld [vmem:[%s2348_s1 + $0x470] sm:$0xff]  ;;  %v264_v62 = vld [vmem:[%s2348_s1 + $0x780] sm:$0xff]  ;;  %v1426_v3 = vpack.c.bf16 %v233_v61, %v232_v60 }
  0x3f   :  { %1357 = vmatpush3.bf16.msra.mxu1 %v1356_v10  ;;  %1327 = vmatprep.subr.bf16.mxu0 %v1326_v11  ;;  %v208_v10 = vld [vmem:[%s2348_s1 + $0x5c0] sm:$0xff]  ;;  %v209_v11 = vld [vmem:[%s2348_s1 + $0x5c8] sm:$0xff]  ;;  %v1378_v15 = vpack.c.bf16 %v177_v9, %v176_v8  ;;  %v234_v9 = vld [vmem:[%s2348_s1 + $0x690] sm:$0xff] }
  0x40   :  { %1359 = vmatprep.subr.bf16.mxu1 %v1358_v16  ;;  %v160_v16 = vld [vmem:[%s2348_s1 + $0x440] sm:$0xff]  ;;  %v1410_v19 = vpack.c.bf16 %v209_v11, %v208_v10  ;;  %v265_v63 = vld [vmem:[%s2348_s1 + $0x788] sm:$0xff]  ;;  %v235_v10 = vld [vmem:[%s2348_s1 + $0x698] sm:$0xff] }
  0x41   :  { %v216_v4 = vld [vmem:[%s2348_s1 + $0x600] sm:$0xff]  ;;  %v217_v5 = vld [vmem:[%s2348_s1 + $0x608] sm:$0xff]  ;;  %v1458_v7 = vpack.c.bf16 %v265_v63, %v264_v62  ;;  %v1430_v18 = vpack.c.bf16 %v235_v10, %v234_v9  ;;  %v219_v20 = vld [vmem:[%s2348_s1 + $0x618] sm:$0xff] }
  0x42   :  { %1329 = vmatpush3.bf16.msra.mxu0 %v1328_v22  ;;  %v179_v22 = vld [vmem:[%s2348_s1 + $0x4d8] sm:$0xff]  ;;  %v249_v8 = vld [vmem:[%s2348_s1 + $0x708] sm:$0xff]  ;;  %v242_v61 = vld [vmem:[%s2348_s1 + $0x6d0] sm:$0xff] }
  0x43   :  { %1361 = vmatpush3.bf16.msra.mxu1 %v1360_v24  ;;  %1363 = vmatprep.subr.bf16.mxu0 %v1362_v25  ;;  %v211_v24 = vld [vmem:[%s2348_s1 + $0x5d8] sm:$0xff]  ;;  %v1380_v25 = vpack.c.bf16 %v161_v17, %v160_v16  ;;  %v1382_v27 = vpack.c.bf16 %v179_v22, %v178_v21  ;;  %v1428_v16 = vpack.c.bf16 %v217_v5, %v216_v4  ;;  %v250_v21 = vld [vmem:[%s2348_s1 + $0x710] sm:$0xff]  ;;  %v221_v32 = vld [vmem:[%s2348_s1 + $0x628] sm:$0xff] }
  0x44   :  { %1395 = vmatprep.subr.bf16.mxu1 %v1394_v29  ;;  %v163_v29 = vld [vmem:[%s2348_s1 + $0x458] sm:$0xff]  ;;  %v1414_v31 = vpack.c.bf16 %v211_v24, %v210_v23  ;;  %v236_v23 = vld [vmem:[%s2348_s1 + $0x6a0] sm:$0xff]  ;;  %v237_v24 = vld [vmem:[%s2348_s1 + $0x6a8] sm:$0xff] }
  0x45   :  { %573 = vmatmul.mubr.f32.vlgmr.msra.gmra.mrb[2].mxu0 %v1833_v33  ;;  %v1400_v33 = vpack.c.bf16 %v187_v46, %v186_v41  ;;  %v164_v41 = vld [vmem:[%s2348_s1 + $0x460] sm:$0xff]  ;;  %v251_v22 = vld [vmem:[%s2348_s1 + $0x718] sm:$0xff]  ;;  %v257_v60 = vld [vmem:[%s2348_s1 + $0x748] sm:$0xff] }
  0x46   :  { %1365 = vmatpush3.bf16.msra.mxu0 %v1364_v35  ;;  %643 = vmatmul.mubr.f32.vlgmr.msra.gmra.mrb[2].mxu1 %v1856_v45  ;;  %v334_v45 = vcombine.high %v1996_v52, %v1996_v52  ;;  %v181_v35 = vld [vmem:[%s2348_s1 + $0x4e8] sm:$0xff]  ;;  %v1464_v30 = vpack.c.bf16 %v251_v22, %v250_v21  ;;  %v255_v49 = vld [vmem:[%s2348_s1 + $0x738] sm:$0xff]  ;;  %v274_v63 = vld [vmem:[%s2348_s1 + $0x7d0] sm:$0xff] }
  0x47   :  { %1397 = vmatpush3.bf16.msra.mxu1 %v1396_v36  ;;  %1367 = vmatprep.subr.bf16.mxu0 %v1366_v38  ;;  %v212_v36 = vld [vmem:[%s2348_s1 + $0x5e0] sm:$0xff]  ;;  %v1384_v38 = vpack.c.bf16 %v163_v29, %v162_v28  ;;  %v1386_v40 = vpack.c.bf16 %v181_v35, %v180_v34  ;;  %v243_v62 = vld [vmem:[%s2348_s1 + $0x6d8] sm:$0xff]  ;;  %v226_v4 = vld [vmem:[%s2348_s1 + $0x650] sm:$0xff] }
  0x48   :  { %1399 = vmatprep.subr.bf16.mxu1 %v1398_v44  ;;  %712 = vmatprep.mubr.f32.mxu0 %v333_v51  ;;  %v196_v44 = vld [vmem:[%s2348_s1 + $0x560] sm:$0xff]  ;;  %v1418_v46 = vpack.c.bf16 %v213_v37, %v212_v36  ;;  %v215_v51 = vld [vmem:[%s2348_s1 + $0x5f8] sm:$0xff]  ;;  %v238_v36 = vld [vmem:[%s2348_s1 + $0x6b0] sm:$0xff] }
  0x49   :  { %782 = vmatprep.mubr.f32.mxu1 %v334_v45  ;;  %v198_v45 = vld [vmem:[%s2348_s1 + $0x570] sm:$0xff]  ;;  %v252_v34 = vld [vmem:[%s2348_s1 + $0x720] sm:$0xff]  ;;  %v239_v37 = vld [vmem:[%s2348_s1 + $0x6b8] sm:$0xff] }
  0x4a   :  { %1369 = vmatpush3.bf16.msra.mxu0 %v1368_v53  ;;  %v1388_v53 = vpack.c.bf16 %v165_v43, %v164_v41  ;;  %v1438_v43 = vpack.c.bf16 %v239_v37, %v238_v36  ;;  %v227_v5 = vld [vmem:[%s2348_s1 + $0x658] sm:$0xff]  ;;  %v244_v9 = vld [vmem:[%s2348_s1 + $0x6e0] sm:$0xff]  ;;  %v245_v10 = vld [vmem:[%s2348_s1 + $0x6e8] sm:$0xff]  ;;  %v1501_v36 = vmov 0.0  }
  0x4b   :  { %1401 = vmatpush3.bf16.msra.mxu1 %v1400_v33  ;;  %1371 = vmatprep.subr.bf16.mxu0 %v1370_v54  ;;  %v23_v33 = vld [vmem:[%s2349_s0 + $0x18] sm:$0xff]  ;;  %v1420_v54 = vpack.c.bf16 %v197_v47, %v196_v44  ;;  %v222_v44 = vld [vmem:[%s2348_s1 + $0x630] sm:$0xff]  ;;  %v260_v21 = vld [vmem:[%s2348_s1 + $0x760] sm:$0xff]  ;;  %18 = vst [vmem:[#allocation2] sm:$0x3] %v1501_v36 }
  0x4c   :  { %1403 = vmatprep.subr.bf16.mxu1 %v1402_v58  ;;  %v1422_v58 = vpack.c.bf16 %v215_v51, %v214_v50  ;;  %v2167_v11 = vrot.slane %v23_v33, %v1672_v13  ;;  %v254_v47 = vld [vmem:[%s2348_s1 + $0x730] sm:$0xff]  ;;  %v240_v50 = vld [vmem:[%s2348_s1 + $0x6c0] sm:$0xff]  ;;  %v241_v51 = vld [vmem:[%s2348_s1 + $0x6c8] sm:$0xff] }
  0x4d   :  { %v261_v22 = vld [vmem:[%s2348_s1 + $0x768] sm:$0xff] }
  0x4e   :  { %1373 = vmatpush3.bf16.msra.mxu0 %v1372_v0  ;;  %v335_v0 = vcombine.high %v23_v33, %v23_v33  ;;  %v273_v33 = vld [vmem:[%s2348_s1 + $0x7c8] sm:$0xff] }
  0x4f   :  { %1405 = vmatpush3.bf16.msra.mxu1 %v1404_v1  ;;  %1375 = vmatprep.subr.bf16.mxu0 %v1374_v2  ;;  %v1392_v1 = vpack.c.bf16 %v167_v57, %v166_v56  ;;  %v1424_v2 = vpack.c.bf16 %v199_v59, %v198_v45  ;;  %v1442_v56 = vpack.c.bf16 %v241_v51, %v240_v50  ;;  %v224_v57 = vld [vmem:[%s2348_s1 + $0x640] sm:$0xff]  ;;  %v225_v45 = vld [vmem:[%s2348_s1 + $0x648] sm:$0xff] }
  0x50   :  { %1407 = vmatprep.subr.bf16.mxu1 %v1406_v6  ;;  %v248_v6 = vld [vmem:[%s2348_s1 + $0x700] sm:$0xff] }
  0x51   :  { %v1460_v17 = vpack.c.bf16 %v249_v8, %v248_v6  ;;  %v258_v6 = vld [vmem:[%s2348_s1 + $0x750] sm:$0xff]  ;;  %v259_v8 = vld [vmem:[%s2348_s1 + $0x758] sm:$0xff] }
  0x52   :  { %1377 = vmatpush3.bf16.msra.mxu0 %v1376_v12  ;;  %v266_v12 = vld [vmem:[%s2348_s1 + $0x790] sm:$0xff] }
  0x53   :  { %1409 = vmatpush3.bf16.msra.mxu1 %v1408_v14  ;;  %1379 = vmatprep.subr.bf16.mxu0 %v1378_v15  ;;  %v267_v14 = vld [vmem:[%s2348_s1 + $0x798] sm:$0xff]  ;;  %v2176_v15 = vrot.slane %v335_v0, %v1672_v13 }
  0x54   :  { %1411 = vmatprep.subr.bf16.mxu1 %v1410_v19  ;;  %v218_v19 = vld [vmem:[%s2348_s1 + $0x610] sm:$0xff]  ;;  %v1462_v13 = vpack.c.bf16 %v267_v14, %v266_v12  ;;  %v275_v0 = vld [vmem:[%s2348_s1 + $0x7d8] sm:$0xff]  ;;  %v276_v12 = vld [vmem:[%s2348_s1 + $0x7e0] sm:$0xff] }
  0x55   :  { %v351_v28 = vcombine.high %v2176_v15, %v2176_v15  ;;  %v1432_v29 = vpack.c.bf16 %v219_v20, %v218_v19  ;;  %v277_v14 = vld [vmem:[%s2348_s1 + $0x7e8] sm:$0xff]  ;;  %v228_v19 = vld [vmem:[%s2348_s1 + $0x660] sm:$0xff] }
  0x56   :  { %1381 = vmatpush3.bf16.msra.mxu0 %v1380_v25  ;;  %v350_v25 = vcombine.high %v2167_v11, %v2167_v11  ;;  %v229_v20 = vld [vmem:[%s2348_s1 + $0x668] sm:$0xff] }
  0x57   :  { %1413 = vmatpush3.bf16.msra.mxu1 %v1412_v26  ;;  %1383 = vmatprep.subr.bf16.mxu0 %v1382_v27  ;;  %v268_v26 = vld [vmem:[%s2348_s1 + $0x7a0] sm:$0xff]  ;;  %v269_v27 = vld [vmem:[%s2348_s1 + $0x7a8] sm:$0xff] }
  0x58   :  { %1415 = vmatprep.subr.bf16.mxu1 %v1414_v31  ;;  %v1434_v31 = vpack.c.bf16 %v237_v24, %v236_v23  ;;  %v1466_v35 = vpack.c.bf16 %v269_v27, %v268_v26  ;;  %v246_v23 = vld [vmem:[%s2348_s1 + $0x6f0] sm:$0xff]  ;;  %v247_v24 = vld [vmem:[%s2348_s1 + $0x6f8] sm:$0xff]  ;;  %v1452_v27 = vpack.c.bf16 %v229_v20, %v228_v19 }
  0x59   :  { %v279_v26 = vld [vmem:[%s2348_s1 + $0x7f8] sm:$0xff] }
  0x5a   :  { %1385 = vmatpush3.bf16.msra.mxu0 %v1384_v38  ;;  %v270_v38 = vld [vmem:[%s2348_s1 + $0x7b0] sm:$0xff] }
  0x5b   :  { %1417 = vmatpush3.bf16.msra.mxu1 %v1416_v39  ;;  %1387 = vmatprep.subr.bf16.mxu0 %v1386_v40  ;;  %v271_v39 = vld [vmem:[%s2348_s1 + $0x7b8] sm:$0xff] }
  0x5c   :  { %1419 = vmatprep.subr.bf16.mxu1 %v1418_v46  ;;  %v223_v46 = vld [vmem:[%s2348_s1 + $0x638] sm:$0xff]  ;;  %v1470_v48 = vpack.c.bf16 %v271_v39, %v270_v38 }
  0x5e   :  { %1389 = vmatpush3.bf16.msra.mxu0 %v1388_v53  ;;  %v272_v53 = vld [vmem:[%s2348_s1 + $0x7c0] sm:$0xff] }
  0x5f   :  { %1421 = vmatpush3.bf16.msra.mxu1 %v1420_v54  ;;  %1391 = vmatprep.subr.bf16.mxu0 %v1390_v55  ;;  %v1440_v54 = vpack.c.bf16 %v223_v46, %v222_v44  ;;  %v1472_v55 = vpack.c.bf16 %v255_v49, %v254_v47  ;;  %v1474_v59 = vpack.c.bf16 %v273_v33, %v272_v53 }
  0x60   :  { %1423 = vmatprep.subr.bf16.mxu1 %v1422_v58  ;;  %v256_v58 = vld [vmem:[%s2348_s1 + $0x740] sm:$0xff] }
  0x62   :  { %1393 = vmatpush3.bf16.msra.mxu0 %v1392_v1  ;;  %v1444_v1 = vpack.c.bf16 %v225_v45, %v224_v57 }
  0x63   :  { %1425 = vmatpush3.bf16.msra.mxu1 %v1424_v2  ;;  %1427 = vmatprep.subr.bf16.mxu0 %v1426_v3  ;;  %v1476_v2 = vpack.c.bf16 %v257_v60, %v256_v58  ;;  %v1446_v3 = vpack.c.bf16 %v243_v62, %v242_v61 }
  0x64   :  { %1459 = vmatprep.subr.bf16.mxu1 %v1458_v7  ;;  %v1478_v7 = vpack.c.bf16 %v275_v0, %v274_v63 }
  0x65   :  { %713 = vmatmul.mubr.f32.vlgmr.msra.gmra.mrb[4].mxu0 %v1975_v42  ;;  %v220_v42 = vld [vmem:[%s2348_s1 + $0x620] sm:$0xff] }
  0x66   :  { %1429 = vmatpush3.bf16.msra.mxu0 %v1428_v16  ;;  %783 = vmatmul.mubr.f32.vlgmr.msra.gmra.mrb[4].mxu1 %v1996_v52  ;;  %v253_v52 = vld [vmem:[%s2348_s1 + $0x728] sm:$0xff]  ;;  %v1436_v40 = vpack.c.bf16 %v221_v32, %v220_v42  ;;  %v1448_v16 = vpack.c.bf16 %v227_v5, %v226_v4  ;;  %v262_v32 = vld [vmem:[%s2348_s1 + $0x770] sm:$0xff]  ;;  %v953_v5 = vld [vmem:[%s2350_s2] ss:$0 sm:$0xff] }
  0x67   :  { %1461 = vmatpush3.bf16.msra.mxu1 %v1460_v17  ;;  %1431 = vmatprep.subr.bf16.mxu0 %v1430_v18  ;;  %v1468_v41 = vpack.c.bf16 %v253_v52, %v252_v34  ;;  %v1480_v17 = vpack.c.bf16 %v259_v8, %v258_v6  ;;  %v1450_v18 = vpack.c.bf16 %v245_v10, %v244_v9  ;;  %v263_v34 = vld [vmem:[%s2348_s1 + $0x778] sm:$0xff] }
  0x68   :  { %1463 = vmatprep.subr.bf16.mxu1 %v1462_v13  ;;  %852 = vmatprep.mubr.f32.mxu0 %v350_v25  ;;  %v1482_v13 = vpack.c.bf16 %v277_v14, %v276_v12  ;;  %v278_v25 = vld [vmem:[%s2348_s1 + $0x7f0] sm:$0xff]  ;;  %v1488_v52 = vpack.c.bf16 %v263_v34, %v262_v32 }
  0x69   :  { %922 = vmatprep.mubr.f32.mxu1 %v351_v28  ;;  %v1484_v28 = vpack.c.bf16 %v261_v22, %v260_v21  ;;  %v1486_v42 = vpack.c.bf16 %v279_v26, %v278_v25 }
  0x6a   :  { %1433 = vmatpush3.bf16.msra.mxu0 %v1432_v29  ;;  %v1454_v29 = vpack.c.bf16 %v247_v24, %v246_v23 }
  0x6b   :  { %1465 = vmatpush3.bf16.msra.mxu1 %v1464_v30  ;;  %1435 = vmatprep.subr.bf16.mxu0 %v1434_v31  ;;  %v230_v30 = vld [vmem:[%s2348_s1 + $0x670] sm:$0xff]  ;;  %v231_v31 = vld [vmem:[%s2348_s1 + $0x678] sm:$0xff] }
  0x6c   :  { %1467 = vmatprep.subr.bf16.mxu1 %v1466_v35  ;;  %v1456_v35 = vpack.c.bf16 %v231_v31, %v230_v30 }
  0x6e   :  { %1437 = vmatpush3.bf16.msra.mxu0 %v1436_v40 }
  0x6f   :  { %1469 = vmatpush3.bf16.msra.mxu1 %v1468_v41  ;;  %1439 = vmatprep.subr.bf16.mxu0 %v1438_v43 }
  0x70   :  { %1471 = vmatprep.subr.bf16.mxu1 %v1470_v48 }
  0x72   :  { %1441 = vmatpush3.bf16.msra.mxu0 %v1440_v54 }
  0x73   :  { %1473 = vmatpush3.bf16.msra.mxu1 %v1472_v55  ;;  %1443 = vmatprep.subr.bf16.mxu0 %v1442_v56 }
  0x74   :  { %1475 = vmatprep.subr.bf16.mxu1 %v1474_v59 }
  0x76   :  { %1445 = vmatpush3.bf16.msra.mxu0 %v1444_v1 }
  0x77   :  { %1477 = vmatpush3.bf16.msra.mxu1 %v1476_v2  ;;  %1447 = vmatprep.subr.bf16.mxu0 %v1446_v3  ;;  %v19_v2 = vld [vmem:[#allocation2] sm:$0x3] }
  0x78   :  { %1479 = vmatprep.subr.bf16.mxu1 %v1478_v7 }
  0x7a   :  { %1449 = vmatpush3.bf16.msra.mxu0 %v1448_v16 }
  0x7b   :  { %1481 = vmatpush3.bf16.msra.mxu1 %v1480_v17  ;;  %1451 = vmatprep.subr.bf16.mxu0 %v1450_v18 }
  0x7c   :  { %1483 = vmatprep.subr.bf16.mxu1 %v1482_v13 }
  0x7e   :  { %1453 = vmatpush3.bf16.msra.mxu0 %v1452_v27 }
  0x7f   :  { %1485 = vmatpush3.bf16.msra.mxu1 %v1484_v28  ;;  %1455 = vmatprep.subr.bf16.mxu0 %v1454_v29 }
  0x80   :  { %1487 = vmatprep.subr.bf16.mxu1 %v1486_v42 }
  0x82   :  { %1457 = vmatpush3.bf16.msra.mxu0 %v1456_v35 }
  0x83   :  { %1489 = vmatpush3.bf16.msra.mxu1 %v1488_v52 }
  0x85   :  { %853 = vmatmul.mubr.f32.vlgmr.msra.gmra.mrb[6].mxu0 %v2167_v11 }
  0x86   :  { %923 = vmatmul.mubr.f32.vlgmr.msra.gmra.mrb[6].mxu1 %v2176_v15 }
  0xf8   :  { %v986_v37 = vpop.f32.mrb[0].mxu0 }
  0xf9   :  { %v1021_v38 = vpop.f32.mrb[0].mxu1  ;;  %v987_v39 = vpop.f32.mrb[1].mxu0 }
  0xfa   :  { %v988_v40 = vadd.f32 %v987_v39, %v986_v37  ;;  %v1022_v41 = vpop.f32.mrb[1].mxu1 }
  0xfb   :  { %v1023_v43 = vadd.f32 %v1022_v41, %v1021_v38 }
  0xfd   :  { %v505_v44 = vadd.f32 %v1023_v43, %v988_v40 }
 0x118   :  { %v1056_v46 = vpop.f32.mrb[2].mxu0 }
 0x119   :  { %v1057_v47 = vpop.f32.mrb[3].mxu0  ;;  %v1091_v48 = vpop.f32.mrb[2].mxu1 }
 0x11a   :  { %v1058_v49 = vadd.f32 %v1057_v47, %v1056_v46  ;;  %v1092_v50 = vpop.f32.mrb[3].mxu1 }
 0x11b   :  { %v1093_v51 = vadd.f32 %v1092_v50, %v1091_v48 }
 0x11c   :  { %v575_v53 = vadd.f32 %v1058_v49, %v505_v44 }
 0x11e   :  { %v645_v33 = vadd.f32 %v1093_v51, %v575_v53 }
 0x138   :  { %v1126_v11 = vpop.f32.mrb[4].mxu0 }
 0x139   :  { %v1127_v54 = vpop.f32.mrb[5].mxu0  ;;  %v1161_v15 = vpop.f32.mrb[4].mxu1 }
 0x13a   :  { %v1128_v55 = vadd.f32 %v1127_v54, %v1126_v11  ;;  %v1162_v56 = vpop.f32.mrb[5].mxu1 }
 0x13b   :  { %v1163_v57 = vadd.f32 %v1162_v56, %v1161_v15 }
 0x13c   :  { %v715_v45 = vadd.f32 %v1128_v55, %v645_v33 }
 0x13e   :  { %v785_v58 = vadd.f32 %v1163_v57, %v715_v45 }
 0x158   :  { %v1196_v59 = vpop.f32.mrb[6].mxu0 }
 0x159   :  { %v1197_v60 = vpop.f32.mrb[7].mxu0  ;;  %v1231_v61 = vpop.f32.mrb[6].mxu1 }
 0x15a   :  { %v1198_v62 = vadd.f32 %v1197_v60, %v1196_v59  ;;  %v1232_v63 = vpop.f32.mrb[7].mxu1 }
 0x15b   :  { %v1233_v0 = vadd.f32 %v1232_v63, %v1231_v61 }
 0x15c   :  { %v855_v1 = vadd.f32 %v1198_v62, %v785_v58 }
 0x15e   :  { %v925_v3 = vadd.f32 %v1233_v0, %v855_v1 }
 0x160   :  { %v928_v4 = vadd.f32 %v925_v3, %v19_v2 }
 0x162   :  { %929 = vst [vmem:[#allocation2] sm:$0x3] %v928_v4 }
 0x169   :  { %v933_v6 = vld [vmem:[#allocation2] sm:$0x3] }
 0x16a   :  { %v941_v7 = vadd.f32 %v953_v5, %v933_v6 }
 0x16c   :  { %v942_v8 = vsub.f32 0.0, %v941_v7 }
 0x16e   :  { %v943_v9 = vmul.f32 1.442695, %v942_v8 }
 0x170   :  { %1496 = vpow2.f32 %v943_v9 }
 0x17a   :  { %v1497_v10 = vpop.eup %1496 }
 0x17b   :  { %v945_v12 = vadd.f32 1.0, %v1497_v10 }
 0x17d   :  { %1498 = vrcp.f32 %v945_v12 }
 0x187   :  { %v1499_v14 = vpop.eup %1498 }
 0x188   :  { %948 = vst [vmem:[%s2351_s3] sm:$0x3] %v1499_v14 }

</bundles_post_ra>
